<compile_context>
chip_gen: v7x
topology: tpu7x:2x2x1
jax: 0.10.0
libtpu: 0.0.40
codegen_flags: <defaults>
</compile_context>

<pallas_src>
import functools

import jax
import jax.numpy as jnp
import numpy as np
from jax import lax
from jax.experimental import pallas as pl
from jax.experimental.pallas import tpu as pltpu

GROUPS = 8
EPS = 1e-5


def _ceil_to(n, m):
    return ((n + m - 1) // m) * m


def _block_kernel(H, W, x_ref, t_ref, wts_ref, aux_ref, o_ref, hpad_ref):
    """Fused conv1+ReLU+GN1(+t-emb) -> conv2+ReLU+GN2 -> 4x4 stride-2 transform."""
    N = H * W
    Ho, Wo = H // 2, W // 2
    No = Ho * Wo
    cinp = x_ref.shape[3]            # channel-padded input width (multiple of 128)
    cp = o_ref.shape[2]              # channel-padded output width (multiple of 128)
    td = t_ref.shape[2]
    Wp = hpad_ref.shape[1]

    # Row offsets of each weight block inside the packed bf16 weight matrix.
    o_w1 = 0
    o_wt = o_w1 + 9 * cinp
    o_w2 = o_wt + td
    o_wtr = o_w2 + 9 * cp

    gmask = aux_ref[0:cp, :]                         # (Cp, Cp) f32, group mask / (N*Cg)
    vec = aux_ref[cp:cp + 8, :]                      # (8, Cp)  f32 per-channel vectors
    b1, g1, be1 = vec[0:1, :], vec[1:2, :], vec[2:3, :]
    bt, b2, g2 = vec[3:4, :], vec[4:5, :], vec[5:6, :]
    be2, btr = vec[6:7, :], vec[7:8, :]

    def gnorm(h, gamma, beta):
        # GroupNorm(8): f32 statistics; per-group mean/var broadcast back to the
        # channel axis via a tiny constant matmul; affine folded into scale/shift.
        s = jnp.sum(h, axis=0, keepdims=True)
        ss = jnp.sum(h * h, axis=0, keepdims=True)
        mean = jnp.dot(s, gmask, preferred_element_type=jnp.float32)
        msq = jnp.dot(ss, gmask, preferred_element_type=jnp.float32)
        var = jnp.maximum(msq - mean * mean, 0.0)
        scale = lax.rsqrt(var + EPS) * gamma
        shift = beta - mean * scale
        return h * scale + shift

    # ---- conv1 (3x3, pad=1): in-kernel im2col, 9 lane-dense bf16 tap matmuls ----
    acc = None
    for k in range(9):
        kh, kw = k // 3, k % 3
        tap = x_ref[0, kh:kh + H, kw:kw + W, :].reshape(N, cinp)          # bf16
        w = wts_ref[o_w1 + k * cinp:o_w1 + (k + 1) * cinp, :]             # bf16
        d = jnp.dot(tap, w, preferred_element_type=jnp.float32)
        acc = d if acc is None else acc + d
    h = jnp.maximum(acc + b1, 0.0)
    h = gnorm(h, g1, be1)

    # ---- time embedding: ReLU(Linear(t_emb)) broadcast over all spatial rows ----
    te = jnp.dot(t_ref[0], wts_ref[o_wt:o_wt + td, :],
                 preferred_element_type=jnp.float32) + bt
    h = h + jnp.maximum(te, 0.0)

    # ---- stage h1 into the zero-padded f32 scratch (border-only zeroing) ----
    hpad_ref[0:1, :, :] = jnp.zeros((1, Wp, cp), jnp.float32)
    hpad_ref[H + 1:H + 4, :, :] = jnp.zeros((3, Wp, cp), jnp.float32)
    hpad_ref[1:H + 1, 0:1, :] = jnp.zeros((H, 1, cp), jnp.float32)
    hpad_ref[1:H + 1, W + 1:W + 2, :] = jnp.zeros((H, 1, cp), jnp.float32)
    hpad_ref[1:H + 1, 1:W + 1, :] = h.reshape(H, W, cp)

    # ---- conv2 (3x3, pad=1): 9 tap matmuls straight from the padded scratch ----
    acc = None
    for k in range(9):
        kh, kw = k // 3, k % 3
        tap = hpad_ref[kh:kh + H, kw:kw + W, :].reshape(N, cp)
        w = wts_ref[o_w2 + k * cp:o_w2 + (k + 1) * cp, :]
        d = jnp.dot(tap.astype(jnp.bfloat16), w,
                    preferred_element_type=jnp.float32)
        acc = d if acc is None else acc + d
    h2 = jnp.maximum(acc + b2, 0.0)
    h2 = gnorm(h2, g2, be2)

    # ---- fused transform Conv2d(C, C, 4, stride=2, pad=1) ----
    # Column stride-2 -> native sublane-strided ref read; row stride-2 -> pure
    # outer-dim deinterleave.  No selection matmuls and no extra HBM inputs.
    hpad_ref[1:H + 1, 1:W + 1, :] = h2.reshape(H, W, cp)
    acc = None
    for k in range(16):
        kh, kw = k // 4, k % 4
        win = hpad_ref[kh:kh + 2 * Ho, pl.ds(kw, Wo, stride=2), :]        # (2Ho,Wo,Cp)
        tap = win.reshape(Ho, 2, Wo, cp)[:, 0].reshape(No, cp)            # rows kh,kh+2,..
        w = wts_ref[o_wtr + k * cp:o_wtr + (k + 1) * cp, :]
        d = jnp.dot(tap.astype(jnp.bfloat16), w,
                    preferred_element_type=jnp.float32)
        acc = d if acc is None else acc + d
    o_ref[...] = (acc + btr).reshape(1, No, cp)


def block_forward(x_nchw, t_emb, params):
    B, Cin, H, W = x_nchw.shape
    Cout = params["b1"].shape[0]
    Tdim = t_emb.shape[1]
    assert H % 2 == 0 and W % 2 == 0, "down Block needs even spatial dims"
    assert Cout % GROUPS == 0, "GroupNorm(8) needs Cout % 8 == 0"

    N = H * W
    Ho, Wo = H // 2, W // 2
    No = Ho * Wo
    Cg = Cout // GROUPS

    cinp = _ceil_to(Cin, 128)        # lane-dense padded channel counts
    cp = _ceil_to(Cout, 128)
    td = _ceil_to(Tdim, 16)
    wxp = _ceil_to(W + 2, 8)         # sublane-aligned padded width

    f32, bf16 = jnp.float32, jnp.bfloat16

    # ---- spatially + channel padded NHWC input (bf16); im2col happens in-kernel ----
    x = jnp.transpose(x_nchw, (0, 2, 3, 1)).astype(f32)
    xp = jnp.zeros((B, H + 2, wxp, cinp), bf16)
    xp = xp.at[:, 1:H + 1, 1:W + 1, :Cin].set(x.astype(bf16))

    # ---- time embedding, zero-padded to a sublane multiple ----
    t3 = jnp.zeros((B, 1, td), bf16)
    t3 = t3.at[:, 0, :Tdim].set(t_emb.astype(bf16))

    # ---- packed bf16 weight matrix: all MXU operands, channel-padded to Cp ----
    o_w1 = 0
    o_wt = o_w1 + 9 * cinp
    o_w2 = o_wt + td
    o_wtr = o_w2 + 9 * cp
    pw = o_wtr + 16 * cp
    wts = jnp.zeros((pw, cp), f32)
    w1 = params["w1"].reshape(9, Cin, Cout)
    w2 = params["w2"].reshape(9, Cout, Cout)
    wtr = params["wtr"].reshape(16, Cout, Cout)
    for k in range(9):
        wts = wts.at[o_w1 + k * cinp:o_w1 + k * cinp + Cin, :Cout].set(w1[k])
        wts = wts.at[o_w2 + k * cp:o_w2 + k * cp + Cout, :Cout].set(w2[k])
    for k in range(16):
        wts = wts.at[o_wtr + k * cp:o_wtr + k * cp + Cout, :Cout].set(wtr[k])
    wts = wts.at[o_wt:o_wt + Tdim, :Cout].set(params["wt"])
    wts = wts.astype(bf16)

    # ---- f32 aux matrix: group-mask for GN statistics + all per-channel vectors ----
    gid = jnp.repeat(jnp.arange(GROUPS), Cg)
    gmask = (gid[:, None] == gid[None, :]).astype(f32) / float(N * Cg)
    aux = jnp.zeros((cp + 8, cp), f32)
    aux = aux.at[:Cout, :Cout].set(gmask)
    vecs = jnp.stack([params["b1"], params["gamma1"], params["beta1"],
                      params["bt"], params["b2"], params["gamma2"],
                      params["beta2"], params["btr"]], axis=0).astype(f32)
    aux = aux.at[cp:cp + 8, :Cout].set(vecs)

    kernel = functools.partial(_block_kernel, H, W)
    out = pl.pallas_call(
        kernel,
        out_shape=jax.ShapeDtypeStruct((B, No, cp), f32),
        grid_spec=pltpu.PrefetchScalarGridSpec(
            num_scalar_prefetch=0,
            grid=(B,),
            in_specs=[
                pl.BlockSpec((1, H + 2, wxp, cinp), lambda b: (b, 0, 0, 0)),
                pl.BlockSpec((1, 1, td), lambda b: (b, 0, 0)),
                pl.BlockSpec((pw, cp), lambda b: (0, 0)),
                pl.BlockSpec((cp + 8, cp), lambda b: (0, 0)),
            ],
            out_specs=pl.BlockSpec((1, No, cp), lambda b: (b, 0, 0)),
            scratch_shapes=[pltpu.VMEM((H + 4, wxp, cp), f32)],
        ),
        compiler_params=pltpu.CompilerParams(
            dimension_semantics=("parallel",),
            vmem_limit_bytes=48 * 1024 * 1024),
    )(xp, t3, wts, aux)

    out = out[:, :, :Cout].reshape(B, Ho, Wo, Cout)   # drop padded channels
    return jnp.transpose(out, (0, 3, 1, 2))           # back to NCHW

# TODO(synk): up=True path (ConvTranspose2d transform + 2*in_ch conv1) not implemented;
# this kernel implements the up=False (downsampling) Block.


# ---------------- deterministic parameter init + pure-JAX reference ----------------
def init_params(key, in_ch, out_ch, time_emb_dim):
    ks = jax.random.split(key, 12)

    def nrm(k, shape, scale):
        return (scale * jax.random.normal(k, shape)).astype(jnp.float32)

    return {
        "w1": nrm(ks[0], (3, 3, in_ch, out_ch), 0.15),
        "b1": nrm(ks[1], (out_ch,), 0.05),
        "w2": nrm(ks[2], (3, 3, out_ch, out_ch), 0.08),
        "b2": nrm(ks[3], (out_ch,), 0.05),
        "wt": nrm(ks[4], (time_emb_dim, out_ch), 0.1),
        "bt": nrm(ks[5], (out_ch,), 0.05),
        "wtr": nrm(ks[6], (4, 4, out_ch, out_ch), 0.08),
        "btr": nrm(ks[7], (out_ch,), 0.05),
        "gamma1": 1.0 + nrm(ks[8], (out_ch,), 0.05),
        "beta1": nrm(ks[9], (out_ch,), 0.05),
        "gamma2": 1.0 + nrm(ks[10], (out_ch,), 0.05),
        "beta2": nrm(ks[11], (out_ch,), 0.05),
    }


def _gn_ref(x, gamma, beta):
    B, H, W, C = x.shape
    xg = x.reshape(B, H, W, GROUPS, C // GROUPS)
    mean = xg.mean(axis=(1, 2, 4), keepdims=True)
    var = xg.var(axis=(1, 2, 4), keepdims=True)
    xn = ((xg - mean) / jnp.sqrt(var + EPS)).reshape(B, H, W, C)
    return xn * gamma + beta


def reference_forward(x_nchw, t_emb, p):
    dn = ('NHWC', 'HWIO', 'NHWC')
    x = jnp.transpose(x_nchw, (0, 2, 3, 1))
    h = lax.conv_general_dilated(x, p["w1"], (1, 1), ((1, 1), (1, 1)),
                                 dimension_numbers=dn) + p["b1"]
    h = _gn_ref(jax.nn.relu(h), p["gamma1"], p["beta1"])
    te = jax.nn.relu(t_emb @ p["wt"] + p["bt"])
    h = h + te[:, None, None, :]
    h = lax.conv_general_dilated(h, p["w2"], (1, 1), ((1, 1), (1, 1)),
                                 dimension_numbers=dn) + p["b2"]
    h = _gn_ref(jax.nn.relu(h), p["gamma2"], p["beta2"])
    out = lax.conv_general_dilated(h, p["wtr"], (2, 2), ((1, 1), (1, 1)),
                                   dimension_numbers=dn) + p["btr"]
    return jnp.transpose(out, (0, 3, 1, 2))


if __name__ == "__main__":
    key = jax.random.PRNGKey(0)
    kx, kt, kp = jax.random.split(key, 3)
    B, in_ch, out_ch, H, W, T = 2, 4, 16, 16, 16, 32

    x = jax.random.normal(kx, (B, in_ch, H, W), dtype=jnp.float32)
    t_emb = jax.random.normal(kt, (B, T), dtype=jnp.float32)
    params = init_params(kp, in_ch, out_ch, T)

    fwd = jax.jit(block_forward)
    out = fwd(x, t_emb, params)
    out = jax.block_until_ready(out)
    assert out.shape == (B, out_ch, H // 2, W // 2)

    ref = reference_forward(x, t_emb, params)
    # bf16 MXU operands with f32 accumulation and f32 GroupNorm statistics.
    np.testing.assert_allclose(np.asarray(out), np.asarray(ref), atol=5e-2, rtol=5e-2)

    print("KERNEL_OK")
</pallas_src>

<mosaic_0001>
module attributes {stable_mosaic.version = 11 : i64} {
  func.func @_block_kernel(%arg0: i32, %arg1: memref<1x18x24x128xbf16, #tpu.memory_space<vmem>>, %arg2: memref<1x1x32xbf16, #tpu.memory_space<vmem>>, %arg3: memref<4384x128xbf16, #tpu.memory_space<vmem>>, %arg4: memref<136x128xf32, #tpu.memory_space<vmem>>, %arg5: memref<1x64x128xf32, #tpu.memory_space<vmem>>, %arg6: memref<20x24x128xf32, #tpu.memory_space<vmem>>) attributes {dimension_semantics = [#tpu.dimension_semantics<parallel>], iteration_bounds = array<i64: 2>, scalar_prefetch = 0 : i64, scratch_operands = 1 : i64, tpu.core_type = #tpu.core_type<tc>, window_params = [{transform_indices = @transform_0, window_bounds = array<i64: 1, 18, 24, 128>}, {transform_indices = @transform_1, window_bounds = array<i64: 1, 1, 32>}, {pipeline_mode = #tpu.pipeline_mode<synchronous>, transform_indices = @transform_2, window_bounds = array<i64: 4384, 128>}, {pipeline_mode = #tpu.pipeline_mode<synchronous>, transform_indices = @transform_3, window_bounds = array<i64: 136, 128>}, {transform_indices = @transform_4, window_bounds = array<i64: 1, 64, 128>}]} {
    %c0 = arith.constant 0 : index
    %c0_0 = arith.constant 0 : index
    %0 = vector.load %arg4[%c0, %c0_0] : memref<136x128xf32, #tpu.memory_space<vmem>>, vector<128x128xf32>
    %c128 = arith.constant 128 : index
    %c0_1 = arith.constant 0 : index
    %1 = vector.load %arg4[%c128, %c0_1] : memref<136x128xf32, #tpu.memory_space<vmem>>, vector<8x128xf32>
    %2 = vector.extract_strided_slice %1 {offsets = [0, 0], sizes = [1, 128], strides = [1, 1]} : vector<8x128xf32> to vector<1x128xf32>
    %3 = vector.extract_strided_slice %1 {offsets = [1, 0], sizes = [1, 128], strides = [1, 1]} : vector<8x128xf32> to vector<1x128xf32>
    %4 = vector.extract_strided_slice %1 {offsets = [2, 0], sizes = [1, 128], strides = [1, 1]} : vector<8x128xf32> to vector<1x128xf32>
    %5 = vector.extract_strided_slice %1 {offsets = [3, 0], sizes = [1, 128], strides = [1, 1]} : vector<8x128xf32> to vector<1x128xf32>
    %6 = vector.extract_strided_slice %1 {offsets = [4, 0], sizes = [1, 128], strides = [1, 1]} : vector<8x128xf32> to vector<1x128xf32>
    %7 = vector.extract_strided_slice %1 {offsets = [5, 0], sizes = [1, 128], strides = [1, 1]} : vector<8x128xf32> to vector<1x128xf32>
    %8 = vector.extract_strided_slice %1 {offsets = [6, 0], sizes = [1, 128], strides = [1, 1]} : vector<8x128xf32> to vector<1x128xf32>
    %9 = vector.extract_strided_slice %1 {offsets = [7, 0], sizes = [1, 128], strides = [1, 1]} : vector<8x128xf32> to vector<1x128xf32>
    %c0_2 = arith.constant 0 : index
    %c0_3 = arith.constant 0 : index
    %c0_4 = arith.constant 0 : index
    %c0_5 = arith.constant 0 : index
    %10 = vector.load %arg1[%c0_2, %c0_3, %c0_4, %c0_5] : memref<1x18x24x128xbf16, #tpu.memory_space<vmem>>, vector<1x16x16x128xbf16>
    %11 = vector.shape_cast %10 : vector<1x16x16x128xbf16> to vector<16x16x128xbf16>
    %12 = vector.shape_cast %11 : vector<16x16x128xbf16> to vector<256x128xbf16>
    %c0_6 = arith.constant 0 : index
    %c0_7 = arith.constant 0 : index
    %13 = vector.load %arg3[%c0_6, %c0_7] : memref<4384x128xbf16, #tpu.memory_space<vmem>>, vector<128x128xbf16>
    %cst = arith.constant dense<0.000000e+00> : vector<256x128xf32>
    %14 = tpu.matmul %12, %13, %cst {dimension_numbers = #tpu.dot_dimension_numbers<[1], [0], [0], [1], [0, 0, 1, 1], [], []>} : vector<256x128xbf16>, vector<128x128xbf16>, vector<256x128xf32> -> vector<256x128xf32>
    %c0_8 = arith.constant 0 : index
    %c0_9 = arith.constant 0 : index
    %c1 = arith.constant 1 : index
    %c0_10 = arith.constant 0 : index
    %15 = vector.load %arg1[%c0_8, %c0_9, %c1, %c0_10] : memref<1x18x24x128xbf16, #tpu.memory_space<vmem>>, vector<1x16x16x128xbf16>
    %16 = vector.shape_cast %15 : vector<1x16x16x128xbf16> to vector<16x16x128xbf16>
    %17 = vector.shape_cast %16 : vector<16x16x128xbf16> to vector<256x128xbf16>
    %c128_11 = arith.constant 128 : index
    %c0_12 = arith.constant 0 : index
    %18 = vector.load %arg3[%c128_11, %c0_12] : memref<4384x128xbf16, #tpu.memory_space<vmem>>, vector<128x128xbf16>
    %cst_13 = arith.constant dense<0.000000e+00> : vector<256x128xf32>
    %19 = tpu.matmul %17, %18, %cst_13 {dimension_numbers = #tpu.dot_dimension_numbers<[1], [0], [0], [1], [0, 0, 1, 1], [], []>} : vector<256x128xbf16>, vector<128x128xbf16>, vector<256x128xf32> -> vector<256x128xf32>
    %20 = arith.addf %14, %19 : vector<256x128xf32>
    %c0_14 = arith.constant 0 : index
    %c0_15 = arith.constant 0 : index
    %c2 = arith.constant 2 : index
    %c0_16 = arith.constant 0 : index
    %21 = vector.load %arg1[%c0_14, %c0_15, %c2, %c0_16] : memref<1x18x24x128xbf16, #tpu.memory_space<vmem>>, vector<1x16x16x128xbf16>
    %22 = vector.shape_cast %21 : vector<1x16x16x128xbf16> to vector<16x16x128xbf16>
    %23 = vector.shape_cast %22 : vector<16x16x128xbf16> to vector<256x128xbf16>
    %c256 = arith.constant 256 : index
    %c0_17 = arith.constant 0 : index
    %24 = vector.load %arg3[%c256, %c0_17] : memref<4384x128xbf16, #tpu.memory_space<vmem>>, vector<128x128xbf16>
    %cst_18 = arith.constant dense<0.000000e+00> : vector<256x128xf32>
    %25 = tpu.matmul %23, %24, %cst_18 {dimension_numbers = #tpu.dot_dimension_numbers<[1], [0], [0], [1], [0, 0, 1, 1], [], []>} : vector<256x128xbf16>, vector<128x128xbf16>, vector<256x128xf32> -> vector<256x128xf32>
    %26 = arith.addf %20, %25 : vector<256x128xf32>
    %c0_19 = arith.constant 0 : index
    %c1_20 = arith.constant 1 : index
    %c0_21 = arith.constant 0 : index
    %c0_22 = arith.constant 0 : index
    %27 = vector.load %arg1[%c0_19, %c1_20, %c0_21, %c0_22] : memref<1x18x24x128xbf16, #tpu.memory_space<vmem>>, vector<1x16x16x128xbf16>
    %28 = vector.shape_cast %27 : vector<1x16x16x128xbf16> to vector<16x16x128xbf16>
    %29 = vector.shape_cast %28 : vector<16x16x128xbf16> to vector<256x128xbf16>
    %c384 = arith.constant 384 : index
    %c0_23 = arith.constant 0 : index
    %30 = vector.load %arg3[%c384, %c0_23] : memref<4384x128xbf16, #tpu.memory_space<vmem>>, vector<128x128xbf16>
    %cst_24 = arith.constant dense<0.000000e+00> : vector<256x128xf32>
    %31 = tpu.matmul %29, %30, %cst_24 {dimension_numbers = #tpu.dot_dimension_numbers<[1], [0], [0], [1], [0, 0, 1, 1], [], []>} : vector<256x128xbf16>, vector<128x128xbf16>, vector<256x128xf32> -> vector<256x128xf32>
    %32 = arith.addf %26, %31 : vector<256x128xf32>
    %c0_25 = arith.constant 0 : index
    %c1_26 = arith.constant 1 : index
    %c1_27 = arith.constant 1 : index
    %c0_28 = arith.constant 0 : index
    %33 = vector.load %arg1[%c0_25, %c1_26, %c1_27, %c0_28] : memref<1x18x24x128xbf16, #tpu.memory_space<vmem>>, vector<1x16x16x128xbf16>
    %34 = vector.shape_cast %33 : vector<1x16x16x128xbf16> to vector<16x16x128xbf16>
    %35 = vector.shape_cast %34 : vector<16x16x128xbf16> to vector<256x128xbf16>
    %c512 = arith.constant 512 : index
    %c0_29 = arith.constant 0 : index
    %36 = vector.load %arg3[%c512, %c0_29] : memref<4384x128xbf16, #tpu.memory_space<vmem>>, vector<128x128xbf16>
    %cst_30 = arith.constant dense<0.000000e+00> : vector<256x128xf32>
    %37 = tpu.matmul %35, %36, %cst_30 {dimension_numbers = #tpu.dot_dimension_numbers<[1], [0], [0], [1], [0, 0, 1, 1], [], []>} : vector<256x128xbf16>, vector<128x128xbf16>, vector<256x128xf32> -> vector<256x128xf32>
    %38 = arith.addf %32, %37 : vector<256x128xf32>
    %c0_31 = arith.constant 0 : index
    %c1_32 = arith.constant 1 : index
    %c2_33 = arith.constant 2 : index
    %c0_34 = arith.constant 0 : index
    %39 = vector.load %arg1[%c0_31, %c1_32, %c2_33, %c0_34] : memref<1x18x24x128xbf16, #tpu.memory_space<vmem>>, vector<1x16x16x128xbf16>
    %40 = vector.shape_cast %39 : vector<1x16x16x128xbf16> to vector<16x16x128xbf16>
    %41 = vector.shape_cast %40 : vector<16x16x128xbf16> to vector<256x128xbf16>
    %c640 = arith.constant 640 : index
    %c0_35 = arith.constant 0 : index
    %42 = vector.load %arg3[%c640, %c0_35] : memref<4384x128xbf16, #tpu.memory_space<vmem>>, vector<128x128xbf16>
    %cst_36 = arith.constant dense<0.000000e+00> : vector<256x128xf32>
    %43 = tpu.matmul %41, %42, %cst_36 {dimension_numbers = #tpu.dot_dimension_numbers<[1], [0], [0], [1], [0, 0, 1, 1], [], []>} : vector<256x128xbf16>, vector<128x128xbf16>, vector<256x128xf32> -> vector<256x128xf32>
    %44 = arith.addf %38, %43 : vector<256x128xf32>
    %c0_37 = arith.constant 0 : index
    %c2_38 = arith.constant 2 : index
    %c0_39 = arith.constant 0 : index
    %c0_40 = arith.constant 0 : index
    %45 = vector.load %arg1[%c0_37, %c2_38, %c0_39, %c0_40] : memref<1x18x24x128xbf16, #tpu.memory_space<vmem>>, vector<1x16x16x128xbf16>
    %46 = vector.shape_cast %45 : vector<1x16x16x128xbf16> to vector<16x16x128xbf16>
    %47 = vector.shape_cast %46 : vector<16x16x128xbf16> to vector<256x128xbf16>
    %c768 = arith.constant 768 : index
    %c0_41 = arith.constant 0 : index
    %48 = vector.load %arg3[%c768, %c0_41] : memref<4384x128xbf16, #tpu.memory_space<vmem>>, vector<128x128xbf16>
    %cst_42 = arith.constant dense<0.000000e+00> : vector<256x128xf32>
    %49 = tpu.matmul %47, %48, %cst_42 {dimension_numbers = #tpu.dot_dimension_numbers<[1], [0], [0], [1], [0, 0, 1, 1], [], []>} : vector<256x128xbf16>, vector<128x128xbf16>, vector<256x128xf32> -> vector<256x128xf32>
    %50 = arith.addf %44, %49 : vector<256x128xf32>
    %c0_43 = arith.constant 0 : index
    %c2_44 = arith.constant 2 : index
    %c1_45 = arith.constant 1 : index
    %c0_46 = arith.constant 0 : index
    %51 = vector.load %arg1[%c0_43, %c2_44, %c1_45, %c0_46] : memref<1x18x24x128xbf16, #tpu.memory_space<vmem>>, vector<1x16x16x128xbf16>
    %52 = vector.shape_cast %51 : vector<1x16x16x128xbf16> to vector<16x16x128xbf16>
    %53 = vector.shape_cast %52 : vector<16x16x128xbf16> to vector<256x128xbf16>
    %c896 = arith.constant 896 : index
    %c0_47 = arith.constant 0 : index
    %54 = vector.load %arg3[%c896, %c0_47] : memref<4384x128xbf16, #tpu.memory_space<vmem>>, vector<128x128xbf16>
    %cst_48 = arith.constant dense<0.000000e+00> : vector<256x128xf32>
    %55 = tpu.matmul %53, %54, %cst_48 {dimension_numbers = #tpu.dot_dimension_numbers<[1], [0], [0], [1], [0, 0, 1, 1], [], []>} : vector<256x128xbf16>, vector<128x128xbf16>, vector<256x128xf32> -> vector<256x128xf32>
    %56 = arith.addf %50, %55 : vector<256x128xf32>
    %c0_49 = arith.constant 0 : index
    %c2_50 = arith.constant 2 : index
    %c2_51 = arith.constant 2 : index
    %c0_52 = arith.constant 0 : index
    %57 = vector.load %arg1[%c0_49, %c2_50, %c2_51, %c0_52] : memref<1x18x24x128xbf16, #tpu.memory_space<vmem>>, vector<1x16x16x128xbf16>
    %58 = vector.shape_cast %57 : vector<1x16x16x128xbf16> to vector<16x16x128xbf16>
    %59 = vector.shape_cast %58 : vector<16x16x128xbf16> to vector<256x128xbf16>
    %c1024 = arith.constant 1024 : index
    %c0_53 = arith.constant 0 : index
    %60 = vector.load %arg3[%c1024, %c0_53] : memref<4384x128xbf16, #tpu.memory_space<vmem>>, vector<128x128xbf16>
    %cst_54 = arith.constant dense<0.000000e+00> : vector<256x128xf32>
    %61 = tpu.matmul %59, %60, %cst_54 {dimension_numbers = #tpu.dot_dimension_numbers<[1], [0], [0], [1], [0, 0, 1, 1], [], []>} : vector<256x128xbf16>, vector<128x128xbf16>, vector<256x128xf32> -> vector<256x128xf32>
    %62 = arith.addf %56, %61 : vector<256x128xf32>
    %63 = vector.broadcast %2 : vector<1x128xf32> to vector<256x128xf32>
    %64 = arith.addf %62, %63 : vector<256x128xf32>
    %cst_55 = arith.constant 0.000000e+00 : f32
    %65 = vector.broadcast %cst_55 : f32 to vector<256x128xf32>
    %66 = arith.maximumf %64, %65 : vector<256x128xf32>
    %cst_56 = arith.constant dense<0.000000e+00> : vector<128xf32>
    %67 = vector.multi_reduction <add>, %66, %cst_56 [0] : vector<256x128xf32> to vector<128xf32>
    %68 = vector.shape_cast %67 : vector<128xf32> to vector<1x128xf32>
    %69 = arith.mulf %66, %66 : vector<256x128xf32>
    %cst_57 = arith.constant dense<0.000000e+00> : vector<128xf32>
    %70 = vector.multi_reduction <add>, %69, %cst_57 [0] : vector<256x128xf32> to vector<128xf32>
    %71 = vector.shape_cast %70 : vector<128xf32> to vector<1x128xf32>
    %cst_58 = arith.constant dense<0.000000e+00> : vector<1x128xf32>
    %72 = tpu.matmul %68, %0, %cst_58 {dimension_numbers = #tpu.dot_dimension_numbers<[1], [0], [0], [1], [0, 0, 1, 1], [], []>} : vector<1x128xf32>, vector<128x128xf32>, vector<1x128xf32> -> vector<1x128xf32>
    %cst_59 = arith.constant dense<0.000000e+00> : vector<1x128xf32>
    %73 = tpu.matmul %71, %0, %cst_59 {dimension_numbers = #tpu.dot_dimension_numbers<[1], [0], [0], [1], [0, 0, 1, 1], [], []>} : vector<1x128xf32>, vector<128x128xf32>, vector<1x128xf32> -> vector<1x128xf32>
    %74 = arith.mulf %72, %72 : vector<1x128xf32>
    %75 = arith.subf %73, %74 : vector<1x128xf32>
    %cst_60 = arith.constant 0.000000e+00 : f32
    %76 = vector.broadcast %cst_60 : f32 to vector<1x128xf32>
    %77 = arith.maximumf %75, %76 : vector<1x128xf32>
    %cst_61 = arith.constant 9.99999974E-6 : f32
    %78 = vector.broadcast %cst_61 : f32 to vector<1x128xf32>
    %79 = arith.addf %77, %78 : vector<1x128xf32>
    %80 = math.rsqrt %79 : vector<1x128xf32>
    %81 = arith.mulf %80, %3 : vector<1x128xf32>
    %82 = arith.mulf %72, %81 : vector<1x128xf32>
    %83 = arith.subf %4, %82 : vector<1x128xf32>
    %84 = vector.broadcast %81 : vector<1x128xf32> to vector<256x128xf32>
    %85 = arith.mulf %66, %84 : vector<256x128xf32>
    %86 = vector.broadcast %83 : vector<1x128xf32> to vector<256x128xf32>
    %87 = arith.addf %85, %86 : vector<256x128xf32>
    %c0_62 = arith.constant 0 : index
    %c0_63 = arith.constant 0 : index
    %c0_64 = arith.constant 0 : index
    %88 = vector.load %arg2[%c0_62, %c0_63, %c0_64] : memref<1x1x32xbf16, #tpu.memory_space<vmem>>, vector<1x1x32xbf16>
    %89 = vector.shape_cast %88 : vector<1x1x32xbf16> to vector<1x32xbf16>
    %c1152 = arith.constant 1152 : index
    %c0_65 = arith.constant 0 : index
    %90 = vector.load %arg3[%c1152, %c0_65] : memref<4384x128xbf16, #tpu.memory_space<vmem>>, vector<32x128xbf16>
    %cst_66 = arith.constant dense<0.000000e+00> : vector<1x128xf32>
    %91 = tpu.matmul %89, %90, %cst_66 {dimension_numbers = #tpu.dot_dimension_numbers<[1], [0], [0], [1], [0, 0, 1, 1], [], []>} : vector<1x32xbf16>, vector<32x128xbf16>, vector<1x128xf32> -> vector<1x128xf32>
    %92 = arith.addf %91, %5 : vector<1x128xf32>
    %cst_67 = arith.constant 0.000000e+00 : f32
    %93 = vector.broadcast %cst_67 : f32 to vector<1x128xf32>
    %94 = arith.maximumf %92, %93 : vector<1x128xf32>
    %95 = vector.broadcast %94 : vector<1x128xf32> to vector<256x128xf32>
    %96 = arith.addf %87, %95 : vector<256x128xf32>
    %cst_68 = arith.constant 0.000000e+00 : f32
    %97 = vector.broadcast %cst_68 : f32 to vector<1x24x128xf32>
    %c0_69 = arith.constant 0 : index
    %c0_70 = arith.constant 0 : index
    %c0_71 = arith.constant 0 : index
    %98 = vector.load %arg6[%c0_69, %c0_70, %c0_71] : memref<20x24x128xf32, #tpu.memory_space<vmem>>, vector<1x24x128xf32>
    tpu.vector_store %arg6[%c0_69, %c0_70, %c0_71], %97 {strides = array<i32>} : memref<20x24x128xf32, #tpu.memory_space<vmem>>, vector<1x24x128xf32>,
    %cst_72 = arith.constant 0.000000e+00 : f32
    %99 = vector.broadcast %cst_72 : f32 to vector<3x24x128xf32>
    %c17 = arith.constant 17 : index
    %c0_73 = arith.constant 0 : index
    %c0_74 = arith.constant 0 : index
    %100 = vector.load %arg6[%c17, %c0_73, %c0_74] : memref<20x24x128xf32, #tpu.memory_space<vmem>>, vector<3x24x128xf32>
    tpu.vector_store %arg6[%c17, %c0_73, %c0_74], %99 {strides = array<i32>} : memref<20x24x128xf32, #tpu.memory_space<vmem>>, vector<3x24x128xf32>,
    %cst_75 = arith.constant 0.000000e+00 : f32
    %101 = vector.broadcast %cst_75 : f32 to vector<16x1x128xf32>
    %c1_76 = arith.constant 1 : index
    %c0_77 = arith.constant 0 : index
    %c0_78 = arith.constant 0 : index
    %102 = vector.load %arg6[%c1_76, %c0_77, %c0_78] : memref<20x24x128xf32, #tpu.memory_space<vmem>>, vector<16x1x128xf32>
    tpu.vector_store %arg6[%c1_76, %c0_77, %c0_78], %101 {strides = array<i32>} : memref<20x24x128xf32, #tpu.memory_space<vmem>>, vector<16x1x128xf32>,
    %cst_79 = arith.constant 0.000000e+00 : f32
    %103 = vector.broadcast %cst_79 : f32 to vector<16x1x128xf32>
    %c1_80 = arith.constant 1 : index
    %c17_81 = arith.constant 17 : index
    %c0_82 = arith.constant 0 : index
    %104 = vector.load %arg6[%c1_80, %c17_81, %c0_82] : memref<20x24x128xf32, #tpu.memory_space<vmem>>, vector<16x1x128xf32>
    tpu.vector_store %arg6[%c1_80, %c17_81, %c0_82], %103 {strides = array<i32>} : memref<20x24x128xf32, #tpu.memory_space<vmem>>, vector<16x1x128xf32>,
    %105 = vector.shape_cast %96 : vector<256x128xf32> to vector<16x16x128xf32>
    %c1_83 = arith.constant 1 : index
    %c1_84 = arith.constant 1 : index
    %c0_85 = arith.constant 0 : index
    %106 = vector.load %arg6[%c1_83, %c1_84, %c0_85] : memref<20x24x128xf32, #tpu.memory_space<vmem>>, vector<16x16x128xf32>
    tpu.vector_store %arg6[%c1_83, %c1_84, %c0_85], %105 {strides = array<i32>} : memref<20x24x128xf32, #tpu.memory_space<vmem>>, vector<16x16x128xf32>,
    %c0_86 = arith.constant 0 : index
    %c0_87 = arith.constant 0 : index
    %c0_88 = arith.constant 0 : index
    %107 = vector.load %arg6[%c0_86, %c0_87, %c0_88] : memref<20x24x128xf32, #tpu.memory_space<vmem>>, vector<16x16x128xf32>
    %108 = vector.shape_cast %107 : vector<16x16x128xf32> to vector<256x128xf32>
    %c1184 = arith.constant 1184 : index
    %c0_89 = arith.constant 0 : index
    %109 = vector.load %arg3[%c1184, %c0_89] : memref<4384x128xbf16, #tpu.memory_space<vmem>>, vector<128x128xbf16>
    %110 = arith.truncf %108 : vector<256x128xf32> to vector<256x128xbf16>
    %cst_90 = arith.constant dense<0.000000e+00> : vector<256x128xf32>
    %111 = tpu.matmul %110, %109, %cst_90 {dimension_numbers = #tpu.dot_dimension_numbers<[1], [0], [0], [1], [0, 0, 1, 1], [], []>} : vector<256x128xbf16>, vector<128x128xbf16>, vector<256x128xf32> -> vector<256x128xf32>
    %c0_91 = arith.constant 0 : index
    %c1_92 = arith.constant 1 : index
    %c0_93 = arith.constant 0 : index
    %112 = vector.load %arg6[%c0_91, %c1_92, %c0_93] : memref<20x24x128xf32, #tpu.memory_space<vmem>>, vector<16x16x128xf32>
    %113 = vector.shape_cast %112 : vector<16x16x128xf32> to vector<256x128xf32>
    %c1312 = arith.constant 1312 : index
    %c0_94 = arith.constant 0 : index
    %114 = vector.load %arg3[%c1312, %c0_94] : memref<4384x128xbf16, #tpu.memory_space<vmem>>, vector<128x128xbf16>
    %115 = arith.truncf %113 : vector<256x128xf32> to vector<256x128xbf16>
    %cst_95 = arith.constant dense<0.000000e+00> : vector<256x128xf32>
    %116 = tpu.matmul %115, %114, %cst_95 {dimension_numbers = #tpu.dot_dimension_numbers<[1], [0], [0], [1], [0, 0, 1, 1], [], []>} : vector<256x128xbf16>, vector<128x128xbf16>, vector<256x128xf32> -> vector<256x128xf32>
    %117 = arith.addf %111, %116 : vector<256x128xf32>
    %c0_96 = arith.constant 0 : index
    %c2_97 = arith.constant 2 : index
    %c0_98 = arith.constant 0 : index
    %118 = vector.load %arg6[%c0_96, %c2_97, %c0_98] : memref<20x24x128xf32, #tpu.memory_space<vmem>>, vector<16x16x128xf32>
    %119 = vector.shape_cast %118 : vector<16x16x128xf32> to vector<256x128xf32>
    %c1440 = arith.constant 1440 : index
    %c0_99 = arith.constant 0 : index
    %120 = vector.load %arg3[%c1440, %c0_99] : memref<4384x128xbf16, #tpu.memory_space<vmem>>, vector<128x128xbf16>
    %121 = arith.truncf %119 : vector<256x128xf32> to vector<256x128xbf16>
    %cst_100 = arith.constant dense<0.000000e+00> : vector<256x128xf32>
    %122 = tpu.matmul %121, %120, %cst_100 {dimension_numbers = #tpu.dot_dimension_numbers<[1], [0], [0], [1], [0, 0, 1, 1], [], []>} : vector<256x128xbf16>, vector<128x128xbf16>, vector<256x128xf32> -> vector<256x128xf32>
    %123 = arith.addf %117, %122 : vector<256x128xf32>
    %c1_101 = arith.constant 1 : index
    %c0_102 = arith.constant 0 : index
    %c0_103 = arith.constant 0 : index
    %124 = vector.load %arg6[%c1_101, %c0_102, %c0_103] : memref<20x24x128xf32, #tpu.memory_space<vmem>>, vector<16x16x128xf32>
    %125 = vector.shape_cast %124 : vector<16x16x128xf32> to vector<256x128xf32>
    %c1568 = arith.constant 1568 : index
    %c0_104 = arith.constant 0 : index
    %126 = vector.load %arg3[%c1568, %c0_104] : memref<4384x128xbf16, #tpu.memory_space<vmem>>, vector<128x128xbf16>
    %127 = arith.truncf %125 : vector<256x128xf32> to vector<256x128xbf16>
    %cst_105 = arith.constant dense<0.000000e+00> : vector<256x128xf32>
    %128 = tpu.matmul %127, %126, %cst_105 {dimension_numbers = #tpu.dot_dimension_numbers<[1], [0], [0], [1], [0, 0, 1, 1], [], []>} : vector<256x128xbf16>, vector<128x128xbf16>, vector<256x128xf32> -> vector<256x128xf32>
    %129 = arith.addf %123, %128 : vector<256x128xf32>
    %c1_106 = arith.constant 1 : index
    %c1_107 = arith.constant 1 : index
    %c0_108 = arith.constant 0 : index
    %130 = vector.load %arg6[%c1_106, %c1_107, %c0_108] : memref<20x24x128xf32, #tpu.memory_space<vmem>>, vector<16x16x128xf32>
    %131 = vector.shape_cast %130 : vector<16x16x128xf32> to vector<256x128xf32>
    %c1696 = arith.constant 1696 : index
    %c0_109 = arith.constant 0 : index
    %132 = vector.load %arg3[%c1696, %c0_109] : memref<4384x128xbf16, #tpu.memory_space<vmem>>, vector<128x128xbf16>
    %133 = arith.truncf %131 : vector<256x128xf32> to vector<256x128xbf16>
    %cst_110 = arith.constant dense<0.000000e+00> : vector<256x128xf32>
    %134 = tpu.matmul %133, %132, %cst_110 {dimension_numbers = #tpu.dot_dimension_numbers<[1], [0], [0], [1], [0, 0, 1, 1], [], []>} : vector<256x128xbf16>, vector<128x128xbf16>, vector<256x128xf32> -> vector<256x128xf32>
    %135 = arith.addf %129, %134 : vector<256x128xf32>
    %c1_111 = arith.constant 1 : index
    %c2_112 = arith.constant 2 : index
    %c0_113 = arith.constant 0 : index
    %136 = vector.load %arg6[%c1_111, %c2_112, %c0_113] : memref<20x24x128xf32, #tpu.memory_space<vmem>>, vector<16x16x128xf32>
    %137 = vector.shape_cast %136 : vector<16x16x128xf32> to vector<256x128xf32>
    %c1824 = arith.constant 1824 : index
    %c0_114 = arith.constant 0 : index
    %138 = vector.load %arg3[%c1824, %c0_114] : memref<4384x128xbf16, #tpu.memory_space<vmem>>, vector<128x128xbf16>
    %139 = arith.truncf %137 : vector<256x128xf32> to vector<256x128xbf16>
    %cst_115 = arith.constant dense<0.000000e+00> : vector<256x128xf32>
    %140 = tpu.matmul %139, %138, %cst_115 {dimension_numbers = #tpu.dot_dimension_numbers<[1], [0], [0], [1], [0, 0, 1, 1], [], []>} : vector<256x128xbf16>, vector<128x128xbf16>, vector<256x128xf32> -> vector<256x128xf32>
    %141 = arith.addf %135, %140 : vector<256x128xf32>
    %c2_116 = arith.constant 2 : index
    %c0_117 = arith.constant 0 : index
    %c0_118 = arith.constant 0 : index
    %142 = vector.load %arg6[%c2_116, %c0_117, %c0_118] : memref<20x24x128xf32, #tpu.memory_space<vmem>>, vector<16x16x128xf32>
    %143 = vector.shape_cast %142 : vector<16x16x128xf32> to vector<256x128xf32>
    %c1952 = arith.constant 1952 : index
    %c0_119 = arith.constant 0 : index
    %144 = vector.load %arg3[%c1952, %c0_119] : memref<4384x128xbf16, #tpu.memory_space<vmem>>, vector<128x128xbf16>
    %145 = arith.truncf %143 : vector<256x128xf32> to vector<256x128xbf16>
    %cst_120 = arith.constant dense<0.000000e+00> : vector<256x128xf32>
    %146 = tpu.matmul %145, %144, %cst_120 {dimension_numbers = #tpu.dot_dimension_numbers<[1], [0], [0], [1], [0, 0, 1, 1], [], []>} : vector<256x128xbf16>, vector<128x128xbf16>, vector<256x128xf32> -> vector<256x128xf32>
    %147 = arith.addf %141, %146 : vector<256x128xf32>
    %c2_121 = arith.constant 2 : index
    %c1_122 = arith.constant 1 : index
    %c0_123 = arith.constant 0 : index
    %148 = vector.load %arg6[%c2_121, %c1_122, %c0_123] : memref<20x24x128xf32, #tpu.memory_space<vmem>>, vector<16x16x128xf32>
    %149 = vector.shape_cast %148 : vector<16x16x128xf32> to vector<256x128xf32>
    %c2080 = arith.constant 2080 : index
    %c0_124 = arith.constant 0 : index
    %150 = vector.load %arg3[%c2080, %c0_124] : memref<4384x128xbf16, #tpu.memory_space<vmem>>, vector<128x128xbf16>
    %151 = arith.truncf %149 : vector<256x128xf32> to vector<256x128xbf16>
    %cst_125 = arith.constant dense<0.000000e+00> : vector<256x128xf32>
    %152 = tpu.matmul %151, %150, %cst_125 {dimension_numbers = #tpu.dot_dimension_numbers<[1], [0], [0], [1], [0, 0, 1, 1], [], []>} : vector<256x128xbf16>, vector<128x128xbf16>, vector<256x128xf32> -> vector<256x128xf32>
    %153 = arith.addf %147, %152 : vector<256x128xf32>
    %c2_126 = arith.constant 2 : index
    %c2_127 = arith.constant 2 : index
    %c0_128 = arith.constant 0 : index
    %154 = vector.load %arg6[%c2_126, %c2_127, %c0_128] : memref<20x24x128xf32, #tpu.memory_space<vmem>>, vector<16x16x128xf32>
    %155 = vector.shape_cast %154 : vector<16x16x128xf32> to vector<256x128xf32>
    %c2208 = arith.constant 2208 : index
    %c0_129 = arith.constant 0 : index
    %156 = vector.load %arg3[%c2208, %c0_129] : memref<4384x128xbf16, #tpu.memory_space<vmem>>, vector<128x128xbf16>
    %157 = arith.truncf %155 : vector<256x128xf32> to vector<256x128xbf16>
    %cst_130 = arith.constant dense<0.000000e+00> : vector<256x128xf32>
    %158 = tpu.matmul %157, %156, %cst_130 {dimension_numbers = #tpu.dot_dimension_numbers<[1], [0], [0], [1], [0, 0, 1, 1], [], []>} : vector<256x128xbf16>, vector<128x128xbf16>, vector<256x128xf32> -> vector<256x128xf32>
    %159 = arith.addf %153, %158 : vector<256x128xf32>
    %160 = vector.broadcast %6 : vector<1x128xf32> to vector<256x128xf32>
    %161 = arith.addf %159, %160 : vector<256x128xf32>
    %cst_131 = arith.constant 0.000000e+00 : f32
    %162 = vector.broadcast %cst_131 : f32 to vector<256x128xf32>
    %163 = arith.maximumf %161, %162 : vector<256x128xf32>
    %cst_132 = arith.constant dense<0.000000e+00> : vector<128xf32>
    %164 = vector.multi_reduction <add>, %163, %cst_132 [0] : vector<256x128xf32> to vector<128xf32>
    %165 = vector.shape_cast %164 : vector<128xf32> to vector<1x128xf32>
    %166 = arith.mulf %163, %163 : vector<256x128xf32>
    %cst_133 = arith.constant dense<0.000000e+00> : vector<128xf32>
    %167 = vector.multi_reduction <add>, %166, %cst_133 [0] : vector<256x128xf32> to vector<128xf32>
    %168 = vector.shape_cast %167 : vector<128xf32> to vector<1x128xf32>
    %cst_134 = arith.constant dense<0.000000e+00> : vector<1x128xf32>
    %169 = tpu.matmul %165, %0, %cst_134 {dimension_numbers = #tpu.dot_dimension_numbers<[1], [0], [0], [1], [0, 0, 1, 1], [], []>} : vector<1x128xf32>, vector<128x128xf32>, vector<1x128xf32> -> vector<1x128xf32>
    %cst_135 = arith.constant dense<0.000000e+00> : vector<1x128xf32>
    %170 = tpu.matmul %168, %0, %cst_135 {dimension_numbers = #tpu.dot_dimension_numbers<[1], [0], [0], [1], [0, 0, 1, 1], [], []>} : vector<1x128xf32>, vector<128x128xf32>, vector<1x128xf32> -> vector<1x128xf32>
    %171 = arith.mulf %169, %169 : vector<1x128xf32>
    %172 = arith.subf %170, %171 : vector<1x128xf32>
    %cst_136 = arith.constant 0.000000e+00 : f32
    %173 = vector.broadcast %cst_136 : f32 to vector<1x128xf32>
    %174 = arith.maximumf %172, %173 : vector<1x128xf32>
    %cst_137 = arith.constant 9.99999974E-6 : f32
    %175 = vector.broadcast %cst_137 : f32 to vector<1x128xf32>
    %176 = arith.addf %174, %175 : vector<1x128xf32>
    %177 = math.rsqrt %176 : vector<1x128xf32>
    %178 = arith.mulf %177, %7 : vector<1x128xf32>
    %179 = arith.mulf %169, %178 : vector<1x128xf32>
    %180 = arith.subf %8, %179 : vector<1x128xf32>
    %181 = vector.broadcast %178 : vector<1x128xf32> to vector<256x128xf32>
    %182 = arith.mulf %163, %181 : vector<256x128xf32>
    %183 = vector.broadcast %180 : vector<1x128xf32> to vector<256x128xf32>
    %184 = arith.addf %182, %183 : vector<256x128xf32>
    %185 = vector.shape_cast %184 : vector<256x128xf32> to vector<16x16x128xf32>
    %c1_138 = arith.constant 1 : index
    %c1_139 = arith.constant 1 : index
    %c0_140 = arith.constant 0 : index
    %186 = vector.load %arg6[%c1_138, %c1_139, %c0_140] : memref<20x24x128xf32, #tpu.memory_space<vmem>>, vector<16x16x128xf32>
    tpu.vector_store %arg6[%c1_138, %c1_139, %c0_140], %185 {strides = array<i32>} : memref<20x24x128xf32, #tpu.memory_space<vmem>>, vector<16x16x128xf32>,
    %c0_141 = arith.constant 0 : index
    %c0_142 = arith.constant 0 : index
    %c0_143 = arith.constant 0 : index
    %187 = tpu.strided_load %arg6[%c0_141, %c0_142, %c0_143] {strides = array<i32: 1, 2, 1>} : memref<20x24x128xf32, #tpu.memory_space<vmem>>, vector<16x8x128xf32>
    %188 = vector.shape_cast %187 : vector<16x8x128xf32> to vector<8x2x8x128xf32>
    %189 = vector.extract_strided_slice %188 {offsets = [0, 0, 0, 0], sizes = [8, 1, 8, 128], strides = [1, 1, 1, 1]} : vector<8x2x8x128xf32> to vector<8x1x8x128xf32>
    %190 = vector.shape_cast %189 : vector<8x1x8x128xf32> to vector<8x8x128xf32>
    %191 = vector.shape_cast %190 : vector<8x8x128xf32> to vector<64x128xf32>
    %c2336 = arith.constant 2336 : index
    %c0_144 = arith.constant 0 : index
    %192 = vector.load %arg3[%c2336, %c0_144] : memref<4384x128xbf16, #tpu.memory_space<vmem>>, vector<128x128xbf16>
    %193 = arith.truncf %191 : vector<64x128xf32> to vector<64x128xbf16>
    %cst_145 = arith.constant dense<0.000000e+00> : vector<64x128xf32>
    %194 = tpu.matmul %193, %192, %cst_145 {dimension_numbers = #tpu.dot_dimension_numbers<[1], [0], [0], [1], [0, 0, 1, 1], [], []>} : vector<64x128xbf16>, vector<128x128xbf16>, vector<64x128xf32> -> vector<64x128xf32>
    %c0_146 = arith.constant 0 : index
    %c1_147 = arith.constant 1 : index
    %c0_148 = arith.constant 0 : index
    %195 = tpu.strided_load %arg6[%c0_146, %c1_147, %c0_148] {strides = array<i32: 1, 2, 1>} : memref<20x24x128xf32, #tpu.memory_space<vmem>>, vector<16x8x128xf32>
    %196 = vector.shape_cast %195 : vector<16x8x128xf32> to vector<8x2x8x128xf32>
    %197 = vector.extract_strided_slice %196 {offsets = [0, 0, 0, 0], sizes = [8, 1, 8, 128], strides = [1, 1, 1, 1]} : vector<8x2x8x128xf32> to vector<8x1x8x128xf32>
    %198 = vector.shape_cast %197 : vector<8x1x8x128xf32> to vector<8x8x128xf32>
    %199 = vector.shape_cast %198 : vector<8x8x128xf32> to vector<64x128xf32>
    %c2464 = arith.constant 2464 : index
    %c0_149 = arith.constant 0 : index
    %200 = vector.load %arg3[%c2464, %c0_149] : memref<4384x128xbf16, #tpu.memory_space<vmem>>, vector<128x128xbf16>
    %201 = arith.truncf %199 : vector<64x128xf32> to vector<64x128xbf16>
    %cst_150 = arith.constant dense<0.000000e+00> : vector<64x128xf32>
    %202 = tpu.matmul %201, %200, %cst_150 {dimension_numbers = #tpu.dot_dimension_numbers<[1], [0], [0], [1], [0, 0, 1, 1], [], []>} : vector<64x128xbf16>, vector<128x128xbf16>, vector<64x128xf32> -> vector<64x128xf32>
    %203 = arith.addf %194, %202 : vector<64x128xf32>
    %c0_151 = arith.constant 0 : index
    %c2_152 = arith.constant 2 : index
    %c0_153 = arith.constant 0 : index
    %204 = tpu.strided_load %arg6[%c0_151, %c2_152, %c0_153] {strides = array<i32: 1, 2, 1>} : memref<20x24x128xf32, #tpu.memory_space<vmem>>, vector<16x8x128xf32>
    %205 = vector.shape_cast %204 : vector<16x8x128xf32> to vector<8x2x8x128xf32>
    %206 = vector.extract_strided_slice %205 {offsets = [0, 0, 0, 0], sizes = [8, 1, 8, 128], strides = [1, 1, 1, 1]} : vector<8x2x8x128xf32> to vector<8x1x8x128xf32>
    %207 = vector.shape_cast %206 : vector<8x1x8x128xf32> to vector<8x8x128xf32>
    %208 = vector.shape_cast %207 : vector<8x8x128xf32> to vector<64x128xf32>
    %c2592 = arith.constant 2592 : index
    %c0_154 = arith.constant 0 : index
    %209 = vector.load %arg3[%c2592, %c0_154] : memref<4384x128xbf16, #tpu.memory_space<vmem>>, vector<128x128xbf16>
    %210 = arith.truncf %208 : vector<64x128xf32> to vector<64x128xbf16>
    %cst_155 = arith.constant dense<0.000000e+00> : vector<64x128xf32>
    %211 = tpu.matmul %210, %209, %cst_155 {dimension_numbers = #tpu.dot_dimension_numbers<[1], [0], [0], [1], [0, 0, 1, 1], [], []>} : vector<64x128xbf16>, vector<128x128xbf16>, vector<64x128xf32> -> vector<64x128xf32>
    %212 = arith.addf %203, %211 : vector<64x128xf32>
    %c0_156 = arith.constant 0 : index
    %c3 = arith.constant 3 : index
    %c0_157 = arith.constant 0 : index
    %213 = tpu.strided_load %arg6[%c0_156, %c3, %c0_157] {strides = array<i32: 1, 2, 1>} : memref<20x24x128xf32, #tpu.memory_space<vmem>>, vector<16x8x128xf32>
    %214 = vector.shape_cast %213 : vector<16x8x128xf32> to vector<8x2x8x128xf32>
    %215 = vector.extract_strided_slice %214 {offsets = [0, 0, 0, 0], sizes = [8, 1, 8, 128], strides = [1, 1, 1, 1]} : vector<8x2x8x128xf32> to vector<8x1x8x128xf32>
    %216 = vector.shape_cast %215 : vector<8x1x8x128xf32> to vector<8x8x128xf32>
    %217 = vector.shape_cast %216 : vector<8x8x128xf32> to vector<64x128xf32>
    %c2720 = arith.constant 2720 : index
    %c0_158 = arith.constant 0 : index
    %218 = vector.load %arg3[%c2720, %c0_158] : memref<4384x128xbf16, #tpu.memory_space<vmem>>, vector<128x128xbf16>
    %219 = arith.truncf %217 : vector<64x128xf32> to vector<64x128xbf16>
    %cst_159 = arith.constant dense<0.000000e+00> : vector<64x128xf32>
    %220 = tpu.matmul %219, %218, %cst_159 {dimension_numbers = #tpu.dot_dimension_numbers<[1], [0], [0], [1], [0, 0, 1, 1], [], []>} : vector<64x128xbf16>, vector<128x128xbf16>, vector<64x128xf32> -> vector<64x128xf32>
    %221 = arith.addf %212, %220 : vector<64x128xf32>
    %c1_160 = arith.constant 1 : index
    %c0_161 = arith.constant 0 : index
    %c0_162 = arith.constant 0 : index
    %222 = tpu.strided_load %arg6[%c1_160, %c0_161, %c0_162] {strides = array<i32: 1, 2, 1>} : memref<20x24x128xf32, #tpu.memory_space<vmem>>, vector<16x8x128xf32>
    %223 = vector.shape_cast %222 : vector<16x8x128xf32> to vector<8x2x8x128xf32>
    %224 = vector.extract_strided_slice %223 {offsets = [0, 0, 0, 0], sizes = [8, 1, 8, 128], strides = [1, 1, 1, 1]} : vector<8x2x8x128xf32> to vector<8x1x8x128xf32>
    %225 = vector.shape_cast %224 : vector<8x1x8x128xf32> to vector<8x8x128xf32>
    %226 = vector.shape_cast %225 : vector<8x8x128xf32> to vector<64x128xf32>
    %c2848 = arith.constant 2848 : index
    %c0_163 = arith.constant 0 : index
    %227 = vector.load %arg3[%c2848, %c0_163] : memref<4384x128xbf16, #tpu.memory_space<vmem>>, vector<128x128xbf16>
    %228 = arith.truncf %226 : vector<64x128xf32> to vector<64x128xbf16>
    %cst_164 = arith.constant dense<0.000000e+00> : vector<64x128xf32>
    %229 = tpu.matmul %228, %227, %cst_164 {dimension_numbers = #tpu.dot_dimension_numbers<[1], [0], [0], [1], [0, 0, 1, 1], [], []>} : vector<64x128xbf16>, vector<128x128xbf16>, vector<64x128xf32> -> vector<64x128xf32>
    %230 = arith.addf %221, %229 : vector<64x128xf32>
    %c1_165 = arith.constant 1 : index
    %c1_166 = arith.constant 1 : index
    %c0_167 = arith.constant 0 : index
    %231 = tpu.strided_load %arg6[%c1_165, %c1_166, %c0_167] {strides = array<i32: 1, 2, 1>} : memref<20x24x128xf32, #tpu.memory_space<vmem>>, vector<16x8x128xf32>
    %232 = vector.shape_cast %231 : vector<16x8x128xf32> to vector<8x2x8x128xf32>
    %233 = vector.extract_strided_slice %232 {offsets = [0, 0, 0, 0], sizes = [8, 1, 8, 128], strides = [1, 1, 1, 1]} : vector<8x2x8x128xf32> to vector<8x1x8x128xf32>
    %234 = vector.shape_cast %233 : vector<8x1x8x128xf32> to vector<8x8x128xf32>
    %235 = vector.shape_cast %234 : vector<8x8x128xf32> to vector<64x128xf32>
    %c2976 = arith.constant 2976 : index
    %c0_168 = arith.constant 0 : index
    %236 = vector.load %arg3[%c2976, %c0_168] : memref<4384x128xbf16, #tpu.memory_space<vmem>>, vector<128x128xbf16>
    %237 = arith.truncf %235 : vector<64x128xf32> to vector<64x128xbf16>
    %cst_169 = arith.constant dense<0.000000e+00> : vector<64x128xf32>
    %238 = tpu.matmul %237, %236, %cst_169 {dimension_numbers = #tpu.dot_dimension_numbers<[1], [0], [0], [1], [0, 0, 1, 1], [], []>} : vector<64x128xbf16>, vector<128x128xbf16>, vector<64x128xf32> -> vector<64x128xf32>
    %239 = arith.addf %230, %238 : vector<64x128xf32>
    %c1_170 = arith.constant 1 : index
    %c2_171 = arith.constant 2 : index
    %c0_172 = arith.constant 0 : index
    %240 = tpu.strided_load %arg6[%c1_170, %c2_171, %c0_172] {strides = array<i32: 1, 2, 1>} : memref<20x24x128xf32, #tpu.memory_space<vmem>>, vector<16x8x128xf32>
    %241 = vector.shape_cast %240 : vector<16x8x128xf32> to vector<8x2x8x128xf32>
    %242 = vector.extract_strided_slice %241 {offsets = [0, 0, 0, 0], sizes = [8, 1, 8, 128], strides = [1, 1, 1, 1]} : vector<8x2x8x128xf32> to vector<8x1x8x128xf32>
    %243 = vector.shape_cast %242 : vector<8x1x8x128xf32> to vector<8x8x128xf32>
    %244 = vector.shape_cast %243 : vector<8x8x128xf32> to vector<64x128xf32>
    %c3104 = arith.constant 3104 : index
    %c0_173 = arith.constant 0 : index
    %245 = vector.load %arg3[%c3104, %c0_173] : memref<4384x128xbf16, #tpu.memory_space<vmem>>, vector<128x128xbf16>
    %246 = arith.truncf %244 : vector<64x128xf32> to vector<64x128xbf16>
    %cst_174 = arith.constant dense<0.000000e+00> : vector<64x128xf32>
    %247 = tpu.matmul %246, %245, %cst_174 {dimension_numbers = #tpu.dot_dimension_numbers<[1], [0], [0], [1], [0, 0, 1, 1], [], []>} : vector<64x128xbf16>, vector<128x128xbf16>, vector<64x128xf32> -> vector<64x128xf32>
    %248 = arith.addf %239, %247 : vector<64x128xf32>
    %c1_175 = arith.constant 1 : index
    %c3_176 = arith.constant 3 : index
    %c0_177 = arith.constant 0 : index
    %249 = tpu.strided_load %arg6[%c1_175, %c3_176, %c0_177] {strides = array<i32: 1, 2, 1>} : memref<20x24x128xf32, #tpu.memory_space<vmem>>, vector<16x8x128xf32>
    %250 = vector.shape_cast %249 : vector<16x8x128xf32> to vector<8x2x8x128xf32>
    %251 = vector.extract_strided_slice %250 {offsets = [0, 0, 0, 0], sizes = [8, 1, 8, 128], strides = [1, 1, 1, 1]} : vector<8x2x8x128xf32> to vector<8x1x8x128xf32>
    %252 = vector.shape_cast %251 : vector<8x1x8x128xf32> to vector<8x8x128xf32>
    %253 = vector.shape_cast %252 : vector<8x8x128xf32> to vector<64x128xf32>
    %c3232 = arith.constant 3232 : index
    %c0_178 = arith.constant 0 : index
    %254 = vector.load %arg3[%c3232, %c0_178] : memref<4384x128xbf16, #tpu.memory_space<vmem>>, vector<128x128xbf16>
    %255 = arith.truncf %253 : vector<64x128xf32> to vector<64x128xbf16>
    %cst_179 = arith.constant dense<0.000000e+00> : vector<64x128xf32>
    %256 = tpu.matmul %255, %254, %cst_179 {dimension_numbers = #tpu.dot_dimension_numbers<[1], [0], [0], [1], [0, 0, 1, 1], [], []>} : vector<64x128xbf16>, vector<128x128xbf16>, vector<64x128xf32> -> vector<64x128xf32>
    %257 = arith.addf %248, %256 : vector<64x128xf32>
    %c2_180 = arith.constant 2 : index
    %c0_181 = arith.constant 0 : index
    %c0_182 = arith.constant 0 : index
    %258 = tpu.strided_load %arg6[%c2_180, %c0_181, %c0_182] {strides = array<i32: 1, 2, 1>} : memref<20x24x128xf32, #tpu.memory_space<vmem>>, vector<16x8x128xf32>
    %259 = vector.shape_cast %258 : vector<16x8x128xf32> to vector<8x2x8x128xf32>
    %260 = vector.extract_strided_slice %259 {offsets = [0, 0, 0, 0], sizes = [8, 1, 8, 128], strides = [1, 1, 1, 1]} : vector<8x2x8x128xf32> to vector<8x1x8x128xf32>
    %261 = vector.shape_cast %260 : vector<8x1x8x128xf32> to vector<8x8x128xf32>
    %262 = vector.shape_cast %261 : vector<8x8x128xf32> to vector<64x128xf32>
    %c3360 = arith.constant 3360 : index
    %c0_183 = arith.constant 0 : index
    %263 = vector.load %arg3[%c3360, %c0_183] : memref<4384x128xbf16, #tpu.memory_space<vmem>>, vector<128x128xbf16>
    %264 = arith.truncf %262 : vector<64x128xf32> to vector<64x128xbf16>
    %cst_184 = arith.constant dense<0.000000e+00> : vector<64x128xf32>
    %265 = tpu.matmul %264, %263, %cst_184 {dimension_numbers = #tpu.dot_dimension_numbers<[1], [0], [0], [1], [0, 0, 1, 1], [], []>} : vector<64x128xbf16>, vector<128x128xbf16>, vector<64x128xf32> -> vector<64x128xf32>
    %266 = arith.addf %257, %265 : vector<64x128xf32>
    %c2_185 = arith.constant 2 : index
    %c1_186 = arith.constant 1 : index
    %c0_187 = arith.constant 0 : index
    %267 = tpu.strided_load %arg6[%c2_185, %c1_186, %c0_187] {strides = array<i32: 1, 2, 1>} : memref<20x24x128xf32, #tpu.memory_space<vmem>>, vector<16x8x128xf32>
    %268 = vector.shape_cast %267 : vector<16x8x128xf32> to vector<8x2x8x128xf32>
    %269 = vector.extract_strided_slice %268 {offsets = [0, 0, 0, 0], sizes = [8, 1, 8, 128], strides = [1, 1, 1, 1]} : vector<8x2x8x128xf32> to vector<8x1x8x128xf32>
    %270 = vector.shape_cast %269 : vector<8x1x8x128xf32> to vector<8x8x128xf32>
    %271 = vector.shape_cast %270 : vector<8x8x128xf32> to vector<64x128xf32>
    %c3488 = arith.constant 3488 : index
    %c0_188 = arith.constant 0 : index
    %272 = vector.load %arg3[%c3488, %c0_188] : memref<4384x128xbf16, #tpu.memory_space<vmem>>, vector<128x128xbf16>
    %273 = arith.truncf %271 : vector<64x128xf32> to vector<64x128xbf16>
    %cst_189 = arith.constant dense<0.000000e+00> : vector<64x128xf32>
    %274 = tpu.matmul %273, %272, %cst_189 {dimension_numbers = #tpu.dot_dimension_numbers<[1], [0], [0], [1], [0, 0, 1, 1], [], []>} : vector<64x128xbf16>, vector<128x128xbf16>, vector<64x128xf32> -> vector<64x128xf32>
    %275 = arith.addf %266, %274 : vector<64x128xf32>
    %c2_190 = arith.constant 2 : index
    %c2_191 = arith.constant 2 : index
    %c0_192 = arith.constant 0 : index
    %276 = tpu.strided_load %arg6[%c2_190, %c2_191, %c0_192] {strides = array<i32: 1, 2, 1>} : memref<20x24x128xf32, #tpu.memory_space<vmem>>, vector<16x8x128xf32>
    %277 = vector.shape_cast %276 : vector<16x8x128xf32> to vector<8x2x8x128xf32>
    %278 = vector.extract_strided_slice %277 {offsets = [0, 0, 0, 0], sizes = [8, 1, 8, 128], strides = [1, 1, 1, 1]} : vector<8x2x8x128xf32> to vector<8x1x8x128xf32>
    %279 = vector.shape_cast %278 : vector<8x1x8x128xf32> to vector<8x8x128xf32>
    %280 = vector.shape_cast %279 : vector<8x8x128xf32> to vector<64x128xf32>
    %c3616 = arith.constant 3616 : index
    %c0_193 = arith.constant 0 : index
    %281 = vector.load %arg3[%c3616, %c0_193] : memref<4384x128xbf16, #tpu.memory_space<vmem>>, vector<128x128xbf16>
    %282 = arith.truncf %280 : vector<64x128xf32> to vector<64x128xbf16>
    %cst_194 = arith.constant dense<0.000000e+00> : vector<64x128xf32>
    %283 = tpu.matmul %282, %281, %cst_194 {dimension_numbers = #tpu.dot_dimension_numbers<[1], [0], [0], [1], [0, 0, 1, 1], [], []>} : vector<64x128xbf16>, vector<128x128xbf16>, vector<64x128xf32> -> vector<64x128xf32>
    %284 = arith.addf %275, %283 : vector<64x128xf32>
    %c2_195 = arith.constant 2 : index
    %c3_196 = arith.constant 3 : index
    %c0_197 = arith.constant 0 : index
    %285 = tpu.strided_load %arg6[%c2_195, %c3_196, %c0_197] {strides = array<i32: 1, 2, 1>} : memref<20x24x128xf32, #tpu.memory_space<vmem>>, vector<16x8x128xf32>
    %286 = vector.shape_cast %285 : vector<16x8x128xf32> to vector<8x2x8x128xf32>
    %287 = vector.extract_strided_slice %286 {offsets = [0, 0, 0, 0], sizes = [8, 1, 8, 128], strides = [1, 1, 1, 1]} : vector<8x2x8x128xf32> to vector<8x1x8x128xf32>
    %288 = vector.shape_cast %287 : vector<8x1x8x128xf32> to vector<8x8x128xf32>
    %289 = vector.shape_cast %288 : vector<8x8x128xf32> to vector<64x128xf32>
    %c3744 = arith.constant 3744 : index
    %c0_198 = arith.constant 0 : index
    %290 = vector.load %arg3[%c3744, %c0_198] : memref<4384x128xbf16, #tpu.memory_space<vmem>>, vector<128x128xbf16>
    %291 = arith.truncf %289 : vector<64x128xf32> to vector<64x128xbf16>
    %cst_199 = arith.constant dense<0.000000e+00> : vector<64x128xf32>
    %292 = tpu.matmul %291, %290, %cst_199 {dimension_numbers = #tpu.dot_dimension_numbers<[1], [0], [0], [1], [0, 0, 1, 1], [], []>} : vector<64x128xbf16>, vector<128x128xbf16>, vector<64x128xf32> -> vector<64x128xf32>
    %293 = arith.addf %284, %292 : vector<64x128xf32>
    %c3_200 = arith.constant 3 : index
    %c0_201 = arith.constant 0 : index
    %c0_202 = arith.constant 0 : index
    %294 = tpu.strided_load %arg6[%c3_200, %c0_201, %c0_202] {strides = array<i32: 1, 2, 1>} : memref<20x24x128xf32, #tpu.memory_space<vmem>>, vector<16x8x128xf32>
    %295 = vector.shape_cast %294 : vector<16x8x128xf32> to vector<8x2x8x128xf32>
    %296 = vector.extract_strided_slice %295 {offsets = [0, 0, 0, 0], sizes = [8, 1, 8, 128], strides = [1, 1, 1, 1]} : vector<8x2x8x128xf32> to vector<8x1x8x128xf32>
    %297 = vector.shape_cast %296 : vector<8x1x8x128xf32> to vector<8x8x128xf32>
    %298 = vector.shape_cast %297 : vector<8x8x128xf32> to vector<64x128xf32>
    %c3872 = arith.constant 3872 : index
    %c0_203 = arith.constant 0 : index
    %299 = vector.load %arg3[%c3872, %c0_203] : memref<4384x128xbf16, #tpu.memory_space<vmem>>, vector<128x128xbf16>
    %300 = arith.truncf %298 : vector<64x128xf32> to vector<64x128xbf16>
    %cst_204 = arith.constant dense<0.000000e+00> : vector<64x128xf32>
    %301 = tpu.matmul %300, %299, %cst_204 {dimension_numbers = #tpu.dot_dimension_numbers<[1], [0], [0], [1], [0, 0, 1, 1], [], []>} : vector<64x128xbf16>, vector<128x128xbf16>, vector<64x128xf32> -> vector<64x128xf32>
    %302 = arith.addf %293, %301 : vector<64x128xf32>
    %c3_205 = arith.constant 3 : index
    %c1_206 = arith.constant 1 : index
    %c0_207 = arith.constant 0 : index
    %303 = tpu.strided_load %arg6[%c3_205, %c1_206, %c0_207] {strides = array<i32: 1, 2, 1>} : memref<20x24x128xf32, #tpu.memory_space<vmem>>, vector<16x8x128xf32>
    %304 = vector.shape_cast %303 : vector<16x8x128xf32> to vector<8x2x8x128xf32>
    %305 = vector.extract_strided_slice %304 {offsets = [0, 0, 0, 0], sizes = [8, 1, 8, 128], strides = [1, 1, 1, 1]} : vector<8x2x8x128xf32> to vector<8x1x8x128xf32>
    %306 = vector.shape_cast %305 : vector<8x1x8x128xf32> to vector<8x8x128xf32>
    %307 = vector.shape_cast %306 : vector<8x8x128xf32> to vector<64x128xf32>
    %c4000 = arith.constant 4000 : index
    %c0_208 = arith.constant 0 : index
    %308 = vector.load %arg3[%c4000, %c0_208] : memref<4384x128xbf16, #tpu.memory_space<vmem>>, vector<128x128xbf16>
    %309 = arith.truncf %307 : vector<64x128xf32> to vector<64x128xbf16>
    %cst_209 = arith.constant dense<0.000000e+00> : vector<64x128xf32>
    %310 = tpu.matmul %309, %308, %cst_209 {dimension_numbers = #tpu.dot_dimension_numbers<[1], [0], [0], [1], [0, 0, 1, 1], [], []>} : vector<64x128xbf16>, vector<128x128xbf16>, vector<64x128xf32> -> vector<64x128xf32>
    %311 = arith.addf %302, %310 : vector<64x128xf32>
    %c3_210 = arith.constant 3 : index
    %c2_211 = arith.constant 2 : index
    %c0_212 = arith.constant 0 : index
    %312 = tpu.strided_load %arg6[%c3_210, %c2_211, %c0_212] {strides = array<i32: 1, 2, 1>} : memref<20x24x128xf32, #tpu.memory_space<vmem>>, vector<16x8x128xf32>
    %313 = vector.shape_cast %312 : vector<16x8x128xf32> to vector<8x2x8x128xf32>
    %314 = vector.extract_strided_slice %313 {offsets = [0, 0, 0, 0], sizes = [8, 1, 8, 128], strides = [1, 1, 1, 1]} : vector<8x2x8x128xf32> to vector<8x1x8x128xf32>
    %315 = vector.shape_cast %314 : vector<8x1x8x128xf32> to vector<8x8x128xf32>
    %316 = vector.shape_cast %315 : vector<8x8x128xf32> to vector<64x128xf32>
    %c4128 = arith.constant 4128 : index
    %c0_213 = arith.constant 0 : index
    %317 = vector.load %arg3[%c4128, %c0_213] : memref<4384x128xbf16, #tpu.memory_space<vmem>>, vector<128x128xbf16>
    %318 = arith.truncf %316 : vector<64x128xf32> to vector<64x128xbf16>
    %cst_214 = arith.constant dense<0.000000e+00> : vector<64x128xf32>
    %319 = tpu.matmul %318, %317, %cst_214 {dimension_numbers = #tpu.dot_dimension_numbers<[1], [0], [0], [1], [0, 0, 1, 1], [], []>} : vector<64x128xbf16>, vector<128x128xbf16>, vector<64x128xf32> -> vector<64x128xf32>
    %320 = arith.addf %311, %319 : vector<64x128xf32>
    %c3_215 = arith.constant 3 : index
    %c3_216 = arith.constant 3 : index
    %c0_217 = arith.constant 0 : index
    %321 = tpu.strided_load %arg6[%c3_215, %c3_216, %c0_217] {strides = array<i32: 1, 2, 1>} : memref<20x24x128xf32, #tpu.memory_space<vmem>>, vector<16x8x128xf32>
    %322 = vector.shape_cast %321 : vector<16x8x128xf32> to vector<8x2x8x128xf32>
    %323 = vector.extract_strided_slice %322 {offsets = [0, 0, 0, 0], sizes = [8, 1, 8, 128], strides = [1, 1, 1, 1]} : vector<8x2x8x128xf32> to vector<8x1x8x128xf32>
    %324 = vector.shape_cast %323 : vector<8x1x8x128xf32> to vector<8x8x128xf32>
    %325 = vector.shape_cast %324 : vector<8x8x128xf32> to vector<64x128xf32>
    %c4256 = arith.constant 4256 : index
    %c0_218 = arith.constant 0 : index
    %326 = vector.load %arg3[%c4256, %c0_218] : memref<4384x128xbf16, #tpu.memory_space<vmem>>, vector<128x128xbf16>
    %327 = arith.truncf %325 : vector<64x128xf32> to vector<64x128xbf16>
    %cst_219 = arith.constant dense<0.000000e+00> : vector<64x128xf32>
    %328 = tpu.matmul %327, %326, %cst_219 {dimension_numbers = #tpu.dot_dimension_numbers<[1], [0], [0], [1], [0, 0, 1, 1], [], []>} : vector<64x128xbf16>, vector<128x128xbf16>, vector<64x128xf32> -> vector<64x128xf32>
    %329 = arith.addf %320, %328 : vector<64x128xf32>
    %330 = vector.broadcast %9 : vector<1x128xf32> to vector<64x128xf32>
    %331 = arith.addf %329, %330 : vector<64x128xf32>
    %332 = vector.shape_cast %331 : vector<64x128xf32> to vector<1x64x128xf32>
    %c0_220 = arith.constant 0 : index
    %c0_221 = arith.constant 0 : index
    %c0_222 = arith.constant 0 : index
    %333 = vector.load %arg5[%c0_220, %c0_221, %c0_222] : memref<1x64x128xf32, #tpu.memory_space<vmem>>, vector<1x64x128xf32>
    tpu.vector_store %arg5[%c0_220, %c0_221, %c0_222], %332 {strides = array<i32>} : memref<1x64x128xf32, #tpu.memory_space<vmem>>, vector<1x64x128xf32>,
    return
  }
  func.func @transform_0(%arg0: i32) -> (i32, i32, i32, i32) {
    %c0_i32 = arith.constant 0 : i32
    %c0_i32_0 = arith.constant 0 : i32
    %c0_i32_1 = arith.constant 0 : i32
    %c0_i32_2 = arith.constant 0 : i32
    return %arg0, %c0_i32, %c0_i32_0, %c0_i32_1 : i32, i32, i32, i32
  }
  func.func @transform_1(%arg0: i32) -> (i32, i32, i32) {
    %c0_i32 = arith.constant 0 : i32
    %c0_i32_0 = arith.constant 0 : i32
    %c0_i32_1 = arith.constant 0 : i32
    return %arg0, %c0_i32, %c0_i32_0 : i32, i32, i32
  }
  func.func @transform_2(%arg0: i32) -> (i32, i32) {
    %c0_i32 = arith.constant 0 : i32
    %c0_i32_0 = arith.constant 0 : i32
    %c0_i32_1 = arith.constant 0 : i32
    return %c0_i32, %c0_i32_0 : i32, i32
  }
  func.func @transform_3(%arg0: i32) -> (i32, i32) {
    %c0_i32 = arith.constant 0 : i32
    %c0_i32_0 = arith.constant 0 : i32
    %c0_i32_1 = arith.constant 0 : i32
    return %c0_i32, %c0_i32_0 : i32, i32
  }
  func.func @transform_4(%arg0: i32) -> (i32, i32, i32) {
    %c0_i32 = arith.constant 0 : i32
    %c0_i32_0 = arith.constant 0 : i32
    %c0_i32_1 = arith.constant 0 : i32
    return %arg0, %c0_i32, %c0_i32_0 : i32, i32, i32
  }
}

</mosaic_0001>

<bundles_post_ra>
// kernel: eq.8
= control target key start
LH: loop header
LB: loop body
LE: loop exit
PB: predicated region body
PF: predicated region fallthrough
CT: control target
= control target key end

     0   :  { %s67_s10 = smov 14   ;;  %s68_s11 = smov 10   ;;  %vm3_vm0 = vcmask 15360   ;;  %vm9_vm1 = vcmask 130160   ;;  %vm15_vm2 = vcmask 113760   ;;  %vm21_vm3 = vcmask 97360   ;;  %s111_s0 = inlined_call_operand.vmem [shape: s32[8,2], index: 0, kind: input, shape index: {}]   ;;  %s112_s1 = inlined_call_operand.vmem [shape: s32[16], index: 1, kind: output, shape index: {}]  }
   0x1   :  { %v53_v0 = vld [vmem:[%s111_s0 + $0x7] sm:$0x1]   ;;  %v55_v1 = vld [vmem:[%s111_s0 + $0x5] sm:$0x1]   ;;  %v54_v2 = vld [vmem:[%s111_s0 + $0x6] sm:$0x1]  }
   0x2   :  { %7 = vrot.lane.b32.xlu0 %v53_v0, %s67_s10  ;;  %19 = vrot.lane.b32.xlu1 %v55_v1, %s68_s11  ;;  %v56_v3 = vld [vmem:[%s111_s0 + $0x4] sm:$0x1]   ;;  %v2_v4 = vld [vmem:[%s111_s0] sm:$0x1]   ;;  %s69_s18 = smov 12   ;;  %s70_s19 = smov 8  }
   0x3   :  { %4 = vst.msk [vmem:[#allocation0] sm:$0x1] %vm3_vm0, %v2_v4   ;;  %v57_v5 = vld [vmem:[%s111_s0 + $0x3] sm:$0x1]   ;;  %v58_v6 = vld [vmem:[%s111_s0 + $0x2] sm:$0x1]  }
   0x4   :  { %s71_s24 = smov 6   ;;  %s72_s25 = smov 4   ;;  %v59_v7 = vld [vmem:[%s111_s0 + $0x1] sm:$0x1]   ;;  %vm27_vm4 = vcmask 80960   ;;  %vm33_vm5 = vcmask 64560  }
   0x5   :  { %s73_s0 = smov 2   ;;  %vm39_vm6 = vcmask 48160   ;;  %vm45_vm7 = vcmask 31760  }
   0x6   :  { %13 = vrot.lane.b32.xlu0 %v54_v2, %s69_s18  ;;  %25 = vrot.lane.b32.xlu1 %v56_v3, %s70_s19 }
   0xa   :  { %31 = vrot.lane.b32.xlu0 %v57_v5, %s71_s24  ;;  %37 = vrot.lane.b32.xlu1 %v58_v6, %s72_s25 }
   0xe   :  { %43 = vrot.lane.b32.xlu0 %v59_v7, %s73_s0 }
  0x74   :  { %v8_v8 = vpop.permute.xlu0 %7   ;;  %v20_v9 = vpop.permute.xlu1 %19  }
  0x75   :  { %10 = vst.msk [vmem:[#allocation0] sm:$0x1] %vm9_vm1, %v8_v8  }
  0x78   :  { %v14_v10 = vpop.permute.xlu0 %13   ;;  %v26_v11 = vpop.permute.xlu1 %25  }
  0x79   :  { %16 = vst.msk [vmem:[#allocation0] sm:$0x1] %vm15_vm2, %v14_v10  }
  0x7a   :  { %22 = vst.msk [vmem:[#allocation0] sm:$0x1] %vm21_vm3, %v20_v9  }
  0x7b   :  { %28 = vst.msk [vmem:[#allocation0] sm:$0x1] %vm27_vm4, %v26_v11  }
  0x7c   :  { %v32_v12 = vpop.permute.xlu0 %31   ;;  %v38_v13 = vpop.permute.xlu1 %37  }
  0x7d   :  { %34 = vst.msk [vmem:[#allocation0] sm:$0x1] %vm33_vm5, %v32_v12  }
  0x7e   :  { %40 = vst.msk [vmem:[#allocation0] sm:$0x1] %vm39_vm6, %v38_v13  }
  0x80   :  { %v44_v14 = vpop.permute.xlu0 %43  }
  0x81   :  { %46 = vst.msk [vmem:[#allocation0] sm:$0x1] %vm45_vm7, %v44_v14  }
  0x88   :  { %v50_v15 = vld [vmem:[#allocation0] sm:$0x1] }
  0x89   :  { %52 = vst [vmem:[%s112_s1] sm:$0x1] %v50_v15 }

// kernel: block_forward.1
= control target key start
LH: loop header
LB: loop body
LE: loop exit
PB: predicated region body
PF: predicated region fallthrough
CT: control target
= control target key end

     0   :  { %s15319_s15 = smov 0   ;;  %s19004_s0 = inlined_call_operand.vmem [shape: bf16[2,18,24,128], index: 0, kind: input, shape index: {}]   ;;  %s19005_s1 = inlined_call_operand.vmem [shape: bf16[2,1,32], index: 1, kind: input, shape index: {}]   ;;  %s19006_s2 = inlined_call_operand.vmem [shape: bf16[4384,128], index: 2, kind: input, shape index: {}]   ;;  %s19007_s3 = inlined_call_operand.vmem [shape: f32[136,128], index: 3, kind: input, shape index: {}]   ;;  %s19008_s4 = inlined_call_operand.vmem [shape: f32[2,64,128], index: 4, kind: output, shape index: {}]  }
   0x1 LB: > { %s11392_s16 = sadd.s32 4294967295, %s15289_s15   ;;  %p11396_p0 = scmp.ge.s32.totalorder %s15289_s15, 1  ;;  %s15289_s15 = sphi %s15319_s15, %s14_s15  }
   0x2   : > { %p170_p1 = scmp.lt.s32.totalorder %s15289_s15, 3 }
   0x4   : > { %p171_p2 = pnand %p11396_p0, %p170_p1 }
   0x6   : > { %174 = sbr.rel (%p171_p2) target bundleno = 2756 (0xac4), region = 36 }
   0xd   : > { %v14893_v0 = vld [vmem:[%s19006_s2 + $0x40] sm:$0xff]   ;;  %p199_p3 = scmp.lt.s32.totalorder %s11392_s16, 1  ;;  %v14895_v2 = vld [vmem:[%s19006_s2 + $0x48] sm:$0xff]   ;;  %v14897_v4 = vld [vmem:[%s19006_s2 + $0x50] sm:$0xff]   ;;  %vm294_vm0 = vsmask.f32 3328 }
   0xe   : > { %v14894_v1 = vld [vmem:[%s19006_s2 + $0x100] sm:$0xff]   ;;  %12757 = vmatprep.subr.bf16.mxu1 %v14893_v0  ;;  %v14896_v3 = vld [vmem:[%s19006_s2 + $0x108] sm:$0xff]   ;;  %v14898_v5 = vld [vmem:[%s19006_s2 + $0x110] sm:$0xff]   ;;  %vm295_vm1 = vsmask.f32 7440  ;;  %vm1323_vm3 = vcmask 1042432  }
   0xf   : > { %12949 = vmatprep.subr.bf16.mxu0 %v14894_v1  ;;  %12758 = vmatpush3.bf16.msra.mxu1 %v14893_v0  ;;  %s19258_s16 = smov (!%p199_p3, %s11392_s16), 1  ;;  %v14899_v6 = vld [vmem:[%s19006_s2 + $0x58] sm:$0xff]   ;;  %v14901_v8 = vld [vmem:[%s19006_s2 + $0x60] sm:$0xff]   ;;  %v14903_v10 = vld [vmem:[%s19006_s2 + $0x68] sm:$0xff]   ;;  %vm1324_vm4 = vcmask 1046532   ;;  %vm15292_vm6 = vmmov 0  }
  0x10   : > { %12950 = vmatpush3.bf16.msra.mxu0 %v14894_v1  ;;  %12759 = vmatprep.subr.bf16.mxu1 %v14895_v2  ;;  %v14900_v7 = vld [vmem:[%s19006_s2 + $0x118] sm:$0xff]   ;;  %s14881_s7 = smul.u32 216, %s19258_s16  ;;  %v14902_v9 = vld [vmem:[%s19006_s2 + $0x120] sm:$0xff]   ;;  %v14904_v11 = vld [vmem:[%s19006_s2 + $0x128] sm:$0xff]   ;;  %s206_s22 = scalar_lea.vmem %s19005_s1, %s19258_s16  ;;  %vm5450_vm7 = vcmask 261120  }
  0x11   : > { %12951 = vmatprep.subr.bf16.mxu0 %v14896_v3  ;;  %v14905_v25 = vld [vmem:[%s19006_s2 + $0x70] sm:$0xff]   ;;  %vm15388_vm2 = vmor %vm294_vm0, %vm295_vm1  ;;  %v14907_v41 = vld [vmem:[%s19006_s2 + $0x78] sm:$0xff]   ;;  %s12061_s17 = sshll.u32 %s19258_s16, 6 }
  0x12   : > { %s15363_s14 = scalar_lea.vmem %s19004_s0, %s14881_s7  ;;  %v14906_v29 = vld [vmem:[%s19006_s2 + $0x130] sm:$0xff]   ;;  %v14908_v51 = vld [vmem:[%s19006_s2 + $0x138] sm:$0xff]   ;;  %vm15773_vm5 = vmor %vm1323_vm3, %vm1324_vm4 }
  0x13   : > { %12760 = vmatpush3.bf16.msra.mxu1 %v14895_v2  ;;  %v230_v12 = vld [vmem:[%s15363_s14] sm:$0xf]  ;;  %v231_v13 = vld [vmem:[%s15363_s14 + $0x4] sm:$0xf]  ;;  %v278_v14 = vld [vmem:[%s15363_s14 + $0x8] sm:$0x1] }
  0x14   : > { %12952 = vmatpush3.bf16.msra.mxu0 %v14896_v3  ;;  %12761 = vmatprep.subr.bf16.mxu1 %v14897_v4  ;;  %v298_v15 = vshrl.u32 %v230_v12, 16  ;;  %v301_v16 = vshll.u32 %v230_v12, 16  ;;  %v307_v17 = vshll.u32 %v231_v13, 16  ;;  %v311_v18 = vshrl.u32 %v231_v13, 16  ;;  %v11544_v20 = vld [vmem:[%s15363_s14 + $0xc] sm:$0xf] }
  0x15   : > { %12953 = vmatprep.subr.bf16.mxu0 %v14898_v5  ;;  %v317_v19 = vshll.u32 %v278_v14, 16  ;;  %v11545_v23 = vld [vmem:[%s15363_s14 + $0x10] sm:$0xf]  ;;  %v15377_v24 = vld [vmem:[%s15363_s14 + $0x14] sm:$0x1]  ;;  %v2194_v28 = vshrl.u32 %v11544_v20, 16 }
  0x16   : > { %v300_v21 = vrot.slane %v298_v15, 4  ;;  %v303_v22 = vrot.slane %v301_v16, 5  ;;  %v309_v26 = vrot.slane %v307_v17, 5  ;;  %v313_v27 = vrot.slane %v311_v18, 4  ;;  %v232_v34 = vld [vmem:[%s15363_s14 + $0xc] sm:$0xf] }
  0x17   : > { %12762 = vmatpush3.bf16.msra.mxu1 %v14897_v4  ;;  %v2197_v31 = vshll.u32 %v11544_v20, 16  ;;  %v2203_v32 = vshll.u32 %v11545_v23, 16  ;;  %v2207_v33 = vshrl.u32 %v11545_v23, 16  ;;  %v319_v37 = vrot.slane %v317_v19, 5  ;;  %v233_v40 = vld [vmem:[%s15363_s14 + $0x10] sm:$0xf] }
  0x18   : > { %12954 = vmatpush3.bf16.msra.mxu0 %v14898_v5  ;;  %12763 = vmatprep.subr.bf16.mxu1 %v14899_v6  ;;  %v304_v30 = vor.u32 %v303_v22, %v300_v21  ;;  %v314_v36 = vor.u32 %v313_v27, %v309_v26  ;;  %v2196_v38 = vrot.slane %v2194_v28, 4  ;;  %v2213_v39 = vshll.u32 %v15377_v24, 16  ;;  %v279_v48 = vld [vmem:[%s15363_s14 + $0x14] sm:$0x1]  ;;  %v11547_v56 = vld [vmem:[%s15363_s14 + $0x18] sm:$0xf] }
  0x19   : > { %12955 = vmatprep.subr.bf16.mxu0 %v14900_v7  ;;  %v2199_v43 = vrot.slane %v2197_v31, 5  ;;  %v2205_v44 = vrot.slane %v2203_v32, 5  ;;  %v2209_v45 = vrot.slane %v2207_v33, 4  ;;  %v322_v49 = vshrl.u32 %v232_v34, 16  ;;  %v15408_v5 = vld [vmem:[%s15363_s14 + $0x1c] sm:$0xf] }
  0x1a   : > { %v305_v42 = vrot.slane %v304_v30, 4  ;;  %v315_v46 = vrot.slane %v314_v36, 4  ;;  %v2215_v47 = vrot.slane %v2213_v39, 5  ;;  %v325_v50 = vshll.u32 %v232_v34, 16  ;;  %v14913_v12 = vld [vmem:[%s19006_s2] sm:$0xff]  }
  0x1b   : > { %12764 = vmatpush3.bf16.msra.mxu1 %v14899_v6  ;;  %v2200_v53 = vor.u32 %v2199_v43, %v2196_v38  ;;  %v2210_v54 = vor.u32 %v2209_v45, %v2205_v44  ;;  %v331_v55 = vshll.u32 %v233_v40, 16  ;;  %v324_v58 = vrot.slane %v322_v49, 4  ;;  %v234_v21 = vld [vmem:[%s15363_s14 + $0x18] sm:$0xf]  ;;  %v235_v27 = vld [vmem:[%s15363_s14 + $0x1c] sm:$0xf] }
  0x1c   : > { %12956 = vmatpush3.bf16.msra.mxu0 %v14900_v7  ;;  %12765 = vmatprep.subr.bf16.mxu1 %v14901_v8  ;;  %v310_v52 = vsel %vm15388_vm2, %v305_v42, %v309_v26  ;;  %v320_v57 = vsel %vm15388_vm2, %v315_v46, %v319_v37  ;;  %v327_v59 = vrot.slane %v325_v50, 5  ;;  %v335_v60 = vshrl.u32 %v233_v40, 16  ;;  %v280_v32 = vld [vmem:[%s15363_s14 + $0x20] sm:$0x1]  ;;  %v11550_v38 = vld [vmem:[%s15363_s14 + $0x24] sm:$0xf] }
  0x1d   : > { %12957 = vmatprep.subr.bf16.mxu0 %v14902_v9  ;;  %v11400_v61 = vcombine.low %v310_v52, %v320_v57  ;;  %v2201_v62 = vrot.slane %v2200_v53, 4  ;;  %v2211_v63 = vrot.slane %v2210_v54, 4  ;;  %v333_v0 = vrot.slane %v331_v55, 5  ;;  %v11551_v43 = vld [vmem:[%s15363_s14 + $0x28] sm:$0xf] }
  0x1e   : > { %v2967_v1 = vrot.slane %v15377_v24, 5  ;;  %v328_v2 = vor.u32 %v327_v59, %v324_v58  ;;  %v337_v3 = vrot.slane %v335_v60, 4  ;;  %v341_v4 = vshll.u32 %v279_v48, 16  ;;  %v11552_v49 = vld [vmem:[%s15363_s14 + $0x2c] sm:$0x1] }
  0x1f   : > { %12766 = vmatpush3.bf16.msra.mxu1 %v14901_v8  ;;  %12773 = vmatprep.mubr.bf16.mxu1 %v11400_v61  ;;  %v2206_v6 = vsel %vm15388_vm2, %v2201_v62, %v2205_v44  ;;  %v2216_v7 = vsel %vm15388_vm2, %v2211_v63, %v2215_v47  ;;  %v15415_v8 = vld [vmem:[%s15363_s14 + $0x20] sm:$0x1]  ;;  %v2227_v19 = vshll.u32 %v15408_v5, 16  ;;  %v2231_v20 = vshrl.u32 %v15408_v5, 16  ;;  %v14915_v44 = vld [vmem:[%s19006_s2 + $0x8] sm:$0xff]   ;;  %v14916_v63 = vld [vmem:[%s19006_s2 + $0x10] sm:$0xff]  }
  0x20   : > { %12958 = vmatpush3.bf16.msra.mxu0 %v14902_v9  ;;  %12767 = vmatprep.subr.bf16.mxu1 %v14903_v10  ;;  %v2218_v9 = vshrl.u32 %v11547_v56, 16  ;;  %v11592_v13 = vcombine.low %v2206_v6, %v2216_v7  ;;  %v329_v14 = vrot.slane %v328_v2, 4  ;;  %v338_v15 = vor.u32 %v337_v3, %v333_v0  ;;  %v236_v58 = vld [vmem:[%s15363_s14 + $0x24] sm:$0xf]  ;;  %v237_v6 = vld [vmem:[%s15363_s14 + $0x28] sm:$0xf] }
  0x21   : > { %12959 = vmatprep.subr.bf16.mxu0 %v14904_v11  ;;  %v343_v16 = vrot.slane %v341_v4, 5  ;;  %v2971_v26 = vrot.slane %v15408_v5, 5  ;;  %v2233_v30 = vrot.slane %v2231_v20, 4  ;;  %v2974_v31 = vrot.slane %v15415_v8, 5  ;;  %v14910_v7 = vld [vmem:[%s19006_s2 + $0x148] sm:$0xff]  }
  0x22   : > { %v2220_v17 = vrot.slane %v2218_v9, 4  ;;  %12965 = vmatprep.mubr.bf16.mxu0 %v11592_v13  ;;  %v334_v22 = vsel %vm15388_vm2, %v329_v14, %v333_v0  ;;  %v339_v23 = vrot.slane %v338_v15, 4  ;;  %v346_v37 = vshrl.u32 %v234_v21, 16  ;;  %v15223_v5 = vld [vmem:[%s15363_s14 + $0x2c] sm:$0x1] }
  0x23   : > { %12768 = vmatpush3.bf16.msra.mxu1 %v14903_v10  ;;  %v2221_v10 = vshll.u32 %v11547_v56, 16  ;;  %v15440_v36 = vrot.slane %v2971_v26, 4  ;;  %v349_v42 = vshll.u32 %v234_v21, 16  ;;  %v355_v46 = vshll.u32 %v235_v27, 16 }
  0x24   : > { %12960 = vmatpush3.bf16.msra.mxu0 %v14904_v11  ;;  %12769 = vmatprep.subr.bf16.mxu1 %v14905_v25  ;;  %v15420_v11 = vld [vmem:[%s19006_s2 + $0x140] sm:$0xff]   ;;  %v344_v33 = vsel %vm15388_vm2, %v339_v23, %v343_v16  ;;  %v348_v45 = vrot.slane %v346_v37, 4  ;;  %v359_v47 = vshrl.u32 %v235_v27, 16  ;;  %v365_v48 = vshll.u32 %v280_v32, 16  ;;  %v11553_v23 = vld [vmem:[%s15363_s14 + $0x30] sm:$0xf] }
  0x25   : > { %12961 = vmatprep.subr.bf16.mxu0 %v14906_v29  ;;  %v2223_v18 = vrot.slane %v2221_v10, 5  ;;  %v11401_v39 = vcombine.low %v334_v22, %v344_v33  ;;  %v351_v52 = vrot.slane %v349_v42, 5  ;;  %v2242_v53 = vshrl.u32 %v11550_v38, 16  ;;  %v14918_v32 = vld [vmem:[%s19006_s2 + $0x18] sm:$0xff]  }
  0x26   : > { %v357_v54 = vrot.slane %v355_v46, 5  ;;  %v361_v55 = vrot.slane %v359_v47, 4  ;;  %v367_v56 = vrot.slane %v365_v48, 5  ;;  %v2245_v57 = vshll.u32 %v11550_v38, 16 }
  0x27   : > { %12770 = vmatpush3.bf16.msra.mxu1 %v14905_v25  ;;  %v2237_v25 = vshll.u32 %v15415_v8, 16  ;;  %v2224_v28 = vor.u32 %v2223_v18, %v2220_v17  ;;  %v352_v60 = vor.u32 %v351_v52, %v348_v45  ;;  %v2244_v61 = vrot.slane %v2242_v53, 4  ;;  %v281_v17 = vld [vmem:[%s15363_s14 + $0x2c] sm:$0x1]  ;;  %v14912_v45 = vld [vmem:[%s19006_s2 + $0x158] sm:$0xff]  }
  0x28   : > { %12962 = vmatpush3.bf16.msra.mxu0 %v14906_v29  ;;  %12771 = vmatprep.subr.bf16.mxu1 %v14907_v41  ;;  %v2229_v29 = vrot.slane %v2227_v19, 5  ;;  %v2251_v62 = vshll.u32 %v11551_v43, 16  ;;  %v362_v2 = vor.u32 %v361_v55, %v357_v54  ;;  %v2247_v3 = vrot.slane %v2245_v57, 5  ;;  %v14919_v55 = vld [vmem:[%s19006_s2 + $0x20] sm:$0xff]  }
  0x29   : > { %12963 = vmatprep.subr.bf16.mxu0 %v14908_v51  ;;  %v2239_v34 = vrot.slane %v2237_v25, 5  ;;  %v2225_v40 = vrot.slane %v2224_v28, 4  ;;  %v2255_v4 = vshrl.u32 %v11551_v43, 16  ;;  %v353_v9 = vrot.slane %v352_v60, 4 }
  0x2a   : > { %v2253_v10 = vrot.slane %v2251_v62, 5  ;;  %v370_v13 = vshrl.u32 %v236_v58, 16  ;;  %v363_v14 = vrot.slane %v362_v2, 4  ;;  %v2248_v15 = vor.u32 %v2247_v3, %v2244_v61  ;;  %v282_v3 = vld [vmem:[%s15363_s14 + $0x38] sm:$0x1] }
  0x2b   : > { %12772 = vmatpush3.bf16.msra.mxu1 %v14907_v41  ;;  %v2234_v41 = vor.u32 %v2233_v30, %v2229_v29  ;;  %v2230_v50 = vsel %vm15388_vm2, %v2225_v40, %v2229_v29  ;;  %v2257_v16 = vrot.slane %v2255_v4, 4  ;;  %v373_v18 = vshll.u32 %v236_v58, 16  ;;  %v11554_v30 = vld [vmem:[%s15363_s14 + $0x34] sm:$0xf] }
  0x2c   : > { %12964 = vmatpush3.bf16.msra.mxu0 %v14908_v51  ;;  %12805 = vmatprep.subr.bf16.mxu1 %v14913_v12  ;;  %v358_v19 = vsel %vm15388_vm2, %v353_v9, %v357_v54  ;;  %v372_v21 = vrot.slane %v370_v13, 4  ;;  %v379_v22 = vshll.u32 %v237_v6, 16  ;;  %v368_v25 = vsel %vm15388_vm2, %v363_v14, %v367_v56  ;;  %v239_v54 = vld [vmem:[%s15363_s14 + $0x34] sm:$0xf]  ;;  %v11556_v14 = vld [vmem:[%s15363_s14 + $0x3c] sm:$0xf] }
  0x2d   : > { %12997 = vmatprep.subr.bf16.mxu0 %v15420_v11  ;;  %v2235_v51 = vrot.slane %v2234_v41, 4  ;;  %v2249_v27 = vrot.slane %v2248_v15, 4  ;;  %v2258_v28 = vor.u32 %v2257_v16, %v2253_v10  ;;  %v375_v29 = vrot.slane %v373_v18, 5  ;;  %v14914_v15 = vld [vmem:[%s19006_s2 + $0x160] sm:$0xff]  }
  0x2e   : > { %12774 = vmatmul.mubr.bf16.vlgmr.msra.gmra.mrb[0].mxu1 %v11401_v39  ;;  %v11402_v33 = vcombine.low %v358_v19, %v368_v25  ;;  %v383_v37 = vshrl.u32 %v237_v6, 16  ;;  %v389_v38 = vshll.u32 %v281_v17, 16  ;;  %v11555_v39 = vld [vmem:[%s15363_s14 + $0x38] sm:$0x1]  ;;  %v2266_v43 = vshrl.u32 %v11553_v23, 16 }
  0x2f   : > { %12806 = vmatpush3.bf16.msra.mxu1 %v14913_v12  ;;  %v2240_v59 = vsel %vm15388_vm2, %v2235_v51, %v2239_v34  ;;  %v2261_v12 = vshll.u32 %v11552_v49, 16  ;;  %v381_v34 = vrot.slane %v379_v22, 5  ;;  %v2254_v40 = vsel %vm15388_vm2, %v2249_v27, %v2253_v10 }
  0x30   : > { %12807 = vmatprep.subr.bf16.mxu1 %v14915_v44  ;;  %v11593_v0 = vcombine.low %v2230_v50, %v2240_v59  ;;  %v2259_v41 = vrot.slane %v2258_v28, 4  ;;  %v376_v42 = vor.u32 %v375_v29, %v372_v21  ;;  %12777 = vmatprep.mubr.bf16.mxu1 %v11402_v33  ;;  %v385_v46 = vrot.slane %v383_v37, 4  ;;  %v11558_v29 = vld [vmem:[%s15363_s14 + $0x44] sm:$0x1] }
  0x31   : > { %v2263_v20 = vrot.slane %v2261_v12, 5  ;;  %v391_v47 = vrot.slane %v389_v38, 5  ;;  %v2269_v48 = vshll.u32 %v11553_v23, 16  ;;  %v2275_v49 = vshll.u32 %v11554_v30, 16 }
  0x32   : > { %12966 = vmatmul.mubr.bf16.vlgmr.msra.gmra.mrb[0].mxu0 %v11593_v0  ;;  %v377_v51 = vrot.slane %v376_v42, 4  ;;  %v2268_v52 = vrot.slane %v2266_v43, 4  ;;  %v2279_v53 = vshrl.u32 %v11554_v30, 16  ;;  %v386_v57 = vor.u32 %v385_v46, %v381_v34 }
  0x33   : > { %12808 = vmatpush3.bf16.msra.mxu1 %v14915_v44  ;;  %12998 = vmatpush3.bf16.msra.mxu0 %v15420_v11  ;;  %v14911_v11 = vld [vmem:[%s19006_s2 + $0x150] sm:$0xff]   ;;  %v2264_v50 = vsel %vm15388_vm2, %v2259_v41, %v2263_v20  ;;  %v2271_v58 = vrot.slane %v2269_v48, 5  ;;  %v2277_v59 = vrot.slane %v2275_v49, 5  ;;  %v2285_v62 = vshll.u32 %v11555_v39, 16  ;;  %v11557_v20 = vld [vmem:[%s15363_s14 + $0x40] sm:$0xf] }
  0x34   : > { %12809 = vmatprep.subr.bf16.mxu1 %v14916_v63  ;;  %12999 = vmatprep.subr.bf16.mxu0 %v14910_v7  ;;  %v238_v44 = vld [vmem:[%s15363_s14 + $0x30] sm:$0xf]  ;;  %v11594_v56 = vcombine.low %v2254_v40, %v2264_v50  ;;  %v382_v60 = vsel %vm15388_vm2, %v377_v51, %v381_v34  ;;  %v2281_v61 = vrot.slane %v2279_v53, 4  ;;  %v387_v0 = vrot.slane %v386_v57, 4  ;;  %v240_v39 = vld [vmem:[%s15363_s14 + $0x3c] sm:$0xf] }
  0x35   : > { %v2272_v2 = vor.u32 %v2271_v58, %v2268_v52  ;;  %v397_v4 = vshll.u32 %v238_v44, 16  ;;  %v403_v6 = vshll.u32 %v239_v54, 16  ;;  %v2287_v10 = vrot.slane %v2285_v62, 5  ;;  %v241_v40 = vld [vmem:[%s15363_s14 + $0x40] sm:$0xf] }
  0x36   : > { %12969 = vmatprep.mubr.bf16.mxu0 %v11594_v56  ;;  %v2282_v9 = vor.u32 %v2281_v61, %v2277_v59  ;;  %v407_v13 = vshrl.u32 %v239_v54, 16  ;;  %v392_v16 = vsel %vm15388_vm2, %v387_v0, %v391_v47  ;;  %v413_v25 = vshll.u32 %v282_v3, 16  ;;  %v283_v52 = vld [vmem:[%s15363_s14 + $0x44] sm:$0x1]  ;;  %v14920_v3 = vld [vmem:[%s19006_s2 + $0x170] sm:$0xff]  }
  0x37   : > { %12810 = vmatpush3.bf16.msra.mxu1 %v14916_v63  ;;  %13000 = vmatpush3.bf16.msra.mxu0 %v14910_v7  ;;  %v394_v63 = vshrl.u32 %v238_v44, 16  ;;  %v14921_v7 = vld [vmem:[%s19006_s2 + $0x28] sm:$0xff]   ;;  %v2273_v17 = vrot.slane %v2272_v2, 4  ;;  %v399_v18 = vrot.slane %v397_v4, 5  ;;  %v405_v19 = vrot.slane %v403_v6, 5 }
  0x38   : > { %13001 = vmatprep.subr.bf16.mxu0 %v14911_v11  ;;  %12811 = vmatprep.subr.bf16.mxu1 %v14918_v32  ;;  %v11403_v21 = vcombine.low %v382_v60, %v392_v16  ;;  %v2283_v22 = vrot.slane %v2282_v9, 4  ;;  %v409_v23 = vrot.slane %v407_v13, 4  ;;  %v2290_v30 = vshrl.u32 %v11556_v14, 16  ;;  %v11559_v60 = vld [vmem:[%s15363_s14 + $0x48] sm:$0xf] }
  0x39   : > { %v396_v12 = vrot.slane %v394_v63, 4  ;;  %v2278_v27 = vsel %vm15388_vm2, %v2273_v17, %v2277_v59  ;;  %v415_v37 = vrot.slane %v413_v25, 5  ;;  %v2299_v38 = vshll.u32 %v11557_v20, 16  ;;  %v11560_v2 = vld [vmem:[%s15363_s14 + $0x4c] sm:$0xf] }
  0x3a   : > { %12778 = vmatmul.mubr.bf16.gmra.mrb[4].mxu1 %v11403_v21  ;;  %v2288_v33 = vsel %vm15388_vm2, %v2283_v22, %v2287_v10  ;;  %v410_v34 = vor.u32 %v409_v23, %v405_v19  ;;  %v2292_v43 = vrot.slane %v2290_v30, 4  ;;  %v2303_v48 = vshrl.u32 %v11557_v20, 16  ;;  %v11561_v13 = vld [vmem:[%s15363_s14 + $0x50] sm:$0x1]  ;;  %v242_v16 = vld [vmem:[%s15363_s14 + $0x48] sm:$0xf] }
  0x3b   : > { %12812 = vmatpush3.bf16.msra.mxu1 %v14918_v32  ;;  %13002 = vmatpush3.bf16.msra.mxu0 %v14911_v11  ;;  %v400_v28 = vor.u32 %v399_v18, %v396_v12  ;;  %v2293_v11 = vshll.u32 %v11556_v14, 16  ;;  %v14922_v32 = vld [vmem:[%s19006_s2 + $0x30] sm:$0xff]   ;;  %v11595_v41 = vcombine.low %v2278_v27, %v2288_v33  ;;  %v2301_v47 = vrot.slane %v2299_v38, 5  ;;  %v243_v21 = vld [vmem:[%s15363_s14 + $0x4c] sm:$0xf] }
  0x3c   : > { %13003 = vmatprep.subr.bf16.mxu0 %v14912_v45  ;;  %12813 = vmatprep.subr.bf16.mxu1 %v14919_v55  ;;  %v411_v46 = vrot.slane %v410_v34, 4  ;;  %v2309_v49 = vshll.u32 %v11558_v29, 16  ;;  %v418_v53 = vshrl.u32 %v240_v39, 16  ;;  %v421_v54 = vshll.u32 %v240_v39, 16  ;;  %v284_v39 = vld [vmem:[%s15363_s14 + $0x50] sm:$0x1] }
  0x3d   : > { %v401_v42 = vrot.slane %v400_v28, 4  ;;  %v2295_v44 = vrot.slane %v2293_v11, 5  ;;  %12970 = vmatmul.mubr.bf16.gmra.mrb[4].mxu0 %v11595_v41  ;;  %v2305_v57 = vrot.slane %v2303_v48, 4  ;;  %v427_v59 = vshll.u32 %v241_v40, 16  ;;  %v14923_v28 = vld [vmem:[%s19006_s2 + $0x178] sm:$0xff]  }
  0x3e   : > { %v416_v56 = vsel %vm15388_vm2, %v411_v46, %v415_v37  ;;  %v2311_v58 = vrot.slane %v2309_v49, 5  ;;  %v420_v63 = vrot.slane %v418_v53, 4  ;;  %v423_v0 = vrot.slane %v421_v54, 5  ;;  %v14927_v46 = vld [vmem:[%s19006_s2 + $0x180] sm:$0xff]  }
  0x3f   : > { %12814 = vmatpush3.bf16.msra.mxu1 %v14919_v55  ;;  %13004 = vmatpush3.bf16.msra.mxu0 %v14912_v45  ;;  %v14917_v45 = vld [vmem:[%s19006_s2 + $0x168] sm:$0xff]   ;;  %v406_v50 = vsel %vm15388_vm2, %v401_v42, %v405_v19  ;;  %v2296_v51 = vor.u32 %v2295_v44, %v2292_v43  ;;  %v14924_v55 = vld [vmem:[%s19006_s2 + $0x38] sm:$0xff]   ;;  %v2306_v4 = vor.u32 %v2305_v57, %v2301_v47  ;;  %v429_v6 = vrot.slane %v427_v59, 5 }
  0x40   : > { %12815 = vmatprep.subr.bf16.mxu1 %v14921_v7  ;;  %13005 = vmatprep.subr.bf16.mxu0 %v14914_v15  ;;  %v11404_v61 = vcombine.low %v406_v50, %v416_v56  ;;  %v437_v9 = vshll.u32 %v283_v52, 16  ;;  %v424_v12 = vor.u32 %v423_v0, %v420_v63  ;;  %v2314_v14 = vshrl.u32 %v11559_v60, 16  ;;  %v11564_v63 = vld [vmem:[%s15363_s14 + $0x5c] sm:$0x1] }
  0x41   : > { %v2297_v62 = vrot.slane %v2296_v51, 4  ;;  %v2307_v17 = vrot.slane %v2306_v4, 4  ;;  %v2323_v20 = vshll.u32 %v11560_v2, 16  ;;  %v2327_v27 = vshrl.u32 %v11560_v2, 16  ;;  %v14939_v51 = vld [vmem:[%s19006_s2 + $0x80] sm:$0xff]  }
  0x42   : > { %12781 = vmatprep.mubr.bf16.mxu1 %v11404_v61  ;;  %v439_v19 = vrot.slane %v437_v9, 5  ;;  %v425_v22 = vrot.slane %v424_v12, 4  ;;  %v2316_v23 = vrot.slane %v2314_v14, 4  ;;  %v442_v43 = vshrl.u32 %v242_v16, 16  ;;  %v245_v14 = vld [vmem:[%s15363_s14 + $0x58] sm:$0xf] }
  0x43   : > { %12816 = vmatpush3.bf16.msra.mxu1 %v14921_v7  ;;  %13006 = vmatpush3.bf16.msra.mxu0 %v14914_v15  ;;  %v431_v7 = vshrl.u32 %v241_v40, 16  ;;  %v2302_v10 = vsel %vm15388_vm2, %v2297_v62, %v2301_v47  ;;  %v2317_v15 = vshll.u32 %v11559_v60, 16  ;;  %v2312_v29 = vsel %vm15388_vm2, %v2307_v17, %v2311_v58  ;;  %v11562_v40 = vld [vmem:[%s15363_s14 + $0x54] sm:$0xf] }
  0x44   : > { %12817 = vmatprep.subr.bf16.mxu1 %v14922_v32  ;;  %13007 = vmatprep.subr.bf16.mxu0 %v14917_v45  ;;  %v2325_v11 = vrot.slane %v2323_v20, 5  ;;  %v11596_v33 = vcombine.low %v2302_v10, %v2312_v29  ;;  %v430_v34 = vsel %vm15388_vm2, %v425_v22, %v429_v6  ;;  %v2329_v38 = vrot.slane %v2327_v27, 4 }
  0x45   : > { %v433_v18 = vrot.slane %v431_v7, 4  ;;  %v2319_v25 = vrot.slane %v2317_v15, 5  ;;  %v445_v44 = vshll.u32 %v242_v16, 16  ;;  %v451_v49 = vshll.u32 %v243_v21, 16  ;;  %v244_v7 = vld [vmem:[%s15363_s14 + $0x54] sm:$0xf] }
  0x46   : > { %12973 = vmatprep.mubr.bf16.mxu0 %v11596_v33  ;;  %v2330_v48 = vor.u32 %v2329_v38, %v2325_v11  ;;  %v455_v50 = vshrl.u32 %v243_v21, 16  ;;  %v444_v53 = vrot.slane %v442_v43, 4  ;;  %v2338_v0 = vshrl.u32 %v11562_v40, 16 }
  0x47   : > { %12818 = vmatpush3.bf16.msra.mxu1 %v14922_v32  ;;  %13008 = vmatpush3.bf16.msra.mxu0 %v14917_v45  ;;  %v434_v30 = vor.u32 %v433_v18, %v429_v6  ;;  %v2333_v32 = vshll.u32 %v11561_v13, 16  ;;  %v2320_v37 = vor.u32 %v2319_v25, %v2316_v23  ;;  %v11563_v45 = vld [vmem:[%s15363_s14 + $0x58] sm:$0xf]  ;;  %v447_v54 = vrot.slane %v445_v44, 5 }
  0x48   : > { %12819 = vmatprep.subr.bf16.mxu1 %v14924_v55  ;;  %13009 = vmatprep.subr.bf16.mxu0 %v14920_v3  ;;  %v2331_v58 = vrot.slane %v2330_v48, 4  ;;  %v453_v59 = vrot.slane %v451_v49, 5  ;;  %v457_v61 = vrot.slane %v455_v50, 4  ;;  %v2347_v4 = vshll.u32 %v11563_v45, 16  ;;  %v11567_v48 = vld [vmem:[%s15363_s14 + $0x68] sm:$0x1] }
  0x49   : > { %v435_v41 = vrot.slane %v434_v30, 4  ;;  %v2335_v42 = vrot.slane %v2333_v32, 5  ;;  %v2321_v47 = vrot.slane %v2320_v37, 4  ;;  %v448_v60 = vor.u32 %v447_v54, %v444_v53  ;;  %v11565_v30 = vld [vmem:[%s15363_s14 + $0x60] sm:$0xf] }
  0x4a   : > { %v2351_v6 = vshrl.u32 %v11563_v45, 16  ;;  %v458_v12 = vor.u32 %v457_v61, %v453_v59  ;;  %v2340_v13 = vrot.slane %v2338_v0, 4  ;;  %v2349_v16 = vrot.slane %v2347_v4, 5  ;;  %v11566_v37 = vld [vmem:[%s15363_s14 + $0x64] sm:$0xf] }
  0x4b   : > { %12820 = vmatpush3.bf16.msra.mxu1 %v14924_v55  ;;  %13010 = vmatpush3.bf16.msra.mxu0 %v14920_v3  ;;  %v440_v52 = vsel %vm15388_vm2, %v435_v41, %v439_v19  ;;  %v461_v55 = vshll.u32 %v284_v39, 16  ;;  %v2326_v57 = vsel %vm15388_vm2, %v2321_v47, %v2325_v11  ;;  %v2336_v2 = vsel %vm15388_vm2, %v2331_v58, %v2335_v42  ;;  %v286_v61 = vld [vmem:[%s15363_s14 + $0x68] sm:$0x1] }
  0x4c   : > { %13011 = vmatprep.subr.bf16.mxu0 %v14923_v28  ;;  %v11405_v56 = vcombine.low %v430_v34, %v440_v52  ;;  %12853 = vmatprep.subr.bf16.mxu1 %v14939_v51  ;;  %v2341_v3 = vshll.u32 %v11562_v40, 16  ;;  %v11597_v9 = vcombine.low %v2326_v57, %v2336_v2  ;;  %v449_v10 = vrot.slane %v448_v60, 4  ;;  %v246_v51 = vld [vmem:[%s15363_s14 + $0x60] sm:$0xf] }
  0x4d   : > { %v463_v62 = vrot.slane %v461_v55, 5  ;;  %v2353_v17 = vrot.slane %v2351_v6, 4  ;;  %v2357_v18 = vshll.u32 %v11564_v63, 16  ;;  %v459_v20 = vrot.slane %v458_v12, 4 }
  0x4e   : > { %12782 = vmatmul.mubr.bf16.gmra.mrb[8].mxu1 %v11405_v56  ;;  %v2343_v15 = vrot.slane %v2341_v3, 5  ;;  %12974 = vmatmul.mubr.bf16.gmra.mrb[8].mxu0 %v11597_v9  ;;  %v454_v19 = vsel %vm15388_vm2, %v449_v10, %v453_v59  ;;  %v466_v21 = vshrl.u32 %v244_v7, 16  ;;  %v469_v22 = vshll.u32 %v244_v7, 16  ;;  %v247_v56 = vld [vmem:[%s15363_s14 + $0x64] sm:$0xf] }
  0x4f   : > { %13012 = vmatpush3.bf16.msra.mxu0 %v14923_v28  ;;  %v2354_v25 = vor.u32 %v2353_v17, %v2349_v16  ;;  %v2359_v27 = vrot.slane %v2357_v18, 5  ;;  %v285_v28 = vld [vmem:[%s15363_s14 + $0x5c] sm:$0x1]  ;;  %v475_v29 = vshll.u32 %v245_v14, 16  ;;  %v464_v11 = vsel %vm15388_vm2, %v459_v20, %v463_v62  ;;  %v11568_v62 = vld [vmem:[%s15363_s14 + $0x6c] sm:$0xf] }
  0x50   : > { %13045 = vmatprep.subr.bf16.mxu0 %v14927_v46  ;;  %v2344_v23 = vor.u32 %v2343_v15, %v2340_v13  ;;  %v468_v32 = vrot.slane %v466_v21, 4  ;;  %v471_v33 = vrot.slane %v469_v22, 5  ;;  %v479_v34 = vshrl.u32 %v245_v14, 16 }
  0x51   : > { %v11406_v38 = vcombine.low %v454_v19, %v464_v11  ;;  %v2355_v40 = vrot.slane %v2354_v25, 4  ;;  %v477_v41 = vrot.slane %v475_v29, 5  ;;  %v485_v44 = vshll.u32 %v285_v28, 16  ;;  %v15577_v19 = vld [vmem:[%s15363_s14 + $0x70] sm:$0xf] }
  0x52   : > { %v2345_v39 = vrot.slane %v2344_v23, 4  ;;  %v472_v42 = vor.u32 %v471_v33, %v468_v32  ;;  %v481_v43 = vrot.slane %v479_v34, 4  ;;  %v2362_v45 = vshrl.u32 %v11565_v30, 16  ;;  %v11570_v29 = vld [vmem:[%s15363_s14 + $0x74] sm:$0x1] }
  0x53   : > { %12785 = vmatprep.mubr.bf16.mxu1 %v11406_v38  ;;  %v2360_v47 = vsel %vm15388_vm2, %v2355_v40, %v2359_v27  ;;  %v2365_v49 = vshll.u32 %v11565_v30, 16  ;;  %v2371_v50 = vshll.u32 %v11566_v37, 16  ;;  %v487_v55 = vrot.slane %v485_v44, 5 }
  0x54   : > { %v2350_v46 = vsel %vm15388_vm2, %v2345_v39, %v2349_v16  ;;  %v473_v53 = vrot.slane %v472_v42, 4  ;;  %v482_v54 = vor.u32 %v481_v43, %v477_v41  ;;  %v2364_v57 = vrot.slane %v2362_v45, 4  ;;  %v249_v42 = vld [vmem:[%s15363_s14 + $0x70] sm:$0xf] }
  0x55   : > { %v11598_v52 = vcombine.low %v2350_v46, %v2360_v47  ;;  %v2367_v58 = vrot.slane %v2365_v49, 5  ;;  %v2373_v59 = vrot.slane %v2371_v50, 5  ;;  %v2375_v60 = vshrl.u32 %v11566_v37, 16  ;;  %v248_v37 = vld [vmem:[%s15363_s14 + $0x6c] sm:$0xf] }
  0x56   : > { %v478_v63 = vsel %vm15388_vm2, %v473_v53, %v477_v41  ;;  %v483_v0 = vrot.slane %v482_v54, 4  ;;  %v2381_v2 = vshll.u32 %v11567_v48, 16  ;;  %v490_v3 = vshrl.u32 %v246_v51, 16  ;;  %v287_v47 = vld [vmem:[%s15363_s14 + $0x74] sm:$0x1] }
  0x57   : > { %12977 = vmatprep.mubr.bf16.mxu0 %v11598_v52  ;;  %v2368_v4 = vor.u32 %v2367_v58, %v2364_v57  ;;  %v2377_v6 = vrot.slane %v2375_v60, 4  ;;  %v493_v7 = vshll.u32 %v246_v51, 16  ;;  %v499_v9 = vshll.u32 %v247_v56, 16 }
  0x58   : > { %v488_v10 = vsel %vm15388_vm2, %v483_v0, %v487_v55  ;;  %v2383_v12 = vrot.slane %v2381_v2, 5  ;;  %v492_v13 = vrot.slane %v490_v3, 4  ;;  %v503_v14 = vshrl.u32 %v247_v56, 16  ;;  %v11571_v56 = vld [vmem:[%s15363_s14 + $0x78] sm:$0xf] }
  0x59   : > { %v11407_v15 = vcombine.low %v478_v63, %v488_v10  ;;  %v2369_v16 = vrot.slane %v2368_v4, 4  ;;  %v2378_v17 = vor.u32 %v2377_v6, %v2373_v59  ;;  %v495_v18 = vrot.slane %v493_v7, 5  ;;  %v11573_v3 = vld [vmem:[%s15363_s14 + $0x80] sm:$0x1]  ;;  %v250_v4 = vld [vmem:[%s15363_s14 + $0x78] sm:$0xf] }
  0x5a   : > { %v501_v20 = vrot.slane %v499_v9, 5  ;;  %v505_v21 = vrot.slane %v503_v14, 4  ;;  %v509_v22 = vshll.u32 %v286_v61, 16  ;;  %v2386_v23 = vshrl.u32 %v11568_v62, 16  ;;  %v15595_v61 = vld [vmem:[%s15363_s14 + $0x7c] sm:$0xf] }
  0x5b   : > { %12786 = vmatmul.mubr.bf16.gmra.mrb[12].mxu1 %v11407_v15  ;;  %v2374_v25 = vsel %vm15388_vm2, %v2369_v16, %v2373_v59  ;;  %v2379_v27 = vrot.slane %v2378_v17, 4  ;;  %v496_v28 = vor.u32 %v495_v18, %v492_v13  ;;  %v2389_v30 = vshll.u32 %v11568_v62, 16 }
  0x5c   : > { %v506_v11 = vor.u32 %v505_v21, %v501_v20  ;;  %v511_v32 = vrot.slane %v509_v22, 5  ;;  %v2388_v33 = vrot.slane %v2386_v23, 4  ;;  %v2395_v34 = vshll.u32 %v15577_v19, 16 }
  0x5d   : > { %v2384_v38 = vsel %vm15388_vm2, %v2379_v27, %v2383_v12  ;;  %v497_v39 = vrot.slane %v496_v28, 4  ;;  %v2391_v40 = vrot.slane %v2389_v30, 5  ;;  %v2399_v41 = vshrl.u32 %v15577_v19, 16  ;;  %v251_v12 = vld [vmem:[%s15363_s14 + $0x7c] sm:$0xf] }
  0x5e   : > { %v11599_v43 = vcombine.low %v2374_v25, %v2384_v38  ;;  %v507_v44 = vrot.slane %v506_v11, 4  ;;  %v2397_v45 = vrot.slane %v2395_v34, 5  ;;  %v2405_v46 = vshll.u32 %v11570_v29, 16  ;;  %v288_v34 = vld [vmem:[%s15363_s14 + $0x80] sm:$0x1] }
  0x5f   : > { %v502_v48 = vsel %vm15388_vm2, %v497_v39, %v501_v20  ;;  %v2392_v49 = vor.u32 %v2391_v40, %v2388_v33  ;;  %v2401_v50 = vrot.slane %v2399_v41, 4  ;;  %v514_v51 = vshrl.u32 %v248_v37, 16 }
  0x60   : > { %12978 = vmatmul.mubr.bf16.gmra.mrb[12].mxu0 %v11599_v43  ;;  %v512_v52 = vsel %vm15388_vm2, %v507_v44, %v511_v32  ;;  %v2407_v53 = vrot.slane %v2405_v46, 5  ;;  %v517_v54 = vshll.u32 %v248_v37, 16  ;;  %v523_v55 = vshll.u32 %v249_v42, 16  ;;  %v11574_v43 = vld [vmem:[%s15363_s14 + $0x84] sm:$0xf] }
  0x61   : > { %v11408_v57 = vcombine.low %v502_v48, %v512_v52  ;;  %v2393_v58 = vrot.slane %v2392_v49, 4  ;;  %v2402_v59 = vor.u32 %v2401_v50, %v2397_v45  ;;  %v516_v60 = vrot.slane %v514_v51, 4  ;;  %v15613_v48 = vld [vmem:[%s15363_s14 + $0x88] sm:$0xf] }
  0x62   : > { %v519_v62 = vrot.slane %v517_v54, 5  ;;  %v525_v63 = vrot.slane %v523_v55, 5  ;;  %v527_v0 = vshrl.u32 %v249_v42, 16  ;;  %v533_v2 = vshll.u32 %v287_v47, 16 }
  0x63   : > { %12789 = vmatprep.mubr.bf16.mxu1 %v11408_v57  ;;  %v2398_v6 = vsel %vm15388_vm2, %v2393_v58, %v2397_v45  ;;  %v2403_v7 = vrot.slane %v2402_v59, 4  ;;  %v2410_v9 = vshrl.u32 %v11571_v56, 16  ;;  %v2413_v10 = vshll.u32 %v11571_v56, 16  ;;  %v252_v58 = vld [vmem:[%s15363_s14 + $0x84] sm:$0xf] }
  0x64   : > { %v520_v13 = vor.u32 %v519_v62, %v516_v60  ;;  %v529_v14 = vrot.slane %v527_v0, 4  ;;  %v535_v15 = vrot.slane %v533_v2, 5  ;;  %v2419_v16 = vshll.u32 %v15595_v61, 16 }
  0x65   : > { %v2408_v17 = vsel %vm15388_vm2, %v2403_v7, %v2407_v53  ;;  %v2412_v18 = vrot.slane %v2410_v9, 4  ;;  %v2415_v20 = vrot.slane %v2413_v10, 5  ;;  %v2423_v21 = vshrl.u32 %v15595_v61, 16  ;;  %v15618_v53 = vld [vmem:[%s15363_s14 + $0x8c] sm:$0x1] }
  0x66   : > { %v11600_v22 = vcombine.low %v2398_v6, %v2408_v17  ;;  %v521_v23 = vrot.slane %v520_v13, 4  ;;  %v530_v25 = vor.u32 %v529_v14, %v525_v63  ;;  %v2421_v27 = vrot.slane %v2419_v16, 5  ;;  %v253_v6 = vld [vmem:[%s15363_s14 + $0x88] sm:$0xf]  ;;  %v289_v13 = vld [vmem:[%s15363_s14 + $0x8c] sm:$0x1] }
  0x67   : > { %v2416_v28 = vor.u32 %v2415_v20, %v2412_v18  ;;  %v2425_v29 = vrot.slane %v2423_v21, 4  ;;  %v2429_v30 = vshll.u32 %v11573_v3, 16  ;;  %v538_v11 = vshrl.u32 %v250_v4, 16  ;;  %v11577_v14 = vld [vmem:[%s15363_s14 + $0x90] sm:$0xf] }
  0x68   : > { %12981 = vmatprep.mubr.bf16.mxu0 %v11600_v22  ;;  %v526_v32 = vsel %vm15388_vm2, %v521_v23, %v525_v63  ;;  %v531_v33 = vrot.slane %v530_v25, 4  ;;  %v541_v37 = vshll.u32 %v250_v4, 16  ;;  %v547_v38 = vshll.u32 %v251_v12, 16  ;;  %v15632_v20 = vld [vmem:[%s15363_s14 + $0x94] sm:$0xf] }
  0x69   : > { %v2417_v39 = vrot.slane %v2416_v28, 4  ;;  %v2426_v40 = vor.u32 %v2425_v29, %v2421_v27  ;;  %v2431_v41 = vrot.slane %v2429_v30, 5  ;;  %v540_v42 = vrot.slane %v538_v11, 4 }
  0x6a   : > { %v536_v44 = vsel %vm15388_vm2, %v531_v33, %v535_v15  ;;  %v543_v45 = vrot.slane %v541_v37, 5  ;;  %v549_v46 = vrot.slane %v547_v38, 5  ;;  %v551_v47 = vshrl.u32 %v251_v12, 16 }
  0x6b   : > { %v11409_v49 = vcombine.low %v526_v32, %v536_v44  ;;  %v2422_v50 = vsel %vm15388_vm2, %v2417_v39, %v2421_v27  ;;  %v2427_v51 = vrot.slane %v2426_v40, 4  ;;  %v557_v52 = vshll.u32 %v288_v34, 16  ;;  %v15637_v40 = vld [vmem:[%s15363_s14 + $0x98] sm:$0x1] }
  0x6c   : > { %v544_v54 = vor.u32 %v543_v45, %v540_v42  ;;  %v553_v55 = vrot.slane %v551_v47, 4  ;;  %v2434_v56 = vshrl.u32 %v11574_v43, 16  ;;  %v2437_v57 = vshll.u32 %v11574_v43, 16 }
  0x6d   : > { %12790 = vmatmul.mubr.bf16.gmra.mrb[16].mxu1 %v11409_v49  ;;  %v2432_v59 = vsel %vm15388_vm2, %v2427_v51, %v2431_v41  ;;  %v559_v60 = vrot.slane %v557_v52, 5  ;;  %v2443_v62 = vshll.u32 %v15613_v48, 16  ;;  %v2447_v63 = vshrl.u32 %v15613_v48, 16  ;;  %v15648_v52 = vld [vmem:[%s15363_s14 + $0x94] sm:$0xf] }
  0x6e   : > { %v11601_v0 = vcombine.low %v2422_v50, %v2432_v59  ;;  %v545_v2 = vrot.slane %v544_v54, 4  ;;  %v554_v3 = vor.u32 %v553_v55, %v549_v46  ;;  %v2436_v4 = vrot.slane %v2434_v56, 4  ;;  %v11580_v59 = vld [vmem:[%s15363_s14 + $0x9c] sm:$0xf] }
  0x6f   : > { %v2439_v7 = vrot.slane %v2437_v57, 5  ;;  %v2445_v9 = vrot.slane %v2443_v62, 5  ;;  %v2449_v10 = vrot.slane %v2447_v63, 4  ;;  %v2453_v12 = vshll.u32 %v15618_v53, 16 }
  0x70   : > { %12982 = vmatmul.mubr.bf16.gmra.mrb[16].mxu0 %v11601_v0  ;;  %v550_v15 = vsel %vm15388_vm2, %v545_v2, %v549_v46  ;;  %v555_v16 = vrot.slane %v554_v3, 4  ;;  %v562_v17 = vshrl.u32 %v252_v58, 16  ;;  %v565_v18 = vshll.u32 %v252_v58, 16  ;;  %v15645_v46 = vld [vmem:[%s15363_s14 + $0x90] sm:$0xf] }
  0x71   : > { %v2440_v21 = vor.u32 %v2439_v7, %v2436_v4  ;;  %v2450_v22 = vor.u32 %v2449_v10, %v2445_v9  ;;  %v2455_v23 = vrot.slane %v2453_v12, 5  ;;  %v571_v25 = vshll.u32 %v253_v6, 16  ;;  %v290_v58 = vld [vmem:[%s15363_s14 + $0x98] sm:$0x1] }
  0x72   : > { %v560_v27 = vsel %vm15388_vm2, %v555_v16, %v559_v60  ;;  %v564_v28 = vrot.slane %v562_v17, 4  ;;  %v567_v29 = vrot.slane %v565_v18, 5  ;;  %v575_v30 = vshrl.u32 %v253_v6, 16  ;;  %v15666_v18 = vld [vmem:[%s15363_s14 + $0xa4] sm:$0x1] }
  0x73   : > { %v11410_v11 = vcombine.low %v550_v15, %v560_v27  ;;  %v2441_v32 = vrot.slane %v2440_v21, 4  ;;  %v2451_v33 = vrot.slane %v2450_v22, 4  ;;  %v573_v34 = vrot.slane %v571_v25, 5 }
  0x74   : > { %v568_v37 = vor.u32 %v567_v29, %v564_v28  ;;  %v577_v38 = vrot.slane %v575_v30, 4  ;;  %v581_v39 = vshll.u32 %v289_v13, 16  ;;  %v2458_v41 = vshrl.u32 %v11577_v14, 16  ;;  %v15663_v13 = vld [vmem:[%s15363_s14 + $0xa0] sm:$0xf] }
  0x75   : > { %12793 = vmatprep.mubr.bf16.mxu1 %v11410_v11  ;;  %v2446_v42 = vsel %vm15388_vm2, %v2441_v32, %v2445_v9  ;;  %v2456_v43 = vsel %vm15388_vm2, %v2451_v33, %v2455_v23  ;;  %v2461_v44 = vshll.u32 %v11577_v14, 16  ;;  %v2467_v45 = vshll.u32 %v15632_v20, 16  ;;  %v15671_v11 = vld [vmem:[%s15363_s14 + $0x9c] sm:$0xf]  ;;  %v15674_v32 = vld [vmem:[%s15363_s14 + $0xa0] sm:$0xf] }
  0x76   : > { %v11602_v47 = vcombine.low %v2446_v42, %v2456_v43  ;;  %v569_v49 = vrot.slane %v568_v37, 4  ;;  %v578_v50 = vor.u32 %v577_v38, %v573_v34  ;;  %v583_v51 = vrot.slane %v581_v39, 5 }
  0x77   : > { %v2460_v54 = vrot.slane %v2458_v41, 4  ;;  %v2463_v55 = vrot.slane %v2461_v44, 5  ;;  %v2469_v56 = vrot.slane %v2467_v45, 5  ;;  %v2471_v57 = vshrl.u32 %v15632_v20, 16  ;;  %v291_v44 = vld [vmem:[%s15363_s14 + $0xa4] sm:$0x1] }
  0x78   : > { %12985 = vmatprep.mubr.bf16.mxu0 %v11602_v47  ;;  %v574_v60 = vsel %vm15388_vm2, %v569_v49, %v573_v34  ;;  %v579_v62 = vrot.slane %v578_v50, 4  ;;  %v2477_v63 = vshll.u32 %v15637_v40, 16  ;;  %v586_v0 = vshrl.u32 %v15645_v46, 16 }
  0x79   : > { %v2464_v2 = vor.u32 %v2463_v55, %v2460_v54  ;;  %v2473_v3 = vrot.slane %v2471_v57, 4  ;;  %v589_v4 = vshll.u32 %v15645_v46, 16  ;;  %v595_v6 = vshll.u32 %v15648_v52, 16 }
  0x7a   : > { %v584_v7 = vsel %vm15388_vm2, %v579_v62, %v583_v51  ;;  %v2479_v9 = vrot.slane %v2477_v63, 5  ;;  %v588_v10 = vrot.slane %v586_v0, 4  ;;  %v599_v12 = vshrl.u32 %v15648_v52, 16  ;;  %v11583_v51 = vld [vmem:[%s15363_s14 + $0xa8] sm:$0xf] }
  0x7b   : > { %v11411_v14 = vcombine.low %v574_v60, %v584_v7  ;;  %v2465_v15 = vrot.slane %v2464_v2, 4  ;;  %v2474_v16 = vor.u32 %v2473_v3, %v2469_v56  ;;  %v591_v17 = vrot.slane %v589_v4, 5  ;;  %v15691_v63 = vld [vmem:[%s15363_s14 + $0xac] sm:$0xf] }
  0x7c   : > { %v597_v21 = vrot.slane %v595_v6, 5  ;;  %v601_v22 = vrot.slane %v599_v12, 4  ;;  %v605_v23 = vshll.u32 %v290_v58, 16  ;;  %v2482_v25 = vshrl.u32 %v11580_v59, 16  ;;  %v15695_v12 = vld [vmem:[%s15363_s14 + $0xb0] sm:$0x1] }
  0x7d   : > { %12794 = vmatmul.mubr.bf16.gmra.mrb[20].mxu1 %v11411_v14  ;;  %v2470_v27 = vsel %vm15388_vm2, %v2465_v15, %v2469_v56  ;;  %v2475_v28 = vrot.slane %v2474_v16, 4  ;;  %v592_v29 = vor.u32 %v591_v17, %v588_v10  ;;  %v2485_v30 = vshll.u32 %v11580_v59, 16  ;;  %v15698_v14 = vld [vmem:[%s15363_s14 + $0xa8] sm:$0xf] }
  0x7e   : > { %v602_v33 = vor.u32 %v601_v22, %v597_v21  ;;  %v607_v34 = vrot.slane %v605_v23, 5  ;;  %v2484_v37 = vrot.slane %v2482_v25, 4  ;;  %v2491_v38 = vshll.u32 %v15663_v13, 16 }
  0x7f   : > { %v2480_v39 = vsel %vm15388_vm2, %v2475_v28, %v2479_v9  ;;  %v593_v41 = vrot.slane %v592_v29, 4  ;;  %v2487_v42 = vrot.slane %v2485_v30, 5  ;;  %v2495_v43 = vshrl.u32 %v15663_v13, 16  ;;  %v15704_v28 = vld [vmem:[%s15363_s14 + $0xac] sm:$0xf] }
  0x80   : > { %v11603_v45 = vcombine.low %v2470_v27, %v2480_v39  ;;  %v603_v47 = vrot.slane %v602_v33, 4  ;;  %v2493_v49 = vrot.slane %v2491_v38, 5  ;;  %v2501_v50 = vshll.u32 %v15666_v18, 16 }
  0x81   : > { %v598_v54 = vsel %vm15388_vm2, %v593_v41, %v597_v21  ;;  %v2488_v55 = vor.u32 %v2487_v42, %v2484_v37  ;;  %v2497_v56 = vrot.slane %v2495_v43, 4  ;;  %v610_v57 = vshrl.u32 %v15671_v11, 16  ;;  %v292_v42 = vld [vmem:[%s15363_s14 + $0xb0] sm:$0x1] }
  0x82   : > { %12986 = vmatmul.mubr.bf16.gmra.mrb[20].mxu0 %v11603_v45  ;;  %v608_v58 = vsel %vm15388_vm2, %v603_v47, %v607_v34  ;;  %v2503_v59 = vrot.slane %v2501_v50, 5  ;;  %v613_v60 = vshll.u32 %v15671_v11, 16  ;;  %v619_v62 = vshll.u32 %v15674_v32, 16 }
  0x83   : > { %v11412_v0 = vcombine.low %v598_v54, %v608_v58  ;;  %v2489_v2 = vrot.slane %v2488_v55, 4  ;;  %v2498_v3 = vor.u32 %v2497_v56, %v2493_v49  ;;  %v612_v4 = vrot.slane %v610_v57, 4  ;;  %v15718_v56 = vld [vmem:[%s15363_s14 + $0xb8] sm:$0xf] }
  0x84   : > { %v615_v6 = vrot.slane %v613_v60, 5  ;;  %v621_v7 = vrot.slane %v619_v62, 5  ;;  %v623_v9 = vshrl.u32 %v15674_v32, 16  ;;  %v629_v10 = vshll.u32 %v291_v44, 16 }
  0x85   : > { %12797 = vmatprep.mubr.bf16.mxu1 %v11412_v0  ;;  %v2494_v15 = vsel %vm15388_vm2, %v2489_v2, %v2493_v49  ;;  %v2499_v16 = vrot.slane %v2498_v3, 4  ;;  %v2506_v17 = vshrl.u32 %v11583_v51, 16  ;;  %v2509_v21 = vshll.u32 %v11583_v51, 16  ;;  %v11586_v49 = vld [vmem:[%s15363_s14 + $0xb4] sm:$0xf] }
  0x86   : > { %v616_v22 = vor.u32 %v615_v6, %v612_v4  ;;  %v625_v23 = vrot.slane %v623_v9, 4  ;;  %v631_v25 = vrot.slane %v629_v10, 5  ;;  %v2515_v27 = vshll.u32 %v15691_v63, 16  ;;  %v15724_v4 = vld [vmem:[%s15363_s14 + $0xbc] sm:$0x1] }
  0x87   : > { %v2504_v29 = vsel %vm15388_vm2, %v2499_v16, %v2503_v59  ;;  %v2508_v30 = vrot.slane %v2506_v17, 4  ;;  %v2511_v33 = vrot.slane %v2509_v21, 5  ;;  %v2519_v34 = vshrl.u32 %v15691_v63, 16 }
  0x88   : > { %v11604_v37 = vcombine.low %v2494_v15, %v2504_v29  ;;  %v617_v38 = vrot.slane %v616_v22, 4  ;;  %v626_v39 = vor.u32 %v625_v23, %v621_v7  ;;  %v2517_v41 = vrot.slane %v2515_v27, 5  ;;  %v15729_v15 = vld [vmem:[%s15363_s14 + $0xb4] sm:$0xf] }
  0x89   : > { %v2512_v43 = vor.u32 %v2511_v33, %v2508_v30  ;;  %v2521_v44 = vrot.slane %v2519_v34, 4  ;;  %v2525_v45 = vshll.u32 %v15695_v12, 16  ;;  %v634_v47 = vshrl.u32 %v15698_v14, 16  ;;  %v15736_v30 = vld [vmem:[%s15363_s14 + $0xb8] sm:$0xf] }
  0x8a   : > { %12989 = vmatprep.mubr.bf16.mxu0 %v11604_v37  ;;  %v622_v50 = vsel %vm15388_vm2, %v617_v38, %v621_v7  ;;  %v627_v51 = vrot.slane %v626_v39, 4  ;;  %v637_v54 = vshll.u32 %v15698_v14, 16  ;;  %v643_v55 = vshll.u32 %v15704_v28, 16 }
  0x8b   : > { %v2513_v57 = vrot.slane %v2512_v43, 4  ;;  %v2522_v58 = vor.u32 %v2521_v44, %v2517_v41  ;;  %v2527_v59 = vrot.slane %v2525_v45, 5  ;;  %v636_v60 = vrot.slane %v634_v47, 4  ;;  %v293_v44 = vld [vmem:[%s15363_s14 + $0xbc] sm:$0x1] }
  0x8c   : > { %v632_v62 = vsel %vm15388_vm2, %v627_v51, %v631_v25  ;;  %v639_v0 = vrot.slane %v637_v54, 5  ;;  %v645_v2 = vrot.slane %v643_v55, 5  ;;  %v647_v3 = vshrl.u32 %v15704_v28, 16  ;;  %v11589_v45 = vld [vmem:[%s15363_s14 + $0xc0] sm:$0xf] }
  0x8d   : > { %v11413_v6 = vcombine.low %v622_v50, %v632_v62  ;;  %v2518_v7 = vsel %vm15388_vm2, %v2513_v57, %v2517_v41  ;;  %v2523_v9 = vrot.slane %v2522_v58, 4  ;;  %v653_v10 = vshll.u32 %v292_v42, 16 }
  0x8e   : > { %v640_v16 = vor.u32 %v639_v0, %v636_v60  ;;  %v649_v17 = vrot.slane %v647_v3, 4  ;;  %v2530_v21 = vshrl.u32 %v11586_v49, 16  ;;  %v2533_v22 = vshll.u32 %v11586_v49, 16 }
  0x8f   : > { %12798 = vmatmul.mubr.bf16.gmra.mrb[24].mxu1 %v11413_v6  ;;  %v2528_v23 = vsel %vm15388_vm2, %v2523_v9, %v2527_v59  ;;  %v655_v25 = vrot.slane %v653_v10, 5  ;;  %v2539_v27 = vshll.u32 %v15718_v56, 16  ;;  %v2543_v29 = vshrl.u32 %v15718_v56, 16  ;;  %v15747_v59 = vld [vmem:[%s15363_s14 + $0xc4] sm:$0xf] }
  0x90   : > { %v11605_v33 = vcombine.low %v2518_v7, %v2528_v23  ;;  %v641_v34 = vrot.slane %v640_v16, 4  ;;  %v650_v37 = vor.u32 %v649_v17, %v645_v2  ;;  %v2532_v38 = vrot.slane %v2530_v21, 4  ;;  %v15753_v10 = vld [vmem:[%s15363_s14 + $0xc8] sm:$0x1] }
  0x91   : > { %v2535_v39 = vrot.slane %v2533_v22, 5  ;;  %v2541_v41 = vrot.slane %v2539_v27, 5  ;;  %v2545_v42 = vrot.slane %v2543_v29, 4  ;;  %v2549_v43 = vshll.u32 %v15724_v4, 16 }
  0x92   : > { %12990 = vmatmul.mubr.bf16.gmra.mrb[24].mxu0 %v11605_v33  ;;  %v646_v47 = vsel %vm15388_vm2, %v641_v34, %v645_v2  ;;  %v651_v49 = vrot.slane %v650_v37, 4  ;;  %v658_v50 = vshrl.u32 %v15729_v15, 16  ;;  %v661_v51 = vshll.u32 %v15729_v15, 16 }
  0x93   : > { %v2536_v54 = vor.u32 %v2535_v39, %v2532_v38  ;;  %v2546_v55 = vor.u32 %v2545_v42, %v2541_v41  ;;  %v2551_v57 = vrot.slane %v2549_v43, 5  ;;  %v667_v58 = vshll.u32 %v15736_v30, 16  ;;  %v11616_v39 = vld [vmem:[%s15363_s14 + $0xc] sm:$0xe] }
  0x94   : > { %v656_v60 = vsel %vm15388_vm2, %v651_v49, %v655_v25  ;;  %v660_v62 = vrot.slane %v658_v50, 4  ;;  %v663_v0 = vrot.slane %v661_v51, 5  ;;  %v671_v2 = vshrl.u32 %v15736_v30, 16  ;;  %v11617_v50 = vld [vmem:[%s15363_s14 + $0x18] sm:$0xe] }
  0x95   : > { %v11414_v3 = vcombine.low %v646_v47, %v656_v60  ;;  %v2537_v6 = vrot.slane %v2536_v54, 4  ;;  %v2547_v7 = vrot.slane %v2546_v55, 4  ;;  %v669_v9 = vrot.slane %v667_v58, 5  ;;  %v15770_v58 = vld [vmem:[%s15363_s14 + $0x4] sm:$0xf] }
  0x96   : > { %v664_v16 = vor.u32 %v663_v0, %v660_v62  ;;  %v673_v17 = vrot.slane %v671_v2, 4  ;;  %v677_v21 = vshll.u32 %v293_v44, 16  ;;  %v2554_v22 = vshrl.u32 %v11589_v45, 16  ;;  %v15221_v2 = vld [vmem:[%s15363_s14 + $0x10] sm:$0xf] }
  0x97   : > { %12801 = vmatprep.mubr.bf16.mxu1 %v11414_v3  ;;  %v2542_v23 = vsel %vm15388_vm2, %v2537_v6, %v2541_v41  ;;  %v2552_v25 = vsel %vm15388_vm2, %v2547_v7, %v2551_v57  ;;  %v2557_v27 = vshll.u32 %v11589_v45, 16  ;;  %v2563_v29 = vshll.u32 %v15747_v59, 16  ;;  %v15219_v57 = vld [vmem:[%s15363_s14] sm:$0xf] }
  0x98   : > { %v11606_v33 = vcombine.low %v2542_v23, %v2552_v25  ;;  %v665_v34 = vrot.slane %v664_v16, 4  ;;  %v674_v37 = vor.u32 %v673_v17, %v669_v9  ;;  %v679_v38 = vrot.slane %v677_v21, 5  ;;  %v11618_v25 = vld [vmem:[%s15363_s14 + $0x24] sm:$0xe] }
  0x99   : > { %v2556_v42 = vrot.slane %v2554_v22, 4  ;;  %v2559_v43 = vrot.slane %v2557_v27, 5  ;;  %v2565_v44 = vrot.slane %v2563_v29, 5  ;;  %v2567_v47 = vshrl.u32 %v15747_v59, 16 }
  0x9a   : > { %12993 = vmatprep.mubr.bf16.mxu0 %v11606_v33  ;;  %v670_v41 = vsel %vm15388_vm2, %v665_v34, %v669_v9  ;;  %v675_v45 = vrot.slane %v674_v37, 4  ;;  %v2573_v49 = vshll.u32 %v15753_v10, 16  ;;  %v11424_v60 = vcombine.low %v15219_v57, %v15770_v58 }
  0x9b   : > { %v2560_v51 = vor.u32 %v2559_v43, %v2556_v42  ;;  %v2569_v54 = vrot.slane %v2567_v47, 4  ;;  %v19067_v62 = vmov 0  ;;  %v11632_v0 = vrot.slane %v11616_v39, 9  ;;  %v15224_v43 = vld [vmem:[%s15363_s14 + $0xc] sm:$0xf] }
  0x9c   : > { %v680_v55 = vsel %vm15388_vm2, %v675_v45, %v679_v38  ;;  %v19068_v62 = vsel %vm15773_vm5, 4294967295, %v19067_v62  ;;  %v2964_v3 = vrot.slane %v15221_v2, 5  ;;  %v2575_v16 = vrot.slane %v2573_v49, 5  ;;  %v11619_v47 = vld [vmem:[%s15363_s14 + $0x30] sm:$0xe] }
  0x9d   : > { %19069 = vst [vmem:[#allocation3_spill] sm:$0xff] %v19068_v62  ;;  %v11415_v6 = vcombine.low %v670_v41, %v680_v55  ;;  %v2561_v7 = vrot.slane %v2560_v51, 4  ;;  %v2570_v9 = vor.u32 %v2569_v54, %v2565_v44  ;;  %v11633_v22 = vrot.slane %v11617_v50, 9  ;;  %v11620_v41 = vld [vmem:[%s15363_s14 + $0x3c] sm:$0xe] }
  0x9e   : > { %v2965_v17 = vsel %vm15773_vm5, %v11632_v0, %v2964_v3  ;;  %v2966_v21 = vrot.slane %v2964_v3, 4  ;;  %v15785_v23 = vsel %vm15773_vm5, %v15440_v36, %v2974_v31  ;;  %v15222_v36 = vld [vmem:[%s15363_s14 + $0x28] sm:$0xf]  ;;  %v11634_v38 = vrot.slane %v11618_v25, 9  ;;  %v15226_v45 = vld [vmem:[%s15363_s14 + $0x18] sm:$0xf] }
  0x9f   : > { %12802 = vmatmul.mubr.bf16.gmra.mrb[28].mxu1 %v11415_v6  ;;  %v2566_v27 = vsel %vm15388_vm2, %v2561_v7, %v2565_v44  ;;  %v2571_v29 = vrot.slane %v2570_v9, 4  ;;  %v2972_v31 = vsel %vm15773_vm5, %v11633_v22, %v2971_v26  ;;  %v2978_v33 = vrot.slane %v15222_v36, 5  ;;  %v15805_v44 = vld [vmem:[%s15363_s14 + $0x10] sm:$0xf]  ;;  %v15812_v49 = vld [vmem:[%s15363_s14 + $0x1c] sm:$0xf] }
  0xa0   : > { %12821 = vmatprep.mubr.bf16.mxu1 %v11424_v60  ;;  %v2968_v8 = vsel %vm15773_vm5, %v2966_v21, %v2967_v1  ;;  %v11649_v24 = vcombine.low %v2972_v31, %v15785_v23  ;;  %v2981_v42 = vrot.slane %v15223_v5, 5  ;;  %v11425_v26 = vcombine.low %v15224_v43, %v15805_v44  ;;  %v15228_v51 = vld [vmem:[%s15363_s14 + $0x34] sm:$0xf]  ;;  %v15229_v55 = vld [vmem:[%s15363_s14 + $0x40] sm:$0xf]  ;;  %v14941_v60 = vld [vmem:[%s19006_s2 + $0x88] sm:$0xff]  }
  0xa1   : > { %v2576_v34 = vsel %vm15388_vm2, %v2571_v29, %v2575_v16  ;;  %v11648_v37 = vcombine.low %v2965_v17, %v2968_v8  ;;  %v2980_v1 = vrot.slane %v2978_v33, 4  ;;  %v11426_v50 = vcombine.low %v15226_v45, %v15812_v49  ;;  %v11621_v3 = vld [vmem:[%s15363_s14 + $0x48] sm:$0xe]  ;;  %v15230_v7 = vld [vmem:[%s15363_s14 + $0x38] sm:$0x1]  ;;  %v15233_v29 = vld [vmem:[%s19006_s2 + $0x80] sm:$0xff]  }
  0xa2   : > { %v11607_v39 = vcombine.low %v2566_v27, %v2576_v34  ;;  %v2985_v54 = vrot.slane %v15228_v51, 5  ;;  %v2992_v57 = vrot.slane %v15229_v55, 5  ;;  %v2979_v0 = vsel %vm15773_vm5, %v11634_v38, %v2978_v33  ;;  %v15827_v16 = vld [vmem:[%s15363_s14 + $0x54] sm:$0xe]  ;;  %v15231_v22 = vld [vmem:[%s15363_s14 + $0x44] sm:$0x1] }
  0xa3   : > { %v2982_v2 = vsel %vm15773_vm5, %v2980_v1, %v2981_v42  ;;  %v11635_v6 = vrot.slane %v11619_v47, 9  ;;  %v2988_v9 = vrot.slane %v15230_v7, 5  ;;  %v11636_v21 = vrot.slane %v11620_v41, 9  ;;  %v15232_v25 = vld [vmem:[%s15363_s14 + $0x4c] sm:$0xf] }
  0xa4   : > { %12994 = vmatmul.mubr.bf16.gmra.mrb[28].mxu0 %v11607_v39  ;;  %v2987_v17 = vrot.slane %v2985_v54, 4  ;;  %v2995_v23 = vrot.slane %v15231_v22, 5  ;;  %v2999_v27 = vrot.slane %v15232_v25, 5  ;;  %v11650_v8 = vcombine.low %v2979_v0, %v2982_v2  ;;  %v15234_v36 = vld [vmem:[%s15363_s14 + $0x58] sm:$0xf]  ;;  %v14930_v34 = vld [vmem:[%s19006_s2 + $0x188] sm:$0xff]  }
  0xa5   : > { %13013 = vmatprep.mubr.bf16.mxu0 %v11648_v37  ;;  %v2994_v31 = vrot.slane %v2992_v57, 4  ;;  %v3006_v33 = vrot.slane %v15234_v36, 5  ;;  %v14944_v37 = vld [vmem:[%s19006_s2 + $0x90] sm:$0xff]   ;;  %v15235_v38 = vld [vmem:[%s15363_s14 + $0x24] sm:$0xf]  ;;  %v15848_v5 = vsel %vm15773_vm5, %v11635_v6, %v2985_v54  ;;  %v11637_v47 = vrot.slane %v11621_v3, 9 }
  0xa6   : > { %v15843_v39 = vld [vmem:[%s15363_s14 + $0x28] sm:$0xf]  ;;  %v15237_v42 = vld [vmem:[%s15363_s14 + $0x30] sm:$0xf]  ;;  %v15852_v43 = vld [vmem:[%s15363_s14 + $0x34] sm:$0xf]  ;;  %v2989_v41 = vsel %vm15773_vm5, %v2987_v17, %v2988_v9  ;;  %v2993_v2 = vsel %vm15773_vm5, %v11636_v21, %v2992_v57 }
  0xa7   : > { %12822 = vmatmul.mubr.bf16.vlgmr.msra.gmra.mrb[0].mxu1 %v11425_v26  ;;  %v11427_v1 = vcombine.low %v15235_v38, %v15843_v39  ;;  %v11428_v26 = vcombine.low %v15237_v42, %v15852_v43  ;;  %v3001_v45 = vrot.slane %v2999_v27, 4  ;;  %v15861_v54 = vld [vmem:[%s19006_s2 + $0x190] sm:$0xff]   ;;  %v11638_v55 = vrot.slane %v15827_v16, 9  ;;  %v15865_v0 = vld [vmem:[%s15363_s14 + $0x60] sm:$0xe] }
  0xa8   : > { %12825 = vmatprep.mubr.bf16.mxu1 %v11426_v50  ;;  %12854 = vmatpush3.bf16.msra.mxu1 %v15233_v29  ;;  %v15239_v50 = vld [vmem:[%s15363_s14 + $0x50] sm:$0x1]  ;;  %v2996_v3 = vsel %vm15773_vm5, %v2994_v31, %v2995_v23  ;;  %v3008_v6 = vrot.slane %v3006_v33, 4  ;;  %v11627_v7 = vld [vmem:[%s15363_s14 + $0x90] sm:$0xe]  ;;  %v11651_v57 = vcombine.low %v15848_v5, %v2989_v41  ;;  %v15891_v29 = vsel %vm15773_vm5, %v11637_v47, %v2999_v27  ;;  %v14936_v27 = vld [vmem:[%s19006_s2 + $0x198] sm:$0xff]  }
  0xa9   : > { %12855 = vmatprep.subr.bf16.mxu1 %v14941_v60  ;;  %v3002_v51 = vrot.slane %v15239_v50, 5  ;;  %v15241_v9 = vld [vmem:[%s15363_s14 + $0x5c] sm:$0x1]  ;;  %v15880_v17 = vld [vmem:[%s15363_s14 + $0x64] sm:$0xf]  ;;  %v15907_v42 = vsel %vm15773_vm5, %v11638_v55, %v3006_v33  ;;  %v11643_v50 = vrot.slane %v11627_v7, 9 }
  0xaa   : > { %v3009_v16 = vrot.slane %v15241_v9, 5  ;;  %v19009_v22 = vrot.slane %v15880_v17, 5  ;;  %v15243_v21 = vld [vmem:[%s15363_s14 + $0x3c] sm:$0xf]  ;;  %v15886_v23 = vld [vmem:[%s15363_s14 + $0x40] sm:$0xf] }
  0xab   : > { %v11429_v25 = vcombine.low %v15243_v21, %v15886_v23  ;;  %v15895_v31 = vld [vmem:[%s15363_s14 + $0x4c] sm:$0xf]  ;;  %v15903_v5 = vsel %vm15773_vm5, %v3001_v45, %v3002_v51  ;;  %v11628_v47 = vld [vmem:[%s15363_s14 + $0x9c] sm:$0xe]  ;;  %v15918_v45 = vld [vmem:[%s15363_s14 + $0x68] sm:$0x1] }
  0xac   : > { %13014 = vmatmul.mubr.bf16.vlgmr.msra.gmra.mrb[0].mxu0 %v11649_v24  ;;  %12856 = vmatpush3.bf16.msra.mxu1 %v14941_v60  ;;  %v15240_v24 = vld [vmem:[%s19006_s2 + $0x180] sm:$0xff]   ;;  %v14946_v60 = vld [vmem:[%s19006_s2 + $0x98] sm:$0xff]   ;;  %v15899_v38 = vld [vmem:[%s15363_s14 + $0x6c] sm:$0xe]  ;;  %v3041_v51 = vrot.slane %v15632_v20, 5  ;;  %v15938_v20 = vrot.slane %v19009_v22, 4 }
  0xad   : > { %13046 = vmatpush3.bf16.msra.mxu0 %v15240_v24  ;;  %13017 = vmatprep.mubr.bf16.mxu0 %v11650_v8  ;;  %v15245_v8 = vld [vmem:[%s15363_s14 + $0x48] sm:$0xf]  ;;  %v15932_v24 = vld [vmem:[%s15363_s14 + $0x58] sm:$0xf]  ;;  %v11630_v7 = vld [vmem:[%s15363_s14 + $0xb4] sm:$0xe] }
  0xae   : > { %13047 = vmatprep.subr.bf16.mxu0 %v14930_v34  ;;  %12857 = vmatprep.subr.bf16.mxu1 %v14944_v37  ;;  %v11430_v36 = vcombine.low %v15245_v8, %v15895_v31  ;;  %v11629_v55 = vld [vmem:[%s15363_s14 + $0xa8] sm:$0xe]  ;;  %v3044_v21 = vrot.slane %v15637_v40, 5  ;;  %v15957_v33 = vld [vmem:[%s15363_s14 + $0x64] sm:$0xf]  ;;  %v3048_v41 = vrot.slane %v15663_v13, 5 }
  0xaf   : > { %12826 = vmatmul.mubr.bf16.gmra.mrb[4].mxu1 %v11427_v1  ;;  %v11652_v1 = vcombine.low %v2993_v2, %v2996_v3  ;;  %v14951_v8 = vld [vmem:[%s19006_s2 + $0xa8] sm:$0xff]   ;;  %v11653_v2 = vcombine.low %v15891_v29, %v15903_v5  ;;  %v15954_v3 = vld [vmem:[%s15363_s14 + $0x60] sm:$0xf]  ;;  %v15252_v5 = vld [vmem:[%s15363_s14 + $0x74] sm:$0x1]  ;;  %v3051_v9 = vrot.slane %v15666_v18, 5 }
  0xb0   : > { %12829 = vmatprep.mubr.bf16.mxu1 %v11428_v26  ;;  %12858 = vmatpush3.bf16.msra.mxu1 %v14944_v37  ;;  %v14949_v26 = vld [vmem:[%s19006_s2 + $0xa0] sm:$0xff]   ;;  %v15926_v37 = vsel %vm15773_vm5, %v3008_v6, %v3009_v16  ;;  %v15945_v6 = vsel %vm15773_vm5, %v11643_v50, %v3041_v51  ;;  %v3043_v16 = vrot.slane %v3041_v51, 4  ;;  %v11644_v51 = vrot.slane %v11628_v47, 9  ;;  %v16433_v62 = vld [vmem:[%s15363_s14 + $0x4c] sm:$0xf] }
  0xb1   : > { %13048 = vmatpush3.bf16.msra.mxu0 %v14930_v34  ;;  %12859 = vmatprep.subr.bf16.mxu1 %v14946_v60  ;;  %v15929_v34 = vld [vmem:[%s15363_s14 + $0x54] sm:$0xf]  ;;  %v14940_v40 = vld [vmem:[%s19006_s2 + $0x1a0] sm:$0xff]   ;;  %v11654_v29 = vcombine.low %v15907_v42, %v15926_v37  ;;  %v3023_v22 = vrot.slane %v15252_v5, 5  ;;  %v11645_v42 = vrot.slane %v11629_v55, 9  ;;  %v3027_v47 = vrot.slane %v15595_v61, 5 }
  0xb2   : > { %13049 = vmatprep.subr.bf16.mxu0 %v15861_v54  ;;  %v15972_v50 = vsel %vm15773_vm5, %v3043_v16, %v3044_v21  ;;  %v3055_v37 = vrot.slane %v15691_v63, 5  ;;  %v3058_v18 = vrot.slane %v15695_v12, 5  ;;  %v11646_v16 = vrot.slane %v11630_v7, 9  ;;  %v14945_v63 = vld [vmem:[%s19006_s2 + $0x1a8] sm:$0xff]   ;;  %19094 = vst [vmem:[#allocation12_spill] sm:$0xff] %v16433_v62 }
  0xb3   : > { %v19070_v21 = vrot.slane %v15577_v19, 5  ;;  %v3069_v7 = vrot.slane %v15747_v59, 5 }
  0xb4   : > { %13018 = vmatmul.mubr.bf16.gmra.mrb[4].mxu0 %v11651_v57  ;;  %12860 = vmatpush3.bf16.msra.mxu1 %v14946_v60  ;;  %v11631_v57 = vld [vmem:[%s15363_s14 + $0xc0] sm:$0xe]  ;;  %v15976_v60 = vld [vmem:[%s15363_s14 + $0x78] sm:$0xe]  ;;  %v3057_v55 = vrot.slane %v3055_v37, 4 }
  0xb5   : > { %13021 = vmatprep.mubr.bf16.mxu0 %v11652_v1  ;;  %13050 = vmatpush3.bf16.msra.mxu0 %v15861_v54  ;;  %v15982_v54 = vsel %vm15773_vm5, %v11644_v51, %v3048_v41  ;;  %v3050_v1 = vrot.slane %v3048_v41, 4  ;;  %v3022_v5 = vrot.slane %v19070_v21, 4  ;;  %v3062_v41 = vrot.slane %v15718_v56, 5 }
  0xb6   : > { %13051 = vmatprep.subr.bf16.mxu0 %v14936_v27  ;;  %12861 = vmatprep.subr.bf16.mxu1 %v14949_v26  ;;  %v19071_v51 = vrot.slane %v15880_v17, 5  ;;  %v16024_v21 = vsel %vm15773_vm5, %v3057_v55, %v3058_v18  ;;  %v3071_v17 = vrot.slane %v3069_v7, 4  ;;  %v19074_v18 = vrot.slane %v15577_v19, 5 }
  0xb7   : > { %12830 = vmatmul.mubr.bf16.gmra.mrb[8].mxu1 %v11429_v25  ;;  %v15991_v13 = vsel %vm15773_vm5, %v3050_v1, %v3051_v9  ;;  %v3065_v25 = vrot.slane %v15724_v4, 5  ;;  %v16006_v56 = vsel %vm15773_vm5, %v11646_v16, %v3062_v41  ;;  %v3064_v4 = vrot.slane %v3062_v41, 4 }
  0xb8   : > { %12833 = vmatprep.mubr.bf16.mxu1 %v11430_v36  ;;  %12862 = vmatpush3.bf16.msra.mxu1 %v14949_v26  ;;  %v11660_v12 = vcombine.low %v15982_v54, %v15991_v13  ;;  %v16002_v36 = vsel %vm15773_vm5, %v11645_v42, %v3055_v37  ;;  %v11647_v26 = vrot.slane %v11631_v57, 9  ;;  %v3072_v9 = vrot.slane %v15753_v10, 5  ;;  %v11626_v37 = vld [vmem:[%s15363_s14 + $0x84] sm:$0xe]  ;;  %v14950_v10 = vld [vmem:[%s19006_s2 + $0x1b0] sm:$0xff]  }
  0xb9   : > { %13052 = vmatpush3.bf16.msra.mxu0 %v14936_v27  ;;  %12863 = vmatprep.subr.bf16.mxu1 %v14951_v8  ;;  %v14954_v27 = vld [vmem:[%s19006_s2 + $0xb0] sm:$0xff]   ;;  %v19072_v1 = vrot.slane %v15865_v0, 9  ;;  %v11641_v42 = vrot.slane %v15976_v60, 9  ;;  %v3034_v16 = vrot.slane %v15613_v48, 5  ;;  %v16033_v0 = vsel %vm15773_vm5, %v3064_v4, %v3065_v25  ;;  %v15253_v25 = vld [vmem:[%s15363_s14 + $0x80] sm:$0x1] }
  0xba   : > { %13053 = vmatprep.subr.bf16.mxu0 %v14940_v40  ;;  %v16037_v48 = vsel %vm15773_vm5, %v11647_v26, %v3069_v7  ;;  %v3030_v55 = vrot.slane %v15253_v25, 5  ;;  %v3029_v19 = vrot.slane %v3027_v47, 4  ;;  %v19076_v4 = vcombine.low %v15929_v34, %v15932_v24  ;;  %v15257_v25 = vld [vmem:[%s15363_s14 + $0x14] sm:$0x1] }
  0xbb   : > { %v3014_v57 = vsel %vm15773_vm5, %v19072_v1, %v19071_v51  ;;  %v3036_v7 = vrot.slane %v3034_v16, 4  ;;  %v1328_v51 = vrot.slane %v15770_v58, 5  ;;  %v15255_v58 = vld [vmem:[%s15363_s14 + $0x6c] sm:$0xf] }
  0xbc   : > { %13022 = vmatmul.mubr.bf16.gmra.mrb[8].mxu0 %v11653_v2  ;;  %12864 = vmatpush3.bf16.msra.mxu1 %v14951_v8  ;;  %v19073_v2 = vrot.slane %v15918_v45, 5  ;;  %v19075_v8 = vrot.slane %v15899_v38, 9  ;;  %v14956_v45 = vld [vmem:[%s19006_s2 + $0xb8] sm:$0xff]   ;;  %v11642_v38 = vrot.slane %v11626_v37, 9  ;;  %v15254_v37 = vld [vmem:[%s15363_s14 + $0x8] sm:$0x1] }
  0xbd   : > { %13025 = vmatprep.mubr.bf16.mxu0 %v11654_v29  ;;  %13054 = vmatpush3.bf16.msra.mxu0 %v14940_v40  ;;  %v16062_v40 = vsel %vm15773_vm5, %v3071_v17, %v3072_v9  ;;  %v1275_v29 = vld [vmem:[%s15363_s14] sm:$0xe]  ;;  %v19077_v9 = vcombine.low %v15954_v3, %v15957_v33  ;;  %v1331_v34 = vrot.slane %v15254_v37, 5 }
  0xbe   : > { %v3017_v60 = vsel %vm15773_vm5, %v15938_v20, %v19073_v2  ;;  %v3021_v41 = vsel %vm15773_vm5, %v19075_v8, %v19074_v18  ;;  %v3024_v20 = vsel %vm15773_vm5, %v3022_v5, %v3023_v22  ;;  %13055 = vmatprep.subr.bf16.mxu0 %v14945_v63  ;;  %12865 = vmatprep.subr.bf16.mxu1 %v14954_v27  ;;  %v3037_v22 = vrot.slane %v15618_v53, 5  ;;  %v14955_v2 = vld [vmem:[%s19006_s2 + $0x1b8] sm:$0xff]   ;;  %v1276_v53 = vld [vmem:[%s15363_s14 + $0xc] sm:$0xe]  ;;  %v16095_v8 = vld [vmem:[%s19006_s2 + $0xc0] sm:$0xff]  }
  0xbf   : > { %12834 = vmatmul.mubr.bf16.gmra.mrb[12].mxu1 %v19076_v4  ;;  %v11655_v1 = vcombine.low %v3014_v57, %v3017_v60  ;;  %v11656_v17 = vcombine.low %v3021_v41, %v3024_v20  ;;  %v1277_v18 = vld [vmem:[%s15363_s14 + $0x18] sm:$0xe]  ;;  %v16083_v57 = vld [vmem:[%s15363_s14 + $0x70] sm:$0xf]  ;;  %v11448_v60 = vrot.slane %v1275_v29, 9  ;;  %v16099_v41 = vsel %vm15773_vm5, %v11642_v38, %v3034_v16  ;;  %v16126_v37 = vld [vmem:[%s19006_s2 + $0x1c0] sm:$0xff]  }
  0xc0   : > { %12837 = vmatprep.mubr.bf16.mxu1 %v19077_v9  ;;  %12866 = vmatpush3.bf16.msra.mxu1 %v14954_v27  ;;  %v11433_v3 = vcombine.low %v15255_v58, %v16083_v57  ;;  %v3031_v27 = vsel %vm15773_vm5, %v3029_v19, %v3030_v55  ;;  %v3038_v61 = vsel %vm15773_vm5, %v3036_v7, %v3037_v22  ;;  %v1338_v55 = vrot.slane %v15257_v25, 5  ;;  %v15258_v20 = vld [vmem:[%s15363_s14 + $0x78] sm:$0xf]  ;;  %v16107_v19 = vld [vmem:[%s15363_s14 + $0x7c] sm:$0xf] }
  0xc1   : > { %13056 = vmatpush3.bf16.msra.mxu0 %v14945_v63  ;;  %12867 = vmatprep.subr.bf16.mxu1 %v14956_v45  ;;  %v3028_v63 = vsel %vm15773_vm5, %v11641_v42, %v3027_v47  ;;  %v1330_v47 = vrot.slane %v1328_v51, 4  ;;  %v1335_v42 = vrot.slane %v15805_v44, 5  ;;  %v11434_v29 = vcombine.low %v15258_v20, %v16107_v19  ;;  %v16111_v4 = vld [vmem:[%s15363_s14 + $0x84] sm:$0xf]  ;;  %v16114_v16 = vld [vmem:[%s15363_s14 + $0x88] sm:$0xf] }
  0xc2   : > { %13057 = vmatprep.subr.bf16.mxu0 %v14950_v10  ;;  %v11435_v38 = vcombine.low %v16111_v4, %v16114_v16  ;;  %v11449_v7 = vrot.slane %v1276_v53, 9  ;;  %v1342_v44 = vrot.slane %v15812_v49, 5  ;;  %v1278_v22 = vld [vmem:[%s15363_s14 + $0x24] sm:$0xe]  ;;  %v11658_v9 = vcombine.low %v16099_v41, %v3038_v61  ;;  %v1282_v4 = vld [vmem:[%s15363_s14 + $0x54] sm:$0xe] }
  0xc3   : > { %v11437_v49 = vcombine.low %v15671_v11, %v15674_v32  ;;  %v11438_v53 = vcombine.low %v15698_v14, %v15704_v28  ;;  %v1349_v58 = vrot.slane %v15843_v39, 5  ;;  %v1363_v61 = vrot.slane %v15886_v23, 5  ;;  %v15263_v23 = vld [vmem:[%s15363_s14 + $0x2c] sm:$0x1] }
  0xc4   : > { %13026 = vmatmul.mubr.bf16.gmra.mrb[12].mxu0 %v11655_v1  ;;  %12868 = vmatpush3.bf16.msra.mxu1 %v14956_v45  ;;  %v11657_v1 = vcombine.low %v3028_v63, %v3031_v27  ;;  %v11436_v45 = vcombine.low %v15645_v46, %v15648_v52  ;;  %v16137_v46 = vsel %vm15773_vm5, %v1330_v47, %v1331_v34  ;;  %v1337_v52 = vrot.slane %v1335_v42, 4  ;;  %v1280_v63 = vld [vmem:[%s15363_s14 + $0x3c] sm:$0xe]  ;;  %v1281_v47 = vld [vmem:[%s15363_s14 + $0x48] sm:$0xe] }
  0xc5   : > { %13029 = vmatprep.mubr.bf16.mxu0 %v11656_v17  ;;  %13058 = vmatpush3.bf16.msra.mxu0 %v14950_v10  ;;  %v11450_v17 = vrot.slane %v1277_v18, 9  ;;  %v16133_v10 = vsel %vm15773_vm5, %v11448_v60, %v1328_v51  ;;  %v1356_v51 = vrot.slane %v15852_v43, 5  ;;  %v16149_v34 = vsel %vm15773_vm5, %v11449_v7, %v1335_v42  ;;  %v15262_v60 = vld [vmem:[%s15363_s14 + $0x20] sm:$0x1] }
  0xc6   : > { %13059 = vmatprep.subr.bf16.mxu0 %v14955_v2  ;;  %12901 = vmatprep.subr.bf16.mxu1 %v16095_v8  ;;  %v1344_v27 = vrot.slane %v1342_v44, 4  ;;  %v1345_v41 = vrot.slane %v15262_v60, 5  ;;  %v1370_v42 = vrot.slane %v15895_v31, 5  ;;  %v16164_v25 = vsel %vm15773_vm5, %v1337_v52, %v1338_v55  ;;  %v1283_v31 = vld [vmem:[%s15363_s14 + $0x60] sm:$0xe] }
  0xc7   : > { %12838 = vmatmul.mubr.bf16.gmra.mrb[16].mxu1 %v11433_v3  ;;  %v1279_v3 = vld [vmem:[%s15363_s14 + $0x30] sm:$0xe]  ;;  %v16159_v43 = vsel %vm15773_vm5, %v11450_v17, %v1342_v44  ;;  %v1352_v20 = vrot.slane %v15263_v23, 5  ;;  %v1377_v7 = vrot.slane %v15932_v24, 5  ;;  %v1351_v60 = vrot.slane %v1349_v58, 4 }
  0xc8   : > { %12841 = vmatprep.mubr.bf16.mxu1 %v11434_v29  ;;  %v11452_v29 = vrot.slane %v1279_v3, 9  ;;  %v1358_v44 = vrot.slane %v1356_v51, 4  ;;  %v15264_v17 = vld [vmem:[%s15363_s14 + $0x38] sm:$0x1]  ;;  %v11453_v5 = vrot.slane %v1280_v63, 9  ;;  %v1365_v39 = vrot.slane %v1363_v61, 4 }
  0xc9   : > { %13060 = vmatpush3.bf16.msra.mxu0 %v14955_v2  ;;  %v11451_v2 = vrot.slane %v1278_v22, 9  ;;  %v1359_v22 = vrot.slane %v15264_v17, 5  ;;  %v15265_v55 = vld [vmem:[%s15363_s14 + $0x44] sm:$0x1]  ;;  %v11454_v18 = vrot.slane %v1281_v47, 9  ;;  %v16176_v59 = vsel %vm15773_vm5, %v1344_v27, %v1345_v41 }
  0xca   : > { %13093 = vmatprep.subr.bf16.mxu0 %v16126_v37  ;;  %v1366_v52 = vrot.slane %v15265_v55, 5  ;;  %v15266_v23 = vld [vmem:[%s15363_s14 + $0x50] sm:$0x1]  ;;  %v1284_v3 = vld [vmem:[%s15363_s14 + $0x6c] sm:$0xe]  ;;  %v11455_v63 = vrot.slane %v1282_v4, 9  ;;  %v16187_v27 = vsel %vm15773_vm5, %v1351_v60, %v1352_v20  ;;  %v16199_v41 = vsel %vm15773_vm5, %v11453_v5, %v1363_v61 }
  0xcb   : > { %v1373_v26 = vrot.slane %v15266_v23, 5  ;;  %v16180_v24 = vsel %vm15773_vm5, %v11451_v2, %v1349_v58  ;;  %v15267_v17 = vld [vmem:[%s15363_s14 + $0x5c] sm:$0x1]  ;;  %v1384_v47 = vrot.slane %v15957_v33, 5  ;;  %v1391_v23 = vrot.slane %v16083_v57, 5 }
  0xcc   : > { %13030 = vmatmul.mubr.bf16.gmra.mrb[16].mxu0 %v11657_v1  ;;  %v1372_v1 = vrot.slane %v1370_v42, 4  ;;  %v1380_v55 = vrot.slane %v15267_v17, 5  ;;  %v16191_v58 = vsel %vm15773_vm5, %v11452_v29, %v1356_v51  ;;  %v16203_v33 = vsel %vm15773_vm5, %v1365_v39, %v1366_v52  ;;  %v1285_v51 = vld [vmem:[%s15363_s14 + $0x78] sm:$0xe]  ;;  %v15268_v61 = vld [vmem:[%s15363_s14 + $0x68] sm:$0x1] }
  0xcd   : > { %13033 = vmatprep.mubr.bf16.mxu0 %v11658_v9  ;;  %v1379_v9 = vrot.slane %v1377_v7, 4  ;;  %v16207_v57 = vsel %vm15773_vm5, %v11454_v18, %v1370_v42  ;;  %v1398_v2 = vrot.slane %v16107_v19, 5  ;;  %v16217_v5 = vsel %vm15773_vm5, %v11455_v63, %v1377_v7  ;;  %v15269_v60 = vld [vmem:[%s15363_s14 + $0x74] sm:$0x1]  ;;  %v11728_v17 = vld [vmem:[%s15363_s14 + $0x18] sm:$0xf] }
  0xce   : > { %v16213_v20 = vsel %vm15773_vm5, %v1372_v1, %v1373_v26  ;;  %v1387_v39 = vrot.slane %v15268_v61, 5  ;;  %v11457_v29 = vrot.slane %v1284_v3, 9  ;;  %v1386_v42 = vrot.slane %v1384_v47, 4  ;;  %v15270_v1 = vld [vmem:[%s15363_s14 + $0x80] sm:$0x1] }
  0xcf   : > { %12842 = vmatmul.mubr.bf16.gmra.mrb[20].mxu1 %v11435_v38  ;;  %v16195_v38 = vsel %vm15773_vm5, %v1358_v44, %v1359_v22  ;;  %v16222_v18 = vsel %vm15773_vm5, %v1379_v9, %v1380_v55  ;;  %v1393_v4 = vrot.slane %v1391_v23, 4  ;;  %v1394_v19 = vrot.slane %v15269_v60, 5  ;;  %v16271_v60 = vld [vmem:[%s15363_s14 + $0x1c] sm:$0xf] }
  0xd0   : > { %12845 = vmatprep.mubr.bf16.mxu1 %v11436_v45  ;;  %v11456_v45 = vrot.slane %v1283_v31, 9  ;;  %v19078_v26 = vcombine.low %v15945_v6, %v15972_v50  ;;  %v11458_v22 = vrot.slane %v1285_v51, 9  ;;  %v1286_v31 = vld [vmem:[%s15363_s14 + $0x84] sm:$0xe]  ;;  %v1405_v52 = vrot.slane %v16114_v16, 5  ;;  %19079 = vst [vmem:[#allocation4_spill] sm:$0xff] %v16271_v60 }
  0xd1   : > { %v1400_v3 = vrot.slane %v1398_v2, 4  ;;  %v1401_v63 = vrot.slane %v15270_v1, 5  ;;  %v16259_v55 = vsel %vm15773_vm5, %v1386_v42, %v1387_v39  ;;  %v16263_v51 = vsel %vm15773_vm5, %v11457_v29, %v1391_v23  ;;  %v15272_v23 = vld [vmem:[%s15363_s14 + $0x8c] sm:$0x1]  ;;  %v1288_v29 = vld [vmem:[%s15363_s14 + $0x9c] sm:$0xe] }
  0xd2   : > { %v16250_v54 = vsel %vm15773_vm5, %v11456_v45, %v1384_v47  ;;  %v16267_v61 = vsel %vm15773_vm5, %v1393_v4, %v1394_v19  ;;  %v15271_v47 = vld [vmem:[%s15363_s14 + $0x94] sm:$0xf]  ;;  %v16278_v11 = vsel %vm15773_vm5, %v11458_v22, %v1398_v2  ;;  %v11459_v32 = vrot.slane %v1286_v31, 9  ;;  %v1289_v19 = vld [vmem:[%s15363_s14 + $0xa8] sm:$0xe] }
  0xd3   : > { %v1412_v45 = vrot.slane %v15271_v47, 5  ;;  %v1408_v39 = vrot.slane %v15272_v23, 5  ;;  %v16284_v42 = vsel %vm15773_vm5, %v1400_v3, %v1401_v63  ;;  %v3830_v14 = vshrl.u32 %v11728_v17, 16  ;;  %v15273_v3 = vld [vmem:[%s15363_s14 + $0x98] sm:$0x1] }
  0xd4   : > { %13034 = vmatmul.mubr.bf16.gmra.mrb[20].mxu0 %v19078_v26  ;;  %v3833_v28 = vshll.u32 %v11728_v17, 16  ;;  %v3839_v26 = vshll.u32 %v16271_v60, 16  ;;  %v3843_v22 = vshrl.u32 %v16271_v60, 16  ;;  %v1415_v1 = vrot.slane %v15273_v3, 5  ;;  %v15274_v63 = vld [vmem:[%s15363_s14 + $0xa0] sm:$0xf] }
  0xd5   : > { %13037 = vmatprep.mubr.bf16.mxu0 %v11660_v12  ;;  %v1287_v12 = vld [vmem:[%s15363_s14 + $0x90] sm:$0xe]  ;;  %v1414_v31 = vrot.slane %v1412_v45, 4  ;;  %v15275_v17 = vld [vmem:[%s15363_s14 + $0xac] sm:$0xf]  ;;  %v19081_v2 = vcombine.low %v16002_v36, %v16024_v21  ;;  %v16306_v13 = vsel %vm15773_vm5, %v11459_v32, %v1405_v52  ;;  %v19083_v36 = vcombine.low %v16006_v56, %v16033_v0 }
  0xd6   : > { %v11460_v4 = vrot.slane %v1287_v12, 9  ;;  %v1419_v12 = vrot.slane %v15274_v63, 5  ;;  %v1426_v47 = vrot.slane %v15275_v17, 5  ;;  %v16297_v23 = vld [vmem:[%s15363_s14 + $0x20] sm:$0x1]  ;;  %v11461_v63 = vrot.slane %v1288_v29, 9 }
  0xd7   : > { %12846 = vmatmul.mubr.bf16.gmra.mrb[24].mxu1 %v11437_v49  ;;  %v1407_v49 = vrot.slane %v1405_v52, 4  ;;  %19080 = vst [vmem:[#allocation5_spill] sm:$0xff] %v16297_v23  ;;  %v11731_v17 = vld [vmem:[%s15363_s14 + $0x24] sm:$0xf]  ;;  %v16314_v16 = vld [vmem:[%s15363_s14 + $0x28] sm:$0xf]  ;;  %v19084_v56 = vcombine.low %v15729_v15, %v15736_v30 }
  0xd8   : > { %12849 = vmatprep.mubr.bf16.mxu1 %v11438_v53  ;;  %19082 = vst [vmem:[#allocation6_spill] sm:$0xff] %v16314_v16  ;;  %v16321_v21 = vsel %vm15773_vm5, %v11460_v4, %v1412_v45  ;;  %v3832_v32 = vrot.slane %v3830_v14, 4  ;;  %v3835_v53 = vrot.slane %v3833_v28, 5  ;;  %v11462_v9 = vrot.slane %v1289_v19, 9  ;;  %v1290_v29 = vld [vmem:[%s15363_s14 + $0xb4] sm:$0xe] }
  0xd9   : > { %v16310_v3 = vsel %vm15773_vm5, %v1407_v49, %v1408_v39  ;;  %v15277_v49 = vld [vmem:[%s15363_s14 + $0xb0] sm:$0x1]  ;;  %v16326_v50 = vrot.slane %v3839_v26, 5  ;;  %v3845_v6 = vrot.slane %v3843_v22, 4  ;;  %v16335_v45 = vsel %vm15773_vm5, %v1414_v31, %v1415_v1 }
  0xda   : > { %v1429_v39 = vrot.slane %v15277_v49, 5  ;;  %v1421_v4 = vrot.slane %v1419_v12, 4  ;;  %v1428_v14 = vrot.slane %v1426_v47, 4  ;;  %v11734_v28 = vld [vmem:[%s15363_s14 + $0x30] sm:$0xf]  ;;  %v19085_v19 = vcombine.low %v16133_v10, %v16137_v46 }
  0xdb   : > { %v1433_v26 = vrot.slane %v15736_v30, 5  ;;  %v3849_v15 = vshll.u32 %v16297_v23, 16  ;;  %v3854_v22 = vshrl.u32 %v11731_v17, 16  ;;  %v16346_v31 = vsel %vm15773_vm5, %v11461_v63, %v1419_v12  ;;  %v16356_v46 = vld [vmem:[%s15363_s14 + $0x34] sm:$0xf]  ;;  %v14973_v12 = vld [vmem:[%s19006_s2 + $0xc8] sm:$0xff]  }
  0xdc   : > { %13038 = vmatmul.mubr.bf16.gmra.mrb[24].mxu0 %v19081_v2  ;;  %v15276_v2 = vld [vmem:[%s15363_s14 + $0xa4] sm:$0x1]  ;;  %v3836_v1 = vor.u32 %v3835_v53, %v3832_v32  ;;  %v3863_v49 = vshll.u32 %v16314_v16, 16  ;;  %v16352_v10 = vsel %vm15773_vm5, %v11462_v9, %v1426_v47  ;;  %v3846_v30 = vor.u32 %v3845_v6, %v16326_v50  ;;  %v15278_v6 = vld [vmem:[%s15363_s14 + $0xbc] sm:$0x1] }
  0xdd   : > { %13041 = vmatprep.mubr.bf16.mxu0 %v19083_v36  ;;  %v1422_v52 = vrot.slane %v15276_v2, 5  ;;  %v3857_v36 = vshll.u32 %v11731_v17, 16  ;;  %v14957_v2 = vld [vmem:[%s15363_s14 + $0x18] sm:$0xff]   ;;  %v3878_v17 = vshrl.u32 %v11734_v28, 16  ;;  %v16367_v63 = vsel %vm15773_vm5, %v1428_v14, %v1429_v39 }
  0xde   : > { %v11463_v9 = vrot.slane %v1290_v29, 9  ;;  %v1436_v47 = vrot.slane %v15278_v6, 5  ;;  %v11737_v32 = vld [vmem:[%s15363_s14 + $0x3c] sm:$0xf]  ;;  %v1435_v0 = vrot.slane %v1433_v26, 4  ;;  %v3851_v44 = vrot.slane %v3849_v15, 5 }
  0xdf   : > { %12850 = vmatmul.mubr.bf16.gmra.mrb[28].mxu1 %v19084_v56  ;;  %v3867_v56 = vshrl.u32 %v16314_v16, 16  ;;  %v16363_v53 = vsel %vm15773_vm5, %v1421_v4, %v1422_v52  ;;  %v3856_v7 = vrot.slane %v3854_v22, 4  ;;  %v3859_v52 = vrot.slane %v3857_v36, 5  ;;  %v16375_v16 = vld [vmem:[%s15363_s14 + $0x2c] sm:$0x1]  ;;  %v14958_v36 = vld [vmem:[%s15363_s14 + $0x24] sm:$0xff]  }
  0xe0   : > { %12869 = vmatprep.mubr.bf16.mxu1 %v19085_v19  ;;  %v3881_v19 = vshll.u32 %v11734_v28, 16  ;;  %v19086_v28 = vcombine.low %v16037_v48, %v16062_v40  ;;  %v3837_v4 = vrot.slane %v3836_v1, 4  ;;  %19087 = vst [vmem:[#allocation7_spill] sm:$0xff] %v16375_v16  ;;  %v16377_v39 = vrot.slane %v3863_v49, 5  ;;  %v16381_v23 = vld [vmem:[%s15363_s14 + $0x38] sm:$0x1] }
  0xe1   : > { %v3869_v29 = vrot.slane %v3867_v56, 4  ;;  %v3887_v14 = vshll.u32 %v16356_v46, 16  ;;  %v3847_v6 = vrot.slane %v3846_v30, 4  ;;  %19088 = vst [vmem:[#allocation8_spill] sm:$0xff] %v16381_v23  ;;  %v3880_v48 = vrot.slane %v3878_v17, 4 }
  0xe2   : > { %v3883_v40 = vrot.slane %v3881_v19, 5  ;;  %v3891_v15 = vshrl.u32 %v16356_v46, 16  ;;  %v19089_v22 = vcombine.low %v16149_v34, %v16164_v25  ;;  %v3902_v56 = vshrl.u32 %v11737_v32, 16  ;;  %v16399_v34 = vld [vmem:[%s19006_s2 + $0x1c8] sm:$0xff]   ;;  %v16430_v1 = vld [vmem:[%s15363_s14 + $0x44] sm:$0x1] }
  0xe3   : > { %v3905_v30 = vshll.u32 %v11737_v32, 16  ;;  %v19090_v17 = vcombine.low %v16159_v43, %v16176_v59  ;;  %v16406_v19 = vsel %vm15773_vm5, %v11463_v9, %v1433_v26  ;;  %v16410_v59 = vsel %vm15773_vm5, %v1435_v0, %v1436_v47  ;;  %v16414_v32 = vld [vmem:[%s15363_s14 + $0x40] sm:$0xf]  ;;  %v11740_v47 = vld [vmem:[%s15363_s14 + $0x48] sm:$0xf]  ;;  %19093 = vst [vmem:[#allocation11_spill] sm:$0xff] %v16430_v1 }
  0xe4   : > { %13042 = vmatmul.mubr.bf16.gmra.mrb[28].mxu0 %v19086_v28  ;;  %19091 = vst [vmem:[#allocation9_spill] sm:$0xff] %v16410_v59  ;;  %v3873_v43 = vshll.u32 %v16375_v16, 16  ;;  %19092 = vst [vmem:[#allocation10_spill] sm:$0xff] %v16414_v32  ;;  %v3842_v26 = vsel %vm15388_vm2, %v3837_v4, %v16326_v50  ;;  %v3860_v9 = vor.u32 %v3859_v52, %v3856_v7  ;;  %v3897_v0 = vshll.u32 %v16381_v23, 16  ;;  %v16440_v4 = vld [vmem:[%s15363_s14 + $0x54] sm:$0xf] }
  0xe5   : > { %13061 = vmatprep.mubr.bf16.mxu0 %v14957_v2  ;;  %v14960_v2 = vld [vmem:[%s15363_s14 + $0x30] sm:$0xff]   ;;  %v3870_v28 = vor.u32 %v3869_v29, %v16377_v39  ;;  %v16427_v25 = vrot.slane %v3887_v14, 5  ;;  %v3893_v49 = vrot.slane %v3891_v15, 4  ;;  %v16435_v16 = vrot.slane %v3902_v56, 4 }
  0xe6   : > { %v3907_v7 = vrot.slane %v3905_v30, 5  ;;  %v3911_v50 = vshll.u32 %v16414_v32, 16  ;;  %v3915_v52 = vshrl.u32 %v16414_v32, 16  ;;  %v16444_v29 = vrot.slane %v3873_v43, 5  ;;  %v14961_v30 = vld [vmem:[%s15363_s14 + $0x3c] sm:$0xff]  }
  0xe7   : > { %12870 = vmatmul.mubr.bf16.vlgmr.msra.gmra.mrb[0].mxu1 %v19089_v22  ;;  %v3852_v22 = vsel %vm15388_vm2, %v3847_v6, %v3851_v44  ;;  %v3926_v14 = vshrl.u32 %v11740_v47, 16  ;;  %v3929_v6 = vshll.u32 %v11740_v47, 16  ;;  %v16459_v56 = vrot.slane %v3897_v0, 5  ;;  %v14963_v47 = vld [vmem:[%s15363_s14 + $0x48] sm:$0xff]   ;;  %v16481_v32 = vld [vmem:[%s15363_s14 + $0x50] sm:$0x1] }
  0xe8   : > { %12873 = vmatprep.mubr.bf16.mxu1 %v19090_v17  ;;  %12902 = vmatpush3.bf16.msra.mxu1 %v16095_v8  ;;  %v14975_v8 = vld [vmem:[%s19006_s2 + $0xd0] sm:$0xff]   ;;  %v3884_v17 = vor.u32 %v3883_v40, %v3880_v48  ;;  %v16447_v48 = vld [vmem:[%s15363_s14 + $0x58] sm:$0xf]  ;;  %v16453_v15 = vcombine.low %v3842_v26, %v3852_v22  ;;  %v3894_v43 = vor.u32 %v3893_v49, %v16427_v25  ;;  %v3935_v26 = vshll.u32 %v16433_v62, 16  ;;  %v16484_v49 = vld [vmem:[%s15363_s14 + $0x64] sm:$0xf] }
  0xe9   : > { %12903 = vmatprep.subr.bf16.mxu1 %v14973_v12  ;;  %19095 = vst [vmem:[#allocation13_spill] sm:$0xff] %v16447_v48  ;;  %v14978_v40 = vld [vmem:[%s19006_s2 + $0xd8] sm:$0xff]   ;;  %v19097_v0 = vcombine.low %v16180_v24, %v16187_v27  ;;  %v3908_v22 = vor.u32 %v3907_v7, %v16435_v16  ;;  %v16477_v44 = vrot.slane %v3911_v50, 5  ;;  %19098 = vst [vmem:[#allocation15_spill] sm:$0xff] %v16481_v32  ;;  %v14980_v27 = vld [vmem:[%s19006_s2 + $0xe0] sm:$0xff]   ;;  %v16495_v16 = vrot.slane %v3926_v14, 4 }
  0xea   : > { %19096 = vst [vmem:[#allocation14_spill] sm:$0xff] %v16453_v15  ;;  %v3917_v15 = vrot.slane %v3915_v52, 4  ;;  %19099 = vst [vmem:[#allocation16_spill] sm:$0xff] %v16484_v49  ;;  %v14968_v24 = vld [vmem:[%s19006_s2 + $0x1d8] sm:$0xff]   ;;  %v3931_v7 = vrot.slane %v3929_v6, 5  ;;  %v3950_v50 = vshrl.u32 %v16440_v4, 16 }
  0xeb   : > { %v3953_v52 = vshll.u32 %v16440_v4, 16  ;;  %v16510_v14 = vrot.slane %v3935_v26, 5  ;;  %v16526_v26 = vld [vmem:[%s19006_s2 + $0x1e0] sm:$0xff]  }
  0xec   : > { %13062 = vmatmul.mubr.bf16.vlgmr.msra.gmra.mrb[0].mxu0 %v14958_v36  ;;  %12904 = vmatpush3.bf16.msra.mxu1 %v14973_v12  ;;  %v16455_v12 = vrot.slane %v3860_v9, 4  ;;  %v16457_v36 = vrot.slane %v3870_v28, 4  ;;  %v3939_v9 = vshrl.u32 %v16433_v62, 16  ;;  %v11746_v28 = vld [vmem:[%s15363_s14 + $0x60] sm:$0xf]  ;;  %v19100_v62 = vcombine.low %v16191_v58, %v16195_v38 }
  0xed   : > { %13094 = vmatpush3.bf16.msra.mxu0 %v16126_v37  ;;  %13065 = vmatprep.mubr.bf16.mxu0 %v14960_v2  ;;  %v14965_v37 = vld [vmem:[%s19006_s2 + $0x1d0] sm:$0xff]   ;;  %v16466_v2 = vrot.slane %v3884_v17, 4  ;;  %v3921_v17 = vshll.u32 %v16430_v1, 16  ;;  %v3959_v38 = vshll.u32 %v16447_v48, 16  ;;  %v3974_v4 = vshrl.u32 %v11746_v28, 16 }
  0xee   : > { %13095 = vmatprep.subr.bf16.mxu0 %v16399_v34  ;;  %12905 = vmatprep.subr.bf16.mxu1 %v14975_v8  ;;  %v3876_v58 = vsel %vm15388_vm2, %v16457_v36, %v16444_v29  ;;  %v3977_v6 = vshll.u32 %v11746_v28, 16  ;;  %v3983_v36 = vshll.u32 %v16484_v49, 16  ;;  %v3932_v28 = vor.u32 %v3931_v7, %v16495_v16 }
  0xef   : > { %12874 = vmatmul.mubr.bf16.gmra.mrb[4].mxu1 %v19097_v0  ;;  %v16519_v29 = vrot.slane %v3921_v17, 5  ;;  %v3987_v0 = vshrl.u32 %v16484_v49, 16  ;;  %v3945_v17 = vshll.u32 %v16481_v32, 16  ;;  %v11749_v49 = vld [vmem:[%s15363_s14 + $0x6c] sm:$0xf]  ;;  %v3955_v1 = vrot.slane %v3953_v52, 5 }
  0xf0   : > { %12877 = vmatprep.mubr.bf16.mxu1 %v19100_v62  ;;  %12906 = vmatpush3.bf16.msra.mxu1 %v14975_v8  ;;  %v3866_v62 = vsel %vm15388_vm2, %v16455_v12, %v16377_v39  ;;  %v3963_v8 = vshrl.u32 %v16447_v48, 16  ;;  %v16515_v39 = vld [vmem:[%s19006_s2 + $0xe8] sm:$0xff]   ;;  %v16517_v12 = vrot.slane %v3894_v43, 4  ;;  %v3918_v43 = vor.u32 %v3917_v15, %v16477_v44  ;;  %v16534_v48 = vld [vmem:[%s15363_s14 + $0x5c] sm:$0x1]  ;;  %v14964_v15 = vld [vmem:[%s15363_s14 + $0x54] sm:$0xff]  }
  0xf1   : > { %13096 = vmatpush3.bf16.msra.mxu0 %v16399_v34  ;;  %12907 = vmatprep.subr.bf16.mxu1 %v14978_v40  ;;  %v3941_v34 = vrot.slane %v3939_v9, 4  ;;  %v16528_v9 = vrot.slane %v3908_v22, 4  ;;  %19101 = vst [vmem:[#allocation17_spill] sm:$0xff] %v16534_v48  ;;  %v16537_v23 = vrot.slane %v3959_v38, 5  ;;  %v16542_v22 = vld [vmem:[%s15363_s14 + $0x70] sm:$0xf]  ;;  %v16545_v16 = vcombine.low %v3866_v62, %v3876_v58 }
  0xf2   : > { %13097 = vmatprep.subr.bf16.mxu0 %v14965_v37  ;;  %19102 = vst [vmem:[#allocation18_spill] sm:$0xff] %v16542_v22  ;;  %v16548_v32 = vrot.slane %v3974_v4, 4  ;;  %v16555_v52 = vld [vmem:[%s15363_s14 + $0x68] sm:$0x1]  ;;  %v16557_v38 = vrot.slane %v3983_v36, 5  ;;  %v3998_v59 = vshrl.u32 %v11749_v49, 16  ;;  %v19107_v58 = vcombine.low %v16207_v57, %v16213_v20 }
  0xf3   : > { %19103 = vst [vmem:[#allocation19_spill] sm:$0xff] %v16545_v16  ;;  %v3942_v7 = vor.u32 %v3941_v34, %v16510_v14  ;;  %19105 = vst [vmem:[#allocation20_spill] sm:$0xff] %v16555_v52  ;;  %v4001_v62 = vshll.u32 %v11749_v49, 16  ;;  %v16572_v34 = vrot.slane %v3918_v43, 4  ;;  %v16574_v4 = vrot.slane %v3945_v17, 5 }
  0xf4   : > { %13066 = vmatmul.mubr.bf16.gmra.mrb[4].mxu0 %v14961_v30  ;;  %12908 = vmatpush3.bf16.msra.mxu1 %v14978_v40  ;;  %v3952_v30 = vrot.slane %v3950_v50, 4  ;;  %v16539_v40 = vrot.slane %v3963_v8, 4  ;;  %v14966_v50 = vld [vmem:[%s15363_s14 + $0x60] sm:$0xff]   ;;  %19106 = vst [vmem:[#allocation21_spill] sm:$0xff] %v16557_v38  ;;  %v16559_v8 = vrot.slane %v3987_v0, 4  ;;  %v4007_v49 = vshll.u32 %v16542_v22, 16 }
  0xf5   : > { %13069 = vmatprep.mubr.bf16.mxu0 %v14963_v47  ;;  %13098 = vmatpush3.bf16.msra.mxu0 %v14965_v37  ;;  %v3979_v47 = vrot.slane %v3977_v6, 5  ;;  %v19104_v37 = vcombine.low %v16199_v41, %v16203_v33  ;;  %v16567_v41 = vld [vmem:[%s19006_s2 + $0x1e8] sm:$0xff]   ;;  %v14985_v33 = vld [vmem:[%s19006_s2 + $0xf0] sm:$0xff]   ;;  %v4011_v57 = vshrl.u32 %v16542_v22, 16  ;;  %v11752_v20 = vld [vmem:[%s15363_s14 + $0x78] sm:$0xf] }
  0xf6   : > { %13099 = vmatprep.subr.bf16.mxu0 %v14968_v24  ;;  %12909 = vmatprep.subr.bf16.mxu1 %v14980_v27  ;;  %v16584_v6 = vrot.slane %v3932_v28, 4  ;;  %v3956_v36 = vor.u32 %v3955_v1, %v3952_v30  ;;  %v3969_v0 = vshll.u32 %v16534_v48, 16  ;;  %v16588_v43 = vld [vmem:[%s15363_s14 + $0x7c] sm:$0xf]  ;;  %v16595_v17 = vrot.slane %v3942_v7, 4 }
  0xf7   : > { %12878 = vmatmul.mubr.bf16.gmra.mrb[8].mxu1 %v19104_v37  ;;  %19108 = vst [vmem:[#allocation22_spill] sm:$0xff] %v16588_v43  ;;  %v3966_v37 = vor.u32 %v16539_v40, %v16537_v23  ;;  %v3993_v28 = vshll.u32 %v16555_v52, 16  ;;  %v14988_v1 = vld [vmem:[%s19006_s2 + $0xf8] sm:$0xff]   ;;  %v3980_v30 = vor.u32 %v3979_v47, %v16548_v32  ;;  %v4003_v7 = vrot.slane %v4001_v62, 5  ;;  %v14982_v40 = vld [vmem:[%s19006_s2 + $0x1f0] sm:$0xff]  }
  0xf8   : > { %12881 = vmatprep.mubr.bf16.mxu1 %v19107_v58  ;;  %12910 = vmatpush3.bf16.msra.mxu1 %v14980_v27  ;;  %v3990_v58 = vor.u32 %v16559_v8, %v16557_v38  ;;  %v16607_v27 = vld [vmem:[%s15363_s14 + $0x74] sm:$0x1]  ;;  %v16613_v16 = vrot.slane %v4007_v49, 5  ;;  %v4013_v22 = vrot.slane %v4011_v57, 4  ;;  %v4022_v32 = vshrl.u32 %v11752_v20, 16  ;;  %v14967_v49 = vld [vmem:[%s15363_s14 + $0x6c] sm:$0xff]  }
  0xf9   : > { %13100 = vmatpush3.bf16.msra.mxu0 %v14968_v24  ;;  %12911 = vmatprep.subr.bf16.mxu1 %v16515_v39  ;;  %19109 = vst [vmem:[#allocation23_spill] sm:$0xff] %v16607_v27  ;;  %v4000_v24 = vrot.slane %v3998_v59, 4  ;;  %v4025_v47 = vshll.u32 %v11752_v20, 16  ;;  %v11755_v8 = vld [vmem:[%s15363_s14 + $0x84] sm:$0xf]  ;;  %v16617_v59 = vrot.slane %v3956_v36, 4 }
  0xfa   : > { %13101 = vmatprep.subr.bf16.mxu0 %v16526_v26  ;;  %19110 = vst [vmem:[#allocation24_spill] sm:$0xff] %v16613_v16  ;;  %v4031_v62 = vshll.u32 %v16588_v43, 16  ;;  %v4035_v52 = vshrl.u32 %v16588_v43, 16  ;;  %v16636_v57 = vrot.slane %v3966_v37, 4  ;;  %v16638_v20 = vrot.slane %v3993_v28, 5  ;;  %v14969_v43 = vld [vmem:[%s15363_s14 + $0x78] sm:$0xff]  }
  0xfb   : > { %v11758_v36 = vld [vmem:[%s15363_s14 + $0x90] sm:$0xf]  ;;  %v16649_v48 = vrot.slane %v3980_v30, 4  ;;  %v4004_v38 = vor.u32 %v4003_v7, %v4000_v24  ;;  %v4017_v37 = vshll.u32 %v16607_v27, 16  ;;  %v16656_v28 = vld [vmem:[%s15363_s14 + $0x94] sm:$0xf]  ;;  %v4014_v24 = vor.u32 %v4013_v22, %v16613_v16 }
  0xfc   : > { %13070 = vmatmul.mubr.bf16.gmra.mrb[8].mxu0 %v14964_v15  ;;  %12912 = vmatpush3.bf16.msra.mxu1 %v16515_v39  ;;  %v16619_v15 = vrot.slane %v3969_v0, 5  ;;  %v16624_v39 = vld [vmem:[%s15363_s14 + $0x88] sm:$0xf]  ;;  %19113 = vst [vmem:[#allocation27_spill] sm:$0xff] %v16636_v57  ;;  %19114 = vst [vmem:[#allocation28_spill] sm:$0xff] %v16638_v20  ;;  %v19115_v0 = vcombine.low %v16217_v5, %v16222_v18  ;;  %v19119_v5 = vcombine.low %v16250_v54, %v16259_v55  ;;  %v14987_v18 = vld [vmem:[%s19006_s2 + $0x1f8] sm:$0xff]  }
  0xfd   : > { %13073 = vmatprep.mubr.bf16.mxu0 %v14966_v50  ;;  %13102 = vmatpush3.bf16.msra.mxu0 %v16526_v26  ;;  %19112 = vst [vmem:[#allocation26_spill] sm:$0xff] %v16624_v39  ;;  %19116 = vst [vmem:[#allocation29_spill] sm:$0xff] %v16649_v48  ;;  %v16653_v50 = vld [vmem:[%s15363_s14 + $0x80] sm:$0x1]  ;;  %v4024_v30 = vrot.slane %v4022_v32, 4  ;;  %v4027_v7 = vrot.slane %v4025_v47, 5 }
  0xfe   : > { %19111 = vst [vmem:[#allocation25_spill] sm:$0xff] %v16619_v15  ;;  %13103 = vmatprep.subr.bf16.mxu0 %v16567_v41  ;;  %12913 = vmatprep.subr.bf16.mxu1 %v14985_v33  ;;  %19117 = vst [vmem:[#allocation30_spill] sm:$0xff] %v16653_v50  ;;  %v11761_v26 = vld [vmem:[%s15363_s14 + $0x9c] sm:$0xf]  ;;  %v16669_v27 = vrot.slane %v4031_v62, 5  ;;  %v4037_v54 = vrot.slane %v4035_v52, 4 }
  0xff   : > { %12882 = vmatmul.mubr.bf16.gmra.mrb[12].mxu1 %v19115_v0  ;;  %19118 = vst [vmem:[#allocation31_spill] sm:$0xff] %v16656_v28  ;;  %v16664_v0 = vrot.slane %v3990_v58, 4  ;;  %v4046_v55 = vshrl.u32 %v11755_v8, 16  ;;  %v4059_v58 = vshrl.u32 %v16624_v39, 16  ;;  %v4073_v20 = vshll.u32 %v11758_v36, 16  ;;  %v14971_v48 = vld [vmem:[%s15363_s14 + $0x84] sm:$0xff]  }
 0x100   : > { %12885 = vmatprep.mubr.bf16.mxu1 %v19119_v5  ;;  %12914 = vmatpush3.bf16.msra.mxu1 %v14985_v33  ;;  %v4049_v5 = vshll.u32 %v11755_v8, 16  ;;  %v4055_v33 = vshll.u32 %v16624_v39, 16  ;;  %v16674_v22 = vld [vmem:[%s15363_s14 + $0xa0] sm:$0xf]  ;;  %v16676_v32 = vrot.slane %v4004_v38, 4  ;;  %v16678_v47 = vrot.slane %v4017_v37, 5 }
 0x101   : > { %19120 = vst [vmem:[#allocation32_spill] sm:$0xff] %v16664_v0  ;;  %13104 = vmatpush3.bf16.msra.mxu0 %v16567_v41  ;;  %12915 = vmatprep.subr.bf16.mxu1 %v14988_v1  ;;  %v4070_v0 = vshrl.u32 %v11758_v36, 16  ;;  %v4079_v41 = vshll.u32 %v16656_v28, 16  ;;  %v4083_v52 = vshrl.u32 %v16656_v28, 16  ;;  %v16685_v8 = vld [vmem:[%s19006_s2 + $0x200] sm:$0xff]   ;;  %v16687_v62 = vrot.slane %v4014_v24, 4 }
 0x102   : > { %13105 = vmatprep.subr.bf16.mxu0 %v14982_v40  ;;  %19121 = vst [vmem:[#allocation33_spill] sm:$0xff] %v16676_v32  ;;  %19122 = vst [vmem:[#allocation34_spill] sm:$0xff] %v16678_v47  ;;  %v4041_v38 = vshll.u32 %v16653_v50, 16  ;;  %v16691_v36 = vld [vmem:[%s15363_s14 + $0x8c] sm:$0x1]  ;;  %v4094_v37 = vshrl.u32 %v11761_v26, 16  ;;  %v4028_v32 = vor.u32 %v4027_v7, %v4024_v30 }
 0x103   : > { %19123 = vst [vmem:[#allocation35_spill] sm:$0xff] %v16687_v62  ;;  %v4097_v47 = vshll.u32 %v11761_v26, 16  ;;  %v4051_v16 = vrot.slane %v4049_v5, 5  ;;  %v16695_v28 = vld [vmem:[%s15363_s14 + $0x98] sm:$0x1]  ;;  %v16699_v24 = vrot.slane %v4055_v33, 5 }
 0x104   : > { %13074 = vmatmul.mubr.bf16.gmra.mrb[12].mxu0 %v14967_v49  ;;  %12916 = vmatpush3.bf16.msra.mxu1 %v14988_v1  ;;  %v4038_v49 = vor.u32 %v4037_v54, %v16669_v27  ;;  %v4048_v1 = vrot.slane %v4046_v55, 4  ;;  %v11764_v39 = vld [vmem:[%s15363_s14 + $0xa8] sm:$0xf]  ;;  %v4061_v62 = vrot.slane %v4059_v58, 4  ;;  %v4072_v50 = vrot.slane %v4070_v0, 4  ;;  %v14974_v33 = vld [vmem:[%s15363_s14 + $0x90] sm:$0xff]  }
 0x105   : > { %13077 = vmatprep.mubr.bf16.mxu0 %v14969_v43  ;;  %13106 = vmatpush3.bf16.msra.mxu0 %v14982_v40  ;;  %19124 = vst [vmem:[#allocation36_spill] sm:$0xff] %v16699_v24  ;;  %v4075_v57 = vrot.slane %v4073_v20, 5  ;;  %v16702_v15 = vld [vmem:[%s15363_s14 + $0xac] sm:$0xf]  ;;  %v19125_v43 = vcombine.low %v16263_v51, %v16267_v61  ;;  %v16707_v40 = vrot.slane %v4079_v41, 5  ;;  %v4085_v26 = vrot.slane %v4083_v52, 4 }
 0x106   : > { %13107 = vmatprep.subr.bf16.mxu0 %v14987_v18  ;;  %v4103_v30 = vshll.u32 %v16674_v22, 16  ;;  %v4107_v7 = vshrl.u32 %v16674_v22, 16  ;;  %v19127_v54 = vcombine.low %v16278_v11, %v16284_v42  ;;  %v4096_v0 = vrot.slane %v4094_v37, 4  ;;  %v16726_v52 = vld [vmem:[%s15363_s14 + $0xa4] sm:$0x1] }
 0x107   : > { %12886 = vmatmul.mubr.bf16.gmra.mrb[16].mxu1 %v19125_v43  ;;  %19126 = vst [vmem:[#allocation37_spill] sm:$0xff] %v16707_v40  ;;  %v4099_v20 = vrot.slane %v4097_v47, 5  ;;  %v4118_v55 = vshrl.u32 %v11764_v39, 16  ;;  %v4121_v5 = vshll.u32 %v11764_v39, 16  ;;  %v16715_v51 = vrot.slane %v4028_v32, 4 }
 0x108   : > { %12889 = vmatprep.mubr.bf16.mxu1 %v19127_v54  ;;  %v16717_v61 = vrot.slane %v4041_v38, 5  ;;  %v4052_v58 = vor.u32 %v4051_v16, %v4048_v1  ;;  %v4065_v41 = vshll.u32 %v16691_v36, 16  ;;  %v16721_v11 = vrot.slane %v4038_v49, 4  ;;  %v16735_v54 = vld [vmem:[%s15363_s14 + $0xb8] sm:$0xf] }
 0x109   : > { %13108 = vmatpush3.bf16.msra.mxu0 %v14987_v18  ;;  %v4062_v42 = vor.u32 %v4061_v62, %v16699_v24  ;;  %v4089_v47 = vshll.u32 %v16695_v28, 16  ;;  %v4127_v39 = vshll.u32 %v16702_v15, 16  ;;  %v11767_v18 = vld [vmem:[%s15363_s14 + $0xb4] sm:$0xf]  ;;  %v4076_v32 = vor.u32 %v4075_v57, %v4072_v50  ;;  %v16742_v57 = vld [vmem:[%s15363_s14 + $0xb0] sm:$0x1] }
 0x10a   : > { %13141 = vmatprep.subr.bf16.mxu0 %v16685_v8  ;;  %v16730_v38 = vrot.slane %v4103_v30, 5  ;;  %v4109_v16 = vrot.slane %v4107_v7, 4  ;;  %v4131_v37 = vshrl.u32 %v16702_v15, 16  ;;  %v4086_v49 = vor.u32 %v4085_v26, %v16707_v40 }
 0x10b   : > { %v4100_v1 = vor.u32 %v4099_v20, %v4096_v0  ;;  %v4120_v62 = vrot.slane %v4118_v55, 4  ;;  %v4123_v43 = vrot.slane %v4121_v5, 5  ;;  %v16737_v24 = vrot.slane %v4052_v58, 4  ;;  %v11770_v55 = vld [vmem:[%s15363_s14 + $0xc0] sm:$0xf] }
 0x10c   : > { %19128 = vst [vmem:[#allocation38_spill] sm:$0xff] %v16730_v38  ;;  %13078 = vmatmul.mubr.bf16.gmra.mrb[16].mxu0 %v14971_v48  ;;  %v16739_v50 = vrot.slane %v4065_v41, 5  ;;  %v4142_v30 = vshrl.u32 %v11767_v18, 16  ;;  %v4145_v48 = vshll.u32 %v11767_v18, 16  ;;  %v16744_v7 = vrot.slane %v4062_v42, 4 }
 0x10d   : > { %13081 = vmatprep.mubr.bf16.mxu0 %v14974_v33  ;;  %v16746_v26 = vrot.slane %v4089_v47, 5  ;;  %v16748_v0 = vrot.slane %v4127_v39, 5  ;;  %v4133_v20 = vrot.slane %v4131_v37, 4  ;;  %v19133_v5 = vcombine.low %v16306_v13, %v16310_v3  ;;  %v16759_v18 = vld [vmem:[%s15363_s14 + $0xc4] sm:$0xf]  ;;  %v14976_v47 = vld [vmem:[%s15363_s14 + $0x9c] sm:$0xff]  }
 0x10e   : > { %19129 = vst [vmem:[#allocation39_spill] sm:$0xff] %v16739_v50  ;;  %19130 = vst [vmem:[#allocation40_spill] sm:$0xff] %v16744_v7  ;;  %v4110_v33 = vor.u32 %v4109_v16, %v16730_v38  ;;  %v4113_v58 = vshll.u32 %v16726_v52, 16  ;;  %v4151_v41 = vshll.u32 %v16735_v54, 16  ;;  %v4155_v42 = vshrl.u32 %v16735_v54, 16  ;;  %v14979_v37 = vld [vmem:[%s15363_s14 + $0xa8] sm:$0xff]  }
 0x10f   : > { %19131 = vst [vmem:[#allocation41_spill] sm:$0xff] %v16746_v26  ;;  %19132 = vst [vmem:[#allocation42_spill] sm:$0xff] %v16748_v0  ;;  %12890 = vmatmul.mubr.bf16.gmra.mrb[20].mxu1 %v19133_v5  ;;  %v19134_v39 = vcombine.low %v16321_v21, %v16335_v45  ;;  %v16766_v26 = vrot.slane %v4076_v32, 4  ;;  %v16768_v13 = vrot.slane %v4086_v49, 4  ;;  %v16770_v3 = vrot.slane %v4100_v1, 4 }
 0x110   : > { %v4124_v16 = vor.u32 %v4123_v43, %v4120_v62  ;;  %v4137_v5 = vshll.u32 %v16742_v57, 16  ;;  %v16774_v38 = vld [vmem:[%s15363_s14 + $0xbc] sm:$0x1]  ;;  %v4144_v40 = vrot.slane %v4142_v30, 4  ;;  %v4147_v7 = vrot.slane %v4145_v48, 5 }
 0x111   : > { %12893 = vmatprep.mubr.bf16.mxu1 %v19134_v39  ;;  %19135 = vst [vmem:[#allocation43_spill] sm:$0xff] %v16768_v13  ;;  %19136 = vst [vmem:[#allocation44_spill] sm:$0xff] %v16770_v3  ;;  %v4166_v50 = vshrl.u32 %v11770_v55, 16  ;;  %v4134_v21 = vor.u32 %v4133_v20, %v16748_v0  ;;  %v4169_v45 = vshll.u32 %v11770_v55, 16  ;;  %v4175_v32 = vshll.u32 %v16759_v18, 16 }
 0x112   : > { %v4179_v49 = vshrl.u32 %v16759_v18, 16  ;;  %v11773_v39 = vld [vmem:[%s15363_s14 + $0xcc] sm:$0xf]  ;;  %v16780_v1 = vrot.slane %v4110_v33, 4  ;;  %v16782_v62 = vrot.slane %v4113_v58, 5  ;;  %v16784_v43 = vrot.slane %v4151_v41, 5 }
 0x113   : > { %v4157_v3 = vrot.slane %v4155_v42, 4  ;;  %v16787_v30 = vld [vmem:[%s15363_s14 + $0xd0] sm:$0xf]  ;;  %v16789_v48 = vrot.slane %v4124_v16, 4  ;;  %v16792_v20 = vld [vmem:[%s15363_s14 + $0xc8] sm:$0x1]  ;;  %v4148_v33 = vor.u32 %v4147_v7, %v4144_v40  ;;  %v3948_v7 = vsel %vm15388_vm2, %v16595_v17, %v16574_v4 }
 0x114   : > { %19137 = vst [vmem:[#allocation45_spill] sm:$0xff] %v16780_v1  ;;  %19138 = vst [vmem:[#allocation46_spill] sm:$0xff] %v16782_v62  ;;  %13082 = vmatmul.mubr.bf16.gmra.mrb[20].mxu0 %v14976_v47  ;;  %v4168_v55 = vrot.slane %v4166_v50, 4  ;;  %v4171_v0 = vrot.slane %v4169_v45, 5  ;;  %v16794_v13 = vrot.slane %v4175_v32, 5  ;;  %v4161_v58 = vshll.u32 %v16774_v38, 16 }
 0x115   : > { %19139 = vst [vmem:[#allocation47_spill] sm:$0xff] %v16784_v43  ;;  %19140 = vst [vmem:[#allocation48_spill] sm:$0xff] %v16789_v48  ;;  %13085 = vmatprep.mubr.bf16.mxu0 %v14979_v37  ;;  %v4181_v41 = vrot.slane %v4179_v49, 4  ;;  %v4190_v42 = vshrl.u32 %v11773_v39, 16  ;;  %v14981_v1 = vld [vmem:[%s15363_s14 + $0xb4] sm:$0xff]   ;;  %v16798_v62 = vrot.slane %v4134_v21, 4  ;;  %v19142_v37 = vcombine.low %v16346_v31, %v16363_v53 }
 0x116   : > { %v16800_v47 = vrot.slane %v4137_v5, 5  ;;  %v16803_v16 = vld [vmem:[%s15363_s14 + $0xd4] sm:$0x1]  ;;  %v4193_v48 = vshll.u32 %v11773_v39, 16  ;;  %v4199_v50 = vshll.u32 %v16787_v30, 16  ;;  %v14984_v40 = vld [vmem:[%s15363_s14 + $0xc0] sm:$0xff]   ;;  %v4158_v5 = vor.u32 %v4157_v3, %v16784_v43 }
 0x117   : > { %19141 = vst [vmem:[#allocation49_spill] sm:$0xff] %v16798_v62  ;;  %12894 = vmatmul.mubr.bf16.gmra.mrb[24].mxu1 %v19142_v37  ;;  %v4185_v21 = vshll.u32 %v16792_v20, 16  ;;  %v4192_v45 = vrot.slane %v4190_v42, 4  ;;  %v16817_v32 = vld [vmem:[%s15363_s14 + $0x18] sm:$0xe]  ;;  %v19144_v49 = vcombine.low %v16352_v10, %v16367_v63  ;;  %v4172_v31 = vor.u32 %v4171_v0, %v4168_v55  ;;  %v14989_v10 = vld [vmem:[%s15363_s14 + $0xc] sm:$0xff]  }
 0x118   : > { %19143 = vst [vmem:[#allocation50_spill] sm:$0xff] %v16817_v32  ;;  %v4182_v53 = vor.u32 %v4181_v41, %v16794_v13  ;;  %v4195_v39 = vrot.slane %v4193_v48, 5  ;;  %v4203_v37 = vshrl.u32 %v16787_v30, 16  ;;  %v11802_v4 = vld [vmem:[%s15363_s14 + $0x30] sm:$0xe]  ;;  %v16825_v17 = vrot.slane %v4148_v33, 4 }
 0x119   : > { %12897 = vmatprep.mubr.bf16.mxu1 %v19144_v49  ;;  %v16827_v3 = vrot.slane %v4161_v58, 5  ;;  %v4209_v42 = vshll.u32 %v16803_v16, 16  ;;  %v19047_v43 = vrot.slane %v16271_v60, 5  ;;  %v16832_v62 = vld [vmem:[%s15363_s14 + $0x24] sm:$0xe]  ;;  %v19146_v63 = vsel %vm15388_vm2, %v16517_v12, %v16459_v56  ;;  %v14990_v60 = vld [vmem:[%s15363_s14 + $0x18] sm:$0xff]  }
 0x11a   : > { %19145 = vst [vmem:[#allocation51_spill] sm:$0xff] %v16832_v62  ;;  %v19147_v0 = vsel %vm15388_vm2, %v16466_v2, %v16427_v25  ;;  %v4196_v55 = vor.u32 %v4195_v39, %v4192_v45  ;;  %v16847_v33 = vrot.slane %v4199_v50, 5  ;;  %v4205_v58 = vrot.slane %v4203_v37, 4  ;;  %v11803_v41 = vld [vmem:[%s15363_s14 + $0x3c] sm:$0xe]  ;;  %v19176_v62 = vld [vmem:[#allocation12_spill] sm:$0xff] }
 0x11b   : > { %v16845_v48 = vcombine.low %v19147_v0, %v19146_v63  ;;  %v19149_v49 = vsel %vm15388_vm2, %v16572_v34, %v16519_v29  ;;  %v19150_v56 = vsel %vm15388_vm2, %v16528_v9, %v16477_v44  ;;  %v19151_v2 = vsel %vm15388_vm2, %v16584_v6, %v16510_v14  ;;  %v19158_v63 = vld [vmem:[#allocation9_spill] sm:$0xff] }
 0x11c   : > { %19148 = vst [vmem:[#allocation52_spill] sm:$0xff] %v16847_v33  ;;  %v16860_v25 = vcombine.low %v19150_v56, %v19149_v49  ;;  %v16867_v12 = vcombine.low %v19151_v2, %v3948_v7  ;;  %v16869_v50 = vrot.slane %v4158_v5, 4  ;;  %v16871_v45 = vrot.slane %v4185_v21, 5  ;;  %13086 = vmatmul.mubr.bf16.gmra.mrb[24].mxu0 %v14981_v1  ;;  %v11804_v7 = vld [vmem:[%s15363_s14 + $0x48] sm:$0xe]  ;;  %v14986_v5 = vld [vmem:[%s15363_s14 + $0xcc] sm:$0xff]  }
 0x11d   : > { %v16873_v29 = vrot.slane %v4172_v31, 4  ;;  %v16875_v34 = vrot.slane %v4182_v53, 4  ;;  %13089 = vmatprep.mubr.bf16.mxu0 %v14984_v40  ;;  %v16879_v37 = vrot.slane %v4196_v55, 4  ;;  %v16881_v14 = vrot.slane %v4209_v42, 5  ;;  %v11805_v42 = vld [vmem:[%s15363_s14 + $0x54] sm:$0xe] }
 0x11e   : > { %19152 = vst [vmem:[#allocation53_spill] sm:$0xff] %v16871_v45  ;;  %v16885_v6 = vrot.slane %v19047_v43, 4  ;;  %v11818_v1 = vrot.slane %v11802_v4, 9  ;;  %v4206_v31 = vor.u32 %v4205_v58, %v16847_v33  ;;  %v4614_v53 = vrot.slane %v16356_v46, 5  ;;  %v19160_v4 = vld [vmem:[#allocation6_spill] sm:$0xff]  ;;  %v19162_v2 = vld [vmem:[#allocation8_spill] sm:$0xff] }
 0x11f   : > { %19153 = vst [vmem:[#allocation54_spill] sm:$0xff] %v16875_v34  ;;  %19155 = vst [vmem:[#allocation55_spill] sm:$0xff] %v16879_v37  ;;  %v19159_v0 = vcombine.low %v16406_v19, %v19158_v63  ;;  %v4617_v39 = vrot.slane %v19162_v2, 5  ;;  %v11819_v44 = vrot.slane %v11803_v41, 9  ;;  %v11806_v43 = vld [vmem:[%s15363_s14 + $0x60] sm:$0xe] }
 0x120   : > { %19156 = vst [vmem:[#allocation56_spill] sm:$0xff] %v16881_v14  ;;  %19157 = vst [vmem:[#allocation57_spill] sm:$0xff] %v16885_v6  ;;  %v19163_v58 = vld [vmem:[#allocation25_spill] sm:$0xff]  ;;  %v19164_v40 = vld [vmem:[#allocation27_spill] sm:$0xff]  ;;  %v16910_v19 = vsel %vm15773_vm5, %v11818_v1, %v4614_v53  ;;  %v4616_v63 = vrot.slane %v4614_v53, 4  ;;  %v11820_v9 = vrot.slane %v11804_v7, 9 }
 0x121   : > { %12898 = vmatmul.mubr.bf16.gmra.mrb[28].mxu1 %v19159_v0  ;;  %19166 = vst [vmem:[#allocation9_spill] sm:$0xff] %v16910_v19  ;;  %v19167_v0 = vld [vmem:[#allocation10_spill] sm:$0xff]  ;;  %v19168_v56 = vld [vmem:[#allocation21_spill] sm:$0xff]  ;;  %v19170_v2 = vld [vmem:[#allocation28_spill] sm:$0xff]  ;;  %v16923_v32 = vrot.slane %v4206_v31, 4  ;;  %v11821_v31 = vrot.slane %v11805_v42, 9 }
 0x122   : > { %12917 = vmatprep.mubr.bf16.mxu1 %v14989_v10  ;;  %v4621_v55 = vrot.slane %v19167_v0, 5  ;;  %v19169_v49 = vld [vmem:[#allocation29_spill] sm:$0xff]  ;;  %v19171_v10 = vld [vmem:[#allocation32_spill] sm:$0xff]  ;;  %v19172_v46 = vld [vmem:[#allocation11_spill] sm:$0xff]  ;;  %v16927_v53 = vsel %vm15773_vm5, %v4616_v63, %v4617_v39  ;;  %v11822_v45 = vrot.slane %v11806_v43, 9  ;;  %v19232_v35 = vrot.slane %v19160_v4, 5 }
 0x123   : > { %v4624_v6 = vrot.slane %v19172_v46, 5  ;;  %v11807_v1 = vld [vmem:[%s15363_s14 + $0x6c] sm:$0xe]  ;;  %19173 = vst [vmem:[#allocation6_spill] sm:$0xff] %v16923_v32  ;;  %19174 = vst [vmem:[#allocation8_spill] sm:$0xff] %v16927_v53  ;;  %v4628_v46 = vrot.slane %v19176_v62, 5 }
 0x124   : > { %v16931_v0 = vsel %vm15773_vm5, %v11819_v44, %v4621_v55  ;;  %v4623_v41 = vrot.slane %v4621_v55, 4  ;;  %v19177_v7 = vld [vmem:[#allocation15_spill] sm:$0xff]  ;;  %v11808_v32 = vld [vmem:[%s15363_s14 + $0x78] sm:$0xe]  ;;  %13090 = vmatmul.mubr.bf16.gmra.mrb[28].mxu0 %v14986_v5  ;;  %v19179_v44 = vld [vmem:[#allocation13_spill] sm:$0xff] }
 0x125   : > { %19175 = vst [vmem:[#allocation25_spill] sm:$0xff] %v16931_v0  ;;  %v4631_v37 = vrot.slane %v19177_v7, 5  ;;  %v14992_v39 = vld [vmem:[%s15363_s14 + $0x24] sm:$0xff]   ;;  %v4635_v55 = vrot.slane %v19179_v44, 5  ;;  %v19180_v33 = vld [vmem:[#allocation17_spill] sm:$0xff]  ;;  %v19181_v14 = vld [vmem:[#allocation14_spill] sm:$0xff]  ;;  %v16951_v42 = vsel %vm15773_vm5, %v11820_v9, %v4628_v46 }
 0x126   : > { %v16942_v63 = vsel %vm15773_vm5, %v4623_v41, %v4624_v6  ;;  %v4638_v34 = vrot.slane %v19180_v33, 5  ;;  %13109 = vmatprep.mubr.bf16.mxu0 %v19181_v14  ;;  %19182 = vst [vmem:[#allocation3_spill] sm:$0xff] %v16951_v42  ;;  %v4630_v5 = vrot.slane %v4628_v46, 4  ;;  %v19183_v7 = vld [vmem:[#allocation16_spill] sm:$0xff]  ;;  %v11809_v19 = vld [vmem:[%s15363_s14 + $0x84] sm:$0xe] }
 0x127   : > { %19178 = vst [vmem:[#allocation27_spill] sm:$0xff] %v16942_v63  ;;  %v4642_v53 = vrot.slane %v19183_v7, 5  ;;  %v16957_v6 = vsel %vm15773_vm5, %v11821_v31, %v4635_v55  ;;  %v4637_v43 = vrot.slane %v4635_v55, 4  ;;  %v19185_v33 = vld [vmem:[#allocation20_spill] sm:$0xff]  ;;  %v11823_v41 = vrot.slane %v11807_v1, 9  ;;  %v19187_v62 = vld [vmem:[#allocation18_spill] sm:$0xff] }
 0x128   : > { %19184 = vst [vmem:[#allocation10_spill] sm:$0xff] %v16957_v6  ;;  %v4645_v14 = vrot.slane %v19185_v33, 5  ;;  %v11810_v44 = vld [vmem:[%s15363_s14 + $0x90] sm:$0xe]  ;;  %v16963_v9 = vsel %vm15773_vm5, %v4630_v5, %v4631_v37  ;;  %v4649_v63 = vrot.slane %v19187_v62, 5  ;;  %v19189_v1 = vld [vmem:[#allocation23_spill] sm:$0xff] }
 0x129   : > { %12918 = vmatmul.mubr.bf16.vlgmr.msra.gmra.mrb[0].mxu1 %v14990_v60  ;;  %19186 = vst [vmem:[#allocation21_spill] sm:$0xff] %v16963_v9  ;;  %v16967_v46 = vsel %vm15773_vm5, %v11822_v45, %v4642_v53  ;;  %v4644_v7 = vrot.slane %v4642_v53, 4  ;;  %v16974_v60 = vsel %vm15773_vm5, %v4637_v43, %v4638_v34  ;;  %v4652_v37 = vrot.slane %v19189_v1, 5  ;;  %v11811_v5 = vld [vmem:[%s15363_s14 + $0x9c] sm:$0xe]  ;;  %v14993_v33 = vld [vmem:[%s15363_s14 + $0x30] sm:$0xff]  }
 0x12a   : > { %12921 = vmatprep.mubr.bf16.mxu1 %v14992_v39  ;;  %19188 = vst [vmem:[#allocation29_spill] sm:$0xff] %v16974_v60  ;;  %v11824_v55 = vrot.slane %v11808_v32, 9  ;;  %v16987_v39 = vsel %vm15773_vm5, %v11823_v41, %v4649_v63  ;;  %v4651_v62 = vrot.slane %v4649_v63, 4  ;;  %v14994_v34 = vld [vmem:[%s19006_s2 + $0x208] sm:$0xff]   ;;  %v19191_v43 = vld [vmem:[#allocation22_spill] sm:$0xff]  ;;  %v11825_v60 = vrot.slane %v11809_v19, 9 }
 0x12b   : > { %v16983_v53 = vsel %vm15773_vm5, %v4644_v7, %v4645_v14  ;;  %v4656_v1 = vrot.slane %v19191_v43, 5  ;;  %v19192_v45 = vld [vmem:[#allocation30_spill] sm:$0xff]  ;;  %v11812_v14 = vld [vmem:[%s15363_s14 + $0xa8] sm:$0xe]  ;;  %v4666_v9 = vrot.slane %v16691_v36, 5  ;;  %v11826_v42 = vrot.slane %v11810_v44, 9 }
 0x12c   : > { %19190 = vst [vmem:[#allocation28_spill] sm:$0xff] %v16983_v53  ;;  %v4659_v31 = vrot.slane %v19192_v45, 5  ;;  %v14995_v7 = vld [vmem:[%s15363_s14 + $0x3c] sm:$0xff]   ;;  %v17000_v41 = vsel %vm15773_vm5, %v4651_v62, %v4652_v37  ;;  %v11813_v37 = vld [vmem:[%s15363_s14 + $0xb4] sm:$0xe]  ;;  %v11827_v62 = vrot.slane %v11811_v5, 9 }
 0x12d   : > { %v19193_v63 = vld [vmem:[#allocation26_spill] sm:$0xff]  ;;  %v19194_v0 = vld [vmem:[#allocation19_spill] sm:$0xff]  ;;  %v11839_v43 = vcombine.low %v16987_v39, %v17000_v41  ;;  %v17009_v19 = vsel %vm15773_vm5, %v11824_v55, %v4656_v1  ;;  %v4658_v45 = vrot.slane %v4656_v1, 4  ;;  %v14997_v36 = vld [vmem:[%s19006_s2 + $0x210] sm:$0xff]   ;;  %v4673_v55 = vrot.slane %v16695_v28, 5 }
 0x12e   : > { %v4663_v6 = vrot.slane %v19193_v63, 5  ;;  %13110 = vmatmul.mubr.bf16.vlgmr.msra.gmra.mrb[0].mxu0 %v19194_v0  ;;  %v19195_v32 = vld [vmem:[#allocation31_spill] sm:$0xff]  ;;  %v4677_v63 = vrot.slane %v16674_v22, 5  ;;  %v11815_v5 = vld [vmem:[%s15363_s14 + $0xcc] sm:$0xe]  ;;  %v19061_v41 = vmov 0.0|0.0  }
 0x12f   : > { %v4670_v53 = vrot.slane %v19195_v32, 5  ;;  %13142 = vmatpush3.bf16.msra.mxu0 %v16685_v8  ;;  %13113 = vmatprep.mubr.bf16.mxu0 %v16845_v48  ;;  %v11814_v1 = vld [vmem:[%s15363_s14 + $0xc0] sm:$0xe]  ;;  %v17026_v8 = vsel %vm15773_vm5, %v4658_v45, %v4659_v31  ;;  %v4680_v31 = vrot.slane %v16726_v52, 5  ;;  %v11829_v45 = vrot.slane %v11813_v37, 9  ;;  %v214_v39 = vld [vmem:[%s19007_s3 + $0x8] sm:$0xff] }
 0x130   : > { %v17020_v0 = vsel %vm15773_vm5, %v11825_v60, %v4663_v6  ;;  %v4665_v44 = vrot.slane %v4663_v6, 4  ;;  %13143 = vmatprep.subr.bf16.mxu0 %v14994_v34  ;;  %v11840_v6 = vcombine.low %v17009_v19, %v17026_v8  ;;  %v11828_v60 = vrot.slane %v11812_v14, 9  ;;  %14153 = vmatprep.subr.bf16.mxu1 %v19061_v41  ;;  %v215_v19 = vld [vmem:[%s19007_s3 + $0x10] sm:$0xff] }
 0x131   : > { %v17030_v48 = vsel %vm15773_vm5, %v11826_v42, %v4670_v53  ;;  %v4672_v32 = vrot.slane %v4670_v53, 4  ;;  %12922 = vmatmul.mubr.bf16.gmra.mrb[4].mxu1 %v14993_v33  ;;  %v17049_v33 = vsel %vm15773_vm5, %v11827_v62, %v4677_v63  ;;  %v4679_v53 = vrot.slane %v4677_v63, 4 }
 0x132   : > { %v17037_v28 = vsel %vm15773_vm5, %v4665_v44, %v4666_v9  ;;  %12925 = vmatprep.mubr.bf16.mxu1 %v14995_v7  ;;  %v14996_v9 = vld [vmem:[%s15363_s14 + $0x48] sm:$0xff]   ;;  %v4684_v14 = vrot.slane %v16702_v15, 5  ;;  %v4687_v7 = vrot.slane %v16742_v57, 5  ;;  %v14998_v44 = vld [vmem:[%s15363_s14 + $0x54] sm:$0xff]   ;;  %v11830_v63 = vrot.slane %v11814_v1, 9 }
 0x133   : > { %v11841_v42 = vcombine.low %v17020_v0, %v17037_v28  ;;  %v17045_v22 = vsel %vm15773_vm5, %v4672_v32, %v4673_v55  ;;  %13144 = vmatpush3.bf16.msra.mxu0 %v14994_v34  ;;  %v15000_v55 = vld [vmem:[%s19006_s2 + $0x218] sm:$0xff]   ;;  %v17062_v62 = vsel %vm15773_vm5, %v4679_v53, %v4680_v31  ;;  %v4691_v34 = vrot.slane %v16735_v54, 5  ;;  %v15003_v31 = vld [vmem:[%s19006_s2 + $0x220] sm:$0xff]   ;;  %v19249_v21 = vld [vmem:[#allocation28_spill] sm:$0xff] }
 0x134   : > { %13145 = vmatprep.subr.bf16.mxu0 %v14997_v36  ;;  %v4694_v32 = vrot.slane %v16774_v38, 5  ;;  %v11843_v15 = vcombine.low %v17049_v33, %v17062_v62  ;;  %v17070_v57 = vsel %vm15773_vm5, %v11828_v60, %v4684_v14  ;;  %v4686_v37 = vrot.slane %v4684_v14, 4  ;;  %v216_v0 = vld [vmem:[%s19007_s3 + $0x18] sm:$0xff] }
 0x135   : > { %v4698_v52 = vrot.slane %v16759_v18, 5  ;;  %v17079_v38 = vsel %vm15773_vm5, %v11829_v45, %v4691_v34  ;;  %v4693_v54 = vrot.slane %v4691_v34, 4  ;;  %v4701_v1 = vrot.slane %v16792_v20, 5 }
 0x136   : > { %13114 = vmatmul.mubr.bf16.gmra.mrb[4].mxu0 %v16860_v25  ;;  %v11831_v53 = vrot.slane %v11815_v5, 9  ;;  %v17085_v18 = vsel %vm15773_vm5, %v4686_v37, %v4687_v7  ;;  %v4705_v14 = vrot.slane %v16787_v30, 5  ;;  %v19196_v45 = vrot.slane %v19160_v4, 5 }
 0x137   : > { %13117 = vmatprep.mubr.bf16.mxu0 %v16867_v12  ;;  %13146 = vmatpush3.bf16.msra.mxu0 %v14997_v36  ;;  %v17089_v25 = vsel %vm15773_vm5, %v11830_v63, %v4698_v52  ;;  %v4700_v60 = vrot.slane %v4698_v52, 4  ;;  %v11844_v12 = vcombine.low %v17070_v57, %v17085_v18  ;;  %v17100_v36 = vsel %vm15773_vm5, %v4693_v54, %v4694_v32  ;;  %v15006_v63 = vld [vmem:[%s19006_s2 + $0x228] sm:$0xff]   ;;  %v221_v18 = vld [vmem:[%s19007_s3 + $0x40] sm:$0xff] }
 0x138   : > { %13147 = vmatprep.subr.bf16.mxu0 %v15000_v55  ;;  %v17094_v20 = vrot.slane %v19196_v45, 4  ;;  %v4708_v5 = vrot.slane %v16803_v16, 5  ;;  %v11845_v30 = vcombine.low %v17079_v38, %v17100_v36  ;;  %v17111_v7 = vsel %vm15773_vm5, %v11831_v53, %v4705_v14  ;;  %v19204_v53 = vld [vmem:[#allocation35_spill] sm:$0xff] }
 0x139   : > { %12926 = vmatmul.mubr.bf16.gmra.mrb[8].mxu1 %v14996_v9  ;;  %v17107_v52 = vsel %vm15773_vm5, %v4700_v60, %v4701_v1  ;;  %v4707_v34 = vrot.slane %v4705_v14, 4  ;;  %v19197_v32 = vsel %vm15388_vm2, %v19164_v40, %v19163_v58  ;;  %v19198_v16 = vsel %vm15388_vm2, %v16617_v59, %v16537_v23  ;;  %v14999_v59 = vld [vmem:[%s15363_s14 + $0x60] sm:$0xff]  }
 0x13a   : > { %v11781_v9 = vcombine.low %v19198_v16, %v19197_v32  ;;  %12929 = vmatprep.mubr.bf16.mxu1 %v14998_v44  ;;  %v11846_v37 = vcombine.low %v17089_v25, %v17107_v52  ;;  %v19199_v54 = vsel %vm15388_vm2, %v19171_v10, %v19170_v2  ;;  %v19200_v40 = vsel %vm15388_vm2, %v19169_v49, %v19168_v56  ;;  %v15001_v44 = vld [vmem:[%s15363_s14 + $0x6c] sm:$0xff]   ;;  %v15004_v16 = vld [vmem:[%s15363_s14 + $0x84] sm:$0xff]  }
 0x13b   : > { %v11782_v23 = vcombine.low %v19200_v40, %v19199_v54  ;;  %13148 = vmatpush3.bf16.msra.mxu0 %v15000_v55  ;;  %v17141_v58 = vsel %vm15773_vm5, %v4707_v34, %v4708_v5  ;;  %v15009_v2 = vld [vmem:[%s19006_s2 + $0x230] sm:$0xff]   ;;  %v19201_v49 = vld [vmem:[#allocation24_spill] sm:$0xff]  ;;  %v19203_v55 = vld [vmem:[#allocation34_spill] sm:$0xff]  ;;  %v4034_v14 = vsel %vm15388_vm2, %v16715_v51, %v16669_v27  ;;  %v4044_v45 = vsel %vm15388_vm2, %v16721_v11, %v16717_v61 }
 0x13c   : > { %13149 = vmatprep.subr.bf16.mxu0 %v15003_v31  ;;  %v11847_v1 = vcombine.low %v17111_v7, %v17141_v58  ;;  %v19202_v56 = vld [vmem:[#allocation33_spill] sm:$0xff]  ;;  %v4020_v60 = vsel %vm15388_vm2, %v19204_v53, %v19203_v55  ;;  %v15012_v34 = vld [vmem:[%s19006_s2 + $0x238] sm:$0xff]   ;;  %v11784_v32 = vcombine.low %v4034_v14, %v4044_v45  ;;  %v19205_v27 = vld [vmem:[#allocation36_spill] sm:$0xff]  ;;  %v17315_v8 = vpack.c.bf16 %v216_v0, %v215_v19 }
 0x13d   : > { %v4010_v10 = vsel %vm15388_vm2, %v19202_v56, %v19201_v49  ;;  %v4058_v51 = vsel %vm15388_vm2, %v16737_v24, %v19205_v27  ;;  %v19206_v61 = vld [vmem:[#allocation39_spill] sm:$0xff]  ;;  %v19207_v11 = vld [vmem:[#allocation40_spill] sm:$0xff]  ;;  %v19208_v54 = vld [vmem:[#allocation37_spill] sm:$0xff] }
 0x13e   : > { %13118 = vmatmul.mubr.bf16.gmra.mrb[8].mxu0 %v11781_v9  ;;  %v11783_v5 = vcombine.low %v4010_v10, %v4020_v60  ;;  %v4068_v9 = vsel %vm15388_vm2, %v19207_v11, %v19206_v61  ;;  %v19209_v40 = vld [vmem:[#allocation41_spill] sm:$0xff]  ;;  %v19211_v56 = vld [vmem:[#allocation38_spill] sm:$0xff]  ;;  %v19212_v10 = vld [vmem:[#allocation44_spill] sm:$0xff] }
 0x13f   : > { %13121 = vmatprep.mubr.bf16.mxu0 %v11782_v23  ;;  %13150 = vmatpush3.bf16.msra.mxu0 %v15003_v31  ;;  %v15002_v31 = vld [vmem:[%s15363_s14 + $0x78] sm:$0xff]   ;;  %v19210_v23 = vld [vmem:[#allocation43_spill] sm:$0xff]  ;;  %v15005_v49 = vld [vmem:[%s15363_s14 + $0x90] sm:$0xff]  }
 0x140   : > { %13151 = vmatprep.subr.bf16.mxu0 %v15006_v63  ;;  %v19213_v55 = vld [vmem:[#allocation46_spill] sm:$0xff]  ;;  %v19214_v53 = vld [vmem:[#allocation45_spill] sm:$0xff]  ;;  %v19216_v45 = vld [vmem:[#allocation48_spill] sm:$0xff] }
 0x141   : > { %12930 = vmatmul.mubr.bf16.gmra.mrb[12].mxu1 %v14999_v59  ;;  %v4092_v59 = vsel %vm15388_vm2, %v19210_v23, %v19209_v40  ;;  %v4116_v60 = vsel %vm15388_vm2, %v19214_v53, %v19213_v55  ;;  %v19215_v14 = vld [vmem:[#allocation42_spill] sm:$0xff]  ;;  %v15008_v27 = vld [vmem:[%s15363_s14 + $0xa8] sm:$0xff]   ;;  %v19218_v61 = vld [vmem:[#allocation47_spill] sm:$0xff] }
 0x142   : > { %12933 = vmatprep.mubr.bf16.mxu1 %v15001_v44  ;;  %v11785_v44 = vcombine.low %v4058_v51, %v4068_v9  ;;  %v15010_v51 = vld [vmem:[%s15363_s14 + $0xb4] sm:$0xff]   ;;  %v4154_v11 = vsel %vm15388_vm2, %v16825_v17, %v19218_v61  ;;  %v4164_v9 = vsel %vm15388_vm2, %v16869_v50, %v16827_v3  ;;  %v15011_v17 = vld [vmem:[%s15363_s14 + $0xc0] sm:$0xff]   ;;  %v19223_v50 = vld [vmem:[#allocation56_spill] sm:$0xff] }
 0x143   : > { %13152 = vmatpush3.bf16.msra.mxu0 %v15006_v63  ;;  %v4082_v63 = vsel %vm15388_vm2, %v16766_v26, %v19208_v54  ;;  %v4106_v26 = vsel %vm15388_vm2, %v19212_v10, %v19211_v56  ;;  %v19219_v54 = vld [vmem:[#allocation53_spill] sm:$0xff]  ;;  %v11789_v23 = vcombine.low %v4154_v11, %v4164_v9  ;;  %v19227_v56 = vld [vmem:[#allocation50_spill] sm:$0xff]  ;;  %v19238_v9 = vld [vmem:[#allocation8_spill] sm:$0xff] }
 0x144   : > { %13153 = vmatprep.subr.bf16.mxu0 %v15009_v2  ;;  %v11786_v24 = vcombine.low %v4082_v63, %v4092_v59  ;;  %v19220_v63 = vld [vmem:[#allocation54_spill] sm:$0xff]  ;;  %v19228_v10 = vrot.slane %v19227_v56, 9  ;;  %v19229_v55 = vld [vmem:[#allocation5_spill] sm:$0xff]  ;;  %v222_v25 = vld [vmem:[%s19007_s3 + $0x48] sm:$0xff] }
 0x145   : > { %v4188_v40 = vsel %vm15388_vm2, %v19220_v63, %v19219_v54  ;;  %v19230_v53 = vrot.slane %v19229_v55, 5  ;;  %v19237_v11 = vld [vmem:[#allocation9_spill] sm:$0xff]  ;;  %v19241_v63 = vld [vmem:[#allocation27_spill] sm:$0xff] }
 0x146   : > { %13122 = vmatmul.mubr.bf16.gmra.mrb[12].mxu0 %v11783_v5  ;;  %v4130_v5 = vsel %vm15388_vm2, %v19216_v45, %v19215_v14  ;;  %v19240_v54 = vld [vmem:[#allocation25_spill] sm:$0xff] }
 0x147   : > { %13125 = vmatprep.mubr.bf16.mxu0 %v11784_v32  ;;  %13154 = vmatpush3.bf16.msra.mxu0 %v15009_v2  ;;  %v15007_v2 = vld [vmem:[%s15363_s14 + $0x9c] sm:$0xff]   ;;  %v19242_v4 = vcombine.low %v19240_v54, %v19241_v63  ;;  %v223_v7 = vld [vmem:[%s19007_s3 + $0x50] sm:$0xff] }
 0x148   : > { %13155 = vmatprep.subr.bf16.mxu0 %v15012_v34  ;;  %v227_v56 = vld [vmem:[%s19007_s3 + $0x70] sm:$0xff] }
 0x149   : > { %12934 = vmatmul.mubr.bf16.gmra.mrb[16].mxu1 %v15002_v31  ;;  %v11787_v31 = vcombine.low %v4106_v26, %v4116_v60  ;;  %v19231_v60 = vld [vmem:[#allocation57_spill] sm:$0xff] }
 0x14a   : > { %12937 = vmatprep.mubr.bf16.mxu1 %v15004_v16  ;;  %v4604_v14 = vsel %vm15773_vm5, %v19231_v60, %v19230_v53  ;;  %v15293_v53 = vmov 0.0  }
 0x14b   : > { %13156 = vmatpush3.bf16.msra.mxu0 %v15012_v34  ;;  %v19217_v34 = vld [vmem:[#allocation49_spill] sm:$0xff]  ;;  %5531 = vst [vmem:[#allocation2] sm:$0xff] %v15293_v53  ;;  %5532 = vst [vmem:[#allocation2 + $0x8] sm:$0xff] %v15293_v53 }
 0x14c   : > { %v4140_v32 = vsel %vm15388_vm2, %v19217_v34, %v16800_v47  ;;  %v4178_v47 = vsel %vm15388_vm2, %v16873_v29, %v16794_v13  ;;  %v19225_v29 = vld [vmem:[#allocation4_spill] sm:$0xff]  ;;  %v19233_v34 = vld [vmem:[#allocation51_spill] sm:$0xff]  ;;  %14201 = vmatprep.subr.bf16.mxu0 %v19061_v41  ;;  %5533 = vst [vmem:[#allocation2 + $0x10] sm:$0xff] %v15293_v53  ;;  %5535 = vst [vmem:[#allocation2 + $0x198] sm:$0xff] %v15293_v53 }
 0x14d   : > { %v11788_v16 = vcombine.low %v4130_v5, %v4140_v32  ;;  %v11790_v59 = vcombine.low %v4178_v47, %v4188_v40  ;;  %v19234_v32 = vrot.slane %v19233_v34, 9  ;;  %v19239_v47 = vcombine.low %v19237_v11, %v19238_v9  ;;  %v19243_v40 = vld [vmem:[#allocation3_spill] sm:$0xff]  ;;  %5536 = vst [vmem:[#allocation2 + $0x1a0] sm:$0xff] %v15293_v53  ;;  %5537 = vst [vmem:[#allocation2 + $0x1a8] sm:$0xff] %v15293_v53 }
 0x14e   : > { %13126 = vmatmul.mubr.bf16.gmra.mrb[16].mxu0 %v11785_v44  ;;  %v19221_v44 = vld [vmem:[#allocation52_spill] sm:$0xff]  ;;  %5545 = vst [vmem:[#allocation2 + $0x18] sm:$0x1] %v15293_v53  ;;  %5546 = vst [vmem:[#allocation2 + $0x30] sm:$0x1] %v15293_v53 }
 0x14f   : > { %13129 = vmatprep.mubr.bf16.mxu0 %v11786_v24  ;;  %v19222_v24 = vld [vmem:[#allocation55_spill] sm:$0xff]  ;;  %5547 = vst [vmem:[#allocation2 + $0x48] sm:$0x1] %v15293_v53  ;;  %5548 = vst [vmem:[#allocation2 + $0x60] sm:$0x1] %v15293_v53 }
 0x150   : > { %v4202_v3 = vsel %vm15388_vm2, %v19222_v24, %v19221_v44  ;;  %v19247_v44 = vld [vmem:[#allocation29_spill] sm:$0xff]  ;;  %5549 = vst [vmem:[#allocation2 + $0x78] sm:$0x1] %v15293_v53  ;;  %5550 = vst [vmem:[#allocation2 + $0x90] sm:$0x1] %v15293_v53 }
 0x151   : > { %12938 = vmatmul.mubr.bf16.gmra.mrb[20].mxu1 %v15005_v49  ;;  %v19224_v49 = vld [vmem:[#allocation6_spill] sm:$0xff]  ;;  %5551 = vst [vmem:[#allocation2 + $0xa8] sm:$0x1] %v15293_v53  ;;  %5552 = vst [vmem:[#allocation2 + $0xc0] sm:$0x1] %v15293_v53 }
 0x152   : > { %12941 = vmatprep.mubr.bf16.mxu1 %v15007_v2  ;;  %v4212_v13 = vsel %vm15388_vm2, %v19224_v49, %v19223_v50  ;;  %v19226_v2 = vrot.slane %v19225_v29, 5  ;;  %v225_v50 = vld [vmem:[%s19007_s3 + $0x60] sm:$0xff]  ;;  %v226_v49 = vld [vmem:[%s19007_s3 + $0x68] sm:$0xff]  ;;  %5553 = vst [vmem:[#allocation2 + $0xd8] sm:$0x1] %v15293_v53 }
 0x153   : > { %v11791_v45 = vcombine.low %v4202_v3, %v4212_v13  ;;  %v19251_v3 = vcombine.low %v17030_v48, %v17045_v22  ;;  %v217_v48 = vld [vmem:[%s19007_s3 + $0x20] sm:$0xff]  ;;  %v220_v22 = vld [vmem:[%s19007_s3 + $0x38] sm:$0xff]  ;;  %v17391_v13 = vpack.c.bf16 %v226_v49, %v225_v50  ;;  %5554 = vst [vmem:[#allocation2 + $0xf0] sm:$0x1] %v15293_v53  ;;  %5555 = vst [vmem:[#allocation2 + $0x108] sm:$0x1] %v15293_v53 }
 0x154   : > { %v4601_v26 = vsel %vm15773_vm5, %v19228_v10, %v19226_v2  ;;  %v228_v10 = vld [vmem:[%s19007_s3 + $0x78] sm:$0xff]  ;;  %5556 = vst [vmem:[#allocation2 + $0x120] sm:$0x1] %v15293_v53  ;;  %5557 = vst [vmem:[#allocation2 + $0x138] sm:$0x1] %v15293_v53 }
 0x155   : > { %v11832_v5 = vcombine.low %v4601_v26, %v4604_v14  ;;  %v17408_v55 = vpack.c.bf16 %v228_v10, %v227_v56  ;;  %5558 = vst [vmem:[#allocation2 + $0x150] sm:$0x1] %v15293_v53  ;;  %5559 = vst [vmem:[#allocation2 + $0x168] sm:$0x1] %v15293_v53 }
 0x156   : > { %13130 = vmatmul.mubr.bf16.gmra.mrb[20].mxu0 %v11787_v31  ;;  %v4608_v31 = vsel %vm15773_vm5, %v19234_v32, %v19232_v35  ;;  %5560 = vst [vmem:[#allocation2 + $0x180] sm:$0x1] %v15293_v53  ;;  %5561 = vst [vmem:[#allocation2 + $0x29] sm:$0x1] %v15293_v53 }
 0x157   : > { %13133 = vmatprep.mubr.bf16.mxu0 %v11788_v16  ;;  %v19235_v16 = vld [vmem:[#allocation7_spill] sm:$0xff]  ;;  %19252 = vst [vmem:[#allocation32_spill] sm:$0xff] %v17408_v55  ;;  %5562 = vst [vmem:[#allocation2 + $0x41] sm:$0x1] %v15293_v53 }
 0x158   : > { %5563 = vst [vmem:[#allocation2 + $0x59] sm:$0x1] %v15293_v53  ;;  %5564 = vst [vmem:[#allocation2 + $0x71] sm:$0x1] %v15293_v53 }
 0x159   : > { %12942 = vmatmul.mubr.bf16.gmra.mrb[24].mxu1 %v15008_v27  ;;  %v19236_v27 = vrot.slane %v19235_v16, 5  ;;  %5565 = vst [vmem:[#allocation2 + $0x89] sm:$0x1] %v15293_v53  ;;  %5566 = vst [vmem:[#allocation2 + $0xa1] sm:$0x1] %v15293_v53 }
 0x15a   : > { %12945 = vmatprep.mubr.bf16.mxu1 %v15010_v51  ;;  %5567 = vst [vmem:[#allocation2 + $0xb9] sm:$0x1] %v15293_v53  ;;  %5568 = vst [vmem:[#allocation2 + $0xd1] sm:$0x1] %v15293_v53 }
 0x15b   : > { %v4611_v51 = vsel %vm15773_vm5, %v17094_v20, %v19236_v27  ;;  %v19250_v20 = vcombine.low %v16967_v46, %v19249_v21  ;;  %v213_v46 = vld [vmem:[%s19007_s3] sm:$0xff]  ;;  %5569 = vst [vmem:[#allocation2 + $0xe9] sm:$0x1] %v15293_v53  ;;  %5570 = vst [vmem:[#allocation2 + $0x101] sm:$0x1] %v15293_v53 }
 0x15c   : > { %v11833_v61 = vcombine.low %v4608_v31, %v4611_v51  ;;  %5571 = vst [vmem:[#allocation2 + $0x119] sm:$0x1] %v15293_v53  ;;  %5572 = vst [vmem:[#allocation2 + $0x131] sm:$0x1] %v15293_v53  ;;  %v17507_v21 = vld [vmem:[%s19007_s3 + $0x80] sm:$0xff] }
 0x15d   : > { %5573 = vst [vmem:[#allocation2 + $0x149] sm:$0x1] %v15293_v53  ;;  %5574 = vst [vmem:[#allocation2 + $0x161] sm:$0x1] %v15293_v53 }
 0x15e   : > { %13134 = vmatmul.mubr.bf16.gmra.mrb[24].mxu0 %v11789_v23  ;;  %v19244_v23 = vld [vmem:[#allocation21_spill] sm:$0xff]  ;;  %5575 = vst [vmem:[#allocation2 + $0x179] sm:$0x1] %v15293_v53  ;;  %5576 = vst [vmem:[#allocation2 + $0x191] sm:$0x1] %v15293_v53 }
 0x15f   : > { %13137 = vmatprep.mubr.bf16.mxu0 %v11790_v59  ;;  %v19245_v59 = vcombine.low %v19243_v40, %v19244_v23  ;;  %v5031_v40 = vlaneseq }
 0x161   : > { %12946 = vmatmul.mubr.bf16.gmra.mrb[28].mxu1 %v15011_v17  ;;  %v19246_v17 = vld [vmem:[#allocation10_spill] sm:$0xff] }
 0x162   : > { %v19248_v24 = vcombine.low %v19246_v17, %v19247_v44  ;;  %13221 = vmatprep.mubr.msk.f32.mxu1 %vm15292_vm6, %v15293_v53  ;;  %v17499_v44 = vshrl.u32 %v5031_v40, 7 }
 0x166   : > { %13138 = vmatmul.mubr.bf16.gmra.mrb[28].mxu0 %v11791_v45 }
 0x167   : > { %13157 = vmatprep.mubr.bf16.mxu0 %v11832_v5 }
 0x16e   : > { %13158 = vmatmul.mubr.bf16.vlgmr.msra.gmra.mrb[0].mxu0 %v11833_v61 }
 0x16f   : > { %13161 = vmatprep.mubr.bf16.mxu0 %v19239_v47 }
 0x176   : > { %13162 = vmatmul.mubr.bf16.gmra.mrb[4].mxu0 %v19242_v4 }
 0x177   : > { %13165 = vmatprep.mubr.bf16.mxu0 %v19245_v59 }
 0x17e   : > { %13166 = vmatmul.mubr.bf16.gmra.mrb[8].mxu0 %v19248_v24  ;;  %v17502_v24 = vsub.s32 0, %v17499_v44 }
 0x17f   : > { %13169 = vmatprep.mubr.bf16.mxu0 %v19250_v20 }
 0x180   : > { %19253 = vst [vmem:[#allocation11_spill] sm:$0xff] %v17502_v24  ;;  %v17511_v20 = vrot.slane %v17507_v21, %v17502_v24 }
 0x186   : > { %13170 = vmatmul.mubr.bf16.gmra.mrb[12].mxu0 %v11839_v43  ;;  %v17302_v43 = vpack.c.bf16 %v214_v39, %v213_v46 }
 0x187   : > { %13173 = vmatprep.mubr.bf16.mxu0 %v11840_v6  ;;  %v218_v6 = vld [vmem:[%s19007_s3 + $0x28] sm:$0xff] }
 0x188   : > { %14155 = vmatpush3.bf16.msra.mxu1 %v17302_v43  ;;  %14203 = vmatpush3.bf16.msra.mxu0 %v17302_v43  ;;  %v17327_v28 = vpack.c.bf16 %v218_v6, %v217_v48 }
 0x189   : > { %14156 = vmatprep.subr.bf16.mxu1 %v19061_v41  ;;  %14204 = vmatprep.subr.bf16.mxu0 %v19061_v41 }
 0x18c   : > { %14158 = vmatpush3.bf16.msra.mxu1 %v17315_v8  ;;  %14206 = vmatpush3.bf16.msra.mxu0 %v17315_v8 }
 0x18d   : > { %14159 = vmatprep.subr.bf16.mxu1 %v19061_v41  ;;  %14207 = vmatprep.subr.bf16.mxu0 %v19061_v41 }
 0x18e   : > { %13174 = vmatmul.mubr.bf16.gmra.mrb[16].mxu0 %v11841_v42  ;;  %v219_v42 = vld [vmem:[%s19007_s3 + $0x30] sm:$0xff] }
 0x18f   : > { %13177 = vmatprep.mubr.bf16.mxu0 %v19251_v3  ;;  %v17339_v33 = vpack.c.bf16 %v220_v22, %v219_v42 }
 0x190   : > { %14161 = vmatpush3.bf16.msra.mxu1 %v17327_v28  ;;  %14209 = vmatpush3.bf16.msra.mxu0 %v17327_v28 }
 0x191   : > { %14162 = vmatprep.subr.bf16.mxu1 %v19061_v41  ;;  %14210 = vmatprep.subr.bf16.mxu0 %v19061_v41 }
 0x194   : > { %14164 = vmatpush3.bf16.msra.mxu1 %v17339_v33  ;;  %14212 = vmatpush3.bf16.msra.mxu0 %v17339_v33 }
 0x195   : > { %14165 = vmatprep.subr.bf16.mxu1 %v19061_v41  ;;  %14213 = vmatprep.subr.bf16.mxu0 %v19061_v41 }
 0x196   : > { %13178 = vmatmul.mubr.bf16.gmra.mrb[20].mxu0 %v11843_v15 }
 0x197   : > { %13181 = vmatprep.mubr.bf16.mxu0 %v11844_v12  ;;  %v17359_v12 = vpack.c.bf16 %v222_v25, %v221_v18 }
 0x199   : > { %14167 = vmatpush3.bf16.msra.mxu1 %v17359_v12  ;;  %14215 = vmatpush3.bf16.msra.mxu0 %v17359_v12 }
 0x19a   : > { %14168 = vmatprep.subr.bf16.mxu1 %v19061_v41  ;;  %14216 = vmatprep.subr.bf16.mxu0 %v19061_v41 }
 0x19e   : > { %13182 = vmatmul.mubr.bf16.gmra.mrb[24].mxu0 %v11845_v30 }
 0x19f   : > { %13185 = vmatprep.mubr.bf16.mxu0 %v11846_v37  ;;  %v224_v37 = vld [vmem:[%s19007_s3 + $0x58] sm:$0xff] }
 0x1a6   : > { %13186 = vmatmul.mubr.bf16.gmra.mrb[28].mxu0 %v11847_v1  ;;  %v17379_v1 = vpack.c.bf16 %v224_v37, %v223_v7 }
 0x1a7   : > { %13731 = vmatprep.mubr.msk.f32.mxu0 %vm15292_vm6, %v15293_v53 }
 0x1a8   : > { %14170 = vmatpush3.bf16.msra.mxu1 %v17379_v1  ;;  %14218 = vmatpush3.bf16.msra.mxu0 %v17379_v1 }
 0x1a9   : > { %14171 = vmatprep.subr.bf16.mxu1 %v19061_v41  ;;  %14219 = vmatprep.subr.bf16.mxu0 %v19061_v41 }
 0x1ac   : > { %14173 = vmatpush3.bf16.msra.mxu1 %v17391_v13  ;;  %14221 = vmatpush3.bf16.msra.mxu0 %v17391_v13 }
 0x1ad   : > { %14174 = vmatprep.subr.bf16.mxu1 %v19061_v41  ;;  %14222 = vmatprep.subr.bf16.mxu0 %v19061_v41 }
 0x1b0   : > { %14176 = vmatpush3.bf16.msra.mxu1 %v17408_v55  ;;  %14224 = vmatpush3.bf16.msra.mxu0 %v17408_v55 }
 0x1b1   : > { %14177 = vmatprep.subr.bf16.mxu1 %v19061_v41  ;;  %14225 = vmatprep.subr.bf16.mxu0 %v19061_v41 }
 0x1fc   : > { %v17345_v62 = vpop.f32.mrb[0].mxu1 }
 0x1fd   : > { %v17347_v15 = vpop.f32.mrb[1].mxu1 }
 0x1fe   : > { %v17349_v57 = vpop.f32.mrb[2].mxu1 }
 0x1ff   : > { %v17351_v38 = vpop.f32.mrb[3].mxu1 }
 0x204   : > { %v17365_v36 = vpop.f32.mrb[4].mxu1 }
 0x205   : > { %v17367_v30 = vpop.f32.mrb[5].mxu1 }
 0x206   : > { %v17369_v52 = vpop.f32.mrb[6].mxu1 }
 0x207   : > { %v17377_v58 = vpop.f32.mrb[7].mxu1 }
 0x20c   : > { %v17393_v29 = vpop.f32.mrb[8].mxu1 }
 0x20d   : > { %v17395_v2 = vpop.f32.mrb[9].mxu1 }
 0x20e   : > { %v17405_v26 = vpop.f32.mrb[10].mxu1 }
 0x20f   : > { %v17450_v60 = vpop.f32.mrb[11].mxu1 }
 0x214   : > { %v17459_v14 = vpop.f32.mrb[12].mxu1 }
 0x215   : > { %v17461_v45 = vpop.f32.mrb[13].mxu1 }
 0x216   : > { %v17463_v5 = vpop.f32.mrb[14].mxu1 }
 0x217   : > { %v17465_v35 = vpop.f32.mrb[15].mxu1 }
 0x21c   : > { %v17467_v34 = vpop.f32.mrb[16].mxu1 }
 0x21d   : > { %v17469_v32 = vpop.f32.mrb[17].mxu1 }
 0x21e   : > { %v17471_v31 = vpop.f32.mrb[18].mxu1 }
 0x21f   : > { %v17473_v16 = vpop.f32.mrb[19].mxu1 }
 0x224   : > { %v17475_v27 = vpop.f32.mrb[20].mxu1 }
 0x225   : > { %v17477_v51 = vpop.f32.mrb[21].mxu1 }
 0x226   : > { %v17479_v61 = vpop.f32.mrb[22].mxu1 }
 0x227   : > { %v17481_v11 = vpop.f32.mrb[23].mxu1 }
 0x22c   : > { %v17483_v9 = vpop.f32.mrb[24].mxu1 }
 0x22d   : > { %v17485_v47 = vpop.f32.mrb[25].mxu1 }
 0x22e   : > { %v17487_v54 = vpop.f32.mrb[26].mxu1 }
 0x22f   : > { %v17489_v63 = vpop.f32.mrb[27].mxu1 }
 0x234   : > { %v17491_v4 = vpop.f32.mrb[28].mxu1 }
 0x235   : > { %v17493_v23 = vpop.f32.mrb[29].mxu1 }
 0x236   : > { %v17495_v59 = vpop.f32.mrb[30].mxu1 }
 0x237   : > { %v17497_v17 = vpop.f32.mrb[31].mxu1 }
 0x241   : > { %v13159_v3 = vpop.f32.mrb[0].mxu0 }
 0x242   : > { %v14249_v46 = vadd.f32 %v13159_v3, %v17345_v62  ;;  %v4872_v39 = vpop.f32.mrb[1].mxu0 }
 0x243   : > { %v14250_v19 = vadd.f32 %v4872_v39, %v17347_v15  ;;  %v13160_v0 = vpop.f32.mrb[2].mxu0 }
 0x244   : > { %v5037_v48 = vadd.f32 %v14249_v46, %v17511_v20  ;;  %v14251_v6 = vadd.f32 %v13160_v0, %v17349_v57  ;;  %v4875_v42 = vpop.f32.mrb[3].mxu0 }
 0x245   : > { %v5035_v22 = vadd.f32 %v14250_v19, %v17511_v20  ;;  %v14252_v18 = vadd.f32 %v4875_v42, %v17351_v38 }
 0x246   : > { %v5038_v25 = vadd.f32 %v14251_v6, %v17511_v20  ;;  %v17523_v62 = vmax.f32 %v5037_v48, 0.0 }
 0x247   : > { %v17520_v7 = vmax.f32 %v5035_v22, 0.0  ;;  %v5036_v37 = vadd.f32 %v14252_v18, %v17511_v20 }
 0x248   : > { %v17527_v49 = vmax.f32 %v5038_v25, 0.0  ;;  %v5138_v39 = vmul.f32 %v17523_v62, %v17523_v62 }
 0x249   : > { %v17525_v50 = vmax.f32 %v5036_v37, 0.0  ;;  %v13163_v15 = vpop.f32.mrb[4].mxu0  ;;  %v5136_v10 = vmul.f32 %v17520_v7, %v17520_v7 }
 0x24a   : > { %v14253_v57 = vadd.f32 %v13163_v15, %v17365_v36  ;;  %v4888_v56 = vpop.f32.mrb[5].mxu0  ;;  %v5139_v18 = vmul.f32 %v17527_v49, %v17527_v49 }
 0x24b   : > { %v5099_v38 = vadd.f32 %v17525_v50, %v17520_v7  ;;  %v5137_v40 = vmul.f32 %v17525_v50, %v17525_v50  ;;  %v14254_v3 = vadd.f32 %v4888_v56, %v17367_v30  ;;  %v13164_v46 = vpop.f32.mrb[6].mxu0 }
 0x24c   : > { %v5041_v19 = vadd.f32 %v14253_v57, %v17511_v20  ;;  %v14255_v36 = vadd.f32 %v13164_v46, %v17369_v52  ;;  %v4891_v0 = vpop.f32.mrb[7].mxu0 }
 0x24d   : > { %v5100_v48 = vadd.f32 %v5099_v38, %v17523_v62  ;;  %v5168_v6 = vadd.f32 %v5137_v40, %v5136_v10  ;;  %v5039_v42 = vadd.f32 %v14254_v3, %v17511_v20  ;;  %v14256_v22 = vadd.f32 %v4891_v0, %v17377_v58 }
 0x24e   : > { %v5042_v30 = vadd.f32 %v14255_v36, %v17511_v20  ;;  %v17551_v57 = vmax.f32 %v5041_v19, 0.0 }
 0x24f   : > { %v5169_v25 = vadd.f32 %v5168_v6, %v5138_v39  ;;  %v17547_v37 = vmax.f32 %v5039_v42, 0.0  ;;  %v5101_v15 = vadd.f32 %v5100_v48, %v17527_v49  ;;  %v5040_v52 = vadd.f32 %v14256_v22, %v17511_v20 }
 0x250   : > { %v17558_v3 = vmax.f32 %v5042_v30, 0.0  ;;  %v5142_v42 = vmul.f32 %v17551_v57, %v17551_v57 }
 0x251   : > { %v5102_v56 = vadd.f32 %v5101_v15, %v17547_v37  ;;  %v5140_v10 = vmul.f32 %v17547_v37, %v17547_v37  ;;  %v5170_v58 = vadd.f32 %v5169_v25, %v5139_v18  ;;  %v17556_v38 = vmax.f32 %v5040_v52, 0.0  ;;  %v13167_v40 = vpop.f32.mrb[8].mxu0 }
 0x252   : > { %v14257_v46 = vadd.f32 %v13167_v40, %v17393_v29  ;;  %v4904_v39 = vpop.f32.mrb[9].mxu0 }
 0x253   : > { %v5171_v36 = vadd.f32 %v5170_v58, %v5140_v10  ;;  %v5103_v0 = vadd.f32 %v5102_v56, %v17556_v38  ;;  %v5141_v19 = vmul.f32 %v17556_v38, %v17556_v38  ;;  %v14258_v48 = vadd.f32 %v4904_v39, %v17395_v2  ;;  %v13168_v6 = vpop.f32.mrb[10].mxu0 }
 0x254   : > { %v5045_v22 = vadd.f32 %v14257_v46, %v17511_v20  ;;  %v14259_v18 = vadd.f32 %v13168_v6, %v17405_v26  ;;  %v4907_v30 = vpop.f32.mrb[11].mxu0  ;;  %v5143_v56 = vmul.f32 %v17558_v3, %v17558_v3 }
 0x255   : > { %v5104_v29 = vadd.f32 %v5103_v0, %v17551_v57  ;;  %v5172_v25 = vadd.f32 %v5171_v36, %v5141_v19  ;;  %v5043_v15 = vadd.f32 %v14258_v48, %v17511_v20  ;;  %v14260_v52 = vadd.f32 %v4907_v30, %v17450_v60 }
 0x256   : > { %v5046_v2 = vadd.f32 %v14259_v18, %v17511_v20  ;;  %v17579_v46 = vmax.f32 %v5045_v22, 0.0 }
 0x257   : > { %v5173_v10 = vadd.f32 %v5172_v25, %v5142_v42  ;;  %v17575_v58 = vmax.f32 %v5043_v15, 0.0  ;;  %v5105_v40 = vadd.f32 %v5104_v29, %v17558_v3  ;;  %v5044_v26 = vadd.f32 %v14260_v52, %v17511_v20 }
 0x258   : > { %v17586_v48 = vmax.f32 %v5046_v2, 0.0  ;;  %v5146_v15 = vmul.f32 %v17579_v46, %v17579_v46 }
 0x259   : > { %v5106_v39 = vadd.f32 %v5105_v40, %v17575_v58  ;;  %v5144_v36 = vmul.f32 %v17575_v58, %v17575_v58  ;;  %v5174_v60 = vadd.f32 %v5173_v10, %v5143_v56  ;;  %v17584_v0 = vmax.f32 %v5044_v26, 0.0  ;;  %v13171_v19 = vpop.f32.mrb[12].mxu0 }
 0x25a   : > { %v14261_v6 = vadd.f32 %v13171_v19, %v17459_v14  ;;  %v4920_v42 = vpop.f32.mrb[13].mxu0 }
 0x25b   : > { %v5175_v18 = vadd.f32 %v5174_v60, %v5144_v36  ;;  %v5107_v30 = vadd.f32 %v5106_v39, %v17584_v0  ;;  %v5145_v22 = vmul.f32 %v17584_v0, %v17584_v0  ;;  %v14262_v29 = vadd.f32 %v4920_v42, %v17461_v45  ;;  %v13172_v25 = vpop.f32.mrb[14].mxu0 }
 0x25c   : > { %v5049_v52 = vadd.f32 %v14261_v6, %v17511_v20  ;;  %v14263_v56 = vadd.f32 %v13172_v25, %v17463_v5  ;;  %v4923_v2 = vpop.f32.mrb[15].mxu0  ;;  %v5147_v39 = vmul.f32 %v17586_v48, %v17586_v48 }
 0x25d   : > { %v5108_v14 = vadd.f32 %v5107_v30, %v17579_v46  ;;  %v5176_v10 = vadd.f32 %v5175_v18, %v5145_v22  ;;  %v5047_v40 = vadd.f32 %v14262_v29, %v17511_v20  ;;  %v14264_v26 = vadd.f32 %v4923_v2, %v17465_v35 }
 0x25e   : > { %v5050_v45 = vadd.f32 %v14263_v56, %v17511_v20  ;;  %v17607_v6 = vmax.f32 %v5049_v52, 0.0 }
 0x25f   : > { %v5177_v36 = vadd.f32 %v5176_v10, %v5146_v15  ;;  %v17603_v60 = vmax.f32 %v5047_v40, 0.0  ;;  %v5109_v19 = vadd.f32 %v5108_v14, %v17586_v48  ;;  %v5048_v5 = vadd.f32 %v14264_v26, %v17511_v20 }
 0x260   : > { %v17614_v29 = vmax.f32 %v5050_v45, 0.0  ;;  %v5150_v40 = vmul.f32 %v17607_v6, %v17607_v6 }
 0x261   : > { %v5110_v42 = vadd.f32 %v5109_v19, %v17603_v60  ;;  %v5148_v18 = vmul.f32 %v17603_v60, %v17603_v60  ;;  %v5178_v35 = vadd.f32 %v5177_v36, %v5147_v39  ;;  %v17612_v30 = vmax.f32 %v5048_v5, 0.0  ;;  %v13175_v22 = vpop.f32.mrb[16].mxu0 }
 0x262   : > { %v14265_v25 = vadd.f32 %v13175_v22, %v17467_v34  ;;  %v4936_v15 = vpop.f32.mrb[17].mxu0 }
 0x263   : > { %v5179_v56 = vadd.f32 %v5178_v35, %v5148_v18  ;;  %v5111_v2 = vadd.f32 %v5110_v42, %v17612_v30  ;;  %v5149_v52 = vmul.f32 %v17612_v30, %v17612_v30  ;;  %v14266_v14 = vadd.f32 %v4936_v15, %v17469_v32  ;;  %v13176_v10 = vpop.f32.mrb[18].mxu0 }
 0x264   : > { %v5053_v26 = vadd.f32 %v14265_v25, %v17511_v20  ;;  %v14267_v39 = vadd.f32 %v13176_v10, %v17471_v31  ;;  %v4939_v45 = vpop.f32.mrb[19].mxu0  ;;  %v5151_v42 = vmul.f32 %v17614_v29, %v17614_v29 }
 0x265   : > { %v5112_v34 = vadd.f32 %v5111_v2, %v17607_v6  ;;  %v5180_v36 = vadd.f32 %v5179_v56, %v5149_v52  ;;  %v5051_v19 = vadd.f32 %v14266_v14, %v17511_v20  ;;  %v14268_v5 = vadd.f32 %v4939_v45, %v17473_v16 }
 0x266   : > { %v5054_v32 = vadd.f32 %v14267_v39, %v17511_v20  ;;  %v17635_v25 = vmax.f32 %v5053_v26, 0.0 }
 0x267   : > { %v5181_v18 = vadd.f32 %v5180_v36, %v5150_v40  ;;  %v17631_v35 = vmax.f32 %v5051_v19, 0.0  ;;  %v5113_v22 = vadd.f32 %v5112_v34, %v17614_v29  ;;  %v5052_v31 = vadd.f32 %v14268_v5, %v17511_v20 }
 0x268   : > { %v17642_v14 = vmax.f32 %v5054_v32, 0.0  ;;  %v5154_v19 = vmul.f32 %v17635_v25, %v17635_v25 }
 0x269   : > { %v5114_v15 = vadd.f32 %v5113_v22, %v17631_v35  ;;  %v5152_v56 = vmul.f32 %v17631_v35, %v17631_v35  ;;  %v5182_v16 = vadd.f32 %v5181_v18, %v5151_v42  ;;  %v17640_v2 = vmax.f32 %v5052_v31, 0.0  ;;  %v13179_v52 = vpop.f32.mrb[20].mxu0 }
 0x26a   : > { %v14269_v10 = vadd.f32 %v13179_v52, %v17475_v27  ;;  %v4952_v40 = vpop.f32.mrb[21].mxu0 }
 0x26b   : > { %v5183_v39 = vadd.f32 %v5182_v16, %v5152_v56  ;;  %v5115_v45 = vadd.f32 %v5114_v15, %v17640_v2  ;;  %v5153_v26 = vmul.f32 %v17640_v2, %v17640_v2  ;;  %v14270_v34 = vadd.f32 %v4952_v40, %v17477_v51  ;;  %v13180_v36 = vpop.f32.mrb[22].mxu0 }
 0x26c   : > { %v5057_v5 = vadd.f32 %v14269_v10, %v17511_v20  ;;  %v14271_v42 = vadd.f32 %v13180_v36, %v17479_v61  ;;  %v4955_v32 = vpop.f32.mrb[23].mxu0  ;;  %v5155_v15 = vmul.f32 %v17642_v14, %v17642_v14 }
 0x26d   : > { %v5116_v27 = vadd.f32 %v5115_v45, %v17635_v25  ;;  %v5184_v18 = vadd.f32 %v5183_v39, %v5153_v26  ;;  %v5055_v22 = vadd.f32 %v14270_v34, %v17511_v20  ;;  %v14272_v31 = vadd.f32 %v4955_v32, %v17481_v11 }
 0x26e   : > { %v17662_v10 = vmax.f32 %v5057_v5, 0.0  ;;  %v5058_v61 = vadd.f32 %v14271_v42, %v17511_v20 }
 0x26f   : > { %v5185_v51 = vadd.f32 %v5184_v18, %v5154_v19  ;;  %v17658_v56 = vmax.f32 %v5055_v22, 0.0  ;;  %v5117_v16 = vadd.f32 %v5116_v27, %v17642_v14  ;;  %v5056_v52 = vadd.f32 %v14272_v31, %v17511_v20 }
 0x270   : > { %v5158_v18 = vmul.f32 %v17662_v10, %v17662_v10  ;;  %v17677_v22 = vmax.f32 %v5058_v61, 0.0 }
 0x271   : > { %v5118_v40 = vadd.f32 %v5117_v16, %v17658_v56  ;;  %v5156_v39 = vmul.f32 %v17658_v56, %v17658_v56  ;;  %v5186_v11 = vadd.f32 %v5185_v51, %v5155_v15  ;;  %v17668_v45 = vmax.f32 %v5056_v52, 0.0  ;;  %v13183_v26 = vpop.f32.mrb[24].mxu0 }
 0x272   : > { %v14273_v34 = vadd.f32 %v13183_v26, %v17483_v9  ;;  %v4968_v36 = vpop.f32.mrb[25].mxu0 }
 0x273   : > { %v5187_v19 = vadd.f32 %v5186_v11, %v5156_v39  ;;  %v5119_v32 = vadd.f32 %v5118_v40, %v17668_v45  ;;  %v5157_v5 = vmul.f32 %v17668_v45, %v17668_v45  ;;  %v14274_v42 = vadd.f32 %v4968_v36, %v17485_v47  ;;  %v13184_v27 = vpop.f32.mrb[26].mxu0 }
 0x274   : > { %v14275_v31 = vadd.f32 %v13184_v27, %v17487_v54  ;;  %v4971_v15 = vpop.f32.mrb[27].mxu0  ;;  %v5061_v40 = vadd.f32 %v14273_v34, %v17511_v20  ;;  %v5159_v54 = vmul.f32 %v17677_v22, %v17677_v22 }
 0x275   : > { %v5120_v9 = vadd.f32 %v5119_v32, %v17662_v10  ;;  %v5188_v51 = vadd.f32 %v5187_v19, %v5157_v5  ;;  %v5059_v16 = vadd.f32 %v14274_v42, %v17511_v20  ;;  %v14276_v52 = vadd.f32 %v4971_v15, %v17489_v63 }
 0x276   : > { %v5062_v36 = vadd.f32 %v14275_v31, %v17511_v20  ;;  %v17697_v27 = vmax.f32 %v5061_v40, 0.0 }
 0x277   : > { %v5189_v39 = vadd.f32 %v5188_v51, %v5158_v18  ;;  %v17684_v47 = vmax.f32 %v5059_v16, 0.0  ;;  %v5121_v11 = vadd.f32 %v5120_v9, %v17677_v22  ;;  %v5060_v61 = vadd.f32 %v14276_v52, %v17511_v20 }
 0x278   : > { %v17702_v16 = vmax.f32 %v5062_v36, 0.0 }
 0x279   : > { %v5122_v26 = vadd.f32 %v5121_v11, %v17684_v47  ;;  %v17692_v19 = vmax.f32 %v5060_v61, 0.0  ;;  %v13187_v32 = vpop.f32.mrb[28].mxu0  ;;  %v5160_v63 = vmul.f32 %v17684_v47, %v17684_v47  ;;  %v5190_v34 = vadd.f32 %v5189_v39, %v5159_v54 }
 0x27a   : > { %v14277_v5 = vadd.f32 %v13187_v32, %v17491_v4  ;;  %v4984_v42 = vpop.f32.mrb[29].mxu0 }
 0x27b   : > { %v5123_v18 = vadd.f32 %v5122_v26, %v17692_v19  ;;  %v14278_v15 = vadd.f32 %v4984_v42, %v17493_v23  ;;  %v13188_v9 = vpop.f32.mrb[30].mxu0  ;;  %v5191_v4 = vadd.f32 %v5190_v34, %v5160_v63  ;;  %v5161_v40 = vmul.f32 %v17692_v19, %v17692_v19 }
 0x27c   : > { %v14279_v51 = vadd.f32 %v13188_v9, %v17495_v59  ;;  %v4987_v31 = vpop.f32.mrb[31].mxu0  ;;  %v5065_v61 = vadd.f32 %v14277_v5, %v17511_v20  ;;  %v5162_v34 = vmul.f32 %v17697_v27, %v17697_v27 }
 0x27d   : > { %v5124_v52 = vadd.f32 %v5123_v18, %v17697_v27  ;;  %v5063_v11 = vadd.f32 %v14278_v15, %v17511_v20  ;;  %v14280_v39 = vadd.f32 %v4987_v31, %v17497_v17  ;;  %v5192_v42 = vadd.f32 %v5191_v4, %v5161_v40 }
 0x27e   : > { %v5066_v36 = vadd.f32 %v14279_v51, %v17511_v20  ;;  %v17718_v17 = vmax.f32 %v5065_v61, 0.0 }
 0x27f   : > { %v17710_v54 = vmax.f32 %v5063_v11, 0.0  ;;  %v5125_v23 = vadd.f32 %v5124_v52, %v17702_v16  ;;  %v5064_v59 = vadd.f32 %v14280_v39, %v17511_v20  ;;  %v5193_v15 = vadd.f32 %v5192_v42, %v5162_v34 }
 0x280   : > { %v17723_v5 = vmax.f32 %v5066_v36, 0.0  ;;  %v5163_v20 = vmul.f32 %v17702_v16, %v17702_v16  ;;  %v5166_v36 = vmul.f32 %v17718_v17, %v17718_v17 }
 0x281   : > { %v5126_v26 = vadd.f32 %v5125_v23, %v17710_v54  ;;  %v17716_v32 = vmax.f32 %v5064_v59, 0.0  ;;  %v5164_v31 = vmul.f32 %v17710_v54, %v17710_v54 }
 0x282   : > { %v5194_v52 = vadd.f32 %v5193_v15, %v5163_v20 }
 0x283   : > { %v5127_v63 = vadd.f32 %v5126_v26, %v17716_v32  ;;  %v5165_v40 = vmul.f32 %v17716_v32, %v17716_v32 }
 0x284   : > { %v5195_v4 = vadd.f32 %v5194_v52, %v5164_v31  ;;  %v15013_v31 = vld [vmem:[%s19006_s2 + $0x240] sm:$0xff]  }
 0x285   : > { %v5128_v18 = vadd.f32 %v5127_v63, %v17718_v17  ;;  %v5167_v63 = vmul.f32 %v17723_v5, %v17723_v5 }
 0x286   : > { %v5196_v59 = vadd.f32 %v5195_v4, %v5165_v40  ;;  %v15015_v4 = vld [vmem:[%s19006_s2 + $0x290] sm:$0xff]   ;;  %v15016_v40 = vld [vmem:[%s19006_s2 + $0x298] sm:$0xff]  }
 0x287   : > { %v5129_v9 = vadd.f32 %v5128_v18, %v17723_v5 }
 0x288   : > { %v5197_v42 = vadd.f32 %v5196_v59, %v5166_v36  ;;  %v15020_v59 = vld [vmem:[%s19006_s2 + $0x2b8] sm:$0xff]   ;;  %v15022_v36 = vld [vmem:[%s19006_s2 + $0x2c8] sm:$0xff]  }
 0x289   : > { %v5130_v51 = vrot.slane %v5129_v9, 4 }
 0x28a   : > { %v5198_v34 = vadd.f32 %v5197_v42, %v5167_v63  ;;  %v5673_v42 = vld [vmem:[#allocation2 + $0x1] sm:$0xff]  ;;  %v5674_v63 = vld [vmem:[#allocation2 + $0x9] sm:$0xff] }
 0x28b   : > { %v5131_v11 = vadd.f32 %v5130_v51, %v5129_v9 }
 0x28c   : > { %v5199_v18 = vrot.slane %v5198_v34, 4 }
 0x28d   : > { %v5132_v39 = vrot.slane %v5131_v11, 2 }
 0x28e   : > { %v5200_v15 = vadd.f32 %v5199_v18, %v5198_v34  ;;  %v5721_v34 = vpack.c.bf16 %v5674_v63, %v5673_v42  ;;  %v17795_v18 = vld [vmem:[%s19006_s2 + $0x250] sm:$0xff]  }
 0x28f   : > { %v5133_v61 = vadd.f32 %v5132_v39, %v5131_v11  ;;  %v15014_v11 = vld [vmem:[%s19006_s2 + $0x248] sm:$0xff]   ;;  %v5431_v39 = vld [vmem:[%s206_s22] sm:$0x1]  ;;  %s211_s22 = scalar_lea.vmem %s19008_s4, %s12061_s17 }
 0x290   : > { %v5201_v9 = vrot.slane %v5200_v15, 2 }
 0x291   : > { %v5134_v23 = vrot.slane %v5133_v61, 1 }
 0x292   : > { %v5202_v20 = vadd.f32 %v5201_v9, %v5200_v15 }
 0x293   : > { %v5135_v26 = vadd.f32 %v5134_v23, %v5133_v61  ;;  %v15018_v61 = vld [vmem:[%s19006_s2 + $0x2a8] sm:$0xff]   ;;  %v15019_v23 = vld [vmem:[%s19006_s2 + $0x2b0] sm:$0xff]  }
 0x294   : > { %v5203_v51 = vrot.slane %v5202_v20, 1 }
 0x295   : > { %13222 = vmatmul.mubr.f32.vlgmr.msra.gmra.mrb[32].mxu1 %v5135_v26  ;;  %v15021_v26 = vld [vmem:[%s19006_s2 + $0x2c0] sm:$0xff]  }
 0x296   : > { %14179 = vmatpush3.bf16.msra.mxu1 %v17302_v43  ;;  %13256 = vmatprep.mubr.msk.f32.mxu1 %vm15292_vm6, %v15293_v53  ;;  %v5204_v52 = vadd.f32 %v5203_v51, %v5202_v20 }
 0x297   : > { %14180 = vmatprep.subr.bf16.mxu1 %v19061_v41 }
 0x29a   : > { %14182 = vmatpush3.bf16.msra.mxu1 %v17315_v8 }
 0x29b   : > { %14183 = vmatprep.subr.bf16.mxu1 %v19061_v41 }
 0x29e   : > { %14185 = vmatpush3.bf16.msra.mxu1 %v17327_v28 }
 0x29f   : > { %14186 = vmatprep.subr.bf16.mxu1 %v19061_v41 }
 0x2a2   : > { %14188 = vmatpush3.bf16.msra.mxu1 %v17339_v33 }
 0x2a3   : > { %14189 = vmatprep.subr.bf16.mxu1 %v19061_v41 }
 0x2a6   : > { %14191 = vmatpush3.bf16.msra.mxu1 %v17359_v12 }
 0x2a7   : > { %14192 = vmatprep.subr.bf16.mxu1 %v19061_v41 }
 0x2aa   : > { %14194 = vmatpush3.bf16.msra.mxu1 %v17379_v1 }
 0x2ab   : > { %14195 = vmatprep.subr.bf16.mxu1 %v19061_v41 }
 0x2ae   : > { %14197 = vmatpush3.bf16.msra.mxu1 %v17391_v13 }
 0x2af   : > { %14198 = vmatprep.subr.bf16.mxu1 %v19061_v41 }
 0x2b2   : > { %14200 = vmatpush3.bf16.msra.mxu1 %v17408_v55 }
 0x2b3   : > { %13259 = vmatprep.subr.bf16.mxu1 %v15293_v53 }
 0x2b5   : > { %13257 = vmatmul.mubr.f32.vlgmr.msra.gmra.mrb[34].mxu1 %v5204_v52 }
 0x2b6   : > { %13260 = vmatpush3.bf16.msra.mxu1 %v15013_v31  ;;  %13263 = vmatprep.mubr.msk.bf16.mxu1 %vm15292_vm6, %v15293_v53 }
 0x2b7   : > { %13261 = vmatprep.subr.bf16.mxu1 %v15293_v53  ;;  %v15017_v53 = vld [vmem:[%s19006_s2 + $0x2a0] sm:$0xff]  }
 0x2ba   : > { %13262 = vmatpush3.bf16.msra.mxu1 %v15014_v11 }
 0x2bb   : > { %13267 = vmatprep.subr.bf16.mxu1 %v15015_v4 }
 0x2bd   : > { %13264 = vmatmul.mubr.msk.bf16.vlgmr.msra.gmra.mrb[36].mxu1 %vm5450_vm7, %v5431_v39 }
 0x2be   : > { %13268 = vmatpush3.bf16.msra.mxu1 %v15015_v4  ;;  %13283 = vmatprep.mubr.bf16.mxu1 %v5721_v34 }
 0x2bf   : > { %13269 = vmatprep.subr.bf16.mxu1 %v15016_v40 }
 0x2c2   : > { %13270 = vmatpush3.bf16.msra.mxu1 %v15016_v40  ;;  %v5448_v40 = vrot.slane %v17507_v21, 3 }
 0x2c3   : > { %13271 = vmatprep.subr.bf16.mxu1 %v15017_v53 }
 0x2c6   : > { %13272 = vmatpush3.bf16.msra.mxu1 %v15017_v53 }
 0x2c7   : > { %13273 = vmatprep.subr.bf16.mxu1 %v15018_v61 }
 0x2ca   : > { %13274 = vmatpush3.bf16.msra.mxu1 %v15018_v61 }
 0x2cb   : > { %13275 = vmatprep.subr.bf16.mxu1 %v15019_v23 }
 0x2ce   : > { %13276 = vmatpush3.bf16.msra.mxu1 %v15019_v23 }
 0x2cf   : > { %13277 = vmatprep.subr.bf16.mxu1 %v15020_v59 }
 0x2d2   : > { %13278 = vmatpush3.bf16.msra.mxu1 %v15020_v59 }
 0x2d3   : > { %13279 = vmatprep.subr.bf16.mxu1 %v15021_v26 }
 0x2d6   : > { %13280 = vmatpush3.bf16.msra.mxu1 %v15021_v26  ;;  %v5351_v26 = vrot.slane %v17507_v21, 1 }
 0x2d7   : > { %13281 = vmatprep.subr.bf16.mxu1 %v15022_v36 }
 0x2da   : > { %13282 = vmatpush3.bf16.msra.mxu1 %v15022_v36 }
 0x2db   : > { %13315 = vmatprep.subr.bf16.mxu1 %v17795_v18 }
 0x368   : > { %v5271_v15 = vpop.f32.mrb[32].mxu1 }
 0x369   : > { %v13223_v9 = vpop.f32.mrb[33].mxu1  ;;  %v5345_v20 = vmul.f32 %v5271_v15, %v5271_v15 }
 0x388   : > { %v5341_v51 = vpop.f32.mrb[34].mxu1 }
 0x389   : > { %v5346_v31 = vsub.f32 %v5341_v51, %v5345_v20  ;;  %v13258_v52 = vpop.f32.mrb[35].mxu1  ;;  %v5397_v20 = vsub.s32 2, %v17499_v44 }
 0x38b   : > { %v5347_v11 = vmax.f32 %v5346_v31, 0.0 }
 0x38d   : > { %v5348_v39 = vadd.f32 1e-05, %v5347_v11 }
 0x38f   : > { %15215 = vrsqrt.f32 %v5348_v39 }
 0x390   : > { %v5488_v4 = vpop.f32.mrb[36].mxu1 }
 0x391   : > { %v13265_v53 = vpop.f32.mrb[37].mxu1  ;;  %v5489_v59 = vadd.f32 %v5488_v4, %v5448_v40 }
 0x392   : > { %v5491_v61 = vpop.f32.mrb[38].mxu1 }
 0x393   : > { %v13266_v23 = vpop.f32.mrb[39].mxu1  ;;  %v5494_v42 = vmax.f32 %v5489_v59, 0.0 }
 0x395   : > { %v17803_v51 = vrot.slane %v5494_v42, %v17502_v24 }
 0x399   : > { %v15216_v36 = vpop.eup %15215 }
 0x39a   : > { %v5353_v63 = vmul.f32 %v15216_v36, %v5351_v26 }
 0x39c   : > { %v5354_v34 = vmul.f32 %v5353_v63, %v5271_v15  ;;  %v5362_v9 = vrot.slane %v5353_v63, %v17502_v24 }
 0x39e   : > { %v5356_v31 = vrot.slane %v5354_v34, 6  ;;  %v5363_v52 = vmul.f32 %v5362_v9, %v17520_v7  ;;  %v5364_v11 = vmul.f32 %v5362_v9, %v17525_v50  ;;  %v5365_v39 = vmul.f32 %v5362_v9, %v17523_v62 }
 0x39f   : > { %v5366_v4 = vmul.f32 %v5362_v9, %v17527_v49  ;;  %v5367_v40 = vmul.f32 %v5362_v9, %v17547_v37  ;;  %v5368_v15 = vmul.f32 %v5362_v9, %v17556_v38  ;;  %v5369_v53 = vmul.f32 %v5362_v9, %v17551_v57 }
 0x3a0   : > { %v5358_v61 = vsub.f32 %v17507_v21, %v5356_v31  ;;  %v5370_v23 = vmul.f32 %v5362_v9, %v17558_v3  ;;  %v5371_v59 = vmul.f32 %v5362_v9, %v17575_v58  ;;  %v5372_v7 = vmul.f32 %v5362_v9, %v17584_v0 }
 0x3a1   : > { %v5373_v50 = vmul.f32 %v5362_v9, %v17579_v46  ;;  %v5374_v62 = vmul.f32 %v5362_v9, %v17586_v48  ;;  %v5375_v49 = vmul.f32 %v5362_v9, %v17603_v60  ;;  %v5376_v37 = vmul.f32 %v5362_v9, %v17612_v30 }
 0x3a2   : > { %v5398_v26 = vrot.slane %v5358_v61, %v5397_v20  ;;  %v5377_v38 = vmul.f32 %v5362_v9, %v17607_v6  ;;  %v5378_v57 = vmul.f32 %v5362_v9, %v17614_v29  ;;  %v5379_v21 = vmul.f32 %v5362_v9, %v17631_v35 }
 0x3a3   : > { %v5380_v3 = vmul.f32 %v5362_v9, %v17640_v2  ;;  %v5381_v58 = vmul.f32 %v5362_v9, %v17635_v25  ;;  %v5382_v0 = vmul.f32 %v5362_v9, %v17642_v14  ;;  %v5383_v46 = vmul.f32 %v5362_v9, %v17658_v56 }
 0x3a4   : > { %v5384_v48 = vmul.f32 %v5362_v9, %v17668_v45  ;;  %v5385_v60 = vmul.f32 %v5362_v9, %v17662_v10  ;;  %v5386_v30 = vmul.f32 %v5362_v9, %v17677_v22  ;;  %v5387_v6 = vmul.f32 %v5362_v9, %v17684_v47 }
 0x3a5   : > { %v5388_v29 = vmul.f32 %v5362_v9, %v17692_v19  ;;  %v5389_v35 = vmul.f32 %v5362_v9, %v17697_v27  ;;  %v5390_v2 = vmul.f32 %v5362_v9, %v17702_v16  ;;  %v5391_v25 = vmul.f32 %v5362_v9, %v17710_v54 }
 0x3a6   : > { %v5392_v14 = vmul.f32 %v5362_v9, %v17716_v32  ;;  %v5393_v56 = vmul.f32 %v5362_v9, %v17718_v17  ;;  %v5394_v45 = vmul.f32 %v5362_v9, %v17723_v5  ;;  %v5399_v36 = vadd.f32 %v5398_v26, %v5363_v52 }
 0x3a7   : > { %v5400_v10 = vadd.f32 %v5398_v26, %v5364_v11  ;;  %v5401_v42 = vadd.f32 %v5398_v26, %v5365_v39  ;;  %v5402_v22 = vadd.f32 %v5398_v26, %v5366_v4  ;;  %v5403_v63 = vadd.f32 %v5398_v26, %v5367_v40 }
 0x3a8   : > { %v5404_v47 = vadd.f32 %v5398_v26, %v5368_v15  ;;  %v5405_v34 = vadd.f32 %v5398_v26, %v5369_v53  ;;  %v5406_v19 = vadd.f32 %v5398_v26, %v5370_v23  ;;  %v5407_v20 = vadd.f32 %v5398_v26, %v5371_v59 }
 0x3a9   : > { %v5408_v27 = vadd.f32 %v5398_v26, %v5372_v7  ;;  %v5409_v31 = vadd.f32 %v5398_v26, %v5373_v50  ;;  %v5410_v16 = vadd.f32 %v5398_v26, %v5374_v62  ;;  %v5411_v61 = vadd.f32 %v5398_v26, %v5375_v49 }
 0x3aa   : > { %v5412_v54 = vadd.f32 %v5398_v26, %v5376_v37  ;;  %v5413_v41 = vadd.f32 %v5398_v26, %v5377_v38  ;;  %v5414_v32 = vadd.f32 %v5398_v26, %v5378_v57  ;;  %v5415_v24 = vadd.f32 %v5398_v26, %v5379_v21 }
 0x3ab   : > { %v5416_v17 = vadd.f32 %v5398_v26, %v5380_v3  ;;  %v5417_v55 = vadd.f32 %v5398_v26, %v5381_v58  ;;  %v5418_v5 = vadd.f32 %v5398_v26, %v5382_v0  ;;  %v5419_v9 = vadd.f32 %v5398_v26, %v5383_v46 }
 0x3ac   : > { %v5420_v52 = vadd.f32 %v5398_v26, %v5384_v48  ;;  %v5421_v11 = vadd.f32 %v5398_v26, %v5385_v60  ;;  %v5422_v39 = vadd.f32 %v5398_v26, %v5386_v30  ;;  %v5423_v4 = vadd.f32 %v5398_v26, %v5387_v6 }
 0x3ad   : > { %v5424_v40 = vadd.f32 %v5398_v26, %v5388_v29  ;;  %v5425_v15 = vadd.f32 %v5398_v26, %v5389_v35  ;;  %v5426_v53 = vadd.f32 %v5398_v26, %v5390_v2  ;;  %v5427_v23 = vadd.f32 %v5398_v26, %v5391_v25 }
 0x3ae   : > { %v5428_v59 = vadd.f32 %v5398_v26, %v5392_v14  ;;  %v5429_v7 = vadd.f32 %v5398_v26, %v5393_v56  ;;  %v5430_v50 = vadd.f32 %v5398_v26, %v5394_v45  ;;  %v5499_v62 = vadd.f32 %v17803_v51, %v5399_v36 }
 0x3af   : > { %v5500_v49 = vadd.f32 %v17803_v51, %v5400_v10  ;;  %v5501_v37 = vadd.f32 %v17803_v51, %v5401_v42  ;;  %v5502_v38 = vadd.f32 %v17803_v51, %v5402_v22  ;;  %v5503_v57 = vadd.f32 %v17803_v51, %v5403_v63 }
 0x3b0   : > { %v5504_v21 = vadd.f32 %v17803_v51, %v5404_v47  ;;  %v5505_v3 = vadd.f32 %v17803_v51, %v5405_v34  ;;  %v5506_v58 = vadd.f32 %v17803_v51, %v5406_v19  ;;  %v5507_v0 = vadd.f32 %v17803_v51, %v5407_v20  ;;  %5577 = vst [vmem:[#allocation2 + $0x19] sm:$0xff] %v5499_v62  ;;  %v15024_v20 = vld [vmem:[%s19006_s2 + $0x258] sm:$0xff]  }
 0x3b1   : > { %v5508_v26 = vadd.f32 %v17803_v51, %v5408_v27  ;;  %v5509_v46 = vadd.f32 %v17803_v51, %v5409_v31  ;;  %v5510_v48 = vadd.f32 %v17803_v51, %v5410_v16  ;;  %v5511_v60 = vadd.f32 %v17803_v51, %v5411_v61  ;;  %5578 = vst [vmem:[#allocation2 + $0x21] sm:$0xff] %v5500_v49 }
 0x3b2   : > { %5579 = vst [vmem:[#allocation2 + $0x31] sm:$0xff] %v5501_v37  ;;  %5580 = vst [vmem:[#allocation2 + $0x39] sm:$0xff] %v5502_v38  ;;  %v5512_v30 = vadd.f32 %v17803_v51, %v5412_v54  ;;  %v5513_v6 = vadd.f32 %v17803_v51, %v5413_v41  ;;  %v5514_v29 = vadd.f32 %v17803_v51, %v5414_v32 }
 0x3b3   : > { %5581 = vst [vmem:[#allocation2 + $0x49] sm:$0xff] %v5503_v57  ;;  %v5515_v35 = vadd.f32 %v17803_v51, %v5415_v24  ;;  %5582 = vst [vmem:[#allocation2 + $0x51] sm:$0xff] %v5504_v21  ;;  %v5516_v2 = vadd.f32 %v17803_v51, %v5416_v17  ;;  %v17857_v25 = vadd.f32 %v17803_v51, %v5417_v55 }
 0x3b4   : > { %5583 = vst [vmem:[#allocation2 + $0x61] sm:$0xff] %v5505_v3  ;;  %5584 = vst [vmem:[#allocation2 + $0x69] sm:$0xff] %v5506_v58  ;;  %v17860_v14 = vadd.f32 %v17803_v51, %v5418_v5  ;;  %v17863_v56 = vadd.f32 %v17803_v51, %v5419_v9  ;;  %v17866_v41 = vadd.f32 %v17803_v51, %v5420_v52 }
 0x3b5   : > { %5585 = vst [vmem:[#allocation2 + $0x79] sm:$0xff] %v5507_v0  ;;  %5586 = vst [vmem:[#allocation2 + $0x81] sm:$0xff] %v5508_v26  ;;  %v17869_v24 = vadd.f32 %v17803_v51, %v5421_v11  ;;  %v17872_v45 = vadd.f32 %v17803_v51, %v5422_v39  ;;  %v17875_v55 = vadd.f32 %v17803_v51, %v5423_v4  ;;  %v15025_v11 = vld [vmem:[%s19006_s2 + $0x260] sm:$0xff]  }
 0x3b6   : > { %5587 = vst [vmem:[#allocation2 + $0x91] sm:$0xff] %v5509_v46  ;;  %5588 = vst [vmem:[#allocation2 + $0x99] sm:$0xff] %v5510_v48  ;;  %v17878_v36 = vadd.f32 %v17803_v51, %v5424_v40  ;;  %v17881_v10 = vadd.f32 %v17803_v51, %v5425_v15  ;;  %v17884_v42 = vadd.f32 %v17803_v51, %v5426_v53  ;;  %v15026_v40 = vld [vmem:[%s19006_s2 + $0x268] sm:$0xff]   ;;  %v15027_v15 = vld [vmem:[%s19006_s2 + $0x270] sm:$0xff]  }
 0x3b7   : > { %5589 = vst [vmem:[#allocation2 + $0xa9] sm:$0xff] %v5511_v60  ;;  %5590 = vst [vmem:[#allocation2 + $0xb1] sm:$0xff] %v5512_v30  ;;  %v17887_v22 = vadd.f32 %v17803_v51, %v5427_v23  ;;  %v17893_v63 = vadd.f32 %v17803_v51, %v5428_v59  ;;  %v5529_v47 = vadd.f32 %v17803_v51, %v5429_v7  ;;  %v15028_v53 = vld [vmem:[%s19006_s2 + $0x278] sm:$0xff]   ;;  %v15029_v23 = vld [vmem:[%s19006_s2 + $0x280] sm:$0xff]  }
 0x3b8   : > { %5591 = vst [vmem:[#allocation2 + $0xc1] sm:$0xff] %v5513_v6  ;;  %5592 = vst [vmem:[#allocation2 + $0xc9] sm:$0xff] %v5514_v29  ;;  %v5530_v34 = vadd.f32 %v17803_v51, %v5430_v50  ;;  %v17901_v19 = vpack.c.bf16 %v5500_v49, %v5499_v62  ;;  %v17910_v51 = vpack.c.bf16 %v5502_v38, %v5501_v37  ;;  %v15030_v59 = vld [vmem:[%s19006_s2 + $0x288] sm:$0xff]   ;;  %v15031_v7 = vld [vmem:[%s19006_s2 + $0x2d0] sm:$0xff]  }
 0x3b9   : > { %5593 = vst [vmem:[#allocation2 + $0xd9] sm:$0xff] %v5515_v35  ;;  %5594 = vst [vmem:[#allocation2 + $0xe1] sm:$0xff] %v5516_v2  ;;  %v17912_v27 = vpack.c.bf16 %v5504_v21, %v5503_v57  ;;  %v17914_v31 = vpack.c.bf16 %v5506_v58, %v5505_v3  ;;  %v17916_v16 = vpack.c.bf16 %v5508_v26, %v5507_v0  ;;  %v15279_v50 = vld [vmem:[#allocation2] sm:$0xff]  ;;  %v5611_v49 = vld [vmem:[#allocation2 + $0x18] sm:$0xff] }
 0x3ba   : > { %5595 = vst [vmem:[#allocation2 + $0xf1] sm:$0xff] %v17857_v25  ;;  %5596 = vst [vmem:[#allocation2 + $0xf9] sm:$0xff] %v17860_v14  ;;  %13284 = vmatmul.mubr.bf16.vlgmr.msra.gmra.mrb[40].mxu1 %v17901_v19  ;;  %v17920_v61 = vpack.c.bf16 %v5510_v48, %v5509_v46  ;;  %v17922_v54 = vpack.c.bf16 %v5512_v30, %v5511_v60  ;;  %v17924_v32 = vpack.c.bf16 %v5514_v29, %v5513_v6  ;;  %v5612_v37 = vld [vmem:[#allocation2 + $0x20] sm:$0xff]  ;;  %v5613_v38 = vld [vmem:[#allocation2 + $0x30] sm:$0xff] }
 0x3bb   : > { %5597 = vst [vmem:[#allocation2 + $0x109] sm:$0xff] %v17863_v56  ;;  %5598 = vst [vmem:[#allocation2 + $0x111] sm:$0xff] %v17866_v41  ;;  %v17926_v17 = vpack.c.bf16 %v5516_v2, %v5515_v35  ;;  %13287 = vmatprep.mubr.bf16.mxu1 %v17910_v51  ;;  %13316 = vmatpush3.bf16.msra.mxu1 %v17795_v18  ;;  %v5731_v5 = vpack.c.bf16 %v17860_v14, %v17857_v25  ;;  %v5614_v57 = vld [vmem:[#allocation2 + $0x38] sm:$0xff]  ;;  %v15033_v0 = vld [vmem:[%s19006_s2 + $0x2e0] sm:$0xff]  }
 0x3bc   : > { %5599 = vst [vmem:[#allocation2 + $0x121] sm:$0xff] %v17869_v24  ;;  %5600 = vst [vmem:[#allocation2 + $0x129] sm:$0xff] %v17872_v45  ;;  %v5732_v9 = vpack.c.bf16 %v17866_v41, %v17863_v56  ;;  %v5733_v52 = vpack.c.bf16 %v17872_v45, %v17869_v24  ;;  %13317 = vmatprep.subr.bf16.mxu1 %v15024_v20  ;;  %v5734_v39 = vpack.c.bf16 %v17878_v36, %v17875_v55  ;;  %v15032_v3 = vld [vmem:[%s19006_s2 + $0x2d8] sm:$0xff]   ;;  %v5615_v26 = vld [vmem:[#allocation2 + $0x48] sm:$0xff] }
 0x3bd   : > { %5601 = vst [vmem:[#allocation2 + $0x139] sm:$0xff] %v17875_v55  ;;  %5602 = vst [vmem:[#allocation2 + $0x141] sm:$0xff] %v17878_v36  ;;  %v5735_v18 = vpack.c.bf16 %v17884_v42, %v17881_v10  ;;  %v5736_v4 = vpack.c.bf16 %v17893_v63, %v17887_v22  ;;  %v17970_v62 = vpack.c.bf16 %v15279_v50, %v15279_v50  ;;  %v5616_v46 = vld [vmem:[#allocation2 + $0x50] sm:$0xff]  ;;  %v5617_v48 = vld [vmem:[#allocation2 + $0x60] sm:$0xff] }
 0x3be   : > { %5603 = vst [vmem:[#allocation2 + $0x151] sm:$0xff] %v17881_v10  ;;  %5604 = vst [vmem:[#allocation2 + $0x159] sm:$0xff] %v17884_v42  ;;  %v17973_v21 = vpack.c.bf16 %v5612_v37, %v5611_v49  ;;  %v17978_v58 = vpack.c.bf16 %v5614_v57, %v5613_v38  ;;  %v5618_v60 = vld [vmem:[#allocation2 + $0x68] sm:$0xff]  ;;  %v17985_v30 = vpack.c.bf16 %v5616_v46, %v5615_v26  ;;  %v15035_v35 = vld [vmem:[%s19006_s2 + $0x2f0] sm:$0xff]  }
 0x3bf   : > { %5605 = vst [vmem:[#allocation2 + $0x169] sm:$0xff] %v17887_v22  ;;  %5606 = vst [vmem:[#allocation2 + $0x171] sm:$0xff] %v17893_v63  ;;  %13318 = vmatpush3.bf16.msra.mxu1 %v15024_v20  ;;  %v15034_v6 = vld [vmem:[%s19006_s2 + $0x2e8] sm:$0xff]   ;;  %v17990_v29 = vpack.c.bf16 %v5618_v60, %v5617_v48  ;;  %v5619_v2 = vld [vmem:[#allocation2 + $0x78] sm:$0xff] }
 0x3c0   : > { %5607 = vst [vmem:[#allocation2 + $0x181] sm:$0xff] %v5529_v47  ;;  %5608 = vst [vmem:[#allocation2 + $0x189] sm:$0xff] %v5530_v34  ;;  %13319 = vmatprep.subr.bf16.mxu1 %v15025_v11  ;;  %v5620_v25 = vld [vmem:[#allocation2 + $0x80] sm:$0xff]  ;;  %v5621_v14 = vld [vmem:[#allocation2 + $0x90] sm:$0xff] }
 0x3c1   : > { %v5622_v56 = vld [vmem:[#allocation2 + $0x98] sm:$0xff]  ;;  %v17997_v41 = vpack.c.bf16 %v5620_v25, %v5619_v2  ;;  %v15037_v55 = vld [vmem:[%s19006_s2 + $0x300] sm:$0xff]   ;;  %v5623_v36 = vld [vmem:[#allocation2 + $0xa8] sm:$0xff] }
 0x3c2   : > { %13288 = vmatmul.mubr.bf16.gmra.mrb[44].mxu1 %v17912_v27  ;;  %v15036_v24 = vld [vmem:[%s19006_s2 + $0x2f8] sm:$0xff]   ;;  %v18002_v45 = vpack.c.bf16 %v5622_v56, %v5621_v14  ;;  %v5624_v10 = vld [vmem:[#allocation2 + $0xb0] sm:$0xff]  ;;  %v5625_v42 = vld [vmem:[#allocation2 + $0xc0] sm:$0xff] }
 0x3c3   : > { %13291 = vmatprep.mubr.bf16.mxu1 %v17914_v31  ;;  %13320 = vmatpush3.bf16.msra.mxu1 %v15025_v11  ;;  %v5626_v22 = vld [vmem:[#allocation2 + $0xc8] sm:$0xff]  ;;  %v18009_v63 = vpack.c.bf16 %v5624_v10, %v5623_v36  ;;  %v15039_v20 = vld [vmem:[%s19006_s2 + $0x310] sm:$0xff]   ;;  %v5630_v11 = vld [vmem:[#allocation2 + $0xf8] sm:$0xff] }
 0x3c4   : > { %13321 = vmatprep.subr.bf16.mxu1 %v15026_v40  ;;  %v15038_v47 = vld [vmem:[%s19006_s2 + $0x308] sm:$0xff]   ;;  %v18014_v34 = vpack.c.bf16 %v5626_v22, %v5625_v42  ;;  %v5636_v50 = vld [vmem:[#allocation2 + $0x140] sm:$0xff]  ;;  %v6159_v2 = vld [vmem:[#allocation2 + $0x32] sm:$0xff] }
 0x3c5   : > { %v5637_v49 = vld [vmem:[#allocation2 + $0x150] sm:$0xff]  ;;  %v5638_v37 = vld [vmem:[#allocation2 + $0x158] sm:$0xff]  ;;  %v6163_v42 = vld [vmem:[#allocation2 + $0x62] sm:$0xff] }
 0x3c6   : > { %v18035_v57 = vpack.c.bf16 %v5638_v37, %v5637_v49  ;;  %v5639_v26 = vld [vmem:[#allocation2 + $0x168] sm:$0xff]  ;;  %v5640_v46 = vld [vmem:[#allocation2 + $0x170] sm:$0xff]  ;;  %v6160_v25 = vld [vmem:[#allocation2 + $0x3a] sm:$0xff] }
 0x3c7   : > { %13322 = vmatpush3.bf16.msra.mxu1 %v15026_v40  ;;  %v5632_v40 = vld [vmem:[#allocation2 + $0x110] sm:$0xff]  ;;  %v18039_v60 = vpack.c.bf16 %v5640_v46, %v5639_v26  ;;  %v15040_v56 = vld [vmem:[%s19006_s2 + $0x318] sm:$0xff]   ;;  %v15046_v46 = vld [vmem:[%s19006_s2 + $0x348] sm:$0xff]  }
 0x3c8   : > { %13323 = vmatprep.subr.bf16.mxu1 %v15027_v15  ;;  %v6161_v36 = vld [vmem:[#allocation2 + $0x4a] sm:$0xff]  ;;  %v6162_v10 = vld [vmem:[#allocation2 + $0x52] sm:$0xff] }
 0x3c9   : > { %v6164_v22 = vld [vmem:[#allocation2 + $0x6a] sm:$0xff]  ;;  %v6170_v37 = vld [vmem:[#allocation2 + $0xb2] sm:$0xff] }
 0x3ca   : > { %13292 = vmatmul.mubr.bf16.gmra.mrb[48].mxu1 %v17916_v16  ;;  %v6169_v49 = vld [vmem:[#allocation2 + $0xaa] sm:$0xff] }
 0x3cb   : > { %13295 = vmatprep.mubr.bf16.mxu1 %v17920_v61  ;;  %13324 = vmatpush3.bf16.msra.mxu1 %v15027_v15  ;;  %v5633_v15 = vld [vmem:[#allocation2 + $0x120] sm:$0xff]  ;;  %v18078_v26 = vpack.c.bf16 %v6170_v37, %v6169_v49  ;;  %v6185_v37 = vld [vmem:[#allocation2 + $0x16a] sm:$0xff] }
 0x3cc   : > { %13325 = vmatprep.subr.bf16.mxu1 %v15028_v53 }
 0x3cf   : > { %13326 = vmatpush3.bf16.msra.mxu1 %v15028_v53  ;;  %v5634_v53 = vld [vmem:[#allocation2 + $0x128] sm:$0xff] }
 0x3d0   : > { %13327 = vmatprep.subr.bf16.mxu1 %v15029_v23 }
 0x3d2   : > { %13296 = vmatmul.mubr.bf16.gmra.mrb[52].mxu1 %v17922_v54 }
 0x3d3   : > { %13299 = vmatprep.mubr.bf16.mxu1 %v17924_v32  ;;  %13328 = vmatpush3.bf16.msra.mxu1 %v15029_v23 }
 0x3d4   : > { %13329 = vmatprep.subr.bf16.mxu1 %v15030_v59 }
 0x3d7   : > { %13330 = vmatpush3.bf16.msra.mxu1 %v15030_v59  ;;  %v18029_v59 = vpack.c.bf16 %v5634_v53, %v5633_v15  ;;  %v15044_v53 = vld [vmem:[%s19006_s2 + $0x338] sm:$0xff]  }
 0x3d8   : > { %13363 = vmatprep.subr.bf16.mxu1 %v15031_v7 }
 0x3da   : > { %13300 = vmatmul.mubr.bf16.gmra.mrb[56].mxu1 %v17926_v17 }
 0x3db   : > { %13303 = vmatprep.mubr.bf16.mxu1 %v5731_v5  ;;  %v5627_v5 = vld [vmem:[#allocation2 + $0xd8] sm:$0xff] }
 0x3e2   : > { %13304 = vmatmul.mubr.bf16.gmra.mrb[60].mxu1 %v5732_v9  ;;  %v5628_v9 = vld [vmem:[#allocation2 + $0xe0] sm:$0xff] }
 0x3e3   : > { %13307 = vmatprep.mubr.bf16.mxu1 %v5733_v52  ;;  %v5629_v52 = vld [vmem:[#allocation2 + $0xf0] sm:$0xff] }
 0x3ea   : > { %13308 = vmatmul.mubr.bf16.gmra.mrb[64].mxu1 %v5734_v39  ;;  %v18021_v39 = vpack.c.bf16 %v5628_v9, %v5627_v5  ;;  %v15042_v5 = vld [vmem:[%s19006_s2 + $0x328] sm:$0xff]   ;;  %v18059_v9 = vpack.c.bf16 %v6164_v22, %v6163_v42  ;;  %v6178_v42 = vld [vmem:[#allocation2 + $0x112] sm:$0xff] }
 0x3eb   : > { %13311 = vmatprep.mubr.bf16.mxu1 %v5735_v18  ;;  %v18023_v18 = vpack.c.bf16 %v5630_v11, %v5629_v52  ;;  %v6165_v52 = vld [vmem:[#allocation2 + $0x7a] sm:$0xff]  ;;  %v6166_v11 = vld [vmem:[#allocation2 + $0x82] sm:$0xff] }
 0x3ec   : > { %v18066_v15 = vpack.c.bf16 %v6166_v11, %v6165_v52  ;;  %v6179_v22 = vld [vmem:[#allocation2 + $0x122] sm:$0xff]  ;;  %v6181_v11 = vld [vmem:[#allocation2 + $0x13a] sm:$0xff] }
 0x3f2   : > { %13312 = vmatmul.mubr.bf16.gmra.mrb[68].mxu1 %v5736_v4  ;;  %v5631_v4 = vld [vmem:[#allocation2 + $0x108] sm:$0xff] }
 0x3f3   : > { %13331 = vmatprep.mubr.bf16.mxu1 %v17970_v62  ;;  %v18027_v23 = vpack.c.bf16 %v5632_v40, %v5631_v4  ;;  %v6167_v4 = vld [vmem:[#allocation2 + $0x92] sm:$0xff]  ;;  %v6168_v40 = vld [vmem:[#allocation2 + $0x9a] sm:$0xff] }
 0x3fa   : > { %13332 = vmatmul.mubr.bf16.vlgmr.msra.gmra.mrb[40].mxu1 %v17973_v21 }
 0x3fb   : > { %13335 = vmatprep.mubr.bf16.mxu1 %v17978_v58  ;;  %13364 = vmatpush3.bf16.msra.mxu1 %v15031_v7  ;;  %v5635_v7 = vld [vmem:[#allocation2 + $0x138] sm:$0xff] }
 0x3fc   : > { %13365 = vmatprep.subr.bf16.mxu1 %v15032_v3  ;;  %v18033_v38 = vpack.c.bf16 %v5636_v50, %v5635_v7  ;;  %v18071_v7 = vpack.c.bf16 %v6168_v40, %v6167_v4  ;;  %v15045_v50 = vld [vmem:[%s19006_s2 + $0x340] sm:$0xff]   ;;  %v6183_v40 = vld [vmem:[#allocation2 + $0x152] sm:$0xff] }
 0x3fd   : > { %v6182_v4 = vld [vmem:[#allocation2 + $0x142] sm:$0xff] }
 0x3ff   : > { %13366 = vmatpush3.bf16.msra.mxu1 %v15032_v3  ;;  %v6155_v3 = vld [vmem:[#allocation2 + $0x2] sm:$0xff] }
 0x400   : > { %13367 = vmatprep.subr.bf16.mxu1 %v15033_v0 }
 0x402   : > { %13336 = vmatmul.mubr.bf16.gmra.mrb[44].mxu1 %v17985_v30 }
 0x403   : > { %13339 = vmatprep.mubr.bf16.mxu1 %v17990_v29  ;;  %13368 = vmatpush3.bf16.msra.mxu1 %v15033_v0  ;;  %v6156_v0 = vld [vmem:[#allocation2 + $0xa] sm:$0xff] }
 0x404   : > { %13369 = vmatprep.subr.bf16.mxu1 %v15034_v6  ;;  %v6203_v48 = vpack.c.bf16 %v6156_v0, %v6155_v3  ;;  %v6171_v3 = vld [vmem:[#allocation2 + $0xc2] sm:$0xff]  ;;  %v6172_v0 = vld [vmem:[#allocation2 + $0xca] sm:$0xff] }
 0x407   : > { %13370 = vmatpush3.bf16.msra.mxu1 %v15034_v6  ;;  %v6157_v6 = vld [vmem:[#allocation2 + $0x1a] sm:$0xff] }
 0x408   : > { %13371 = vmatprep.subr.bf16.mxu1 %v15035_v35 }
 0x40a   : > { %13340 = vmatmul.mubr.bf16.gmra.mrb[48].mxu1 %v17997_v41 }
 0x40b   : > { %13343 = vmatprep.mubr.bf16.mxu1 %v18002_v45  ;;  %13372 = vmatpush3.bf16.msra.mxu1 %v15035_v35  ;;  %v6158_v35 = vld [vmem:[#allocation2 + $0x22] sm:$0xff] }
 0x40c   : > { %13373 = vmatprep.subr.bf16.mxu1 %v15036_v24  ;;  %v18042_v14 = vpack.c.bf16 %v6158_v35, %v6157_v6  ;;  %v15047_v6 = vld [vmem:[%s19006_s2 + $0x350] sm:$0xff]   ;;  %v6173_v35 = vld [vmem:[#allocation2 + $0xda] sm:$0xff] }
 0x40f   : > { %13374 = vmatpush3.bf16.msra.mxu1 %v15036_v24  ;;  %v18047_v24 = vpack.c.bf16 %v6160_v25, %v6159_v2  ;;  %v6174_v2 = vld [vmem:[#allocation2 + $0xe2] sm:$0xff]  ;;  %v6175_v25 = vld [vmem:[#allocation2 + $0xf2] sm:$0xff] }
 0x410   : > { %13375 = vmatprep.subr.bf16.mxu1 %v15037_v55 }
 0x412   : > { %13344 = vmatmul.mubr.bf16.gmra.mrb[52].mxu1 %v18009_v63 }
 0x413   : > { %13347 = vmatprep.mubr.bf16.mxu1 %v18014_v34  ;;  %13376 = vmatpush3.bf16.msra.mxu1 %v15037_v55  ;;  %v15041_v55 = vld [vmem:[%s19006_s2 + $0x320] sm:$0xff]  }
 0x414   : > { %13377 = vmatprep.subr.bf16.mxu1 %v15038_v47 }
 0x417   : > { %13378 = vmatpush3.bf16.msra.mxu1 %v15038_v47  ;;  %v18054_v47 = vpack.c.bf16 %v6162_v10, %v6161_v36  ;;  %v6177_v10 = vld [vmem:[#allocation2 + $0x10a] sm:$0xff] }
 0x418   : > { %13411 = vmatprep.subr.bf16.mxu1 %v15039_v20 }
 0x41a   : > { %13348 = vmatmul.mubr.bf16.gmra.mrb[56].mxu1 %v18021_v39 }
 0x41b   : > { %13351 = vmatprep.mubr.bf16.mxu1 %v18023_v18 }
 0x422   : > { %13352 = vmatmul.mubr.bf16.gmra.mrb[60].mxu1 %v18027_v23 }
 0x423   : > { %13355 = vmatprep.mubr.bf16.mxu1 %v18029_v59 }
 0x42a   : > { %13356 = vmatmul.mubr.bf16.gmra.mrb[64].mxu1 %v18033_v38 }
 0x42b   : > { %13359 = vmatprep.mubr.bf16.mxu1 %v18035_v57 }
 0x432   : > { %13360 = vmatmul.mubr.bf16.gmra.mrb[68].mxu1 %v18039_v60 }
 0x433   : > { %13379 = vmatprep.mubr.bf16.mxu1 %v6203_v48  ;;  %v18083_v48 = vpack.c.bf16 %v6172_v0, %v6171_v3  ;;  %v6186_v3 = vld [vmem:[#allocation2 + $0x172] sm:$0xff] }
 0x434   : > { %v18108_v0 = vpack.c.bf16 %v6186_v3, %v6185_v37  ;;  %v6786_v37 = vld [vmem:[#allocation2 + $0x111] sm:$0xff] }
 0x43a   : > { %13380 = vmatmul.mubr.bf16.vlgmr.msra.gmra.mrb[40].mxu1 %v18042_v14 }
 0x43b   : > { %13383 = vmatprep.mubr.bf16.mxu1 %v18047_v24  ;;  %13412 = vmatpush3.bf16.msra.mxu1 %v15039_v20  ;;  %v15043_v20 = vld [vmem:[%s19006_s2 + $0x330] sm:$0xff]  }
 0x43c   : > { %13413 = vmatprep.subr.bf16.mxu1 %v15040_v56 }
 0x43f   : > { %13414 = vmatpush3.bf16.msra.mxu1 %v15040_v56  ;;  %v6176_v56 = vld [vmem:[#allocation2 + $0xfa] sm:$0xff] }
 0x440   : > { %13415 = vmatprep.subr.bf16.mxu1 %v15041_v55  ;;  %v18092_v36 = vpack.c.bf16 %v6176_v56, %v6175_v25  ;;  %v15053_v25 = vld [vmem:[%s19006_s2 + $0x380] sm:$0xff]   ;;  %v15054_v56 = vld [vmem:[%s19006_s2 + $0x388] sm:$0xff]  }
 0x442   : > { %13384 = vmatmul.mubr.bf16.gmra.mrb[44].mxu1 %v18054_v47 }
 0x443   : > { %13387 = vmatprep.mubr.bf16.mxu1 %v18059_v9  ;;  %13416 = vmatpush3.bf16.msra.mxu1 %v15041_v55  ;;  %v18090_v55 = vpack.c.bf16 %v6174_v2, %v6173_v35  ;;  %v15049_v35 = vld [vmem:[%s19006_s2 + $0x360] sm:$0xff]   ;;  %v15052_v2 = vld [vmem:[%s19006_s2 + $0x378] sm:$0xff]  }
 0x444   : > { %13417 = vmatprep.subr.bf16.mxu1 %v15042_v5 }
 0x447   : > { %13418 = vmatpush3.bf16.msra.mxu1 %v15042_v5  ;;  %v6180_v5 = vld [vmem:[#allocation2 + $0x12a] sm:$0xff] }
 0x448   : > { %13419 = vmatprep.subr.bf16.mxu1 %v15043_v20  ;;  %v18098_v52 = vpack.c.bf16 %v6180_v5, %v6179_v22  ;;  %v6491_v22 = vld [vmem:[#allocation2 + $0x188] sm:$0xff] }
 0x44a   : > { %13388 = vmatmul.mubr.bf16.gmra.mrb[48].mxu1 %v18066_v15 }
 0x44b   : > { %13391 = vmatprep.mubr.bf16.mxu1 %v18071_v7  ;;  %13420 = vmatpush3.bf16.msra.mxu1 %v15043_v20  ;;  %v18096_v20 = vpack.c.bf16 %v6178_v42, %v6177_v10  ;;  %v15055_v10 = vld [vmem:[%s19006_s2 + $0x390] sm:$0xff]   ;;  %v6490_v42 = vld [vmem:[#allocation2 + $0x180] sm:$0xff] }
 0x44c   : > { %13421 = vmatprep.subr.bf16.mxu1 %v15044_v53  ;;  %v18150_v5 = vpack.c.bf16 %v6491_v22, %v6490_v42  ;;  %v6794_v42 = vld [vmem:[#allocation2 + $0x171] sm:$0xff] }
 0x44f   : > { %13422 = vmatpush3.bf16.msra.mxu1 %v15044_v53  ;;  %v6184_v53 = vld [vmem:[#allocation2 + $0x15a] sm:$0xff] }
 0x450   : > { %13423 = vmatprep.subr.bf16.mxu1 %v15045_v50  ;;  %v18104_v49 = vpack.c.bf16 %v6184_v53, %v6183_v40  ;;  %v6784_v40 = vld [vmem:[#allocation2 + $0xf9] sm:$0xff]  ;;  %v6785_v53 = vld [vmem:[#allocation2 + $0x109] sm:$0xff] }
 0x452   : > { %13392 = vmatmul.mubr.bf16.gmra.mrb[52].mxu1 %v18078_v26 }
 0x453   : > { %13395 = vmatprep.mubr.bf16.mxu1 %v18083_v48  ;;  %13424 = vmatpush3.bf16.msra.mxu1 %v15045_v50  ;;  %v18102_v50 = vpack.c.bf16 %v6182_v4, %v6181_v11  ;;  %v15056_v11 = vld [vmem:[%s19006_s2 + $0x398] sm:$0xff]   ;;  %v15057_v4 = vld [vmem:[%s19006_s2 + $0x3a0] sm:$0xff]  }
 0x454   : > { %13425 = vmatprep.subr.bf16.mxu1 %v15046_v46 }
 0x457   : > { %13426 = vmatpush3.bf16.msra.mxu1 %v15046_v46  ;;  %v15048_v46 = vld [vmem:[%s19006_s2 + $0x358] sm:$0xff]  }
 0x458   : > { %13459 = vmatprep.subr.bf16.mxu1 %v15047_v6 }
 0x45a   : > { %13396 = vmatmul.mubr.bf16.gmra.mrb[56].mxu1 %v18090_v55 }
 0x45b   : > { %13399 = vmatprep.mubr.bf16.mxu1 %v18092_v36 }
 0x462   : > { %13400 = vmatmul.mubr.bf16.gmra.mrb[60].mxu1 %v18096_v20 }
 0x463   : > { %13403 = vmatprep.mubr.bf16.mxu1 %v18098_v52 }
 0x46a   : > { %13404 = vmatmul.mubr.bf16.gmra.mrb[64].mxu1 %v18102_v50 }
 0x46b   : > { %13407 = vmatprep.mubr.bf16.mxu1 %v18104_v49 }
 0x472   : > { %13408 = vmatmul.mubr.bf16.gmra.mrb[68].mxu1 %v18108_v0 }
 0x473   : > { %13427 = vmatprep.mubr.bf16.mxu1 %v17973_v21  ;;  %v15050_v21 = vld [vmem:[%s19006_s2 + $0x368] sm:$0xff]  }
 0x47a   : > { %13428 = vmatmul.mubr.bf16.vlgmr.msra.gmra.mrb[40].mxu1 %v17978_v58 }
 0x47b   : > { %13431 = vmatprep.mubr.bf16.mxu1 %v17985_v30  ;;  %13460 = vmatpush3.bf16.msra.mxu1 %v15047_v6  ;;  %v15051_v6 = vld [vmem:[%s19006_s2 + $0x370] sm:$0xff]  }
 0x47c   : > { %13461 = vmatprep.subr.bf16.mxu1 %v15048_v46 }
 0x47f   : > { %13462 = vmatpush3.bf16.msra.mxu1 %v15048_v46  ;;  %v18188_v46 = vpack.c.bf16 %v6786_v37, %v6785_v53  ;;  %v15083_v53 = vld [vmem:[%s19006_s2 + $0x470] sm:$0xff]  }
 0x480   : > { %13463 = vmatprep.subr.bf16.mxu1 %v15049_v35  ;;  %v7691_v37 = vld [vmem:[#allocation2 + $0xa9] sm:$0xff] }
 0x482   : > { %13432 = vmatmul.mubr.bf16.gmra.mrb[44].mxu1 %v17990_v29 }
 0x483   : > { %13435 = vmatprep.mubr.bf16.mxu1 %v17997_v41  ;;  %13464 = vmatpush3.bf16.msra.mxu1 %v15049_v35  ;;  %v6789_v35 = vld [vmem:[#allocation2 + $0x139] sm:$0xff] }
 0x484   : > { %13465 = vmatprep.subr.bf16.mxu1 %v15050_v21 }
 0x487   : > { %13466 = vmatpush3.bf16.msra.mxu1 %v15050_v21  ;;  %v6790_v21 = vld [vmem:[#allocation2 + $0x141] sm:$0xff] }
 0x488   : > { %13467 = vmatprep.subr.bf16.mxu1 %v15051_v6 }
 0x48a   : > { %13436 = vmatmul.mubr.bf16.gmra.mrb[48].mxu1 %v18002_v45 }
 0x48b   : > { %13439 = vmatprep.mubr.bf16.mxu1 %v18009_v63  ;;  %13468 = vmatpush3.bf16.msra.mxu1 %v15051_v6 }
 0x48c   : > { %13469 = vmatprep.subr.bf16.mxu1 %v15052_v2 }
 0x48f   : > { %13470 = vmatpush3.bf16.msra.mxu1 %v15052_v2  ;;  %v18194_v2 = vpack.c.bf16 %v6790_v21, %v6789_v35  ;;  %v7694_v35 = vld [vmem:[#allocation2 + $0xc9] sm:$0xff] }
 0x490   : > { %13471 = vmatprep.subr.bf16.mxu1 %v15053_v25 }
 0x492   : > { %13440 = vmatmul.mubr.bf16.gmra.mrb[52].mxu1 %v18014_v34 }
 0x493   : > { %13443 = vmatprep.mubr.bf16.mxu1 %v18021_v39  ;;  %13472 = vmatpush3.bf16.msra.mxu1 %v15053_v25  ;;  %v6791_v25 = vld [vmem:[#allocation2 + $0x151] sm:$0xff] }
 0x494   : > { %13473 = vmatprep.subr.bf16.mxu1 %v15054_v56 }
 0x497   : > { %13474 = vmatpush3.bf16.msra.mxu1 %v15054_v56  ;;  %v6792_v56 = vld [vmem:[#allocation2 + $0x159] sm:$0xff] }
 0x498   : > { %13507 = vmatprep.subr.bf16.mxu1 %v15055_v10  ;;  %v18198_v22 = vpack.c.bf16 %v6792_v56, %v6791_v25  ;;  %v15084_v25 = vld [vmem:[%s19006_s2 + $0x478] sm:$0xff]  }
 0x49a   : > { %13444 = vmatmul.mubr.bf16.gmra.mrb[56].mxu1 %v18023_v18 }
 0x49b   : > { %13447 = vmatprep.mubr.bf16.mxu1 %v18027_v23 }
 0x4a2   : > { %13448 = vmatmul.mubr.bf16.gmra.mrb[60].mxu1 %v18029_v59 }
 0x4a3   : > { %13451 = vmatprep.mubr.bf16.mxu1 %v18033_v38 }
 0x4aa   : > { %13452 = vmatmul.mubr.bf16.gmra.mrb[64].mxu1 %v18035_v57 }
 0x4ab   : > { %13455 = vmatprep.mubr.bf16.mxu1 %v18039_v60 }
 0x4b2   : > { %13456 = vmatmul.mubr.bf16.gmra.mrb[68].mxu1 %v18150_v5 }
 0x4b3   : > { %13475 = vmatprep.mubr.bf16.mxu1 %v17901_v19  ;;  %v15058_v19 = vld [vmem:[%s19006_s2 + $0x3a8] sm:$0xff]  }
 0x4ba   : > { %13476 = vmatmul.mubr.bf16.vlgmr.msra.gmra.mrb[40].mxu1 %v17910_v51  ;;  %v15059_v51 = vld [vmem:[%s19006_s2 + $0x3b0] sm:$0xff]  }
 0x4bb   : > { %13479 = vmatprep.mubr.bf16.mxu1 %v17912_v27  ;;  %13508 = vmatpush3.bf16.msra.mxu1 %v15055_v10  ;;  %v15060_v27 = vld [vmem:[%s19006_s2 + $0x3b8] sm:$0xff]   ;;  %v6793_v10 = vld [vmem:[#allocation2 + $0x169] sm:$0xff] }
 0x4bc   : > { %13509 = vmatprep.subr.bf16.mxu1 %v15056_v11 }
 0x4bf   : > { %13510 = vmatpush3.bf16.msra.mxu1 %v15056_v11  ;;  %v18200_v11 = vpack.c.bf16 %v6794_v42, %v6793_v10  ;;  %v15085_v10 = vld [vmem:[%s19006_s2 + $0x480] sm:$0xff]  }
 0x4c0   : > { %13511 = vmatprep.subr.bf16.mxu1 %v15057_v4  ;;  %v7695_v42 = vld [vmem:[#allocation2 + $0xd9] sm:$0xff] }
 0x4c2   : > { %13480 = vmatmul.mubr.bf16.gmra.mrb[44].mxu1 %v17914_v31  ;;  %v15061_v31 = vld [vmem:[%s19006_s2 + $0x3c0] sm:$0xff]  }
 0x4c3   : > { %13483 = vmatprep.mubr.bf16.mxu1 %v17916_v16  ;;  %13512 = vmatpush3.bf16.msra.mxu1 %v15057_v4  ;;  %v15062_v16 = vld [vmem:[%s19006_s2 + $0x3c8] sm:$0xff]  }
 0x4c4   : > { %13513 = vmatprep.subr.bf16.mxu1 %v15058_v19  ;;  %v6795_v4 = vld [vmem:[#allocation2 + $0x181] sm:$0xff] }
 0x4c7   : > { %13514 = vmatpush3.bf16.msra.mxu1 %v15058_v19  ;;  %v6796_v19 = vld [vmem:[#allocation2 + $0x189] sm:$0xff] }
 0x4c8   : > { %13515 = vmatprep.subr.bf16.mxu1 %v15059_v51 }
 0x4ca   : > { %13484 = vmatmul.mubr.bf16.gmra.mrb[48].mxu1 %v17920_v61  ;;  %v15063_v61 = vld [vmem:[%s19006_s2 + $0x3d0] sm:$0xff]  }
 0x4cb   : > { %13487 = vmatprep.mubr.bf16.mxu1 %v17922_v54  ;;  %13516 = vmatpush3.bf16.msra.mxu1 %v15059_v51  ;;  %v6783_v54 = vld [vmem:[#allocation2 + $0xf1] sm:$0xff]  ;;  %v18204_v51 = vpack.c.bf16 %v6796_v19, %v6795_v4  ;;  %v7696_v4 = vld [vmem:[#allocation2 + $0xe1] sm:$0xff] }
 0x4cc   : > { %13517 = vmatprep.subr.bf16.mxu1 %v15060_v27  ;;  %v18186_v3 = vpack.c.bf16 %v6784_v40, %v6783_v54  ;;  %v15082_v54 = vld [vmem:[%s19006_s2 + $0x468] sm:$0xff]   ;;  %v7736_v19 = vpack.c.bf16 %v7696_v4, %v7695_v42 }
 0x4cf   : > { %13518 = vmatpush3.bf16.msra.mxu1 %v15060_v27  ;;  %v15064_v27 = vld [vmem:[%s19006_s2 + $0x3d8] sm:$0xff]  }
 0x4d0   : > { %13519 = vmatprep.subr.bf16.mxu1 %v15061_v31 }
 0x4d2   : > { %13488 = vmatmul.mubr.bf16.gmra.mrb[52].mxu1 %v17924_v32  ;;  %v6787_v32 = vld [vmem:[#allocation2 + $0x121] sm:$0xff] }
 0x4d3   : > { %13491 = vmatprep.mubr.bf16.mxu1 %v17926_v17  ;;  %13520 = vmatpush3.bf16.msra.mxu1 %v15061_v31  ;;  %v6788_v17 = vld [vmem:[#allocation2 + $0x129] sm:$0xff]  ;;  %v15065_v31 = vld [vmem:[%s19006_s2 + $0x3e0] sm:$0xff]  }
 0x4d4   : > { %13521 = vmatprep.subr.bf16.mxu1 %v15062_v16  ;;  %v18192_v6 = vpack.c.bf16 %v6788_v17, %v6787_v32  ;;  %v7692_v32 = vld [vmem:[#allocation2 + $0xb1] sm:$0xff]  ;;  %v7693_v17 = vld [vmem:[#allocation2 + $0xc1] sm:$0xff] }
 0x4d5   : > { %v7734_v21 = vpack.c.bf16 %v7692_v32, %v7691_v37  ;;  %v7735_v56 = vpack.c.bf16 %v7694_v35, %v7693_v17  ;;  %v8013_v37 = vld [vmem:[#allocation2 + $0x172] sm:$0xff]  ;;  %v8016_v17 = vld [vmem:[#allocation2 + $0x19a] sm:$0xff]  ;;  %v8017_v35 = vld [vmem:[#allocation2 + $0x1a2] sm:$0xff] }
 0x4d7   : > { %13522 = vmatpush3.bf16.msra.mxu1 %v15062_v16  ;;  %v7690_v16 = vld [vmem:[#allocation2 + $0x99] sm:$0xff] }
 0x4d8   : > { %13555 = vmatprep.subr.bf16.mxu1 %v15063_v61 }
 0x4da   : > { %13492 = vmatmul.mubr.bf16.gmra.mrb[56].mxu1 %v18186_v3 }
 0x4db   : > { %13495 = vmatprep.mubr.bf16.mxu1 %v18188_v46 }
 0x4e2   : > { %13496 = vmatmul.mubr.bf16.gmra.mrb[60].mxu1 %v18192_v6 }
 0x4e3   : > { %13499 = vmatprep.mubr.bf16.mxu1 %v18194_v2 }
 0x4ea   : > { %13500 = vmatmul.mubr.bf16.gmra.mrb[64].mxu1 %v18198_v22 }
 0x4eb   : > { %13503 = vmatprep.mubr.bf16.mxu1 %v18200_v11 }
 0x4f2   : > { %13504 = vmatmul.mubr.bf16.gmra.mrb[68].mxu1 %v18204_v51 }
 0x4f3   : > { %13523 = vmatprep.mubr.bf16.mxu1 %v18042_v14  ;;  %v15066_v14 = vld [vmem:[%s19006_s2 + $0x3e8] sm:$0xff]  }
 0x4fa   : > { %13524 = vmatmul.mubr.bf16.vlgmr.msra.gmra.mrb[40].mxu1 %v18047_v24  ;;  %v15067_v24 = vld [vmem:[%s19006_s2 + $0x3f0] sm:$0xff]  }
 0x4fb   : > { %13527 = vmatprep.mubr.bf16.mxu1 %v18054_v47  ;;  %13556 = vmatpush3.bf16.msra.mxu1 %v15063_v61  ;;  %v15068_v47 = vld [vmem:[%s19006_s2 + $0x3f8] sm:$0xff]  }
 0x4fc   : > { %13557 = vmatprep.subr.bf16.mxu1 %v15064_v27 }
 0x4ff   : > { %13558 = vmatpush3.bf16.msra.mxu1 %v15064_v27  ;;  %v15086_v27 = vld [vmem:[%s19006_s2 + $0x488] sm:$0xff]  }
 0x500   : > { %13559 = vmatprep.subr.bf16.mxu1 %v15065_v31 }
 0x502   : > { %13528 = vmatmul.mubr.bf16.gmra.mrb[44].mxu1 %v18059_v9  ;;  %v15069_v9 = vld [vmem:[%s19006_s2 + $0x400] sm:$0xff]  }
 0x503   : > { %13531 = vmatprep.mubr.bf16.mxu1 %v18066_v15  ;;  %13560 = vmatpush3.bf16.msra.mxu1 %v15065_v31  ;;  %v15070_v15 = vld [vmem:[%s19006_s2 + $0x408] sm:$0xff]   ;;  %v7711_v31 = vld [vmem:[#allocation2 + $0x199] sm:$0xff] }
 0x504   : > { %13561 = vmatprep.subr.bf16.mxu1 %v15066_v14 }
 0x507   : > { %13562 = vmatpush3.bf16.msra.mxu1 %v15066_v14  ;;  %v7712_v14 = vld [vmem:[#allocation2 + $0x1a1] sm:$0xff] }
 0x508   : > { %13563 = vmatprep.subr.bf16.mxu1 %v15067_v24 }
 0x50a   : > { %13532 = vmatmul.mubr.bf16.gmra.mrb[48].mxu1 %v18071_v7  ;;  %v15071_v7 = vld [vmem:[%s19006_s2 + $0x410] sm:$0xff]  }
 0x50b   : > { %13535 = vmatprep.mubr.bf16.mxu1 %v18078_v26  ;;  %13564 = vmatpush3.bf16.msra.mxu1 %v15067_v24  ;;  %v7100_v26 = vld [vmem:[#allocation2 + $0x182] sm:$0xff]  ;;  %v7744_v24 = vpack.c.bf16 %v7712_v14, %v7711_v31 }
 0x50c   : > { %13565 = vmatprep.subr.bf16.mxu1 %v15068_v47 }
 0x50f   : > { %13566 = vmatpush3.bf16.msra.mxu1 %v15068_v47  ;;  %v7986_v47 = vld [vmem:[#allocation2 + $0x32] sm:$0xff] }
 0x510   : > { %13567 = vmatprep.subr.bf16.mxu1 %v15069_v9 }
 0x512   : > { %13536 = vmatmul.mubr.bf16.gmra.mrb[52].mxu1 %v18083_v48  ;;  %v7101_v48 = vld [vmem:[#allocation2 + $0x18a] sm:$0xff] }
 0x513   : > { %13539 = vmatprep.mubr.bf16.mxu1 %v18090_v55  ;;  %13568 = vmatpush3.bf16.msra.mxu1 %v15069_v9  ;;  %v18246_v55 = vpack.c.bf16 %v7101_v48, %v7100_v26  ;;  %v7994_v48 = vld [vmem:[#allocation2 + $0x92] sm:$0xff] }
 0x514   : > { %13569 = vmatprep.subr.bf16.mxu1 %v15070_v15 }
 0x517   : > { %13570 = vmatpush3.bf16.msra.mxu1 %v15070_v15  ;;  %v7988_v15 = vld [vmem:[#allocation2 + $0x4a] sm:$0xff] }
 0x518   : > { %13603 = vmatprep.subr.bf16.mxu1 %v15071_v7 }
 0x51a   : > { %13540 = vmatmul.mubr.bf16.gmra.mrb[56].mxu1 %v18092_v36  ;;  %v15072_v36 = vld [vmem:[%s19006_s2 + $0x418] sm:$0xff]  }
 0x51b   : > { %13543 = vmatprep.mubr.bf16.mxu1 %v18096_v20  ;;  %v15073_v20 = vld [vmem:[%s19006_s2 + $0x420] sm:$0xff]  }
 0x522   : > { %13544 = vmatmul.mubr.bf16.gmra.mrb[60].mxu1 %v18098_v52  ;;  %v7683_v52 = vld [vmem:[#allocation2 + $0x49] sm:$0xff] }
 0x523   : > { %13547 = vmatprep.mubr.bf16.mxu1 %v18102_v50  ;;  %v7684_v50 = vld [vmem:[#allocation2 + $0x51] sm:$0xff] }
 0x52a   : > { %13548 = vmatmul.mubr.bf16.gmra.mrb[64].mxu1 %v18104_v49  ;;  %v7685_v49 = vld [vmem:[#allocation2 + $0x61] sm:$0xff] }
 0x52b   : > { %13551 = vmatprep.mubr.bf16.mxu1 %v18108_v0  ;;  %v7730_v0 = vpack.c.bf16 %v7684_v50, %v7683_v52  ;;  %v8003_v52 = vld [vmem:[#allocation2 + $0xfa] sm:$0xff] }
 0x532   : > { %13552 = vmatmul.mubr.bf16.gmra.mrb[68].mxu1 %v18246_v55 }
 0x533   : > { %13571 = vmatprep.mubr.bf16.mxu1 %v17978_v58  ;;  %v15074_v58 = vld [vmem:[%s19006_s2 + $0x428] sm:$0xff]  }
 0x53a   : > { %13572 = vmatmul.mubr.bf16.vlgmr.msra.gmra.mrb[40].mxu1 %v17985_v30  ;;  %v15075_v30 = vld [vmem:[%s19006_s2 + $0x430] sm:$0xff]  }
 0x53b   : > { %13575 = vmatprep.mubr.bf16.mxu1 %v17990_v29  ;;  %13604 = vmatpush3.bf16.msra.mxu1 %v15071_v7  ;;  %v15076_v29 = vld [vmem:[%s19006_s2 + $0x438] sm:$0xff]   ;;  %v7990_v7 = vld [vmem:[#allocation2 + $0x62] sm:$0xff] }
 0x53c   : > { %13605 = vmatprep.subr.bf16.mxu1 %v15072_v36 }
 0x53f   : > { %13606 = vmatpush3.bf16.msra.mxu1 %v15072_v36 }
 0x540   : > { %13607 = vmatprep.subr.bf16.mxu1 %v15073_v20 }
 0x542   : > { %13576 = vmatmul.mubr.bf16.gmra.mrb[44].mxu1 %v17997_v41  ;;  %v15077_v41 = vld [vmem:[%s19006_s2 + $0x440] sm:$0xff]  }
 0x543   : > { %13579 = vmatprep.mubr.bf16.mxu1 %v18002_v45  ;;  %13608 = vmatpush3.bf16.msra.mxu1 %v15073_v20  ;;  %v15078_v45 = vld [vmem:[%s19006_s2 + $0x448] sm:$0xff]  }
 0x544   : > { %13609 = vmatprep.subr.bf16.mxu1 %v15074_v58 }
 0x547   : > { %13610 = vmatpush3.bf16.msra.mxu1 %v15074_v58  ;;  %v7996_v58 = vld [vmem:[#allocation2 + $0xaa] sm:$0xff] }
 0x548   : > { %13611 = vmatprep.subr.bf16.mxu1 %v15075_v30 }
 0x54a   : > { %13580 = vmatmul.mubr.bf16.gmra.mrb[48].mxu1 %v18009_v63  ;;  %v15079_v63 = vld [vmem:[%s19006_s2 + $0x450] sm:$0xff]  }
 0x54b   : > { %13583 = vmatprep.mubr.bf16.mxu1 %v18014_v34  ;;  %13612 = vmatpush3.bf16.msra.mxu1 %v15075_v30  ;;  %v7681_v34 = vld [vmem:[#allocation2 + $0x31] sm:$0xff] }
 0x54c   : > { %13613 = vmatprep.subr.bf16.mxu1 %v15076_v29  ;;  %v7997_v30 = vld [vmem:[#allocation2 + $0xb2] sm:$0xff] }
 0x54f   : > { %13614 = vmatpush3.bf16.msra.mxu1 %v15076_v29  ;;  %v7998_v29 = vld [vmem:[#allocation2 + $0xc2] sm:$0xff] }
 0x550   : > { %13615 = vmatprep.subr.bf16.mxu1 %v15077_v41 }
 0x552   : > { %13584 = vmatmul.mubr.bf16.gmra.mrb[52].mxu1 %v18021_v39  ;;  %v7682_v39 = vld [vmem:[#allocation2 + $0x39] sm:$0xff] }
 0x553   : > { %13587 = vmatprep.mubr.bf16.mxu1 %v18023_v18  ;;  %13616 = vmatpush3.bf16.msra.mxu1 %v15077_v41  ;;  %v7729_v18 = vpack.c.bf16 %v7682_v39, %v7681_v34  ;;  %v7999_v41 = vld [vmem:[#allocation2 + $0xca] sm:$0xff]  ;;  %v8000_v34 = vld [vmem:[#allocation2 + $0xda] sm:$0xff]  ;;  %v8001_v39 = vld [vmem:[#allocation2 + $0xe2] sm:$0xff] }
 0x554   : > { %13617 = vmatprep.subr.bf16.mxu1 %v15078_v45  ;;  %v8041_v50 = vpack.c.bf16 %v8001_v39, %v8000_v34 }
 0x557   : > { %13618 = vmatpush3.bf16.msra.mxu1 %v15078_v45  ;;  %v8039_v45 = vpack.c.bf16 %v7997_v30, %v7996_v58 }
 0x558   : > { %13651 = vmatprep.subr.bf16.mxu1 %v15079_v63 }
 0x55a   : > { %13588 = vmatmul.mubr.bf16.gmra.mrb[56].mxu1 %v18027_v23  ;;  %v7686_v23 = vld [vmem:[#allocation2 + $0x69] sm:$0xff] }
 0x55b   : > { %13591 = vmatprep.mubr.bf16.mxu1 %v18029_v59  ;;  %v15080_v59 = vld [vmem:[%s19006_s2 + $0x458] sm:$0xff]  }
 0x562   : > { %13592 = vmatmul.mubr.bf16.gmra.mrb[60].mxu1 %v18033_v38  ;;  %v7731_v38 = vpack.c.bf16 %v7686_v23, %v7685_v49  ;;  %v8004_v23 = vld [vmem:[#allocation2 + $0x10a] sm:$0xff] }
 0x563   : > { %13595 = vmatprep.mubr.bf16.mxu1 %v18035_v57  ;;  %v15081_v57 = vld [vmem:[%s19006_s2 + $0x460] sm:$0xff]  }
 0x56a   : > { %13596 = vmatmul.mubr.bf16.gmra.mrb[64].mxu1 %v18039_v60  ;;  %v7688_v60 = vld [vmem:[#allocation2 + $0x81] sm:$0xff] }
 0x56b   : > { %13599 = vmatprep.mubr.bf16.mxu1 %v18150_v5  ;;  %v7689_v5 = vld [vmem:[#allocation2 + $0x91] sm:$0xff] }
 0x56c   : > { %v7733_v40 = vpack.c.bf16 %v7690_v16, %v7689_v5  ;;  %v8009_v5 = vld [vmem:[#allocation2 + $0x142] sm:$0xff]  ;;  %v8010_v16 = vld [vmem:[#allocation2 + $0x152] sm:$0xff] }
 0x572   : > { %13600 = vmatmul.mubr.bf16.gmra.mrb[68].mxu1 %v17970_v62  ;;  %v7687_v62 = vld [vmem:[#allocation2 + $0x79] sm:$0xff] }
 0x573   : > { %13619 = vmatprep.mubr.bf16.mxu1 %v7729_v18  ;;  %v7732_v61 = vpack.c.bf16 %v7688_v60, %v7687_v62  ;;  %v8002_v18 = vld [vmem:[#allocation2 + $0xf2] sm:$0xff]  ;;  %v8008_v60 = vld [vmem:[#allocation2 + $0x13a] sm:$0xff] }
 0x574   : > { %v8042_v49 = vpack.c.bf16 %v8003_v52, %v8002_v18 }
 0x57a   : > { %13620 = vmatmul.mubr.bf16.vlgmr.msra.gmra.mrb[40].mxu1 %v7730_v0  ;;  %v8005_v0 = vld [vmem:[#allocation2 + $0x112] sm:$0xff] }
 0x57b   : > { %13623 = vmatprep.mubr.bf16.mxu1 %v7731_v38  ;;  %13652 = vmatpush3.bf16.msra.mxu1 %v15079_v63  ;;  %v8040_v63 = vpack.c.bf16 %v7999_v41, %v7998_v29  ;;  %v8007_v38 = vld [vmem:[#allocation2 + $0x12a] sm:$0xff] }
 0x57c   : > { %13653 = vmatprep.subr.bf16.mxu1 %v15080_v59 }
 0x57f   : > { %13654 = vmatpush3.bf16.msra.mxu1 %v15080_v59  ;;  %v8006_v59 = vld [vmem:[#allocation2 + $0x122] sm:$0xff] }
 0x580   : > { %13655 = vmatprep.subr.bf16.mxu1 %v15081_v57  ;;  %v8044_v62 = vpack.c.bf16 %v8007_v38, %v8006_v59 }
 0x582   : > { %13624 = vmatmul.mubr.bf16.gmra.mrb[44].mxu1 %v7732_v61  ;;  %v8011_v61 = vld [vmem:[#allocation2 + $0x15a] sm:$0xff] }
 0x583   : > { %13627 = vmatprep.mubr.bf16.mxu1 %v7733_v40  ;;  %13656 = vmatpush3.bf16.msra.mxu1 %v15081_v57  ;;  %v8043_v57 = vpack.c.bf16 %v8005_v0, %v8004_v23  ;;  %v8046_v40 = vpack.c.bf16 %v8011_v61, %v8010_v16 }
 0x584   : > { %13657 = vmatprep.subr.bf16.mxu1 %v15082_v54 }
 0x587   : > { %13658 = vmatpush3.bf16.msra.mxu1 %v15082_v54  ;;  %v8045_v54 = vpack.c.bf16 %v8009_v5, %v8008_v60 }
 0x588   : > { %13659 = vmatprep.subr.bf16.mxu1 %v15083_v53 }
 0x58a   : > { %13628 = vmatmul.mubr.bf16.gmra.mrb[48].mxu1 %v7734_v21  ;;  %v8049_v21 = vpack.c.bf16 %v8017_v35, %v8016_v17 }
 0x58b   : > { %13631 = vmatprep.mubr.bf16.mxu1 %v7735_v56  ;;  %13660 = vmatpush3.bf16.msra.mxu1 %v15083_v53  ;;  %v8012_v53 = vld [vmem:[#allocation2 + $0x16a] sm:$0xff]  ;;  %v18322_v56 = vld [vmem:[%s19007_s3 + $0x80] sm:$0xff] }
 0x58c   : > { %13661 = vmatprep.subr.bf16.mxu1 %v15084_v25  ;;  %v8047_v32 = vpack.c.bf16 %v8013_v37, %v8012_v53 }
 0x58f   : > { %13662 = vmatpush3.bf16.msra.mxu1 %v15084_v25  ;;  %v8293_v25 = vsub.s32 4, %v17499_v44 }
 0x590   : > { %13663 = vmatprep.subr.bf16.mxu1 %v15085_v10 }
 0x592   : > { %13632 = vmatmul.mubr.bf16.gmra.mrb[52].mxu1 %v7736_v19 }
 0x593   : > { %13635 = vmatprep.mubr.bf16.mxu1 %v18186_v3  ;;  %13664 = vmatpush3.bf16.msra.mxu1 %v15085_v10  ;;  %v7987_v3 = vld [vmem:[#allocation2 + $0x3a] sm:$0xff]  ;;  %v18325_v10 = vrot.slane %v18322_v56, %v8293_v25 }
 0x594   : > { %13665 = vmatprep.subr.bf16.mxu1 %v15086_v27  ;;  %v8034_v9 = vpack.c.bf16 %v7987_v3, %v7986_v47 }
 0x597   : > { %13666 = vmatpush3.bf16.msra.mxu1 %v15086_v27 }
 0x59a   : > { %13636 = vmatmul.mubr.bf16.gmra.mrb[56].mxu1 %v18188_v46  ;;  %v7989_v46 = vld [vmem:[#allocation2 + $0x52] sm:$0xff] }
 0x59b   : > { %13639 = vmatprep.mubr.bf16.mxu1 %v18192_v6  ;;  %v7991_v6 = vld [vmem:[#allocation2 + $0x6a] sm:$0xff]  ;;  %v8035_v26 = vpack.c.bf16 %v7989_v46, %v7988_v15 }
 0x5a2   : > { %13640 = vmatmul.mubr.bf16.gmra.mrb[60].mxu1 %v18194_v2  ;;  %v8036_v2 = vpack.c.bf16 %v7991_v6, %v7990_v7 }
 0x5a3   : > { %13643 = vmatprep.mubr.bf16.mxu1 %v18198_v22  ;;  %v7992_v22 = vld [vmem:[#allocation2 + $0x7a] sm:$0xff] }
 0x5aa   : > { %13644 = vmatmul.mubr.bf16.gmra.mrb[64].mxu1 %v18200_v11  ;;  %v7993_v11 = vld [vmem:[#allocation2 + $0x82] sm:$0xff] }
 0x5ab   : > { %13647 = vmatprep.mubr.bf16.mxu1 %v18204_v51  ;;  %v7995_v51 = vld [vmem:[#allocation2 + $0x9a] sm:$0xff]  ;;  %v8037_v36 = vpack.c.bf16 %v7993_v11, %v7992_v22 }
 0x5ac   : > { %v8038_v20 = vpack.c.bf16 %v7995_v51, %v7994_v48 }
 0x5b2   : > { %13648 = vmatmul.mubr.bf16.gmra.mrb[68].mxu1 %v7744_v24 }
 0x5b3   : > { %13667 = vmatprep.mubr.bf16.mxu1 %v8034_v9 }
 0x5ba   : > { %13668 = vmatmul.mubr.bf16.vlgmr.msra.gmra.mrb[40].mxu1 %v8035_v26 }
 0x5bb   : > { %13671 = vmatprep.mubr.bf16.mxu1 %v8036_v2 }
 0x5c2   : > { %13672 = vmatmul.mubr.bf16.gmra.mrb[44].mxu1 %v8037_v36 }
 0x5c3   : > { %13675 = vmatprep.mubr.bf16.mxu1 %v8038_v20 }
 0x5ca   : > { %13676 = vmatmul.mubr.bf16.gmra.mrb[48].mxu1 %v8039_v45 }
 0x5cb   : > { %13679 = vmatprep.mubr.bf16.mxu1 %v8040_v63 }
 0x5d2   : > { %13680 = vmatmul.mubr.bf16.gmra.mrb[52].mxu1 %v8041_v50 }
 0x5d3   : > { %13683 = vmatprep.mubr.bf16.mxu1 %v8042_v49 }
 0x5da   : > { %13684 = vmatmul.mubr.bf16.gmra.mrb[56].mxu1 %v8043_v57 }
 0x5db   : > { %13687 = vmatprep.mubr.bf16.mxu1 %v8044_v62 }
 0x5e2   : > { %13688 = vmatmul.mubr.bf16.gmra.mrb[60].mxu1 %v8045_v54 }
 0x5e3   : > { %13691 = vmatprep.mubr.bf16.mxu1 %v8046_v40 }
 0x5ea   : > { %13692 = vmatmul.mubr.bf16.gmra.mrb[64].mxu1 %v8047_v32 }
 0x5eb   : > { %13695 = vmatprep.mubr.bf16.mxu1 %v18246_v55 }
 0x5f2   : > { %13696 = vmatmul.mubr.bf16.gmra.mrb[68].mxu1 %v8049_v21 }
 0x68d   : > { %v13669_v42 = vpop.f32.mrb[40].mxu1 }
 0x68e   : > { %v8132_v4 = vpop.f32.mrb[41].mxu1  ;;  %v8297_v19 = vadd.f32 %v13669_v42, %v18325_v10 }
 0x68f   : > { %v8295_v55 = vadd.f32 %v18325_v10, %v8132_v4  ;;  %v13670_v27 = vpop.f32.mrb[42].mxu1 }
 0x690   : > { %v8298_v31 = vadd.f32 %v13670_v27, %v18325_v10  ;;  %v8135_v14 = vpop.f32.mrb[43].mxu1  ;;  %v18333_v3 = vmax.f32 %v8297_v19, 0.0 }
 0x691   : > { %v18330_v24 = vmax.f32 %v8295_v55, 0.0  ;;  %v8296_v47 = vadd.f32 %v18325_v10, %v8135_v14 }
 0x692   : > { %v18337_v15 = vmax.f32 %v8298_v31, 0.0  ;;  %v8398_v11 = vmul.f32 %v18333_v3, %v18333_v3 }
 0x693   : > { %v18335_v9 = vmax.f32 %v8296_v47, 0.0  ;;  %v8396_v46 = vmul.f32 %v18330_v24, %v18330_v24 }
 0x694   : > { %v8399_v58 = vmul.f32 %v18337_v15, %v18337_v15 }
 0x695   : > { %v8359_v7 = vadd.f32 %v18335_v9, %v18330_v24  ;;  %v8397_v6 = vmul.f32 %v18335_v9, %v18335_v9  ;;  %v13673_v26 = vpop.f32.mrb[44].mxu1 }
 0x696   : > { %v8301_v2 = vadd.f32 %v13673_v26, %v18325_v10  ;;  %v8148_v22 = vpop.f32.mrb[45].mxu1 }
 0x697   : > { %v8360_v48 = vadd.f32 %v8359_v7, %v18333_v3  ;;  %v8428_v51 = vadd.f32 %v8397_v6, %v8396_v46  ;;  %v8299_v36 = vadd.f32 %v18325_v10, %v8148_v22  ;;  %v13674_v20 = vpop.f32.mrb[46].mxu1 }
 0x698   : > { %v8302_v30 = vadd.f32 %v13674_v20, %v18325_v10  ;;  %v8151_v29 = vpop.f32.mrb[47].mxu1  ;;  %v18357_v39 = vmax.f32 %v8301_v2, 0.0 }
 0x699   : > { %v8429_v41 = vadd.f32 %v8428_v51, %v8398_v11  ;;  %v18353_v45 = vmax.f32 %v8299_v36, 0.0  ;;  %v8361_v63 = vadd.f32 %v8360_v48, %v18337_v15  ;;  %v8300_v34 = vadd.f32 %v18325_v10, %v8151_v29 }
 0x69a   : > { %v18364_v23 = vmax.f32 %v8302_v30, 0.0  ;;  %v8402_v5 = vmul.f32 %v18357_v39, %v18357_v39 }
 0x69b   : > { %v8362_v18 = vadd.f32 %v8361_v63, %v18353_v45  ;;  %v8400_v52 = vmul.f32 %v18353_v45, %v18353_v45  ;;  %v8430_v50 = vadd.f32 %v8429_v41, %v8399_v58  ;;  %v18362_v49 = vmax.f32 %v8300_v34, 0.0 }
 0x69c   : > { %v8403_v53 = vmul.f32 %v18364_v23, %v18364_v23 }
 0x69d   : > { %v8431_v0 = vadd.f32 %v8430_v50, %v8400_v52  ;;  %v8363_v59 = vadd.f32 %v8362_v18, %v18362_v49  ;;  %v8401_v38 = vmul.f32 %v18362_v49, %v18362_v49  ;;  %v13677_v57 = vpop.f32.mrb[48].mxu1 }
 0x69e   : > { %v8305_v62 = vadd.f32 %v13677_v57, %v18325_v10  ;;  %v8164_v60 = vpop.f32.mrb[49].mxu1 }
 0x69f   : > { %v8364_v16 = vadd.f32 %v8363_v59, %v18357_v39  ;;  %v8432_v61 = vadd.f32 %v8431_v0, %v8401_v38  ;;  %v8303_v54 = vadd.f32 %v18325_v10, %v8164_v60  ;;  %v13678_v40 = vpop.f32.mrb[50].mxu1 }
 0x6a0   : > { %v8306_v37 = vadd.f32 %v13678_v40, %v18325_v10  ;;  %v8167_v32 = vpop.f32.mrb[51].mxu1  ;;  %v18381_v42 = vmax.f32 %v8305_v62, 0.0 }
 0x6a1   : > { %v8433_v17 = vadd.f32 %v8432_v61, %v8402_v5  ;;  %v18377_v35 = vmax.f32 %v8303_v54, 0.0  ;;  %v8365_v21 = vadd.f32 %v8364_v16, %v18364_v23  ;;  %v8304_v25 = vadd.f32 %v18325_v10, %v8167_v32 }
 0x6a2   : > { %v18388_v31 = vmax.f32 %v8306_v37, 0.0  ;;  %v8406_v2 = vmul.f32 %v18381_v42, %v18381_v42 }
 0x6a3   : > { %v8366_v4 = vadd.f32 %v8365_v21, %v18377_v35  ;;  %v8404_v19 = vmul.f32 %v18377_v35, %v18377_v35  ;;  %v8434_v55 = vadd.f32 %v8433_v17, %v8403_v53  ;;  %v18386_v27 = vmax.f32 %v8304_v25, 0.0 }
 0x6a4   : > { %v8407_v36 = vmul.f32 %v18388_v31, %v18388_v31 }
 0x6a5   : > { %v8435_v14 = vadd.f32 %v8434_v55, %v8404_v19  ;;  %v8367_v47 = vadd.f32 %v8366_v4, %v18386_v27  ;;  %v8405_v46 = vmul.f32 %v18386_v27, %v18386_v27  ;;  %v13681_v7 = vpop.f32.mrb[52].mxu1 }
 0x6a6   : > { %v8309_v6 = vadd.f32 %v13681_v7, %v18325_v10  ;;  %v8180_v26 = vpop.f32.mrb[53].mxu1 }
 0x6a7   : > { %v8368_v22 = vadd.f32 %v8367_v47, %v18381_v42  ;;  %v8436_v11 = vadd.f32 %v8435_v14, %v8405_v46  ;;  %v8307_v48 = vadd.f32 %v18325_v10, %v8180_v26  ;;  %v13682_v51 = vpop.f32.mrb[54].mxu1 }
 0x6a8   : > { %v8310_v20 = vadd.f32 %v13682_v51, %v18325_v10  ;;  %v8183_v58 = vpop.f32.mrb[55].mxu1  ;;  %v18405_v34 = vmax.f32 %v8309_v6, 0.0 }
 0x6a9   : > { %v8437_v30 = vadd.f32 %v8436_v11, %v8406_v2  ;;  %v18401_v29 = vmax.f32 %v8307_v48, 0.0  ;;  %v8369_v41 = vadd.f32 %v8368_v22, %v18388_v31  ;;  %v8308_v63 = vadd.f32 %v18325_v10, %v8183_v58 }
 0x6aa   : > { %v18412_v59 = vmax.f32 %v8310_v20, 0.0  ;;  %v8410_v61 = vmul.f32 %v18405_v34, %v18405_v34 }
 0x6ab   : > { %v8370_v18 = vadd.f32 %v8369_v41, %v18401_v29  ;;  %v8408_v52 = vmul.f32 %v18401_v29, %v18401_v29  ;;  %v8438_v50 = vadd.f32 %v8437_v30, %v8407_v36  ;;  %v18410_v0 = vmax.f32 %v8308_v63, 0.0 }
 0x6ac   : > { %v8411_v32 = vmul.f32 %v18412_v59, %v18412_v59 }
 0x6ad   : > { %v8439_v38 = vadd.f32 %v8438_v50, %v8408_v52  ;;  %v8371_v57 = vadd.f32 %v8370_v18, %v18410_v0  ;;  %v8409_v62 = vmul.f32 %v18410_v0, %v18410_v0  ;;  %v13685_v60 = vpop.f32.mrb[56].mxu1 }
 0x6ae   : > { %v8313_v5 = vadd.f32 %v13685_v60, %v18325_v10  ;;  %v8196_v16 = vpop.f32.mrb[57].mxu1 }
 0x6af   : > { %v8372_v54 = vadd.f32 %v8371_v57, %v18405_v34  ;;  %v8440_v40 = vadd.f32 %v8439_v38, %v8409_v62  ;;  %v8311_v53 = vadd.f32 %v18325_v10, %v8196_v16  ;;  %v13686_v37 = vpop.f32.mrb[58].mxu1 }
 0x6b0   : > { %v8314_v17 = vadd.f32 %v13686_v37, %v18325_v10  ;;  %v8199_v21 = vpop.f32.mrb[59].mxu1  ;;  %v18429_v14 = vmax.f32 %v8313_v5, 0.0 }
 0x6b1   : > { %v8441_v25 = vadd.f32 %v8440_v40, %v8410_v61  ;;  %v18425_v4 = vmax.f32 %v8311_v53, 0.0  ;;  %v8373_v19 = vadd.f32 %v8372_v54, %v18412_v59  ;;  %v8312_v55 = vadd.f32 %v18325_v10, %v8199_v21 }
 0x6b2   : > { %v18436_v26 = vmax.f32 %v8314_v17, 0.0  ;;  %v8414_v20 = vmul.f32 %v18429_v14, %v18429_v14 }
 0x6b3   : > { %v8374_v47 = vadd.f32 %v8373_v19, %v18425_v4  ;;  %v8412_v46 = vmul.f32 %v18425_v4, %v18425_v4  ;;  %v8442_v7 = vadd.f32 %v8441_v25, %v8411_v32  ;;  %v18434_v6 = vmax.f32 %v8312_v55, 0.0 }
 0x6b4   : > { %v8415_v18 = vmul.f32 %v18436_v26, %v18436_v26 }
 0x6b5   : > { %v8443_v2 = vadd.f32 %v8442_v7, %v8412_v46  ;;  %v8375_v22 = vadd.f32 %v8374_v47, %v18434_v6  ;;  %v8413_v11 = vmul.f32 %v18434_v6, %v18434_v6  ;;  %v13689_v48 = vpop.f32.mrb[60].mxu1 }
 0x6b6   : > { %v8317_v51 = vadd.f32 %v13689_v48, %v18325_v10  ;;  %v8212_v36 = vpop.f32.mrb[61].mxu1 }
 0x6b7   : > { %v8376_v58 = vadd.f32 %v8375_v22, %v18429_v14  ;;  %v8444_v30 = vadd.f32 %v8443_v2, %v8413_v11  ;;  %v8315_v41 = vadd.f32 %v18325_v10, %v8212_v36  ;;  %v13690_v63 = vpop.f32.mrb[62].mxu1 }
 0x6b8   : > { %v8215_v52 = vpop.f32.mrb[63].mxu1  ;;  %v18452_v60 = vmax.f32 %v8317_v51, 0.0  ;;  %v8318_v5 = vadd.f32 %v13690_v63, %v18325_v10 }
 0x6b9   : > { %v8445_v50 = vadd.f32 %v8444_v30, %v8414_v20  ;;  %v18448_v38 = vmax.f32 %v8315_v41, 0.0  ;;  %v8377_v57 = vadd.f32 %v8376_v58, %v18436_v26  ;;  %v8316_v62 = vadd.f32 %v18325_v10, %v8215_v52 }
 0x6ba   : > { %v18463_v21 = vmax.f32 %v8318_v5, 0.0  ;;  %v8418_v19 = vmul.f32 %v18452_v60, %v18452_v60 }
 0x6bb   : > { %v8378_v16 = vadd.f32 %v8377_v57, %v18448_v38  ;;  %v8416_v61 = vmul.f32 %v18448_v38, %v18448_v38  ;;  %v8446_v54 = vadd.f32 %v8445_v50, %v8415_v18  ;;  %v18458_v40 = vmax.f32 %v8316_v62, 0.0 }
 0x6bc   : > { %v8419_v20 = vmul.f32 %v18463_v21, %v18463_v21 }
 0x6bd   : > { %v8447_v53 = vadd.f32 %v8446_v54, %v8416_v61  ;;  %v8379_v37 = vadd.f32 %v8378_v16, %v18458_v40  ;;  %v8417_v32 = vmul.f32 %v18458_v40, %v18458_v40  ;;  %v13693_v17 = vpop.f32.mrb[64].mxu1 }
 0x6be   : > { %v8228_v25 = vpop.f32.mrb[65].mxu1  ;;  %v8321_v2 = vadd.f32 %v13693_v17, %v18325_v10 }
 0x6bf   : > { %v8380_v55 = vadd.f32 %v8379_v37, %v18452_v60  ;;  %v8448_v47 = vadd.f32 %v8447_v53, %v8417_v32  ;;  %v8319_v46 = vadd.f32 %v18325_v10, %v8228_v25  ;;  %v13694_v7 = vpop.f32.mrb[66].mxu1 }
 0x6c0   : > { %v8231_v22 = vpop.f32.mrb[67].mxu1  ;;  %v8322_v30 = vadd.f32 %v13694_v7, %v18325_v10  ;;  %v18482_v52 = vmax.f32 %v8321_v2, 0.0 }
 0x6c1   : > { %v8449_v11 = vadd.f32 %v8448_v47, %v8418_v19  ;;  %v18470_v48 = vmax.f32 %v8319_v46, 0.0  ;;  %v8381_v51 = vadd.f32 %v8380_v55, %v18463_v21  ;;  %v8320_v36 = vadd.f32 %v18325_v10, %v8231_v22 }
 0x6c2   : > { %v18485_v5 = vmax.f32 %v8322_v30, 0.0 }
 0x6c3   : > { %v8382_v58 = vadd.f32 %v8381_v51, %v18470_v48  ;;  %v18478_v41 = vmax.f32 %v8320_v36, 0.0  ;;  %v8420_v63 = vmul.f32 %v18470_v48, %v18470_v48  ;;  %v8450_v18 = vadd.f32 %v8449_v11, %v8419_v20 }
 0x6c4   : > { %v8422_v51 = vmul.f32 %v18482_v52, %v18482_v52 }
 0x6c5   : > { %v8383_v50 = vadd.f32 %v8382_v58, %v18478_v41  ;;  %v13697_v57 = vpop.f32.mrb[68].mxu1  ;;  %v8451_v53 = vadd.f32 %v8450_v18, %v8420_v63  ;;  %v8421_v37 = vmul.f32 %v18478_v41, %v18478_v41 }
 0x6c6   : > { %v8244_v62 = vpop.f32.mrb[69].mxu1  ;;  %v8325_v17 = vadd.f32 %v13697_v57, %v18325_v10 }
 0x6c7   : > { %v8384_v16 = vadd.f32 %v8383_v50, %v18482_v52  ;;  %v8323_v61 = vadd.f32 %v18325_v10, %v8244_v62  ;;  %v13698_v54 = vpop.f32.mrb[70].mxu1  ;;  %v8452_v2 = vadd.f32 %v8451_v53, %v8421_v37 }
 0x6c8   : > { %v8247_v32 = vpop.f32.mrb[71].mxu1  ;;  %v8326_v46 = vadd.f32 %v13698_v54, %v18325_v10  ;;  %v18500_v22 = vmax.f32 %v8325_v17, 0.0 }
 0x6c9   : > { %v18492_v25 = vmax.f32 %v8323_v61, 0.0  ;;  %v8385_v19 = vadd.f32 %v8384_v16, %v18485_v5  ;;  %v8324_v55 = vadd.f32 %v18325_v10, %v8247_v32  ;;  %v8453_v58 = vadd.f32 %v8452_v2, %v8422_v51 }
 0x6ca   : > { %v18505_v36 = vmax.f32 %v8326_v46, 0.0  ;;  %v8423_v10 = vmul.f32 %v18485_v5, %v18485_v5  ;;  %v8426_v17 = vmul.f32 %v18500_v22, %v18500_v22 }
 0x6cb   : > { %v8386_v47 = vadd.f32 %v8385_v19, %v18492_v25  ;;  %v18498_v7 = vmax.f32 %v8324_v55, 0.0  ;;  %v8424_v18 = vmul.f32 %v18492_v25, %v18492_v25  ;;  %v15281_v19 = vld [vmem:[#allocation2] sm:$0xff] }
 0x6cc   : > { %v8454_v50 = vadd.f32 %v8453_v58, %v8423_v10  ;;  %v8427_v46 = vmul.f32 %v18505_v36, %v18505_v36  ;;  %v15090_v58 = vld [vmem:[%s19006_s2 + $0x4e8] sm:$0xff]   ;;  %v15092_v10 = vld [vmem:[%s19006_s2 + $0x4f8] sm:$0xff]  }
 0x6cd   : > { %v8387_v11 = vadd.f32 %v8386_v47, %v18498_v7  ;;  %v8425_v54 = vmul.f32 %v18498_v7, %v18498_v7  ;;  %v19254_v47 = vmov 0.0|0.0  }
 0x6ce   : > { %v8455_v16 = vadd.f32 %v8454_v50, %v8424_v18  ;;  %v15094_v18 = vld [vmem:[%s19006_s2 + $0x508] sm:$0xff]   ;;  %v18562_v50 = vld [vmem:[%s19006_s2 + $0x490] sm:$0xff]  }
 0x6cf   : > { %v8388_v20 = vadd.f32 %v8387_v11, %v18500_v22 }
 0x6d0   : > { %v8456_v37 = vadd.f32 %v8455_v16, %v8425_v54 }
 0x6d1   : > { %v8389_v30 = vadd.f32 %v8388_v20, %v18505_v36  ;;  %v19255_v20 = vld [vmem:[#allocation32_spill] sm:$0xff] }
 0x6d2   : > { %v8457_v55 = vadd.f32 %v8456_v37, %v8426_v17  ;;  %v8610_v17 = vrot.slane %v18322_v56, 5 }
 0x6d3   : > { %v8390_v63 = vrot.slane %v8389_v30, 4 }
 0x6d4   : > { %v8458_v2 = vadd.f32 %v8457_v55, %v8427_v46  ;;  %v19256_v46 = vld [vmem:[#allocation11_spill] sm:$0xff] }
 0x6d5   : > { %v8391_v57 = vadd.f32 %v8390_v63, %v8389_v30  ;;  %v15091_v30 = vld [vmem:[%s19006_s2 + $0x4f0] sm:$0xff]   ;;  %v15093_v63 = vld [vmem:[%s19006_s2 + $0x500] sm:$0xff]  }
 0x6d6   : > { %v8459_v11 = vrot.slane %v8458_v2, 4 }
 0x6d7   : > { %v8392_v62 = vrot.slane %v8391_v57, 2 }
 0x6d9   : > { %v8393_v61 = vadd.f32 %v8392_v62, %v8391_v57 }
 0x6db   : > { %v8394_v53 = vrot.slane %v8393_v61, 1 }
 0x6dd   : > { %v8395_v32 = vadd.f32 %v8394_v53, %v8393_v61 }
 0x6df   : > { %13732 = vmatmul.mubr.f32.vlgmr.msra.gmra.mrb[32].mxu0 %v8395_v32 }
 0x6e0   : > { %14227 = vmatpush3.bf16.msra.mxu0 %v17302_v43  ;;  %13766 = vmatprep.mubr.msk.f32.mxu0 %vm15292_vm6, %v15281_v19  ;;  %v8460_v43 = vadd.f32 %v8459_v11, %v8458_v2  ;;  %v8656_v11 = vsub.s32 6, %v17499_v44 }
 0x6e1   : > { %14228 = vmatprep.subr.bf16.mxu0 %v19254_v47 }
 0x6e2   : > { %v8461_v51 = vrot.slane %v8460_v43, 2 }
 0x6e4   : > { %14230 = vmatpush3.bf16.msra.mxu0 %v17315_v8  ;;  %v8462_v8 = vadd.f32 %v8461_v51, %v8460_v43 }
 0x6e5   : > { %14231 = vmatprep.subr.bf16.mxu0 %v19254_v47 }
 0x6e8   : > { %14233 = vmatpush3.bf16.msra.mxu0 %v17327_v28  ;;  %v8463_v28 = vrot.slane %v8462_v8, 1 }
 0x6e9   : > { %14234 = vmatprep.subr.bf16.mxu0 %v19254_v47 }
 0x6ec   : > { %14236 = vmatpush3.bf16.msra.mxu0 %v17339_v33  ;;  %v8464_v33 = vadd.f32 %v8463_v28, %v8462_v8 }
 0x6ed   : > { %14237 = vmatprep.subr.bf16.mxu0 %v19254_v47 }
 0x6f0   : > { %14239 = vmatpush3.bf16.msra.mxu0 %v17359_v12  ;;  %v15087_v12 = vld [vmem:[%s19006_s2 + $0x4d0] sm:$0xff]  }
 0x6f1   : > { %14240 = vmatprep.subr.bf16.mxu0 %v19254_v47 }
 0x6f4   : > { %14242 = vmatpush3.bf16.msra.mxu0 %v17379_v1  ;;  %v15088_v1 = vld [vmem:[%s19006_s2 + $0x4d8] sm:$0xff]  }
 0x6f5   : > { %14243 = vmatprep.subr.bf16.mxu0 %v19254_v47 }
 0x6f8   : > { %14245 = vmatpush3.bf16.msra.mxu0 %v17391_v13  ;;  %v15089_v13 = vld [vmem:[%s19006_s2 + $0x4e0] sm:$0xff]  }
 0x6f9   : > { %14246 = vmatprep.subr.bf16.mxu0 %v19254_v47 }
 0x6fc   : > { %14248 = vmatpush3.bf16.msra.mxu0 %v19255_v20 }
 0x6fd   : > { %13769 = vmatprep.subr.bf16.mxu0 %v15087_v12 }
 0x6ff   : > { %13767 = vmatmul.mubr.f32.vlgmr.msra.gmra.mrb[34].mxu0 %v8464_v33 }
 0x700   : > { %13770 = vmatpush3.bf16.msra.mxu0 %v15087_v12 }
 0x701   : > { %13771 = vmatprep.subr.bf16.mxu0 %v15088_v1 }
 0x704   : > { %13772 = vmatpush3.bf16.msra.mxu0 %v15088_v1 }
 0x705   : > { %13773 = vmatprep.subr.bf16.mxu0 %v15089_v13 }
 0x708   : > { %13774 = vmatpush3.bf16.msra.mxu0 %v15089_v13 }
 0x709   : > { %13775 = vmatprep.subr.bf16.mxu0 %v15090_v58 }
 0x70c   : > { %13776 = vmatpush3.bf16.msra.mxu0 %v15090_v58 }
 0x70d   : > { %13777 = vmatprep.subr.bf16.mxu0 %v15091_v30 }
 0x710   : > { %13778 = vmatpush3.bf16.msra.mxu0 %v15091_v30 }
 0x711   : > { %13779 = vmatprep.subr.bf16.mxu0 %v15092_v10 }
 0x714   : > { %13780 = vmatpush3.bf16.msra.mxu0 %v15092_v10 }
 0x715   : > { %13781 = vmatprep.subr.bf16.mxu0 %v15093_v63 }
 0x718   : > { %13782 = vmatpush3.bf16.msra.mxu0 %v15093_v63 }
 0x719   : > { %13783 = vmatprep.subr.bf16.mxu0 %v15094_v18 }
 0x71c   : > { %13784 = vmatpush3.bf16.msra.mxu0 %v15094_v18 }
 0x71d   : > { %13793 = vmatprep.subr.bf16.mxu0 %v18562_v50 }
 0x7b2   : > { %v8531_v57 = vpop.f32.mrb[32].mxu0 }
 0x7b3   : > { %v13733_v62 = vpop.f32.mrb[33].mxu0  ;;  %v8605_v16 = vmul.f32 %v8531_v57, %v8531_v57 }
 0x7d2   : > { %v8601_v61 = vpop.f32.mrb[34].mxu0 }
 0x7d3   : > { %v8606_v54 = vsub.f32 %v8601_v61, %v8605_v16  ;;  %v13768_v53 = vpop.f32.mrb[35].mxu0 }
 0x7d5   : > { %v8607_v37 = vmax.f32 %v8606_v54, 0.0 }
 0x7d7   : > { %v8608_v32 = vadd.f32 1e-05, %v8607_v37 }
 0x7d9   : > { %15217 = vrsqrt.f32 %v8608_v32 }
 0x7e3   : > { %v15218_v19 = vpop.eup %15217 }
 0x7e4   : > { %v8612_v55 = vmul.f32 %v15218_v19, %v8610_v17 }
 0x7e6   : > { %v8613_v47 = vmul.f32 %v8612_v55, %v8531_v57  ;;  %v8621_v2 = vrot.slane %v8612_v55, %v19256_v46 }
 0x7e8   : > { %v8615_v43 = vrot.slane %v8613_v47, 2  ;;  %v8622_v51 = vmul.f32 %v8621_v2, %v18330_v24  ;;  %v8623_v8 = vmul.f32 %v8621_v2, %v18335_v9  ;;  %v8624_v28 = vmul.f32 %v8621_v2, %v18333_v3 }
 0x7e9   : > { %v8625_v20 = vmul.f32 %v8621_v2, %v18337_v15  ;;  %v8626_v33 = vmul.f32 %v8621_v2, %v18353_v45  ;;  %v8627_v12 = vmul.f32 %v8621_v2, %v18362_v49  ;;  %v8628_v1 = vmul.f32 %v8621_v2, %v18357_v39 }
 0x7ea   : > { %v8617_v13 = vsub.f32 %v18322_v56, %v8615_v43  ;;  %v8629_v58 = vmul.f32 %v8621_v2, %v18364_v23  ;;  %v8630_v30 = vmul.f32 %v8621_v2, %v18377_v35  ;;  %v8631_v24 = vmul.f32 %v8621_v2, %v18386_v27 }
 0x7eb   : > { %v8632_v9 = vmul.f32 %v8621_v2, %v18381_v42  ;;  %v8633_v3 = vmul.f32 %v8621_v2, %v18388_v31  ;;  %v8634_v15 = vmul.f32 %v8621_v2, %v18401_v29  ;;  %v8635_v45 = vmul.f32 %v8621_v2, %v18410_v0 }
 0x7ec   : > { %v18583_v10 = vrot.slane %v8617_v13, %v8656_v11  ;;  %v8636_v39 = vmul.f32 %v8621_v2, %v18405_v34  ;;  %v8637_v56 = vmul.f32 %v8621_v2, %v18412_v59  ;;  %v8638_v49 = vmul.f32 %v8621_v2, %v18425_v4 }
 0x7ed   : > { %v8639_v23 = vmul.f32 %v8621_v2, %v18434_v6  ;;  %v8640_v35 = vmul.f32 %v8621_v2, %v18429_v14  ;;  %v8641_v42 = vmul.f32 %v8621_v2, %v18436_v26  ;;  %v8642_v27 = vmul.f32 %v8621_v2, %v18448_v38 }
 0x7ee   : > { %v8643_v31 = vmul.f32 %v8621_v2, %v18458_v40  ;;  %v8644_v29 = vmul.f32 %v8621_v2, %v18452_v60  ;;  %v8645_v0 = vmul.f32 %v8621_v2, %v18463_v21  ;;  %v8646_v34 = vmul.f32 %v8621_v2, %v18470_v48 }
 0x7ef   : > { %v8647_v59 = vmul.f32 %v8621_v2, %v18478_v41  ;;  %v8648_v4 = vmul.f32 %v8621_v2, %v18482_v52  ;;  %v8649_v6 = vmul.f32 %v8621_v2, %v18485_v5  ;;  %v8650_v14 = vmul.f32 %v8621_v2, %v18492_v25 }
 0x7f0   : > { %v8651_v26 = vmul.f32 %v8621_v2, %v18498_v7  ;;  %v8652_v38 = vmul.f32 %v8621_v2, %v18500_v22  ;;  %v8653_v40 = vmul.f32 %v8621_v2, %v18505_v36  ;;  %v8658_v60 = vadd.f32 %v18583_v10, %v8622_v51 }
 0x7f1   : > { %v8659_v21 = vadd.f32 %v18583_v10, %v8623_v8  ;;  %v8660_v48 = vadd.f32 %v18583_v10, %v8624_v28  ;;  %v8661_v41 = vadd.f32 %v18583_v10, %v8625_v20  ;;  %v8662_v52 = vadd.f32 %v18583_v10, %v8626_v33  ;;  %v8758_v33 = vld [vmem:[#allocation2 + $0x1] ss:$2 sm:$0xff] }
 0x7f2   : > { %v8663_v5 = vadd.f32 %v18583_v10, %v8627_v12  ;;  %v8664_v25 = vadd.f32 %v18583_v10, %v8628_v1  ;;  %v8665_v7 = vadd.f32 %v18583_v10, %v8629_v58  ;;  %v8666_v22 = vadd.f32 %v18583_v10, %v8630_v30  ;;  %8690 = vst [vmem:[#allocation2 + $0x19] sm:$0xff] %v8658_v60 }
 0x7f3   : > { %v8667_v36 = vadd.f32 %v18583_v10, %v8631_v24  ;;  %v8668_v63 = vadd.f32 %v18583_v10, %v8632_v9  ;;  %v8669_v18 = vadd.f32 %v18583_v10, %v8633_v3  ;;  %v8670_v57 = vadd.f32 %v18583_v10, %v8634_v15  ;;  %8691 = vst [vmem:[#allocation2 + $0x21] sm:$0xff] %v8659_v21  ;;  %v15096_v9 = vld [vmem:[%s19006_s2 + $0x498] sm:$0xff]  }
 0x7f4   : > { %8692 = vst [vmem:[#allocation2 + $0x31] sm:$0xff] %v8660_v48  ;;  %8693 = vst [vmem:[#allocation2 + $0x39] sm:$0xff] %v8661_v41  ;;  %v8671_v62 = vadd.f32 %v18583_v10, %v8635_v45  ;;  %v8672_v16 = vadd.f32 %v18583_v10, %v8636_v39  ;;  %v8673_v61 = vadd.f32 %v18583_v10, %v8637_v56  ;;  %v15097_v45 = vld [vmem:[%s19006_s2 + $0x4a0] sm:$0xff]  }
 0x7f5   : > { %8694 = vst [vmem:[#allocation2 + $0x49] sm:$0xff] %v8662_v52  ;;  %v8674_v54 = vadd.f32 %v18583_v10, %v8638_v49  ;;  %8695 = vst [vmem:[#allocation2 + $0x51] sm:$0xff] %v8663_v5  ;;  %v8675_v53 = vadd.f32 %v18583_v10, %v8639_v23  ;;  %v8676_v37 = vadd.f32 %v18583_v10, %v8640_v35  ;;  %v8722_v56 = vld [vmem:[#allocation2] ss:$2 sm:$0xff] }
 0x7f6   : > { %8696 = vst [vmem:[#allocation2 + $0x61] sm:$0xff] %v8664_v25  ;;  %8697 = vst [vmem:[#allocation2 + $0x69] sm:$0xff] %v8665_v7  ;;  %v8677_v32 = vadd.f32 %v18583_v10, %v8641_v42  ;;  %v8678_v17 = vadd.f32 %v18583_v10, %v8642_v27  ;;  %v8679_v19 = vadd.f32 %v18583_v10, %v8643_v31  ;;  %v15098_v35 = vld [vmem:[%s19006_s2 + $0x4a8] sm:$0xff]   ;;  %v15100_v27 = vld [vmem:[%s19006_s2 + $0x4b8] sm:$0xff]  }
 0x7f7   : > { %8698 = vst [vmem:[#allocation2 + $0x79] sm:$0xff] %v8666_v22  ;;  %8699 = vst [vmem:[#allocation2 + $0x81] sm:$0xff] %v8667_v36  ;;  %v8680_v55 = vadd.f32 %v18583_v10, %v8644_v29  ;;  %v8681_v47 = vadd.f32 %v18583_v10, %v8645_v0  ;;  %v8682_v46 = vadd.f32 %v18583_v10, %v8646_v34  ;;  %v15101_v31 = vld [vmem:[%s19006_s2 + $0x4c0] sm:$0xff]   ;;  %v15102_v29 = vld [vmem:[%s19006_s2 + $0x4c8] sm:$0xff]  }
 0x7f8   : > { %8700 = vst [vmem:[#allocation2 + $0x91] sm:$0xff] %v8668_v63  ;;  %8701 = vst [vmem:[#allocation2 + $0x99] sm:$0xff] %v8669_v18  ;;  %v8683_v2 = vadd.f32 %v18583_v10, %v8647_v59  ;;  %v8684_v11 = vadd.f32 %v18583_v10, %v8648_v4  ;;  %v8685_v43 = vadd.f32 %v18583_v10, %v8649_v6  ;;  %v15103_v0 = vld [vmem:[%s19006_s2 + $0x510] sm:$0xff]   ;;  %v15106_v5 = vld [vmem:[%s19006_s2 + $0x528] sm:$0xff]  }
 0x7f9   : > { %8702 = vst [vmem:[#allocation2 + $0xa9] sm:$0xff] %v8670_v57  ;;  %8703 = vst [vmem:[#allocation2 + $0xb1] sm:$0xff] %v8671_v62  ;;  %v8686_v51 = vadd.f32 %v18583_v10, %v8650_v14  ;;  %v8687_v8 = vadd.f32 %v18583_v10, %v8651_v26  ;;  %v8688_v28 = vadd.f32 %v18583_v10, %v8652_v38  ;;  %v15104_v26 = vld [vmem:[%s19006_s2 + $0x518] sm:$0xff]   ;;  %v9020_v48 = vld [vmem:[#allocation2 + $0x2] ss:$2 sm:$0xff] }
 0x7fa   : > { %8704 = vst [vmem:[#allocation2 + $0xc1] sm:$0xff] %v8672_v16  ;;  %8705 = vst [vmem:[#allocation2 + $0xc9] sm:$0xff] %v8673_v61  ;;  %v8689_v20 = vadd.f32 %v18583_v10, %v8653_v40  ;;  %v15105_v40 = vld [vmem:[%s19006_s2 + $0x520] sm:$0xff]   ;;  %v15107_v7 = vld [vmem:[%s19006_s2 + $0x530] sm:$0xff]  }
 0x7fb   : > { %8706 = vst [vmem:[#allocation2 + $0xd9] sm:$0xff] %v8674_v54  ;;  %8707 = vst [vmem:[#allocation2 + $0xe1] sm:$0xff] %v8675_v53  ;;  %v8760_v12 = vld [vmem:[#allocation2 + $0x31] ss:$2 sm:$0xff]  ;;  %v8724_v49 = vld [vmem:[#allocation2 + $0x30] ss:$2 sm:$0xff] }
 0x7fc   : > { %8708 = vst [vmem:[#allocation2 + $0xf1] sm:$0xff] %v8676_v37  ;;  %8709 = vst [vmem:[#allocation2 + $0xf9] sm:$0xff] %v8677_v32  ;;  %v8789_v1 = vpack.c.bf16 %v8760_v12, %v8758_v33  ;;  %v8753_v42 = vpack.c.bf16 %v8724_v49, %v8722_v56  ;;  %v9022_v41 = vld [vmem:[#allocation2 + $0x32] ss:$2 sm:$0xff]  ;;  %v15110_v63 = vld [vmem:[%s19006_s2 + $0x548] sm:$0xff]  }
 0x7fd   : > { %8710 = vst [vmem:[#allocation2 + $0x109] sm:$0xff] %v8678_v17  ;;  %8711 = vst [vmem:[#allocation2 + $0x111] sm:$0xff] %v8679_v19  ;;  %v8762_v13 = vld [vmem:[#allocation2 + $0x61] ss:$2 sm:$0xff]  ;;  %v8726_v34 = vld [vmem:[#allocation2 + $0x60] ss:$2 sm:$0xff]  ;;  %v9051_v25 = vpack.c.bf16 %v9022_v41, %v9020_v48 }
 0x7fe   : > { %8712 = vst [vmem:[#allocation2 + $0x121] sm:$0xff] %v8680_v55  ;;  %8713 = vst [vmem:[#allocation2 + $0x129] sm:$0xff] %v8681_v47  ;;  %13785 = vmatprep.mubr.bf16.mxu0 %v8789_v1  ;;  %v15108_v22 = vld [vmem:[%s19006_s2 + $0x538] sm:$0xff]   ;;  %v15109_v36 = vld [vmem:[%s19006_s2 + $0x540] sm:$0xff]  }
 0x7ff   : > { %8714 = vst [vmem:[#allocation2 + $0x139] sm:$0xff] %v8682_v46  ;;  %8715 = vst [vmem:[#allocation2 + $0x141] sm:$0xff] %v8683_v2  ;;  %v8764_v58 = vld [vmem:[#allocation2 + $0x91] ss:$2 sm:$0xff]  ;;  %v8728_v59 = vld [vmem:[#allocation2 + $0x90] ss:$2 sm:$0xff] }
 0x800   : > { %8716 = vst [vmem:[#allocation2 + $0x151] sm:$0xff] %v8684_v11  ;;  %8717 = vst [vmem:[#allocation2 + $0x159] sm:$0xff] %v8685_v43  ;;  %v8790_v30 = vpack.c.bf16 %v8764_v58, %v8762_v13  ;;  %v8754_v14 = vpack.c.bf16 %v8728_v59, %v8726_v34  ;;  %v15111_v18 = vld [vmem:[%s19006_s2 + $0x550] sm:$0xff]   ;;  %v15112_v53 = vld [vmem:[%s19006_s2 + $0x558] sm:$0xff]  }
 0x801   : > { %8718 = vst [vmem:[#allocation2 + $0x169] sm:$0xff] %v8686_v51  ;;  %8719 = vst [vmem:[#allocation2 + $0x171] sm:$0xff] %v8687_v8  ;;  %v8766_v24 = vld [vmem:[#allocation2 + $0xc1] ss:$2 sm:$0xff]  ;;  %v8730_v4 = vld [vmem:[#allocation2 + $0xc0] ss:$2 sm:$0xff] }
 0x802   : > { %8720 = vst [vmem:[#allocation2 + $0x181] sm:$0xff] %v8688_v28  ;;  %8721 = vst [vmem:[#allocation2 + $0x189] sm:$0xff] %v8689_v20  ;;  %13786 = vmatmul.mubr.bf16.vlgmr.msra.gmra.mrb[36].mxu0 %v8790_v30  ;;  %v9024_v57 = vld [vmem:[#allocation2 + $0x62] ss:$2 sm:$0xff]  ;;  %v9026_v62 = vld [vmem:[#allocation2 + $0x92] ss:$2 sm:$0xff] }
 0x803   : > { %v8768_v3 = vld [vmem:[#allocation2 + $0xf1] ss:$2 sm:$0xff]  ;;  %13794 = vmatpush3.bf16.msra.mxu0 %v18562_v50  ;;  %v8732_v6 = vld [vmem:[#allocation2 + $0xf0] ss:$2 sm:$0xff]  ;;  %v9052_v54 = vpack.c.bf16 %v9026_v62, %v9024_v57  ;;  %v15113_v32 = vld [vmem:[%s19006_s2 + $0x560] sm:$0xff]  }
 0x804   : > { %v8791_v15 = vpack.c.bf16 %v8768_v3, %v8766_v24  ;;  %13795 = vmatprep.subr.bf16.mxu0 %v15096_v9  ;;  %v15099_v50 = vld [vmem:[%s19006_s2 + $0x4b0] sm:$0xff]   ;;  %v8755_v38 = vpack.c.bf16 %v8732_v6, %v8730_v4  ;;  %v15114_v2 = vld [vmem:[%s19006_s2 + $0x568] sm:$0xff]   ;;  %v15116_v51 = vld [vmem:[%s19006_s2 + $0x578] sm:$0xff]  }
 0x805   : > { %v8770_v10 = vld [vmem:[#allocation2 + $0x121] ss:$2 sm:$0xff]  ;;  %v8734_v60 = vld [vmem:[#allocation2 + $0x120] ss:$2 sm:$0xff]  ;;  %v15115_v43 = vld [vmem:[%s19006_s2 + $0x570] sm:$0xff]  }
 0x806   : > { %13789 = vmatprep.mubr.bf16.mxu0 %v8791_v15  ;;  %v9028_v16 = vld [vmem:[#allocation2 + $0xc2] ss:$2 sm:$0xff]  ;;  %v9030_v61 = vld [vmem:[#allocation2 + $0xf2] ss:$2 sm:$0xff]  ;;  %v9177_v55 = vld [vmem:[#allocation2 + $0x3] ss:$2 sm:$0xff] }
 0x807   : > { %v8772_v39 = vld [vmem:[#allocation2 + $0x151] ss:$2 sm:$0xff]  ;;  %13796 = vmatpush3.bf16.msra.mxu0 %v15096_v9  ;;  %v8736_v21 = vld [vmem:[#allocation2 + $0x150] ss:$2 sm:$0xff]  ;;  %v9053_v37 = vpack.c.bf16 %v9030_v61, %v9028_v16  ;;  %v15117_v8 = vld [vmem:[%s19006_s2 + $0x580] sm:$0xff]  }
 0x808   : > { %13797 = vmatprep.subr.bf16.mxu0 %v15097_v45  ;;  %v8792_v23 = vpack.c.bf16 %v8772_v39, %v8770_v10  ;;  %v8756_v52 = vpack.c.bf16 %v8736_v21, %v8734_v60  ;;  %v9032_v17 = vld [vmem:[#allocation2 + $0x122] ss:$2 sm:$0xff]  ;;  %v9034_v19 = vld [vmem:[#allocation2 + $0x152] ss:$2 sm:$0xff]  ;;  %v9179_v47 = vld [vmem:[#allocation2 + $0x33] ss:$2 sm:$0xff] }
 0x809   : > { %v9054_v46 = vpack.c.bf16 %v9034_v19, %v9032_v17  ;;  %v9208_v11 = vpack.c.bf16 %v9179_v47, %v9177_v55  ;;  %v15118_v28 = vld [vmem:[%s19006_s2 + $0x588] sm:$0xff]   ;;  %v15119_v20 = vld [vmem:[%s19006_s2 + $0x590] sm:$0xff]   ;;  %v15120_v30 = vld [vmem:[%s19006_s2 + $0x598] sm:$0xff]  }
 0x80a   : > { %13790 = vmatmul.mubr.bf16.gmra.mrb[40].mxu0 %v8792_v23  ;;  %v9181_v33 = vld [vmem:[#allocation2 + $0x63] ss:$2 sm:$0xff]  ;;  %v9183_v12 = vld [vmem:[#allocation2 + $0x93] ss:$2 sm:$0xff]  ;;  %v9335_v10 = vld [vmem:[#allocation2 + $0x48] ss:$2 sm:$0xff] }
 0x80b   : > { %13798 = vmatpush3.bf16.msra.mxu0 %v15097_v45  ;;  %13809 = vmatprep.mubr.bf16.mxu0 %v8753_v42  ;;  %v9185_v1 = vld [vmem:[#allocation2 + $0xc3] ss:$2 sm:$0xff]  ;;  %v9187_v13 = vld [vmem:[#allocation2 + $0xf3] ss:$2 sm:$0xff]  ;;  %v9209_v58 = vpack.c.bf16 %v9183_v12, %v9181_v33  ;;  %v9333_v45 = vld [vmem:[#allocation2 + $0x18] ss:$2 sm:$0xff] }
 0x80c   : > { %13799 = vmatprep.subr.bf16.mxu0 %v15098_v35  ;;  %v9210_v24 = vpack.c.bf16 %v9187_v13, %v9185_v1  ;;  %v15121_v9 = vld [vmem:[%s19006_s2 + $0x5a0] sm:$0xff]   ;;  %v15122_v56 = vld [vmem:[%s19006_s2 + $0x5a8] sm:$0xff]   ;;  %v9364_v49 = vpack.c.bf16 %v9335_v10, %v9333_v45  ;;  %v15123_v23 = vld [vmem:[%s19006_s2 + $0x5b0] sm:$0xff]  }
 0x80d   : > { %v9189_v3 = vld [vmem:[#allocation2 + $0x123] ss:$2 sm:$0xff]  ;;  %v9191_v15 = vld [vmem:[#allocation2 + $0x153] ss:$2 sm:$0xff]  ;;  %v9343_v34 = vld [vmem:[#allocation2 + $0x108] ss:$2 sm:$0xff] }
 0x80e   : > { %v9211_v39 = vpack.c.bf16 %v9191_v15, %v9189_v3  ;;  %v15125_v42 = vld [vmem:[%s19006_s2 + $0x5c0] sm:$0xff]   ;;  %v15128_v4 = vld [vmem:[%s19006_s2 + $0x5d8] sm:$0xff]   ;;  %v9492_v60 = vld [vmem:[#allocation2 + $0x49] ss:$2 sm:$0xff] }
 0x80f   : > { %13800 = vmatpush3.bf16.msra.mxu0 %v15098_v35  ;;  %v15124_v35 = vld [vmem:[%s19006_s2 + $0x5b8] sm:$0xff]   ;;  %v15130_v48 = vld [vmem:[%s19006_s2 + $0x5e8] sm:$0xff]  }
 0x810   : > { %13801 = vmatprep.subr.bf16.mxu0 %v15099_v50  ;;  %v9500_v57 = vld [vmem:[#allocation2 + $0x109] ss:$2 sm:$0xff]  ;;  %v15136_v16 = vld [vmem:[%s19006_s2 + $0x618] sm:$0xff]  }
 0x811   : > { %v9649_v17 = vld [vmem:[#allocation2 + $0x4a] ss:$2 sm:$0xff]  ;;  %v9806_v3 = vld [vmem:[#allocation2 + $0x4b] ss:$2 sm:$0xff] }
 0x812   : > { %v15138_v55 = vld [vmem:[%s19006_s2 + $0x628] sm:$0xff]   ;;  %v15144_v1 = vld [vmem:[%s19006_s2 + $0x658] sm:$0xff]  }
 0x813   : > { %13802 = vmatpush3.bf16.msra.mxu0 %v15099_v50  ;;  %v15126_v50 = vld [vmem:[%s19006_s2 + $0x5c8] sm:$0xff]  }
 0x814   : > { %13803 = vmatprep.subr.bf16.mxu0 %v15100_v27  ;;  %v9657_v33 = vld [vmem:[#allocation2 + $0x10a] ss:$2 sm:$0xff] }
 0x815   : > { %v15146_v45 = vld [vmem:[%s19006_s2 + $0x668] sm:$0xff]  }
 0x817   : > { %13804 = vmatpush3.bf16.msra.mxu0 %v15100_v27  ;;  %v15127_v27 = vld [vmem:[%s19006_s2 + $0x5d0] sm:$0xff]  }
 0x818   : > { %13805 = vmatprep.subr.bf16.mxu0 %v15101_v31 }
 0x81b   : > { %13806 = vmatpush3.bf16.msra.mxu0 %v15101_v31  ;;  %v9337_v31 = vld [vmem:[#allocation2 + $0x78] ss:$2 sm:$0xff] }
 0x81c   : > { %13807 = vmatprep.subr.bf16.mxu0 %v15102_v29 }
 0x81f   : > { %13808 = vmatpush3.bf16.msra.mxu0 %v15102_v29  ;;  %v9339_v29 = vld [vmem:[#allocation2 + $0xa8] ss:$2 sm:$0xff] }
 0x820   : > { %13817 = vmatprep.subr.bf16.mxu0 %v15103_v0  ;;  %v9365_v59 = vpack.c.bf16 %v9339_v29, %v9337_v31  ;;  %v9814_v31 = vld [vmem:[#allocation2 + $0x10b] ss:$2 sm:$0xff] }
 0x822   : > { %13810 = vmatmul.mubr.bf16.vlgmr.msra.gmra.mrb[36].mxu0 %v8754_v14  ;;  %v15129_v14 = vld [vmem:[%s19006_s2 + $0x5e0] sm:$0xff]  }
 0x823   : > { %13813 = vmatprep.mubr.bf16.mxu0 %v8755_v38  ;;  %13818 = vmatpush3.bf16.msra.mxu0 %v15103_v0  ;;  %v9341_v0 = vld [vmem:[#allocation2 + $0xd8] ss:$2 sm:$0xff]  ;;  %v9347_v38 = vld [vmem:[#allocation2 + $0x168] ss:$2 sm:$0xff] }
 0x824   : > { %13819 = vmatprep.subr.bf16.mxu0 %v15104_v26  ;;  %v9366_v6 = vpack.c.bf16 %v9343_v34, %v9341_v0  ;;  %v15152_v0 = vld [vmem:[%s19006_s2 + $0x698] sm:$0xff]  }
 0x827   : > { %13820 = vmatpush3.bf16.msra.mxu0 %v15104_v26  ;;  %v9345_v26 = vld [vmem:[#allocation2 + $0x138] ss:$2 sm:$0xff] }
 0x828   : > { %13821 = vmatprep.subr.bf16.mxu0 %v15105_v40  ;;  %v9367_v21 = vpack.c.bf16 %v9347_v38, %v9345_v26  ;;  %v9962_v26 = vld [vmem:[#allocation2 + $0x60] ss:$2 sm:$0xff] }
 0x82a   : > { %13814 = vmatmul.mubr.bf16.gmra.mrb[40].mxu0 %v8756_v52  ;;  %v15131_v52 = vld [vmem:[%s19006_s2 + $0x5f0] sm:$0xff]  }
 0x82b   : > { %13822 = vmatpush3.bf16.msra.mxu0 %v15105_v40  ;;  %13833 = vmatprep.mubr.bf16.mxu0 %v9051_v25  ;;  %v9490_v40 = vld [vmem:[#allocation2 + $0x19] ss:$2 sm:$0xff] }
 0x82c   : > { %13823 = vmatprep.subr.bf16.mxu0 %v15106_v5  ;;  %v9521_v41 = vpack.c.bf16 %v9492_v60, %v9490_v40  ;;  %v15133_v25 = vld [vmem:[%s19006_s2 + $0x600] sm:$0xff]   ;;  %v15154_v40 = vld [vmem:[%s19006_s2 + $0x6a8] sm:$0xff]  }
 0x82f   : > { %13824 = vmatpush3.bf16.msra.mxu0 %v15106_v5  ;;  %v15132_v5 = vld [vmem:[%s19006_s2 + $0x5f8] sm:$0xff]  }
 0x830   : > { %13825 = vmatprep.subr.bf16.mxu0 %v15107_v7 }
 0x833   : > { %13826 = vmatpush3.bf16.msra.mxu0 %v15107_v7  ;;  %v15134_v7 = vld [vmem:[%s19006_s2 + $0x608] sm:$0xff]  }
 0x834   : > { %13827 = vmatprep.subr.bf16.mxu0 %v15108_v22 }
 0x837   : > { %13828 = vmatpush3.bf16.msra.mxu0 %v15108_v22  ;;  %v15135_v22 = vld [vmem:[%s19006_s2 + $0x610] sm:$0xff]  }
 0x838   : > { %13829 = vmatprep.subr.bf16.mxu0 %v15109_v36 }
 0x83b   : > { %13830 = vmatpush3.bf16.msra.mxu0 %v15109_v36  ;;  %v9494_v36 = vld [vmem:[#allocation2 + $0x79] ss:$2 sm:$0xff] }
 0x83c   : > { %13831 = vmatprep.subr.bf16.mxu0 %v15110_v63 }
 0x83f   : > { %13832 = vmatpush3.bf16.msra.mxu0 %v15110_v63  ;;  %v9496_v63 = vld [vmem:[#allocation2 + $0xa9] ss:$2 sm:$0xff] }
 0x840   : > { %13841 = vmatprep.subr.bf16.mxu0 %v15111_v18  ;;  %v9522_v62 = vpack.c.bf16 %v9496_v63, %v9494_v36  ;;  %v9970_v36 = vld [vmem:[#allocation2 + $0x120] ss:$2 sm:$0xff] }
 0x842   : > { %13834 = vmatmul.mubr.bf16.vlgmr.msra.gmra.mrb[36].mxu0 %v9052_v54  ;;  %v15137_v54 = vld [vmem:[%s19006_s2 + $0x620] sm:$0xff]  }
 0x843   : > { %13837 = vmatprep.mubr.bf16.mxu0 %v9053_v37  ;;  %13842 = vmatpush3.bf16.msra.mxu0 %v15111_v18  ;;  %v9498_v18 = vld [vmem:[#allocation2 + $0xd9] ss:$2 sm:$0xff]  ;;  %v9504_v37 = vld [vmem:[#allocation2 + $0x169] ss:$2 sm:$0xff] }
 0x844   : > { %13843 = vmatprep.subr.bf16.mxu0 %v15112_v53  ;;  %v9523_v61 = vpack.c.bf16 %v9500_v57, %v9498_v18  ;;  %v15160_v18 = vld [vmem:[%s19006_s2 + $0x6d8] sm:$0xff]  }
 0x847   : > { %13844 = vmatpush3.bf16.msra.mxu0 %v15112_v53  ;;  %v9502_v53 = vld [vmem:[#allocation2 + $0x139] ss:$2 sm:$0xff] }
 0x848   : > { %13845 = vmatprep.subr.bf16.mxu0 %v15113_v32  ;;  %v9524_v19 = vpack.c.bf16 %v9504_v37, %v9502_v53  ;;  %v10119_v53 = vld [vmem:[#allocation2 + $0x61] ss:$2 sm:$0xff] }
 0x84a   : > { %13838 = vmatmul.mubr.bf16.gmra.mrb[40].mxu0 %v9054_v46  ;;  %v15139_v46 = vld [vmem:[%s19006_s2 + $0x630] sm:$0xff]  }
 0x84b   : > { %13846 = vmatpush3.bf16.msra.mxu0 %v15113_v32  ;;  %13857 = vmatprep.mubr.bf16.mxu0 %v9208_v11  ;;  %v9647_v32 = vld [vmem:[#allocation2 + $0x1a] ss:$2 sm:$0xff] }
 0x84c   : > { %13847 = vmatprep.subr.bf16.mxu0 %v15114_v2  ;;  %v9678_v47 = vpack.c.bf16 %v9649_v17, %v9647_v32  ;;  %v15141_v11 = vld [vmem:[%s19006_s2 + $0x640] sm:$0xff]   ;;  %v15162_v32 = vld [vmem:[%s19006_s2 + $0x6e8] sm:$0xff]  }
 0x84f   : > { %13848 = vmatpush3.bf16.msra.mxu0 %v15114_v2  ;;  %v15140_v2 = vld [vmem:[%s19006_s2 + $0x638] sm:$0xff]  }
 0x850   : > { %13849 = vmatprep.subr.bf16.mxu0 %v15115_v43 }
 0x853   : > { %13850 = vmatpush3.bf16.msra.mxu0 %v15115_v43  ;;  %v15142_v43 = vld [vmem:[%s19006_s2 + $0x648] sm:$0xff]  }
 0x854   : > { %13851 = vmatprep.subr.bf16.mxu0 %v15116_v51 }
 0x857   : > { %13852 = vmatpush3.bf16.msra.mxu0 %v15116_v51  ;;  %v15143_v51 = vld [vmem:[%s19006_s2 + $0x650] sm:$0xff]  }
 0x858   : > { %13853 = vmatprep.subr.bf16.mxu0 %v15117_v8 }
 0x85b   : > { %13854 = vmatpush3.bf16.msra.mxu0 %v15117_v8  ;;  %v9651_v8 = vld [vmem:[#allocation2 + $0x7a] ss:$2 sm:$0xff] }
 0x85c   : > { %13855 = vmatprep.subr.bf16.mxu0 %v15118_v28 }
 0x85f   : > { %13856 = vmatpush3.bf16.msra.mxu0 %v15118_v28  ;;  %v9653_v28 = vld [vmem:[#allocation2 + $0xaa] ss:$2 sm:$0xff] }
 0x860   : > { %13865 = vmatprep.subr.bf16.mxu0 %v15119_v20  ;;  %v9679_v12 = vpack.c.bf16 %v9653_v28, %v9651_v8  ;;  %v10127_v8 = vld [vmem:[#allocation2 + $0x121] ss:$2 sm:$0xff] }
 0x862   : > { %13858 = vmatmul.mubr.bf16.vlgmr.msra.gmra.mrb[36].mxu0 %v9209_v58  ;;  %v15145_v58 = vld [vmem:[%s19006_s2 + $0x660] sm:$0xff]  }
 0x863   : > { %13861 = vmatprep.mubr.bf16.mxu0 %v9210_v24  ;;  %13866 = vmatpush3.bf16.msra.mxu0 %v15119_v20  ;;  %v9655_v20 = vld [vmem:[#allocation2 + $0xda] ss:$2 sm:$0xff]  ;;  %v9661_v24 = vld [vmem:[#allocation2 + $0x16a] ss:$2 sm:$0xff] }
 0x864   : > { %13867 = vmatprep.subr.bf16.mxu0 %v15120_v30  ;;  %v9680_v13 = vpack.c.bf16 %v9657_v33, %v9655_v20  ;;  %v15168_v20 = vld [vmem:[%s19006_s2 + $0x718] sm:$0xff]  }
 0x867   : > { %13868 = vmatpush3.bf16.msra.mxu0 %v15120_v30  ;;  %v9659_v30 = vld [vmem:[#allocation2 + $0x13a] ss:$2 sm:$0xff] }
 0x868   : > { %13869 = vmatprep.subr.bf16.mxu0 %v15121_v9  ;;  %v9681_v15 = vpack.c.bf16 %v9661_v24, %v9659_v30  ;;  %v10276_v30 = vld [vmem:[#allocation2 + $0x62] ss:$2 sm:$0xff] }
 0x86a   : > { %13862 = vmatmul.mubr.bf16.gmra.mrb[40].mxu0 %v9211_v39  ;;  %v15147_v39 = vld [vmem:[%s19006_s2 + $0x670] sm:$0xff]  }
 0x86b   : > { %13870 = vmatpush3.bf16.msra.mxu0 %v15121_v9  ;;  %13881 = vmatprep.mubr.bf16.mxu0 %v9364_v49  ;;  %v9804_v9 = vld [vmem:[#allocation2 + $0x1b] ss:$2 sm:$0xff] }
 0x86c   : > { %13871 = vmatprep.subr.bf16.mxu0 %v15122_v56  ;;  %v9835_v10 = vpack.c.bf16 %v9806_v3, %v9804_v9  ;;  %v15149_v49 = vld [vmem:[%s19006_s2 + $0x680] sm:$0xff]   ;;  %v15170_v9 = vld [vmem:[%s19006_s2 + $0x728] sm:$0xff]  }
 0x86f   : > { %13872 = vmatpush3.bf16.msra.mxu0 %v15122_v56  ;;  %v15148_v56 = vld [vmem:[%s19006_s2 + $0x678] sm:$0xff]  }
 0x870   : > { %13873 = vmatprep.subr.bf16.mxu0 %v15123_v23 }
 0x873   : > { %13874 = vmatpush3.bf16.msra.mxu0 %v15123_v23  ;;  %v15150_v23 = vld [vmem:[%s19006_s2 + $0x688] sm:$0xff]  }
 0x874   : > { %13875 = vmatprep.subr.bf16.mxu0 %v15124_v35 }
 0x877   : > { %13876 = vmatpush3.bf16.msra.mxu0 %v15124_v35  ;;  %v15151_v35 = vld [vmem:[%s19006_s2 + $0x690] sm:$0xff]  }
 0x878   : > { %13877 = vmatprep.subr.bf16.mxu0 %v15125_v42 }
 0x87b   : > { %13878 = vmatpush3.bf16.msra.mxu0 %v15125_v42  ;;  %v9808_v42 = vld [vmem:[#allocation2 + $0x7b] ss:$2 sm:$0xff] }
 0x87c   : > { %13879 = vmatprep.subr.bf16.mxu0 %v15126_v50 }
 0x87f   : > { %13880 = vmatpush3.bf16.msra.mxu0 %v15126_v50  ;;  %v9810_v50 = vld [vmem:[#allocation2 + $0xab] ss:$2 sm:$0xff] }
 0x880   : > { %13889 = vmatprep.subr.bf16.mxu0 %v15127_v27  ;;  %v9836_v29 = vpack.c.bf16 %v9810_v50, %v9808_v42  ;;  %v10284_v42 = vld [vmem:[#allocation2 + $0x122] ss:$2 sm:$0xff] }
 0x882   : > { %13882 = vmatmul.mubr.bf16.vlgmr.msra.gmra.mrb[36].mxu0 %v9365_v59  ;;  %v15153_v59 = vld [vmem:[%s19006_s2 + $0x6a0] sm:$0xff]  }
 0x883   : > { %13885 = vmatprep.mubr.bf16.mxu0 %v9366_v6  ;;  %13890 = vmatpush3.bf16.msra.mxu0 %v15127_v27  ;;  %v9812_v27 = vld [vmem:[#allocation2 + $0xdb] ss:$2 sm:$0xff]  ;;  %v9818_v6 = vld [vmem:[#allocation2 + $0x16b] ss:$2 sm:$0xff] }
 0x884   : > { %13891 = vmatprep.subr.bf16.mxu0 %v15128_v4  ;;  %v9837_v34 = vpack.c.bf16 %v9814_v31, %v9812_v27  ;;  %v15176_v27 = vld [vmem:[%s19006_s2 + $0x758] sm:$0xff]  }
 0x887   : > { %13892 = vmatpush3.bf16.msra.mxu0 %v15128_v4  ;;  %v9816_v4 = vld [vmem:[#allocation2 + $0x13b] ss:$2 sm:$0xff] }
 0x888   : > { %13893 = vmatprep.subr.bf16.mxu0 %v15129_v14  ;;  %v9838_v38 = vpack.c.bf16 %v9818_v6, %v9816_v4  ;;  %v10433_v4 = vld [vmem:[#allocation2 + $0x63] ss:$2 sm:$0xff] }
 0x88a   : > { %13886 = vmatmul.mubr.bf16.gmra.mrb[40].mxu0 %v9367_v21  ;;  %v15155_v21 = vld [vmem:[%s19006_s2 + $0x6b0] sm:$0xff]  }
 0x88b   : > { %13894 = vmatpush3.bf16.msra.mxu0 %v15129_v14  ;;  %13905 = vmatprep.mubr.bf16.mxu0 %v9521_v41  ;;  %v9960_v14 = vld [vmem:[#allocation2 + $0x30] ss:$2 sm:$0xff]  ;;  %v15157_v41 = vld [vmem:[%s19006_s2 + $0x6c0] sm:$0xff]  }
 0x88c   : > { %13895 = vmatprep.subr.bf16.mxu0 %v15130_v48  ;;  %v9991_v60 = vpack.c.bf16 %v9962_v26, %v9960_v14  ;;  %v15178_v14 = vld [vmem:[%s19006_s2 + $0x768] sm:$0xff]  }
 0x88f   : > { %13896 = vmatpush3.bf16.msra.mxu0 %v15130_v48  ;;  %v15156_v48 = vld [vmem:[%s19006_s2 + $0x6b8] sm:$0xff]  }
 0x890   : > { %13897 = vmatprep.subr.bf16.mxu0 %v15131_v52 }
 0x893   : > { %13898 = vmatpush3.bf16.msra.mxu0 %v15131_v52  ;;  %v15158_v52 = vld [vmem:[%s19006_s2 + $0x6c8] sm:$0xff]  }
 0x894   : > { %13899 = vmatprep.subr.bf16.mxu0 %v15132_v5 }
 0x897   : > { %13900 = vmatpush3.bf16.msra.mxu0 %v15132_v5  ;;  %v15159_v5 = vld [vmem:[%s19006_s2 + $0x6d0] sm:$0xff]  }
 0x898   : > { %13901 = vmatprep.subr.bf16.mxu0 %v15133_v25 }
 0x89b   : > { %13902 = vmatpush3.bf16.msra.mxu0 %v15133_v25  ;;  %v9964_v25 = vld [vmem:[#allocation2 + $0x90] ss:$2 sm:$0xff] }
 0x89c   : > { %13903 = vmatprep.subr.bf16.mxu0 %v15134_v7 }
 0x89f   : > { %13904 = vmatpush3.bf16.msra.mxu0 %v15134_v7  ;;  %v9966_v7 = vld [vmem:[#allocation2 + $0xc0] ss:$2 sm:$0xff] }
 0x8a0   : > { %13913 = vmatprep.subr.bf16.mxu0 %v15135_v22  ;;  %v9992_v63 = vpack.c.bf16 %v9966_v7, %v9964_v25  ;;  %v10441_v25 = vld [vmem:[#allocation2 + $0x123] ss:$2 sm:$0xff] }
 0x8a2   : > { %13906 = vmatmul.mubr.bf16.vlgmr.msra.gmra.mrb[36].mxu0 %v9522_v62  ;;  %v15161_v62 = vld [vmem:[%s19006_s2 + $0x6e0] sm:$0xff]  }
 0x8a3   : > { %13909 = vmatprep.mubr.bf16.mxu0 %v9523_v61  ;;  %13914 = vmatpush3.bf16.msra.mxu0 %v15135_v22  ;;  %v9968_v22 = vld [vmem:[#allocation2 + $0xf0] ss:$2 sm:$0xff]  ;;  %v9974_v61 = vld [vmem:[#allocation2 + $0x180] ss:$2 sm:$0xff] }
 0x8a4   : > { %13915 = vmatprep.subr.bf16.mxu0 %v15136_v16  ;;  %v9993_v57 = vpack.c.bf16 %v9970_v36, %v9968_v22  ;;  %v15184_v22 = vld [vmem:[%s19006_s2 + $0x798] sm:$0xff]  }
 0x8a7   : > { %13916 = vmatpush3.bf16.msra.mxu0 %v15136_v16  ;;  %v9972_v16 = vld [vmem:[#allocation2 + $0x150] ss:$2 sm:$0xff] }
 0x8a8   : > { %13917 = vmatprep.subr.bf16.mxu0 %v15137_v54  ;;  %v9994_v37 = vpack.c.bf16 %v9974_v61, %v9972_v16  ;;  %v10590_v16 = vld [vmem:[#allocation2 + $0x78] ss:$2 sm:$0xff] }
 0x8aa   : > { %13910 = vmatmul.mubr.bf16.gmra.mrb[40].mxu0 %v9524_v19  ;;  %v15163_v19 = vld [vmem:[%s19006_s2 + $0x6f0] sm:$0xff]  }
 0x8ab   : > { %13918 = vmatpush3.bf16.msra.mxu0 %v15137_v54  ;;  %13929 = vmatprep.mubr.bf16.mxu0 %v9678_v47  ;;  %v10117_v54 = vld [vmem:[#allocation2 + $0x31] ss:$2 sm:$0xff]  ;;  %v15165_v47 = vld [vmem:[%s19006_s2 + $0x700] sm:$0xff]  }
 0x8ac   : > { %13919 = vmatprep.subr.bf16.mxu0 %v15138_v55  ;;  %v10148_v17 = vpack.c.bf16 %v10119_v53, %v10117_v54  ;;  %v15186_v54 = vld [vmem:[%s19006_s2 + $0x7a8] sm:$0xff]  }
 0x8af   : > { %13920 = vmatpush3.bf16.msra.mxu0 %v15138_v55  ;;  %v15164_v55 = vld [vmem:[%s19006_s2 + $0x6f8] sm:$0xff]  }
 0x8b0   : > { %13921 = vmatprep.subr.bf16.mxu0 %v15139_v46 }
 0x8b3   : > { %13922 = vmatpush3.bf16.msra.mxu0 %v15139_v46  ;;  %v15166_v46 = vld [vmem:[%s19006_s2 + $0x708] sm:$0xff]  }
 0x8b4   : > { %13923 = vmatprep.subr.bf16.mxu0 %v15140_v2 }
 0x8b7   : > { %13924 = vmatpush3.bf16.msra.mxu0 %v15140_v2  ;;  %v15167_v2 = vld [vmem:[%s19006_s2 + $0x710] sm:$0xff]  }
 0x8b8   : > { %13925 = vmatprep.subr.bf16.mxu0 %v15141_v11 }
 0x8bb   : > { %13926 = vmatpush3.bf16.msra.mxu0 %v15141_v11  ;;  %v10121_v11 = vld [vmem:[#allocation2 + $0x91] ss:$2 sm:$0xff] }
 0x8bc   : > { %13927 = vmatprep.subr.bf16.mxu0 %v15142_v43 }
 0x8bf   : > { %13928 = vmatpush3.bf16.msra.mxu0 %v15142_v43  ;;  %v10123_v43 = vld [vmem:[#allocation2 + $0xc1] ss:$2 sm:$0xff] }
 0x8c0   : > { %13937 = vmatprep.subr.bf16.mxu0 %v15143_v51  ;;  %v10149_v28 = vpack.c.bf16 %v10123_v43, %v10121_v11  ;;  %v10598_v11 = vld [vmem:[#allocation2 + $0x138] ss:$2 sm:$0xff] }
 0x8c2   : > { %13930 = vmatmul.mubr.bf16.vlgmr.msra.gmra.mrb[36].mxu0 %v9679_v12  ;;  %v15169_v12 = vld [vmem:[%s19006_s2 + $0x720] sm:$0xff]  }
 0x8c3   : > { %13933 = vmatprep.mubr.bf16.mxu0 %v9680_v13  ;;  %13938 = vmatpush3.bf16.msra.mxu0 %v15143_v51  ;;  %v10125_v51 = vld [vmem:[#allocation2 + $0xf1] ss:$2 sm:$0xff]  ;;  %v10131_v13 = vld [vmem:[#allocation2 + $0x181] ss:$2 sm:$0xff] }
 0x8c4   : > { %13939 = vmatprep.subr.bf16.mxu0 %v15144_v1  ;;  %v10150_v33 = vpack.c.bf16 %v10127_v8, %v10125_v51  ;;  %v15192_v51 = vld [vmem:[%s19006_s2 + $0x7d8] sm:$0xff]  }
 0x8c7   : > { %13940 = vmatpush3.bf16.msra.mxu0 %v15144_v1  ;;  %v10129_v1 = vld [vmem:[#allocation2 + $0x151] ss:$2 sm:$0xff] }
 0x8c8   : > { %13941 = vmatprep.subr.bf16.mxu0 %v15145_v58  ;;  %v10151_v24 = vpack.c.bf16 %v10131_v13, %v10129_v1  ;;  %v10747_v1 = vld [vmem:[#allocation2 + $0x79] ss:$2 sm:$0xff] }
 0x8ca   : > { %13934 = vmatmul.mubr.bf16.gmra.mrb[40].mxu0 %v9681_v15  ;;  %v15171_v15 = vld [vmem:[%s19006_s2 + $0x730] sm:$0xff]  }
 0x8cb   : > { %13942 = vmatpush3.bf16.msra.mxu0 %v15145_v58  ;;  %13953 = vmatprep.mubr.bf16.mxu0 %v9835_v10  ;;  %v10274_v58 = vld [vmem:[#allocation2 + $0x32] ss:$2 sm:$0xff] }
 0x8cc   : > { %13943 = vmatprep.subr.bf16.mxu0 %v15146_v45  ;;  %v10305_v3 = vpack.c.bf16 %v10276_v30, %v10274_v58  ;;  %v15173_v10 = vld [vmem:[%s19006_s2 + $0x740] sm:$0xff]   ;;  %v15194_v58 = vld [vmem:[%s19006_s2 + $0x7e8] sm:$0xff]  }
 0x8cf   : > { %13944 = vmatpush3.bf16.msra.mxu0 %v15146_v45  ;;  %v15172_v45 = vld [vmem:[%s19006_s2 + $0x738] sm:$0xff]  }
 0x8d0   : > { %13945 = vmatprep.subr.bf16.mxu0 %v15147_v39 }
 0x8d3   : > { %13946 = vmatpush3.bf16.msra.mxu0 %v15147_v39  ;;  %v15174_v39 = vld [vmem:[%s19006_s2 + $0x748] sm:$0xff]  }
 0x8d4   : > { %13947 = vmatprep.subr.bf16.mxu0 %v15148_v56 }
 0x8d7   : > { %13948 = vmatpush3.bf16.msra.mxu0 %v15148_v56  ;;  %v15175_v56 = vld [vmem:[%s19006_s2 + $0x750] sm:$0xff]  }
 0x8d8   : > { %13949 = vmatprep.subr.bf16.mxu0 %v15149_v49 }
 0x8db   : > { %13950 = vmatpush3.bf16.msra.mxu0 %v15149_v49  ;;  %v10278_v49 = vld [vmem:[#allocation2 + $0x92] ss:$2 sm:$0xff] }
 0x8dc   : > { %13951 = vmatprep.subr.bf16.mxu0 %v15150_v23 }
 0x8df   : > { %13952 = vmatpush3.bf16.msra.mxu0 %v15150_v23  ;;  %v10280_v23 = vld [vmem:[#allocation2 + $0xc2] ss:$2 sm:$0xff] }
 0x8e0   : > { %13961 = vmatprep.subr.bf16.mxu0 %v15151_v35  ;;  %v10306_v50 = vpack.c.bf16 %v10280_v23, %v10278_v49  ;;  %v10755_v49 = vld [vmem:[#allocation2 + $0x139] ss:$2 sm:$0xff] }
 0x8e2   : > { %13954 = vmatmul.mubr.bf16.vlgmr.msra.gmra.mrb[36].mxu0 %v9836_v29  ;;  %v15177_v29 = vld [vmem:[%s19006_s2 + $0x760] sm:$0xff]  }
 0x8e3   : > { %13957 = vmatprep.mubr.bf16.mxu0 %v9837_v34  ;;  %13962 = vmatpush3.bf16.msra.mxu0 %v15151_v35  ;;  %v10282_v35 = vld [vmem:[#allocation2 + $0xf2] ss:$2 sm:$0xff]  ;;  %v10288_v34 = vld [vmem:[#allocation2 + $0x182] ss:$2 sm:$0xff] }
 0x8e4   : > { %13963 = vmatprep.subr.bf16.mxu0 %v15152_v0  ;;  %v10307_v31 = vpack.c.bf16 %v10284_v42, %v10282_v35  ;;  %v15200_v35 = vld [vmem:[%s19006_s2 + $0x818] sm:$0xff]  }
 0x8e7   : > { %13964 = vmatpush3.bf16.msra.mxu0 %v15152_v0  ;;  %v10286_v0 = vld [vmem:[#allocation2 + $0x152] ss:$2 sm:$0xff] }
 0x8e8   : > { %13965 = vmatprep.subr.bf16.mxu0 %v15153_v59  ;;  %v10308_v6 = vpack.c.bf16 %v10288_v34, %v10286_v0  ;;  %v10904_v0 = vld [vmem:[#allocation2 + $0x7a] ss:$2 sm:$0xff] }
 0x8ea   : > { %13958 = vmatmul.mubr.bf16.gmra.mrb[40].mxu0 %v9838_v38  ;;  %v15179_v38 = vld [vmem:[%s19006_s2 + $0x770] sm:$0xff]  }
 0x8eb   : > { %13966 = vmatpush3.bf16.msra.mxu0 %v15153_v59  ;;  %13977 = vmatprep.mubr.bf16.mxu0 %v9991_v60  ;;  %v10431_v59 = vld [vmem:[#allocation2 + $0x33] ss:$2 sm:$0xff] }
 0x8ec   : > { %13967 = vmatprep.subr.bf16.mxu0 %v15154_v40  ;;  %v10462_v26 = vpack.c.bf16 %v10433_v4, %v10431_v59  ;;  %v15181_v60 = vld [vmem:[%s19006_s2 + $0x780] sm:$0xff]   ;;  %v15202_v59 = vld [vmem:[%s19006_s2 + $0x828] sm:$0xff]  }
 0x8ef   : > { %13968 = vmatpush3.bf16.msra.mxu0 %v15154_v40  ;;  %v15180_v40 = vld [vmem:[%s19006_s2 + $0x778] sm:$0xff]  }
 0x8f0   : > { %13969 = vmatprep.subr.bf16.mxu0 %v15155_v21 }
 0x8f3   : > { %13970 = vmatpush3.bf16.msra.mxu0 %v15155_v21  ;;  %v15182_v21 = vld [vmem:[%s19006_s2 + $0x788] sm:$0xff]  }
 0x8f4   : > { %13971 = vmatprep.subr.bf16.mxu0 %v15156_v48 }
 0x8f7   : > { %13972 = vmatpush3.bf16.msra.mxu0 %v15156_v48  ;;  %v15183_v48 = vld [vmem:[%s19006_s2 + $0x790] sm:$0xff]  }
 0x8f8   : > { %13973 = vmatprep.subr.bf16.mxu0 %v15157_v41 }
 0x8fb   : > { %13974 = vmatpush3.bf16.msra.mxu0 %v15157_v41  ;;  %v10435_v41 = vld [vmem:[#allocation2 + $0x93] ss:$2 sm:$0xff] }
 0x8fc   : > { %13975 = vmatprep.subr.bf16.mxu0 %v15158_v52 }
 0x8ff   : > { %13976 = vmatpush3.bf16.msra.mxu0 %v15158_v52  ;;  %v10437_v52 = vld [vmem:[#allocation2 + $0xc3] ss:$2 sm:$0xff] }
 0x900   : > { %13985 = vmatprep.subr.bf16.mxu0 %v15159_v5  ;;  %v10463_v7 = vpack.c.bf16 %v10437_v52, %v10435_v41  ;;  %v10912_v41 = vld [vmem:[#allocation2 + $0x13a] ss:$2 sm:$0xff] }
 0x902   : > { %13978 = vmatmul.mubr.bf16.vlgmr.msra.gmra.mrb[36].mxu0 %v9992_v63  ;;  %v15185_v63 = vld [vmem:[%s19006_s2 + $0x7a0] sm:$0xff]  }
 0x903   : > { %13981 = vmatprep.mubr.bf16.mxu0 %v9993_v57  ;;  %13986 = vmatpush3.bf16.msra.mxu0 %v15159_v5  ;;  %v10439_v5 = vld [vmem:[#allocation2 + $0xf3] ss:$2 sm:$0xff]  ;;  %v10445_v57 = vld [vmem:[#allocation2 + $0x183] ss:$2 sm:$0xff] }
 0x904   : > { %13987 = vmatprep.subr.bf16.mxu0 %v15160_v18  ;;  %v10464_v36 = vpack.c.bf16 %v10441_v25, %v10439_v5  ;;  %v15208_v5 = vld [vmem:[%s19006_s2 + $0x858] sm:$0xff]  }
 0x907   : > { %13988 = vmatpush3.bf16.msra.mxu0 %v15160_v18  ;;  %v10443_v18 = vld [vmem:[#allocation2 + $0x153] ss:$2 sm:$0xff] }
 0x908   : > { %13989 = vmatprep.subr.bf16.mxu0 %v15161_v62  ;;  %v10465_v61 = vpack.c.bf16 %v10445_v57, %v10443_v18  ;;  %v11061_v18 = vld [vmem:[#allocation2 + $0x7b] ss:$2 sm:$0xff] }
 0x90a   : > { %13982 = vmatmul.mubr.bf16.gmra.mrb[40].mxu0 %v9994_v37  ;;  %v15187_v37 = vld [vmem:[%s19006_s2 + $0x7b0] sm:$0xff]  }
 0x90b   : > { %13990 = vmatpush3.bf16.msra.mxu0 %v15161_v62  ;;  %14001 = vmatprep.mubr.bf16.mxu0 %v10148_v17  ;;  %v10588_v62 = vld [vmem:[#allocation2 + $0x48] ss:$2 sm:$0xff]  ;;  %v15189_v17 = vld [vmem:[%s19006_s2 + $0x7c0] sm:$0xff]  }
 0x90c   : > { %13991 = vmatprep.subr.bf16.mxu0 %v15162_v32  ;;  %v10619_v53 = vpack.c.bf16 %v10590_v16, %v10588_v62  ;;  %v15210_v62 = vld [vmem:[%s19006_s2 + $0x868] sm:$0xff]  }
 0x90f   : > { %13992 = vmatpush3.bf16.msra.mxu0 %v15162_v32  ;;  %v15188_v32 = vld [vmem:[%s19006_s2 + $0x7b8] sm:$0xff]  }
 0x910   : > { %13993 = vmatprep.subr.bf16.mxu0 %v15163_v19 }
 0x913   : > { %13994 = vmatpush3.bf16.msra.mxu0 %v15163_v19  ;;  %v15190_v19 = vld [vmem:[%s19006_s2 + $0x7c8] sm:$0xff]  }
 0x914   : > { %13995 = vmatprep.subr.bf16.mxu0 %v15164_v55 }
 0x917   : > { %13996 = vmatpush3.bf16.msra.mxu0 %v15164_v55  ;;  %v15191_v55 = vld [vmem:[%s19006_s2 + $0x7d0] sm:$0xff]  }
 0x918   : > { %13997 = vmatprep.subr.bf16.mxu0 %v15165_v47 }
 0x91b   : > { %13998 = vmatpush3.bf16.msra.mxu0 %v15165_v47  ;;  %v10592_v47 = vld [vmem:[#allocation2 + $0xa8] ss:$2 sm:$0xff] }
 0x91c   : > { %13999 = vmatprep.subr.bf16.mxu0 %v15166_v46 }
 0x91f   : > { %14000 = vmatpush3.bf16.msra.mxu0 %v15166_v46  ;;  %v10594_v46 = vld [vmem:[#allocation2 + $0xd8] ss:$2 sm:$0xff] }
 0x920   : > { %14009 = vmatprep.subr.bf16.mxu0 %v15167_v2  ;;  %v10620_v43 = vpack.c.bf16 %v10594_v46, %v10592_v47 }
 0x922   : > { %14002 = vmatmul.mubr.bf16.vlgmr.msra.gmra.mrb[36].mxu0 %v10149_v28  ;;  %v15193_v28 = vld [vmem:[%s19006_s2 + $0x7e0] sm:$0xff]  }
 0x923   : > { %14005 = vmatprep.mubr.bf16.mxu0 %v10150_v33  ;;  %14010 = vmatpush3.bf16.msra.mxu0 %v15167_v2  ;;  %v10596_v2 = vld [vmem:[#allocation2 + $0x108] ss:$2 sm:$0xff]  ;;  %v10602_v33 = vld [vmem:[#allocation2 + $0x198] ss:$2 sm:$0xff] }
 0x924   : > { %14011 = vmatprep.subr.bf16.mxu0 %v15168_v20  ;;  %v10621_v8 = vpack.c.bf16 %v10598_v11, %v10596_v2  ;;  %v11071_v2 = vld [vmem:[#allocation2 + $0x16b] ss:$2 sm:$0xff]  ;;  %v11073_v11 = vld [vmem:[#allocation2 + $0x19b] ss:$2 sm:$0xff] }
 0x927   : > { %14012 = vmatpush3.bf16.msra.mxu0 %v15168_v20  ;;  %v10600_v20 = vld [vmem:[#allocation2 + $0x168] ss:$2 sm:$0xff] }
 0x928   : > { %14013 = vmatprep.subr.bf16.mxu0 %v15169_v12  ;;  %v10622_v13 = vpack.c.bf16 %v10602_v33, %v10600_v20 }
 0x92a   : > { %14006 = vmatmul.mubr.bf16.gmra.mrb[40].mxu0 %v10151_v24  ;;  %v15195_v24 = vld [vmem:[%s19006_s2 + $0x7f0] sm:$0xff]  }
 0x92b   : > { %14014 = vmatpush3.bf16.msra.mxu0 %v15169_v12  ;;  %14025 = vmatprep.mubr.bf16.mxu0 %v10305_v3  ;;  %v10745_v12 = vld [vmem:[#allocation2 + $0x49] ss:$2 sm:$0xff]  ;;  %v15197_v3 = vld [vmem:[%s19006_s2 + $0x800] sm:$0xff]  }
 0x92c   : > { %14015 = vmatprep.subr.bf16.mxu0 %v15170_v9  ;;  %v10776_v30 = vpack.c.bf16 %v10747_v1, %v10745_v12 }
 0x92f   : > { %14016 = vmatpush3.bf16.msra.mxu0 %v15170_v9  ;;  %v15196_v9 = vld [vmem:[%s19006_s2 + $0x7f8] sm:$0xff]  }
 0x930   : > { %14017 = vmatprep.subr.bf16.mxu0 %v15171_v15 }
 0x933   : > { %14018 = vmatpush3.bf16.msra.mxu0 %v15171_v15  ;;  %v15198_v15 = vld [vmem:[%s19006_s2 + $0x808] sm:$0xff]  }
 0x934   : > { %14019 = vmatprep.subr.bf16.mxu0 %v15172_v45 }
 0x937   : > { %14020 = vmatpush3.bf16.msra.mxu0 %v15172_v45  ;;  %v15199_v45 = vld [vmem:[%s19006_s2 + $0x810] sm:$0xff]  }
 0x938   : > { %14021 = vmatprep.subr.bf16.mxu0 %v15173_v10 }
 0x93b   : > { %14022 = vmatpush3.bf16.msra.mxu0 %v15173_v10  ;;  %v10749_v10 = vld [vmem:[#allocation2 + $0xa9] ss:$2 sm:$0xff] }
 0x93c   : > { %14023 = vmatprep.subr.bf16.mxu0 %v15174_v39 }
 0x93f   : > { %14024 = vmatpush3.bf16.msra.mxu0 %v15174_v39  ;;  %v10751_v39 = vld [vmem:[#allocation2 + $0xd9] ss:$2 sm:$0xff] }
 0x940   : > { %14033 = vmatprep.subr.bf16.mxu0 %v15175_v56  ;;  %v10777_v23 = vpack.c.bf16 %v10751_v39, %v10749_v10 }
 0x942   : > { %14026 = vmatmul.mubr.bf16.vlgmr.msra.gmra.mrb[36].mxu0 %v10306_v50  ;;  %v15201_v50 = vld [vmem:[%s19006_s2 + $0x820] sm:$0xff]  }
 0x943   : > { %14029 = vmatprep.mubr.bf16.mxu0 %v10307_v31  ;;  %14034 = vmatpush3.bf16.msra.mxu0 %v15175_v56  ;;  %v10753_v56 = vld [vmem:[#allocation2 + $0x109] ss:$2 sm:$0xff]  ;;  %v10759_v31 = vld [vmem:[#allocation2 + $0x199] ss:$2 sm:$0xff] }
 0x944   : > { %14035 = vmatprep.subr.bf16.mxu0 %v15176_v27  ;;  %v10778_v42 = vpack.c.bf16 %v10755_v49, %v10753_v56 }
 0x947   : > { %14036 = vmatpush3.bf16.msra.mxu0 %v15176_v27  ;;  %v10757_v27 = vld [vmem:[#allocation2 + $0x169] ss:$2 sm:$0xff] }
 0x948   : > { %14037 = vmatprep.subr.bf16.mxu0 %v15177_v29  ;;  %v10779_v34 = vpack.c.bf16 %v10759_v31, %v10757_v27 }
 0x94a   : > { %14030 = vmatmul.mubr.bf16.gmra.mrb[40].mxu0 %v10308_v6  ;;  %v15203_v6 = vld [vmem:[%s19006_s2 + $0x830] sm:$0xff]  }
 0x94b   : > { %14038 = vmatpush3.bf16.msra.mxu0 %v15177_v29  ;;  %14049 = vmatprep.mubr.bf16.mxu0 %v10462_v26  ;;  %v10902_v29 = vld [vmem:[#allocation2 + $0x4a] ss:$2 sm:$0xff]  ;;  %v15205_v26 = vld [vmem:[%s19006_s2 + $0x840] sm:$0xff]  }
 0x94c   : > { %14039 = vmatprep.subr.bf16.mxu0 %v15178_v14  ;;  %v10933_v4 = vpack.c.bf16 %v10904_v0, %v10902_v29 }
 0x94f   : > { %14040 = vmatpush3.bf16.msra.mxu0 %v15178_v14  ;;  %v15204_v14 = vld [vmem:[%s19006_s2 + $0x838] sm:$0xff]  }
 0x950   : > { %14041 = vmatprep.subr.bf16.mxu0 %v15179_v38 }
 0x953   : > { %14042 = vmatpush3.bf16.msra.mxu0 %v15179_v38  ;;  %v15206_v38 = vld [vmem:[%s19006_s2 + $0x848] sm:$0xff]  }
 0x954   : > { %14043 = vmatprep.subr.bf16.mxu0 %v15180_v40 }
 0x957   : > { %14044 = vmatpush3.bf16.msra.mxu0 %v15180_v40  ;;  %v15207_v40 = vld [vmem:[%s19006_s2 + $0x850] sm:$0xff]  }
 0x958   : > { %14045 = vmatprep.subr.bf16.mxu0 %v15181_v60 }
 0x95b   : > { %14046 = vmatpush3.bf16.msra.mxu0 %v15181_v60  ;;  %v10906_v60 = vld [vmem:[#allocation2 + $0xaa] ss:$2 sm:$0xff] }
 0x95c   : > { %14047 = vmatprep.subr.bf16.mxu0 %v15182_v21 }
 0x95f   : > { %14048 = vmatpush3.bf16.msra.mxu0 %v15182_v21  ;;  %v10908_v21 = vld [vmem:[#allocation2 + $0xda] ss:$2 sm:$0xff] }
 0x960   : > { %14057 = vmatprep.subr.bf16.mxu0 %v15183_v48  ;;  %v10934_v52 = vpack.c.bf16 %v10908_v21, %v10906_v60 }
 0x962   : > { %14050 = vmatmul.mubr.bf16.vlgmr.msra.gmra.mrb[36].mxu0 %v10463_v7  ;;  %v15209_v7 = vld [vmem:[%s19006_s2 + $0x860] sm:$0xff]  }
 0x963   : > { %14053 = vmatprep.mubr.bf16.mxu0 %v10464_v36  ;;  %14058 = vmatpush3.bf16.msra.mxu0 %v15183_v48  ;;  %v10910_v48 = vld [vmem:[#allocation2 + $0x10a] ss:$2 sm:$0xff]  ;;  %v10916_v36 = vld [vmem:[#allocation2 + $0x19a] ss:$2 sm:$0xff] }
 0x964   : > { %14059 = vmatprep.subr.bf16.mxu0 %v15184_v22  ;;  %v10935_v25 = vpack.c.bf16 %v10912_v41, %v10910_v48 }
 0x967   : > { %14060 = vmatpush3.bf16.msra.mxu0 %v15184_v22  ;;  %v10914_v22 = vld [vmem:[#allocation2 + $0x16a] ss:$2 sm:$0xff] }
 0x968   : > { %14061 = vmatprep.subr.bf16.mxu0 %v15185_v63  ;;  %v10936_v57 = vpack.c.bf16 %v10916_v36, %v10914_v22 }
 0x96a   : > { %14054 = vmatmul.mubr.bf16.gmra.mrb[40].mxu0 %v10465_v61  ;;  %v15211_v61 = vld [vmem:[%s19006_s2 + $0x870] sm:$0xff]  }
 0x96b   : > { %14062 = vmatpush3.bf16.msra.mxu0 %v15185_v63  ;;  %14073 = vmatprep.mubr.bf16.mxu0 %v10619_v53  ;;  %v11059_v63 = vld [vmem:[#allocation2 + $0x4b] ss:$2 sm:$0xff]  ;;  %v15213_v53 = vld [vmem:[%s19006_s2 + $0x880] sm:$0xff]  }
 0x96c   : > { %14063 = vmatprep.subr.bf16.mxu0 %v15186_v54  ;;  %v11090_v16 = vpack.c.bf16 %v11061_v18, %v11059_v63 }
 0x96f   : > { %14064 = vmatpush3.bf16.msra.mxu0 %v15186_v54  ;;  %v15212_v54 = vld [vmem:[%s19006_s2 + $0x878] sm:$0xff]  }
 0x970   : > { %14065 = vmatprep.subr.bf16.mxu0 %v15187_v37 }
 0x973   : > { %14066 = vmatpush3.bf16.msra.mxu0 %v15187_v37  ;;  %v15214_v37 = vld [vmem:[%s19006_s2 + $0x888] sm:$0xff]  }
 0x974   : > { %14067 = vmatprep.subr.bf16.mxu0 %v15188_v32 }
 0x977   : > { %14068 = vmatpush3.bf16.msra.mxu0 %v15188_v32  ;;  %v11063_v32 = vld [vmem:[#allocation2 + $0xab] ss:$2 sm:$0xff] }
 0x978   : > { %14069 = vmatprep.subr.bf16.mxu0 %v15189_v17 }
 0x97b   : > { %14070 = vmatpush3.bf16.msra.mxu0 %v15189_v17  ;;  %v11065_v17 = vld [vmem:[#allocation2 + $0xdb] ss:$2 sm:$0xff] }
 0x97c   : > { %14071 = vmatprep.subr.bf16.mxu0 %v15190_v19  ;;  %v11091_v47 = vpack.c.bf16 %v11065_v17, %v11063_v32 }
 0x97f   : > { %14072 = vmatpush3.bf16.msra.mxu0 %v15190_v19  ;;  %v11067_v19 = vld [vmem:[#allocation2 + $0x10b] ss:$2 sm:$0xff] }
 0x980   : > { %14081 = vmatprep.subr.bf16.mxu0 %v15191_v55 }
 0x982   : > { %14074 = vmatmul.mubr.bf16.vlgmr.msra.gmra.mrb[36].mxu0 %v10620_v43  ;;  %v11093_v43 = vpack.c.bf16 %v11073_v11, %v11071_v2 }
 0x983   : > { %14077 = vmatprep.mubr.bf16.mxu0 %v10621_v8  ;;  %14082 = vmatpush3.bf16.msra.mxu0 %v15191_v55  ;;  %v11069_v55 = vld [vmem:[#allocation2 + $0x13b] ss:$2 sm:$0xff] }
 0x984   : > { %14083 = vmatprep.subr.bf16.mxu0 %v15192_v51  ;;  %v11092_v46 = vpack.c.bf16 %v11069_v55, %v11067_v19  ;;  %v15282_v8 = vld [vmem:[%s19007_s3 + $0x80] sm:$0xff] }
 0x987   : > { %14084 = vmatpush3.bf16.msra.mxu0 %v15192_v51  ;;  %v11217_v51 = vsub.s32 7, %v17499_v44 }
 0x988   : > { %14085 = vmatprep.subr.bf16.mxu0 %v15193_v28 }
 0x98a   : > { %14078 = vmatmul.mubr.bf16.gmra.mrb[40].mxu0 %v10622_v13 }
 0x98b   : > { %14086 = vmatpush3.bf16.msra.mxu0 %v15193_v28  ;;  %14097 = vmatprep.mubr.bf16.mxu0 %v10776_v30  ;;  %v11218_v28 = vrot.slane %v15282_v8, %v11217_v51 }
 0x98c   : > { %14087 = vmatprep.subr.bf16.mxu0 %v15194_v58 }
 0x98f   : > { %14088 = vmatpush3.bf16.msra.mxu0 %v15194_v58 }
 0x990   : > { %14089 = vmatprep.subr.bf16.mxu0 %v15195_v24 }
 0x993   : > { %14090 = vmatpush3.bf16.msra.mxu0 %v15195_v24 }
 0x994   : > { %14091 = vmatprep.subr.bf16.mxu0 %v15196_v9 }
 0x997   : > { %14092 = vmatpush3.bf16.msra.mxu0 %v15196_v9 }
 0x998   : > { %14093 = vmatprep.subr.bf16.mxu0 %v15197_v3 }
 0x99b   : > { %14094 = vmatpush3.bf16.msra.mxu0 %v15197_v3 }
 0x99c   : > { %14095 = vmatprep.subr.bf16.mxu0 %v15198_v15 }
 0x99f   : > { %14096 = vmatpush3.bf16.msra.mxu0 %v15198_v15 }
 0x9a0   : > { %14105 = vmatprep.subr.bf16.mxu0 %v15199_v45 }
 0x9a2   : > { %14098 = vmatmul.mubr.bf16.vlgmr.msra.gmra.mrb[36].mxu0 %v10777_v23 }
 0x9a3   : > { %14101 = vmatprep.mubr.bf16.mxu0 %v10778_v42  ;;  %14106 = vmatpush3.bf16.msra.mxu0 %v15199_v45 }
 0x9a4   : > { %14107 = vmatprep.subr.bf16.mxu0 %v15200_v35 }
 0x9a7   : > { %14108 = vmatpush3.bf16.msra.mxu0 %v15200_v35 }
 0x9a8   : > { %14109 = vmatprep.subr.bf16.mxu0 %v15201_v50 }
 0x9aa   : > { %14102 = vmatmul.mubr.bf16.gmra.mrb[40].mxu0 %v10779_v34 }
 0x9ab   : > { %14110 = vmatpush3.bf16.msra.mxu0 %v15201_v50  ;;  %14121 = vmatprep.mubr.bf16.mxu0 %v10933_v4 }
 0x9ac   : > { %14111 = vmatprep.subr.bf16.mxu0 %v15202_v59 }
 0x9af   : > { %14112 = vmatpush3.bf16.msra.mxu0 %v15202_v59 }
 0x9b0   : > { %14113 = vmatprep.subr.bf16.mxu0 %v15203_v6 }
 0x9b3   : > { %14114 = vmatpush3.bf16.msra.mxu0 %v15203_v6 }
 0x9b4   : > { %14115 = vmatprep.subr.bf16.mxu0 %v15204_v14 }
 0x9b7   : > { %14116 = vmatpush3.bf16.msra.mxu0 %v15204_v14 }
 0x9b8   : > { %14117 = vmatprep.subr.bf16.mxu0 %v15205_v26 }
 0x9bb   : > { %14118 = vmatpush3.bf16.msra.mxu0 %v15205_v26 }
 0x9bc   : > { %14119 = vmatprep.subr.bf16.mxu0 %v15206_v38 }
 0x9bf   : > { %14120 = vmatpush3.bf16.msra.mxu0 %v15206_v38 }
 0x9c0   : > { %14129 = vmatprep.subr.bf16.mxu0 %v15207_v40 }
 0x9c2   : > { %14122 = vmatmul.mubr.bf16.vlgmr.msra.gmra.mrb[36].mxu0 %v10934_v52 }
 0x9c3   : > { %14125 = vmatprep.mubr.bf16.mxu0 %v10935_v25  ;;  %14130 = vmatpush3.bf16.msra.mxu0 %v15207_v40 }
 0x9c4   : > { %14131 = vmatprep.subr.bf16.mxu0 %v15208_v5 }
 0x9c7   : > { %14132 = vmatpush3.bf16.msra.mxu0 %v15208_v5 }
 0x9c8   : > { %14133 = vmatprep.subr.bf16.mxu0 %v15209_v7 }
 0x9ca   : > { %14126 = vmatmul.mubr.bf16.gmra.mrb[40].mxu0 %v10936_v57 }
 0x9cb   : > { %14134 = vmatpush3.bf16.msra.mxu0 %v15209_v7  ;;  %14145 = vmatprep.mubr.bf16.mxu0 %v11090_v16 }
 0x9cc   : > { %14135 = vmatprep.subr.bf16.mxu0 %v15210_v62 }
 0x9cf   : > { %14136 = vmatpush3.bf16.msra.mxu0 %v15210_v62 }
 0x9d0   : > { %14137 = vmatprep.subr.bf16.mxu0 %v15211_v61 }
 0x9d3   : > { %14138 = vmatpush3.bf16.msra.mxu0 %v15211_v61 }
 0x9d4   : > { %14139 = vmatprep.subr.bf16.mxu0 %v15212_v54 }
 0x9d7   : > { %14140 = vmatpush3.bf16.msra.mxu0 %v15212_v54 }
 0x9d8   : > { %14141 = vmatprep.subr.bf16.mxu0 %v15213_v53 }
 0x9db   : > { %14142 = vmatpush3.bf16.msra.mxu0 %v15213_v53 }
 0x9dc   : > { %14143 = vmatprep.subr.bf16.mxu0 %v15214_v37 }
 0x9df   : > { %14144 = vmatpush3.bf16.msra.mxu0 %v15214_v37 }
 0x9e2   : > { %14146 = vmatmul.mubr.bf16.vlgmr.msra.gmra.mrb[36].mxu0 %v11091_v47 }
 0x9e3   : > { %14149 = vmatprep.mubr.bf16.mxu0 %v11092_v46 }
 0x9ea   : > { %14150 = vmatmul.mubr.bf16.gmra.mrb[40].mxu0 %v11093_v43 }
 0xab5   : > { %v14147_v20 = vpop.f32.mrb[36].mxu0 }
 0xab6   : > { %v11221_v33 = vadd.f32 %v14147_v20, %v11218_v28  ;;  %v11176_v12 = vpop.f32.mrb[37].mxu0 }
 0xab7   : > { %v11219_v1 = vadd.f32 %v11218_v28, %v11176_v12  ;;  %v14148_v13 = vpop.f32.mrb[38].mxu0 }
 0xab8   : > { %11229 = vst [vmem:[%s211_s22 + $0x10] sm:$0xff] %v11221_v33  ;;  %v11222_v58 = vadd.f32 %v14148_v13, %v11218_v28  ;;  %v11179_v30 = vpop.f32.mrb[39].mxu0 }
 0xab9   : > { %11227 = vst [vmem:[%s211_s22] sm:$0xff] %v11219_v1  ;;  %v11220_v44 = vadd.f32 %v11218_v28, %v11179_v30 }
 0xaba   : > { %11230 = vst [vmem:[%s211_s22 + $0x18] sm:$0xff] %v11222_v58 }
 0xabb   : > { %11228 = vst [vmem:[%s211_s22 + $0x8] sm:$0xff] %v11220_v44 }
 0xabd   : > { %v14151_v24 = vpop.f32.mrb[40].mxu0 }
 0xabe   : > { %v11225_v9 = vadd.f32 %v14151_v24, %v11218_v28  ;;  %v11192_v3 = vpop.f32.mrb[41].mxu0 }
 0xabf   : > { %v11223_v15 = vadd.f32 %v11218_v28, %v11192_v3  ;;  %v14152_v45 = vpop.f32.mrb[42].mxu0 }
 0xac0   : > { %11233 = vst [vmem:[%s211_s22 + $0x30] sm:$0xff] %v11225_v9  ;;  %v11226_v10 = vadd.f32 %v14152_v45, %v11218_v28  ;;  %v11195_v39 = vpop.f32.mrb[43].mxu0 }
 0xac1   : > { %11231 = vst [vmem:[%s211_s22 + $0x20] sm:$0xff] %v11223_v15  ;;  %v11224_v56 = vadd.f32 %v11218_v28, %v11195_v39 }
 0xac2   : > { %11234 = vst [vmem:[%s211_s22 + $0x38] sm:$0xff] %v11226_v10 }
 0xac3   : > { %11232 = vst [vmem:[%s211_s22 + $0x28] sm:$0xff] %v11224_v56 }
 0xac4 PF: > { %s14_s15 = sadd.s32 1, %s15289_s15  }
 0xac5   : > { %p11_p4 = scmp.ge.s32.totalorder %s14_s15, 4  }
 0xac7   :  { %13 = sbr.rel (!%p11_p4) target bundleno = 1 (0x1), region = 199 }

</bundles_post_ra>
